<compile_context>
chip_gen: v6e
topology: v6e:2x2x1
jax: 0.10.0
libtpu: 0.0.40
codegen_flags: <defaults>
</compile_context>

<pallas_src>
import functools
import math

import jax
import jax.numpy as jnp
from jax import lax
from jax.experimental import pallas as pl
from jax.experimental.pallas import tpu as pltpu


def _round_up(x, m):
    return (x + m - 1) // m * m


def _conv_block_kernel(x_ref, w_ref, b_ref, o_ref, *act_refs,
                       n_stages, D, H, W, Cp, Mp, TH):
    """Fused n_stages x (3x3x3 conv + bias + ReLU) for one batch element.

    x_ref:    (D+2, Mp, Cp)  bf16 zero-padded input; each slab is the flattened
                             (H+2)x(W+2) plane padded to Mp rows.
    w_ref:    (S, 27, Cp, Cp) bf16 per-stage per-tap weights (zero padded).
    b_ref:    (S, 1, Cp)      f32 bias (zero padded).
    o_ref:    (D, H*(W+2), Cp) f32 output (the 2 junk columns per H-line are
                             sliced away by the wrapper).
    act_refs: 0..2 ping-pong VMEM scratches, (D+2, Mp, Cp) bf16.
    """
    Wp = W + 2
    head = Wp + 1                  # rows [0, Wp+1) of interior slabs are halo
    tail = (H + 1) * Wp + 1        # rows [tail, Mp) are halo / alignment slack

    # --- zero ONLY the halo faces of the ping-pong buffers ------------------
    # (interior rows are fully overwritten by every stage's writeback; the
    #  W/H side halos inside the writeback range are written as exact zeros
    #  via the junk-row mask, so they maintain themselves.)
    for a in act_refs:
        a[0] = jnp.zeros((Mp, Cp), a.dtype)                     # front D halo
        a[D + 1] = jnp.zeros((Mp, Cp), a.dtype)                 # back D halo
        a[1:D + 1, 0:head, :] = jnp.zeros((D, head, Cp), a.dtype)
        a[1:D + 1, tail:Mp, :] = jnp.zeros((D, Mp - tail, Cp), a.dtype)

    # --- chunking of the H*(W+2) flattened output rows (register accum) -----
    n_chunks = -(-H // TH)
    chunk_rows = [min(TH, H - c * TH) * Wp for c in range(n_chunks)]

    # Row-validity mask: output row q is real iff (q mod Wp) < W.  The two
    # "wrap" rows per H-line are junk and are written back as exact zeros so
    # they become the next stage's W-halo.  Hoisted out of all loops.
    masks = {}
    if n_stages > 1:
        for mc in sorted(set(chunk_rows)):
            r = lax.broadcasted_iota(jnp.int32, (mc, 1), 0)
            masks[mc] = (r % Wp) < W

    for s in range(n_stages):
        last = (s == n_stages - 1)
        src = x_ref if s == 0 else act_refs[(s - 1) % 2]
        dst = None if last else act_refs[s % 2]

        @pl.loop(0, D)
        def _depth(d):  # noqa: B023  (traced immediately; closure is current)
            for c in range(n_chunks):
                q0 = c * TH * Wp
                mc = chunk_rows[c]
                acc = jnp.zeros((mc, Cp), jnp.float32)
                for kd in range(3):
                    for kh in range(3):
                        for kw in range(3):
                            tap = kd * 9 + kh * 3 + kw
                            off = q0 + kh * Wp + kw       # contiguous LHS rows
                            lhs = src[d + kd, pl.ds(off, mc), :]
                            acc = acc + jnp.dot(
                                lhs, w_ref[s, tap],
                                preferred_element_type=jnp.float32)
                # bias + ReLU epilogue in f32 (v5e has no bf16 VPU path).
                y = jnp.maximum(acc + b_ref[s], 0.0)
                if last:
                    o_ref[d, pl.ds(q0, mc), :] = y
                else:
                    y = jnp.where(masks[mc], y, 0.0)        # junk rows -> 0
                    dst[d + 1, pl.ds(q0 + Wp + 1, mc), :] = y.astype(dst.dtype)


def _pack_params(params, Cp):
    """Stack per-stage conv weights/biases, zero-padded to Cp channels."""
    ws, bs = [], []
    for (w, b) in params:
        cin, cout = w.shape[3], w.shape[4]
        wp = jnp.zeros((27, Cp, Cp), jnp.float32)
        wp = wp.at[:, :cin, :cout].set(w.reshape(27, cin, cout))
        ws.append(wp)
        bp = jnp.zeros((Cp,), jnp.float32).at[:cout].set(b)
        bs.append(bp)
    w_packed = jnp.stack(ws).astype(jnp.bfloat16)
    b_packed = jnp.stack(bs).reshape(len(params), 1, Cp)
    return w_packed, b_packed


def _resident_spec(block_shape):
    """BlockSpec for grid-invariant inputs, single-buffered when supported."""
    nd = len(block_shape)
    idx = lambda b: (0,) * nd
    try:
        return pl.BlockSpec(block_shape, idx, pipeline_mode=pl.Buffered(1))
    except Exception:                      # fallback: default double buffering
        return pl.BlockSpec(block_shape, idx)


def _vmem_limit_bytes():
    """Generation-aware scoped-VMEM limit (leave ~25% pipeline headroom)."""
    try:
        cap = pltpu.get_tpu_info().vmem_capacity_bytes
    except Exception:
        cap = 64 * 1024 * 1024
    return int(min(cap - cap // 4, 100 * 1024 * 1024))


def conv_block_forward(x, params):
    """ConvBlock.forward with normalization='none' (stack of conv3d+relu).

    x: (B, D, H, W, Cin) NDHWC float32; params: list of (w, b) per stage with
    w: (3, 3, 3, Cin_stage, Cout) and b: (Cout,).
    """
    B, D, H, W, cin0 = x.shape
    cout = params[0][1].shape[0]
    S = len(params)
    Cp = 128 * ((max(cin0, cout) + 127) // 128)   # lane-dense channel padding
    Wp, Hp = W + 2, H + 2
    Mp = _round_up(Hp * Wp + 2, 8)                # +2 slack rows for junk taps
    Mq = H * Wp
    TH = max(1, min(H, 128 // Wp))                # ~<=128-row register accum

    w_packed, b_packed = _pack_params(params, Cp)

    # One-time zero pad: 1-voxel spatial halo (D/H/W) + channel pad, cast to
    # bf16 once (conv operands are bf16 / f32 accumulate, like the reference).
    xp = jnp.pad(x, ((0, 0), (1, 1), (1, 1), (1, 1), (0, Cp - cin0)))
    xp = xp.reshape(B, D + 2, Hp * Wp, Cp)
    if Mp > Hp * Wp:
        xp = jnp.pad(xp, ((0, 0), (0, 0), (0, Mp - Hp * Wp), (0, 0)))
    xp = xp.astype(jnp.bfloat16)

    n_act = 0 if S == 1 else (1 if S == 2 else 2)   # ping-pong stage buffers
    kernel = functools.partial(_conv_block_kernel, n_stages=S, D=D, H=H, W=W,
                               Cp=Cp, Mp=Mp, TH=TH)

    out = pl.pallas_call(
        kernel,
        out_shape=jax.ShapeDtypeStruct((B, D, Mq, Cp), jnp.float32),
        grid=(B,),
        in_specs=[
            pl.BlockSpec((None, D + 2, Mp, Cp), lambda b: (b, 0, 0, 0)),
            _resident_spec((S, 27, Cp, Cp)),
            _resident_spec((S, 1, Cp)),
        ],
        out_specs=pl.BlockSpec((None, D, Mq, Cp), lambda b: (b, 0, 0, 0)),
        scratch_shapes=[pltpu.VMEM((D + 2, Mp, Cp), jnp.bfloat16)
                        for _ in range(n_act)],
        compiler_params=pltpu.CompilerParams(
            dimension_semantics=("parallel",),      # batch -> 2 TCs on v7x
            vmem_limit_bytes=_vmem_limit_bytes()),
    )(xp, w_packed, b_packed)

    # Lane-dense kernel output -> user layout; drop junk columns + channel pad.
    return out.reshape(B, D, H, Wp, Cp)[:, :, :, :W, :cout]


def init_conv_block_params(key, n_stages, n_filters_in, n_filters_out):
    """Deterministic synthetic init matching PyTorch Conv3d default init scale."""
    params = []
    for i in range(n_stages):
        cin = n_filters_in if i == 0 else n_filters_out
        key, kw_key, kb_key = jax.random.split(key, 3)
        fan_in = cin * 3 * 3 * 3
        bound = 1.0 / math.sqrt(fan_in)
        w = jax.random.uniform(kw_key, (3, 3, 3, cin, n_filters_out),
                               jnp.float32, -bound, bound)
        b = jax.random.uniform(kb_key, (n_filters_out,),
                               jnp.float32, -bound, bound)
        params.append((w, b))
    return params


def _reference_forward(x, params):
    """Plain-JAX reference matching the kernel's bf16-operand / f32-accum math."""
    rnd = lambda a: a.astype(jnp.bfloat16).astype(jnp.float32)
    dn = lax.conv_dimension_numbers(x.shape, params[0][0].shape,
                                    ("NDHWC", "DHWIO", "NDHWC"))
    y = x
    for (w, b) in params:
        y = lax.conv_general_dilated(rnd(y), rnd(w), window_strides=(1, 1, 1),
                                     padding="SAME", dimension_numbers=dn,
                                     precision=lax.Precision.HIGHEST)
        y = jnp.maximum(y + b, 0.0)
    return y


if __name__ == "__main__":
    # Small shapes consistent with the module: batch=2, Cin=4, Cout=8, spatial=8.
    B, Cin, Cout, D, H, W = 2, 4, 8, 8, 8, 8
    n_stages = 2

    key = jax.random.PRNGKey(0)
    key, pkey, xkey = jax.random.split(key, 3)
    params = init_conv_block_params(pkey, n_stages, Cin, Cout)

    # NDHWC input (PyTorch NCDHW (2,4,8,8,8) transposed to channels-last).
    x = jax.random.normal(xkey, (B, D, H, W, Cin), jnp.float32)

    out = jax.jit(conv_block_forward)(x, params)
    out = jax.block_until_ready(out)

    ref = _reference_forward(x, params)
    assert out.shape == (B, D, H, W, Cout)
    max_err = float(jnp.max(jnp.abs(out - ref)))
    assert jnp.allclose(out, ref, atol=1e-2, rtol=1e-2), max_err

    print("KERNEL_OK")
</pallas_src>

<mosaic_0001>
module attributes {stable_mosaic.version = 11 : i64} {
  func.func @_conv_block_kernel(%arg0: i32, %arg1: memref<1x10x104x128xbf16, #tpu.memory_space<vmem>>, %arg2: memref<2x27x128x128xbf16, #tpu.memory_space<vmem>>, %arg3: memref<2x1x128xf32, #tpu.memory_space<vmem>>, %arg4: memref<1x8x80x128xf32, #tpu.memory_space<vmem>>, %arg5: memref<10x104x128xbf16, #tpu.memory_space<vmem>>) attributes {dimension_semantics = [#tpu.dimension_semantics<parallel>], iteration_bounds = array<i64: 2>, scalar_prefetch = 0 : i64, scratch_operands = 1 : i64, tpu.core_type = #tpu.core_type<tc>, window_params = [{transform_indices = @transform_0, window_bounds = array<i64: 1, 10, 104, 128>}, {pipeline_mode = #tpu.pipeline_mode<synchronous>, transform_indices = @transform_1, window_bounds = array<i64: 2, 27, 128, 128>}, {pipeline_mode = #tpu.pipeline_mode<synchronous>, transform_indices = @transform_2, window_bounds = array<i64: 2, 1, 128>}, {transform_indices = @transform_3, window_bounds = array<i64: 1, 8, 80, 128>}]} {
    %cst = arith.constant 0.000000e+00 : bf16
    %0 = vector.broadcast %cst : bf16 to vector<104x128xbf16>
    %c0 = arith.constant 0 : index
    %c0_0 = arith.constant 0 : index
    %c0_1 = arith.constant 0 : index
    %1 = vector.load %arg5[%c0, %c0_0, %c0_1] : memref<10x104x128xbf16, #tpu.memory_space<vmem>>, vector<1x104x128xbf16>
    %2 = vector.shape_cast %1 : vector<1x104x128xbf16> to vector<104x128xbf16>
    %3 = vector.shape_cast %0 : vector<104x128xbf16> to vector<1x104x128xbf16>
    tpu.vector_store %arg5[%c0, %c0_0, %c0_1], %3 {strides = array<i32>} : memref<10x104x128xbf16, #tpu.memory_space<vmem>>, vector<1x104x128xbf16>,
    %cst_2 = arith.constant 0.000000e+00 : bf16
    %4 = vector.broadcast %cst_2 : bf16 to vector<104x128xbf16>
    %c9 = arith.constant 9 : index
    %c0_3 = arith.constant 0 : index
    %c0_4 = arith.constant 0 : index
    %5 = vector.load %arg5[%c9, %c0_3, %c0_4] : memref<10x104x128xbf16, #tpu.memory_space<vmem>>, vector<1x104x128xbf16>
    %6 = vector.shape_cast %5 : vector<1x104x128xbf16> to vector<104x128xbf16>
    %7 = vector.shape_cast %4 : vector<104x128xbf16> to vector<1x104x128xbf16>
    tpu.vector_store %arg5[%c9, %c0_3, %c0_4], %7 {strides = array<i32>} : memref<10x104x128xbf16, #tpu.memory_space<vmem>>, vector<1x104x128xbf16>,
    %cst_5 = arith.constant 0.000000e+00 : bf16
    %8 = vector.broadcast %cst_5 : bf16 to vector<8x11x128xbf16>
    %c1 = arith.constant 1 : index
    %c0_6 = arith.constant 0 : index
    %c0_7 = arith.constant 0 : index
    %9 = vector.load %arg5[%c1, %c0_6, %c0_7] : memref<10x104x128xbf16, #tpu.memory_space<vmem>>, vector<8x11x128xbf16>
    tpu.vector_store %arg5[%c1, %c0_6, %c0_7], %8 {strides = array<i32>} : memref<10x104x128xbf16, #tpu.memory_space<vmem>>, vector<8x11x128xbf16>,
    %cst_8 = arith.constant 0.000000e+00 : bf16
    %10 = vector.broadcast %cst_8 : bf16 to vector<8x13x128xbf16>
    %c1_9 = arith.constant 1 : index
    %c91 = arith.constant 91 : index
    %c0_10 = arith.constant 0 : index
    %11 = vector.load %arg5[%c1_9, %c91, %c0_10] : memref<10x104x128xbf16, #tpu.memory_space<vmem>>, vector<8x13x128xbf16>
    tpu.vector_store %arg5[%c1_9, %c91, %c0_10], %10 {strides = array<i32>} : memref<10x104x128xbf16, #tpu.memory_space<vmem>>, vector<8x13x128xbf16>,
    %12 = tpu.iota {dimensions = array<i32: 0>} : vector<80x1xi32>
    %c10_i32 = arith.constant 10 : i32
    %c0_i32 = arith.constant 0 : i32
    %13 = arith.cmpi eq, %c10_i32, %c0_i32 : i32
    %c1_i32 = arith.constant 1 : i32
    %14 = arith.select %13, %c1_i32, %c10_i32 : i32
    %15 = vector.broadcast %14 : i32 to vector<80x1xi32>
    %16 = arith.remsi %12, %15 : vector<80x1xi32>
    %c0_i32_11 = arith.constant 0 : i32
    %17 = vector.broadcast %c0_i32_11 : i32 to vector<80x1xi32>
    %18 = arith.cmpi ne, %16, %17 : vector<80x1xi32>
    %c0_i32_12 = arith.constant 0 : i32
    %19 = vector.broadcast %c0_i32_12 : i32 to vector<80x1xi32>
    %20 = arith.cmpi slt, %16, %19 : vector<80x1xi32>
    %c0_i32_13 = arith.constant 0 : i32
    %21 = arith.cmpi slt, %14, %c0_i32_13 : i32
    %22 = vector.broadcast %21 : i1 to vector<80x1xi1>
    %23 = vector.broadcast %22 : vector<80x1xi1> to vector<80x1xi1>
    %24 = arith.xori %20, %23 : vector<80x1xi1>
    %25 = arith.andi %24, %18 : vector<80x1xi1>
    %26 = vector.broadcast %14 : i32 to vector<80x1xi32>
    %27 = arith.addi %16, %26 : vector<80x1xi32>
    %28 = arith.select %25, %27, %16 : vector<80x1xi1>, vector<80x1xi32>
    %c8_i32 = arith.constant 8 : i32
    %29 = vector.broadcast %c8_i32 : i32 to vector<80x1xi32>
    %30 = arith.cmpi slt, %28, %29 : vector<80x1xi32>
    %c0_i32_14 = arith.constant 0 : i32
    %c8_i32_15 = arith.constant 8 : i32
    %31 = arith.addi %c0_i32_14, %c8_i32_15 : i32
    %c1_i32_16 = arith.constant 1 : i32
    scf.for %arg6 = %c0_i32_14 to %31 step %c1_i32_16  : i32 {
      %c1_i32_22 = arith.constant 1 : i32
      %33 = arith.muli %arg6, %c1_i32_22 : i32
      %c0_i32_23 = arith.constant 0 : i32
      %34 = arith.addi %c0_i32_23, %33 : i32
      %cst_24 = arith.constant 0.000000e+00 : f32
      %35 = vector.broadcast %cst_24 : f32 to vector<80x128xf32>
      %c0_i32_25 = arith.constant 0 : i32
      %36 = arith.addi %34, %c0_i32_25 : i32
      %c0_26 = arith.constant 0 : index
      %37 = arith.index_cast %36 : i32 to index
      %c0_27 = arith.constant 0 : index
      %c0_28 = arith.constant 0 : index
      %38 = vector.load %arg1[%c0_26, %37, %c0_27, %c0_28] : memref<1x10x104x128xbf16, #tpu.memory_space<vmem>>, vector<1x1x80x128xbf16>
      %39 = vector.shape_cast %38 : vector<1x1x80x128xbf16> to vector<80x128xbf16>
      %c0_29 = arith.constant 0 : index
      %c0_30 = arith.constant 0 : index
      %c0_31 = arith.constant 0 : index
      %c0_32 = arith.constant 0 : index
      %40 = vector.load %arg2[%c0_29, %c0_30, %c0_31, %c0_32] : memref<2x27x128x128xbf16, #tpu.memory_space<vmem>>, vector<1x1x128x128xbf16>
      %41 = vector.shape_cast %40 : vector<1x1x128x128xbf16> to vector<128x128xbf16>
      %cst_33 = arith.constant dense<0.000000e+00> : vector<80x128xf32>
      %42 = tpu.matmul %39, %41, %cst_33 {dimension_numbers = #tpu.dot_dimension_numbers<[1], [0], [0], [1], [0, 0, 1, 1], [], []>} : vector<80x128xbf16>, vector<128x128xbf16>, vector<80x128xf32> -> vector<80x128xf32>
      %43 = arith.addf %35, %42 : vector<80x128xf32>
      %c0_i32_34 = arith.constant 0 : i32
      %44 = arith.addi %34, %c0_i32_34 : i32
      %c0_35 = arith.constant 0 : index
      %45 = arith.index_cast %44 : i32 to index
      %c1_36 = arith.constant 1 : index
      %c0_37 = arith.constant 0 : index
      %46 = vector.load %arg1[%c0_35, %45, %c1_36, %c0_37] : memref<1x10x104x128xbf16, #tpu.memory_space<vmem>>, vector<1x1x80x128xbf16>
      %47 = vector.shape_cast %46 : vector<1x1x80x128xbf16> to vector<80x128xbf16>
      %c0_38 = arith.constant 0 : index
      %c1_39 = arith.constant 1 : index
      %c0_40 = arith.constant 0 : index
      %c0_41 = arith.constant 0 : index
      %48 = vector.load %arg2[%c0_38, %c1_39, %c0_40, %c0_41] : memref<2x27x128x128xbf16, #tpu.memory_space<vmem>>, vector<1x1x128x128xbf16>
      %49 = vector.shape_cast %48 : vector<1x1x128x128xbf16> to vector<128x128xbf16>
      %cst_42 = arith.constant dense<0.000000e+00> : vector<80x128xf32>
      %50 = tpu.matmul %47, %49, %cst_42 {dimension_numbers = #tpu.dot_dimension_numbers<[1], [0], [0], [1], [0, 0, 1, 1], [], []>} : vector<80x128xbf16>, vector<128x128xbf16>, vector<80x128xf32> -> vector<80x128xf32>
      %51 = arith.addf %43, %50 : vector<80x128xf32>
      %c0_i32_43 = arith.constant 0 : i32
      %52 = arith.addi %34, %c0_i32_43 : i32
      %c0_44 = arith.constant 0 : index
      %53 = arith.index_cast %52 : i32 to index
      %c2 = arith.constant 2 : index
      %c0_45 = arith.constant 0 : index
      %54 = vector.load %arg1[%c0_44, %53, %c2, %c0_45] : memref<1x10x104x128xbf16, #tpu.memory_space<vmem>>, vector<1x1x80x128xbf16>
      %55 = vector.shape_cast %54 : vector<1x1x80x128xbf16> to vector<80x128xbf16>
      %c0_46 = arith.constant 0 : index
      %c2_47 = arith.constant 2 : index
      %c0_48 = arith.constant 0 : index
      %c0_49 = arith.constant 0 : index
      %56 = vector.load %arg2[%c0_46, %c2_47, %c0_48, %c0_49] : memref<2x27x128x128xbf16, #tpu.memory_space<vmem>>, vector<1x1x128x128xbf16>
      %57 = vector.shape_cast %56 : vector<1x1x128x128xbf16> to vector<128x128xbf16>
      %cst_50 = arith.constant dense<0.000000e+00> : vector<80x128xf32>
      %58 = tpu.matmul %55, %57, %cst_50 {dimension_numbers = #tpu.dot_dimension_numbers<[1], [0], [0], [1], [0, 0, 1, 1], [], []>} : vector<80x128xbf16>, vector<128x128xbf16>, vector<80x128xf32> -> vector<80x128xf32>
      %59 = arith.addf %51, %58 : vector<80x128xf32>
      %c0_i32_51 = arith.constant 0 : i32
      %60 = arith.addi %34, %c0_i32_51 : i32
      %c0_52 = arith.constant 0 : index
      %61 = arith.index_cast %60 : i32 to index
      %c10 = arith.constant 10 : index
      %c0_53 = arith.constant 0 : index
      %62 = vector.load %arg1[%c0_52, %61, %c10, %c0_53] : memref<1x10x104x128xbf16, #tpu.memory_space<vmem>>, vector<1x1x80x128xbf16>
      %63 = vector.shape_cast %62 : vector<1x1x80x128xbf16> to vector<80x128xbf16>
      %c0_54 = arith.constant 0 : index
      %c3 = arith.constant 3 : index
      %c0_55 = arith.constant 0 : index
      %c0_56 = arith.constant 0 : index
      %64 = vector.load %arg2[%c0_54, %c3, %c0_55, %c0_56] : memref<2x27x128x128xbf16, #tpu.memory_space<vmem>>, vector<1x1x128x128xbf16>
      %65 = vector.shape_cast %64 : vector<1x1x128x128xbf16> to vector<128x128xbf16>
      %cst_57 = arith.constant dense<0.000000e+00> : vector<80x128xf32>
      %66 = tpu.matmul %63, %65, %cst_57 {dimension_numbers = #tpu.dot_dimension_numbers<[1], [0], [0], [1], [0, 0, 1, 1], [], []>} : vector<80x128xbf16>, vector<128x128xbf16>, vector<80x128xf32> -> vector<80x128xf32>
      %67 = arith.addf %59, %66 : vector<80x128xf32>
      %c0_i32_58 = arith.constant 0 : i32
      %68 = arith.addi %34, %c0_i32_58 : i32
      %c0_59 = arith.constant 0 : index
      %69 = arith.index_cast %68 : i32 to index
      %c11 = arith.constant 11 : index
      %c0_60 = arith.constant 0 : index
      %70 = vector.load %arg1[%c0_59, %69, %c11, %c0_60] : memref<1x10x104x128xbf16, #tpu.memory_space<vmem>>, vector<1x1x80x128xbf16>
      %71 = vector.shape_cast %70 : vector<1x1x80x128xbf16> to vector<80x128xbf16>
      %c0_61 = arith.constant 0 : index
      %c4 = arith.constant 4 : index
      %c0_62 = arith.constant 0 : index
      %c0_63 = arith.constant 0 : index
      %72 = vector.load %arg2[%c0_61, %c4, %c0_62, %c0_63] : memref<2x27x128x128xbf16, #tpu.memory_space<vmem>>, vector<1x1x128x128xbf16>
      %73 = vector.shape_cast %72 : vector<1x1x128x128xbf16> to vector<128x128xbf16>
      %cst_64 = arith.constant dense<0.000000e+00> : vector<80x128xf32>
      %74 = tpu.matmul %71, %73, %cst_64 {dimension_numbers = #tpu.dot_dimension_numbers<[1], [0], [0], [1], [0, 0, 1, 1], [], []>} : vector<80x128xbf16>, vector<128x128xbf16>, vector<80x128xf32> -> vector<80x128xf32>
      %75 = arith.addf %67, %74 : vector<80x128xf32>
      %c0_i32_65 = arith.constant 0 : i32
      %76 = arith.addi %34, %c0_i32_65 : i32
      %c0_66 = arith.constant 0 : index
      %77 = arith.index_cast %76 : i32 to index
      %c12 = arith.constant 12 : index
      %c0_67 = arith.constant 0 : index
      %78 = vector.load %arg1[%c0_66, %77, %c12, %c0_67] : memref<1x10x104x128xbf16, #tpu.memory_space<vmem>>, vector<1x1x80x128xbf16>
      %79 = vector.shape_cast %78 : vector<1x1x80x128xbf16> to vector<80x128xbf16>
      %c0_68 = arith.constant 0 : index
      %c5 = arith.constant 5 : index
      %c0_69 = arith.constant 0 : index
      %c0_70 = arith.constant 0 : index
      %80 = vector.load %arg2[%c0_68, %c5, %c0_69, %c0_70] : memref<2x27x128x128xbf16, #tpu.memory_space<vmem>>, vector<1x1x128x128xbf16>
      %81 = vector.shape_cast %80 : vector<1x1x128x128xbf16> to vector<128x128xbf16>
      %cst_71 = arith.constant dense<0.000000e+00> : vector<80x128xf32>
      %82 = tpu.matmul %79, %81, %cst_71 {dimension_numbers = #tpu.dot_dimension_numbers<[1], [0], [0], [1], [0, 0, 1, 1], [], []>} : vector<80x128xbf16>, vector<128x128xbf16>, vector<80x128xf32> -> vector<80x128xf32>
      %83 = arith.addf %75, %82 : vector<80x128xf32>
      %c0_i32_72 = arith.constant 0 : i32
      %84 = arith.addi %34, %c0_i32_72 : i32
      %c0_73 = arith.constant 0 : index
      %85 = arith.index_cast %84 : i32 to index
      %c20 = arith.constant 20 : index
      %c0_74 = arith.constant 0 : index
      %86 = vector.load %arg1[%c0_73, %85, %c20, %c0_74] : memref<1x10x104x128xbf16, #tpu.memory_space<vmem>>, vector<1x1x80x128xbf16>
      %87 = vector.shape_cast %86 : vector<1x1x80x128xbf16> to vector<80x128xbf16>
      %c0_75 = arith.constant 0 : index
      %c6 = arith.constant 6 : index
      %c0_76 = arith.constant 0 : index
      %c0_77 = arith.constant 0 : index
      %88 = vector.load %arg2[%c0_75, %c6, %c0_76, %c0_77] : memref<2x27x128x128xbf16, #tpu.memory_space<vmem>>, vector<1x1x128x128xbf16>
      %89 = vector.shape_cast %88 : vector<1x1x128x128xbf16> to vector<128x128xbf16>
      %cst_78 = arith.constant dense<0.000000e+00> : vector<80x128xf32>
      %90 = tpu.matmul %87, %89, %cst_78 {dimension_numbers = #tpu.dot_dimension_numbers<[1], [0], [0], [1], [0, 0, 1, 1], [], []>} : vector<80x128xbf16>, vector<128x128xbf16>, vector<80x128xf32> -> vector<80x128xf32>
      %91 = arith.addf %83, %90 : vector<80x128xf32>
      %c0_i32_79 = arith.constant 0 : i32
      %92 = arith.addi %34, %c0_i32_79 : i32
      %c0_80 = arith.constant 0 : index
      %93 = arith.index_cast %92 : i32 to index
      %c21 = arith.constant 21 : index
      %c0_81 = arith.constant 0 : index
      %94 = vector.load %arg1[%c0_80, %93, %c21, %c0_81] : memref<1x10x104x128xbf16, #tpu.memory_space<vmem>>, vector<1x1x80x128xbf16>
      %95 = vector.shape_cast %94 : vector<1x1x80x128xbf16> to vector<80x128xbf16>
      %c0_82 = arith.constant 0 : index
      %c7 = arith.constant 7 : index
      %c0_83 = arith.constant 0 : index
      %c0_84 = arith.constant 0 : index
      %96 = vector.load %arg2[%c0_82, %c7, %c0_83, %c0_84] : memref<2x27x128x128xbf16, #tpu.memory_space<vmem>>, vector<1x1x128x128xbf16>
      %97 = vector.shape_cast %96 : vector<1x1x128x128xbf16> to vector<128x128xbf16>
      %cst_85 = arith.constant dense<0.000000e+00> : vector<80x128xf32>
      %98 = tpu.matmul %95, %97, %cst_85 {dimension_numbers = #tpu.dot_dimension_numbers<[1], [0], [0], [1], [0, 0, 1, 1], [], []>} : vector<80x128xbf16>, vector<128x128xbf16>, vector<80x128xf32> -> vector<80x128xf32>
      %99 = arith.addf %91, %98 : vector<80x128xf32>
      %c0_i32_86 = arith.constant 0 : i32
      %100 = arith.addi %34, %c0_i32_86 : i32
      %c0_87 = arith.constant 0 : index
      %101 = arith.index_cast %100 : i32 to index
      %c22 = arith.constant 22 : index
      %c0_88 = arith.constant 0 : index
      %102 = vector.load %arg1[%c0_87, %101, %c22, %c0_88] : memref<1x10x104x128xbf16, #tpu.memory_space<vmem>>, vector<1x1x80x128xbf16>
      %103 = vector.shape_cast %102 : vector<1x1x80x128xbf16> to vector<80x128xbf16>
      %c0_89 = arith.constant 0 : index
      %c8 = arith.constant 8 : index
      %c0_90 = arith.constant 0 : index
      %c0_91 = arith.constant 0 : index
      %104 = vector.load %arg2[%c0_89, %c8, %c0_90, %c0_91] : memref<2x27x128x128xbf16, #tpu.memory_space<vmem>>, vector<1x1x128x128xbf16>
      %105 = vector.shape_cast %104 : vector<1x1x128x128xbf16> to vector<128x128xbf16>
      %cst_92 = arith.constant dense<0.000000e+00> : vector<80x128xf32>
      %106 = tpu.matmul %103, %105, %cst_92 {dimension_numbers = #tpu.dot_dimension_numbers<[1], [0], [0], [1], [0, 0, 1, 1], [], []>} : vector<80x128xbf16>, vector<128x128xbf16>, vector<80x128xf32> -> vector<80x128xf32>
      %107 = arith.addf %99, %106 : vector<80x128xf32>
      %c1_i32_93 = arith.constant 1 : i32
      %108 = arith.addi %34, %c1_i32_93 : i32
      %c0_94 = arith.constant 0 : index
      %109 = arith.index_cast %108 : i32 to index
      %c0_95 = arith.constant 0 : index
      %c0_96 = arith.constant 0 : index
      %110 = vector.load %arg1[%c0_94, %109, %c0_95, %c0_96] : memref<1x10x104x128xbf16, #tpu.memory_space<vmem>>, vector<1x1x80x128xbf16>
      %111 = vector.shape_cast %110 : vector<1x1x80x128xbf16> to vector<80x128xbf16>
      %c0_97 = arith.constant 0 : index
      %c9_98 = arith.constant 9 : index
      %c0_99 = arith.constant 0 : index
      %c0_100 = arith.constant 0 : index
      %112 = vector.load %arg2[%c0_97, %c9_98, %c0_99, %c0_100] : memref<2x27x128x128xbf16, #tpu.memory_space<vmem>>, vector<1x1x128x128xbf16>
      %113 = vector.shape_cast %112 : vector<1x1x128x128xbf16> to vector<128x128xbf16>
      %cst_101 = arith.constant dense<0.000000e+00> : vector<80x128xf32>
      %114 = tpu.matmul %111, %113, %cst_101 {dimension_numbers = #tpu.dot_dimension_numbers<[1], [0], [0], [1], [0, 0, 1, 1], [], []>} : vector<80x128xbf16>, vector<128x128xbf16>, vector<80x128xf32> -> vector<80x128xf32>
      %115 = arith.addf %107, %114 : vector<80x128xf32>
      %c1_i32_102 = arith.constant 1 : i32
      %116 = arith.addi %34, %c1_i32_102 : i32
      %c0_103 = arith.constant 0 : index
      %117 = arith.index_cast %116 : i32 to index
      %c1_104 = arith.constant 1 : index
      %c0_105 = arith.constant 0 : index
      %118 = vector.load %arg1[%c0_103, %117, %c1_104, %c0_105] : memref<1x10x104x128xbf16, #tpu.memory_space<vmem>>, vector<1x1x80x128xbf16>
      %119 = vector.shape_cast %118 : vector<1x1x80x128xbf16> to vector<80x128xbf16>
      %c0_106 = arith.constant 0 : index
      %c10_107 = arith.constant 10 : index
      %c0_108 = arith.constant 0 : index
      %c0_109 = arith.constant 0 : index
      %120 = vector.load %arg2[%c0_106, %c10_107, %c0_108, %c0_109] : memref<2x27x128x128xbf16, #tpu.memory_space<vmem>>, vector<1x1x128x128xbf16>
      %121 = vector.shape_cast %120 : vector<1x1x128x128xbf16> to vector<128x128xbf16>
      %cst_110 = arith.constant dense<0.000000e+00> : vector<80x128xf32>
      %122 = tpu.matmul %119, %121, %cst_110 {dimension_numbers = #tpu.dot_dimension_numbers<[1], [0], [0], [1], [0, 0, 1, 1], [], []>} : vector<80x128xbf16>, vector<128x128xbf16>, vector<80x128xf32> -> vector<80x128xf32>
      %123 = arith.addf %115, %122 : vector<80x128xf32>
      %c1_i32_111 = arith.constant 1 : i32
      %124 = arith.addi %34, %c1_i32_111 : i32
      %c0_112 = arith.constant 0 : index
      %125 = arith.index_cast %124 : i32 to index
      %c2_113 = arith.constant 2 : index
      %c0_114 = arith.constant 0 : index
      %126 = vector.load %arg1[%c0_112, %125, %c2_113, %c0_114] : memref<1x10x104x128xbf16, #tpu.memory_space<vmem>>, vector<1x1x80x128xbf16>
      %127 = vector.shape_cast %126 : vector<1x1x80x128xbf16> to vector<80x128xbf16>
      %c0_115 = arith.constant 0 : index
      %c11_116 = arith.constant 11 : index
      %c0_117 = arith.constant 0 : index
      %c0_118 = arith.constant 0 : index
      %128 = vector.load %arg2[%c0_115, %c11_116, %c0_117, %c0_118] : memref<2x27x128x128xbf16, #tpu.memory_space<vmem>>, vector<1x1x128x128xbf16>
      %129 = vector.shape_cast %128 : vector<1x1x128x128xbf16> to vector<128x128xbf16>
      %cst_119 = arith.constant dense<0.000000e+00> : vector<80x128xf32>
      %130 = tpu.matmul %127, %129, %cst_119 {dimension_numbers = #tpu.dot_dimension_numbers<[1], [0], [0], [1], [0, 0, 1, 1], [], []>} : vector<80x128xbf16>, vector<128x128xbf16>, vector<80x128xf32> -> vector<80x128xf32>
      %131 = arith.addf %123, %130 : vector<80x128xf32>
      %c1_i32_120 = arith.constant 1 : i32
      %132 = arith.addi %34, %c1_i32_120 : i32
      %c0_121 = arith.constant 0 : index
      %133 = arith.index_cast %132 : i32 to index
      %c10_122 = arith.constant 10 : index
      %c0_123 = arith.constant 0 : index
      %134 = vector.load %arg1[%c0_121, %133, %c10_122, %c0_123] : memref<1x10x104x128xbf16, #tpu.memory_space<vmem>>, vector<1x1x80x128xbf16>
      %135 = vector.shape_cast %134 : vector<1x1x80x128xbf16> to vector<80x128xbf16>
      %c0_124 = arith.constant 0 : index
      %c12_125 = arith.constant 12 : index
      %c0_126 = arith.constant 0 : index
      %c0_127 = arith.constant 0 : index
      %136 = vector.load %arg2[%c0_124, %c12_125, %c0_126, %c0_127] : memref<2x27x128x128xbf16, #tpu.memory_space<vmem>>, vector<1x1x128x128xbf16>
      %137 = vector.shape_cast %136 : vector<1x1x128x128xbf16> to vector<128x128xbf16>
      %cst_128 = arith.constant dense<0.000000e+00> : vector<80x128xf32>
      %138 = tpu.matmul %135, %137, %cst_128 {dimension_numbers = #tpu.dot_dimension_numbers<[1], [0], [0], [1], [0, 0, 1, 1], [], []>} : vector<80x128xbf16>, vector<128x128xbf16>, vector<80x128xf32> -> vector<80x128xf32>
      %139 = arith.addf %131, %138 : vector<80x128xf32>
      %c1_i32_129 = arith.constant 1 : i32
      %140 = arith.addi %34, %c1_i32_129 : i32
      %c0_130 = arith.constant 0 : index
      %141 = arith.index_cast %140 : i32 to index
      %c11_131 = arith.constant 11 : index
      %c0_132 = arith.constant 0 : index
      %142 = vector.load %arg1[%c0_130, %141, %c11_131, %c0_132] : memref<1x10x104x128xbf16, #tpu.memory_space<vmem>>, vector<1x1x80x128xbf16>
      %143 = vector.shape_cast %142 : vector<1x1x80x128xbf16> to vector<80x128xbf16>
      %c0_133 = arith.constant 0 : index
      %c13 = arith.constant 13 : index
      %c0_134 = arith.constant 0 : index
      %c0_135 = arith.constant 0 : index
      %144 = vector.load %arg2[%c0_133, %c13, %c0_134, %c0_135] : memref<2x27x128x128xbf16, #tpu.memory_space<vmem>>, vector<1x1x128x128xbf16>
      %145 = vector.shape_cast %144 : vector<1x1x128x128xbf16> to vector<128x128xbf16>
      %cst_136 = arith.constant dense<0.000000e+00> : vector<80x128xf32>
      %146 = tpu.matmul %143, %145, %cst_136 {dimension_numbers = #tpu.dot_dimension_numbers<[1], [0], [0], [1], [0, 0, 1, 1], [], []>} : vector<80x128xbf16>, vector<128x128xbf16>, vector<80x128xf32> -> vector<80x128xf32>
      %147 = arith.addf %139, %146 : vector<80x128xf32>
      %c1_i32_137 = arith.constant 1 : i32
      %148 = arith.addi %34, %c1_i32_137 : i32
      %c0_138 = arith.constant 0 : index
      %149 = arith.index_cast %148 : i32 to index
      %c12_139 = arith.constant 12 : index
      %c0_140 = arith.constant 0 : index
      %150 = vector.load %arg1[%c0_138, %149, %c12_139, %c0_140] : memref<1x10x104x128xbf16, #tpu.memory_space<vmem>>, vector<1x1x80x128xbf16>
      %151 = vector.shape_cast %150 : vector<1x1x80x128xbf16> to vector<80x128xbf16>
      %c0_141 = arith.constant 0 : index
      %c14 = arith.constant 14 : index
      %c0_142 = arith.constant 0 : index
      %c0_143 = arith.constant 0 : index
      %152 = vector.load %arg2[%c0_141, %c14, %c0_142, %c0_143] : memref<2x27x128x128xbf16, #tpu.memory_space<vmem>>, vector<1x1x128x128xbf16>
      %153 = vector.shape_cast %152 : vector<1x1x128x128xbf16> to vector<128x128xbf16>
      %cst_144 = arith.constant dense<0.000000e+00> : vector<80x128xf32>
      %154 = tpu.matmul %151, %153, %cst_144 {dimension_numbers = #tpu.dot_dimension_numbers<[1], [0], [0], [1], [0, 0, 1, 1], [], []>} : vector<80x128xbf16>, vector<128x128xbf16>, vector<80x128xf32> -> vector<80x128xf32>
      %155 = arith.addf %147, %154 : vector<80x128xf32>
      %c1_i32_145 = arith.constant 1 : i32
      %156 = arith.addi %34, %c1_i32_145 : i32
      %c0_146 = arith.constant 0 : index
      %157 = arith.index_cast %156 : i32 to index
      %c20_147 = arith.constant 20 : index
      %c0_148 = arith.constant 0 : index
      %158 = vector.load %arg1[%c0_146, %157, %c20_147, %c0_148] : memref<1x10x104x128xbf16, #tpu.memory_space<vmem>>, vector<1x1x80x128xbf16>
      %159 = vector.shape_cast %158 : vector<1x1x80x128xbf16> to vector<80x128xbf16>
      %c0_149 = arith.constant 0 : index
      %c15 = arith.constant 15 : index
      %c0_150 = arith.constant 0 : index
      %c0_151 = arith.constant 0 : index
      %160 = vector.load %arg2[%c0_149, %c15, %c0_150, %c0_151] : memref<2x27x128x128xbf16, #tpu.memory_space<vmem>>, vector<1x1x128x128xbf16>
      %161 = vector.shape_cast %160 : vector<1x1x128x128xbf16> to vector<128x128xbf16>
      %cst_152 = arith.constant dense<0.000000e+00> : vector<80x128xf32>
      %162 = tpu.matmul %159, %161, %cst_152 {dimension_numbers = #tpu.dot_dimension_numbers<[1], [0], [0], [1], [0, 0, 1, 1], [], []>} : vector<80x128xbf16>, vector<128x128xbf16>, vector<80x128xf32> -> vector<80x128xf32>
      %163 = arith.addf %155, %162 : vector<80x128xf32>
      %c1_i32_153 = arith.constant 1 : i32
      %164 = arith.addi %34, %c1_i32_153 : i32
      %c0_154 = arith.constant 0 : index
      %165 = arith.index_cast %164 : i32 to index
      %c21_155 = arith.constant 21 : index
      %c0_156 = arith.constant 0 : index
      %166 = vector.load %arg1[%c0_154, %165, %c21_155, %c0_156] : memref<1x10x104x128xbf16, #tpu.memory_space<vmem>>, vector<1x1x80x128xbf16>
      %167 = vector.shape_cast %166 : vector<1x1x80x128xbf16> to vector<80x128xbf16>
      %c0_157 = arith.constant 0 : index
      %c16 = arith.constant 16 : index
      %c0_158 = arith.constant 0 : index
      %c0_159 = arith.constant 0 : index
      %168 = vector.load %arg2[%c0_157, %c16, %c0_158, %c0_159] : memref<2x27x128x128xbf16, #tpu.memory_space<vmem>>, vector<1x1x128x128xbf16>
      %169 = vector.shape_cast %168 : vector<1x1x128x128xbf16> to vector<128x128xbf16>
      %cst_160 = arith.constant dense<0.000000e+00> : vector<80x128xf32>
      %170 = tpu.matmul %167, %169, %cst_160 {dimension_numbers = #tpu.dot_dimension_numbers<[1], [0], [0], [1], [0, 0, 1, 1], [], []>} : vector<80x128xbf16>, vector<128x128xbf16>, vector<80x128xf32> -> vector<80x128xf32>
      %171 = arith.addf %163, %170 : vector<80x128xf32>
      %c1_i32_161 = arith.constant 1 : i32
      %172 = arith.addi %34, %c1_i32_161 : i32
      %c0_162 = arith.constant 0 : index
      %173 = arith.index_cast %172 : i32 to index
      %c22_163 = arith.constant 22 : index
      %c0_164 = arith.constant 0 : index
      %174 = vector.load %arg1[%c0_162, %173, %c22_163, %c0_164] : memref<1x10x104x128xbf16, #tpu.memory_space<vmem>>, vector<1x1x80x128xbf16>
      %175 = vector.shape_cast %174 : vector<1x1x80x128xbf16> to vector<80x128xbf16>
      %c0_165 = arith.constant 0 : index
      %c17 = arith.constant 17 : index
      %c0_166 = arith.constant 0 : index
      %c0_167 = arith.constant 0 : index
      %176 = vector.load %arg2[%c0_165, %c17, %c0_166, %c0_167] : memref<2x27x128x128xbf16, #tpu.memory_space<vmem>>, vector<1x1x128x128xbf16>
      %177 = vector.shape_cast %176 : vector<1x1x128x128xbf16> to vector<128x128xbf16>
      %cst_168 = arith.constant dense<0.000000e+00> : vector<80x128xf32>
      %178 = tpu.matmul %175, %177, %cst_168 {dimension_numbers = #tpu.dot_dimension_numbers<[1], [0], [0], [1], [0, 0, 1, 1], [], []>} : vector<80x128xbf16>, vector<128x128xbf16>, vector<80x128xf32> -> vector<80x128xf32>
      %179 = arith.addf %171, %178 : vector<80x128xf32>
      %c2_i32 = arith.constant 2 : i32
      %180 = arith.addi %34, %c2_i32 : i32
      %c0_169 = arith.constant 0 : index
      %181 = arith.index_cast %180 : i32 to index
      %c0_170 = arith.constant 0 : index
      %c0_171 = arith.constant 0 : index
      %182 = vector.load %arg1[%c0_169, %181, %c0_170, %c0_171] : memref<1x10x104x128xbf16, #tpu.memory_space<vmem>>, vector<1x1x80x128xbf16>
      %183 = vector.shape_cast %182 : vector<1x1x80x128xbf16> to vector<80x128xbf16>
      %c0_172 = arith.constant 0 : index
      %c18 = arith.constant 18 : index
      %c0_173 = arith.constant 0 : index
      %c0_174 = arith.constant 0 : index
      %184 = vector.load %arg2[%c0_172, %c18, %c0_173, %c0_174] : memref<2x27x128x128xbf16, #tpu.memory_space<vmem>>, vector<1x1x128x128xbf16>
      %185 = vector.shape_cast %184 : vector<1x1x128x128xbf16> to vector<128x128xbf16>
      %cst_175 = arith.constant dense<0.000000e+00> : vector<80x128xf32>
      %186 = tpu.matmul %183, %185, %cst_175 {dimension_numbers = #tpu.dot_dimension_numbers<[1], [0], [0], [1], [0, 0, 1, 1], [], []>} : vector<80x128xbf16>, vector<128x128xbf16>, vector<80x128xf32> -> vector<80x128xf32>
      %187 = arith.addf %179, %186 : vector<80x128xf32>
      %c2_i32_176 = arith.constant 2 : i32
      %188 = arith.addi %34, %c2_i32_176 : i32
      %c0_177 = arith.constant 0 : index
      %189 = arith.index_cast %188 : i32 to index
      %c1_178 = arith.constant 1 : index
      %c0_179 = arith.constant 0 : index
      %190 = vector.load %arg1[%c0_177, %189, %c1_178, %c0_179] : memref<1x10x104x128xbf16, #tpu.memory_space<vmem>>, vector<1x1x80x128xbf16>
      %191 = vector.shape_cast %190 : vector<1x1x80x128xbf16> to vector<80x128xbf16>
      %c0_180 = arith.constant 0 : index
      %c19 = arith.constant 19 : index
      %c0_181 = arith.constant 0 : index
      %c0_182 = arith.constant 0 : index
      %192 = vector.load %arg2[%c0_180, %c19, %c0_181, %c0_182] : memref<2x27x128x128xbf16, #tpu.memory_space<vmem>>, vector<1x1x128x128xbf16>
      %193 = vector.shape_cast %192 : vector<1x1x128x128xbf16> to vector<128x128xbf16>
      %cst_183 = arith.constant dense<0.000000e+00> : vector<80x128xf32>
      %194 = tpu.matmul %191, %193, %cst_183 {dimension_numbers = #tpu.dot_dimension_numbers<[1], [0], [0], [1], [0, 0, 1, 1], [], []>} : vector<80x128xbf16>, vector<128x128xbf16>, vector<80x128xf32> -> vector<80x128xf32>
      %195 = arith.addf %187, %194 : vector<80x128xf32>
      %c2_i32_184 = arith.constant 2 : i32
      %196 = arith.addi %34, %c2_i32_184 : i32
      %c0_185 = arith.constant 0 : index
      %197 = arith.index_cast %196 : i32 to index
      %c2_186 = arith.constant 2 : index
      %c0_187 = arith.constant 0 : index
      %198 = vector.load %arg1[%c0_185, %197, %c2_186, %c0_187] : memref<1x10x104x128xbf16, #tpu.memory_space<vmem>>, vector<1x1x80x128xbf16>
      %199 = vector.shape_cast %198 : vector<1x1x80x128xbf16> to vector<80x128xbf16>
      %c0_188 = arith.constant 0 : index
      %c20_189 = arith.constant 20 : index
      %c0_190 = arith.constant 0 : index
      %c0_191 = arith.constant 0 : index
      %200 = vector.load %arg2[%c0_188, %c20_189, %c0_190, %c0_191] : memref<2x27x128x128xbf16, #tpu.memory_space<vmem>>, vector<1x1x128x128xbf16>
      %201 = vector.shape_cast %200 : vector<1x1x128x128xbf16> to vector<128x128xbf16>
      %cst_192 = arith.constant dense<0.000000e+00> : vector<80x128xf32>
      %202 = tpu.matmul %199, %201, %cst_192 {dimension_numbers = #tpu.dot_dimension_numbers<[1], [0], [0], [1], [0, 0, 1, 1], [], []>} : vector<80x128xbf16>, vector<128x128xbf16>, vector<80x128xf32> -> vector<80x128xf32>
      %203 = arith.addf %195, %202 : vector<80x128xf32>
      %c2_i32_193 = arith.constant 2 : i32
      %204 = arith.addi %34, %c2_i32_193 : i32
      %c0_194 = arith.constant 0 : index
      %205 = arith.index_cast %204 : i32 to index
      %c10_195 = arith.constant 10 : index
      %c0_196 = arith.constant 0 : index
      %206 = vector.load %arg1[%c0_194, %205, %c10_195, %c0_196] : memref<1x10x104x128xbf16, #tpu.memory_space<vmem>>, vector<1x1x80x128xbf16>
      %207 = vector.shape_cast %206 : vector<1x1x80x128xbf16> to vector<80x128xbf16>
      %c0_197 = arith.constant 0 : index
      %c21_198 = arith.constant 21 : index
      %c0_199 = arith.constant 0 : index
      %c0_200 = arith.constant 0 : index
      %208 = vector.load %arg2[%c0_197, %c21_198, %c0_199, %c0_200] : memref<2x27x128x128xbf16, #tpu.memory_space<vmem>>, vector<1x1x128x128xbf16>
      %209 = vector.shape_cast %208 : vector<1x1x128x128xbf16> to vector<128x128xbf16>
      %cst_201 = arith.constant dense<0.000000e+00> : vector<80x128xf32>
      %210 = tpu.matmul %207, %209, %cst_201 {dimension_numbers = #tpu.dot_dimension_numbers<[1], [0], [0], [1], [0, 0, 1, 1], [], []>} : vector<80x128xbf16>, vector<128x128xbf16>, vector<80x128xf32> -> vector<80x128xf32>
      %211 = arith.addf %203, %210 : vector<80x128xf32>
      %c2_i32_202 = arith.constant 2 : i32
      %212 = arith.addi %34, %c2_i32_202 : i32
      %c0_203 = arith.constant 0 : index
      %213 = arith.index_cast %212 : i32 to index
      %c11_204 = arith.constant 11 : index
      %c0_205 = arith.constant 0 : index
      %214 = vector.load %arg1[%c0_203, %213, %c11_204, %c0_205] : memref<1x10x104x128xbf16, #tpu.memory_space<vmem>>, vector<1x1x80x128xbf16>
      %215 = vector.shape_cast %214 : vector<1x1x80x128xbf16> to vector<80x128xbf16>
      %c0_206 = arith.constant 0 : index
      %c22_207 = arith.constant 22 : index
      %c0_208 = arith.constant 0 : index
      %c0_209 = arith.constant 0 : index
      %216 = vector.load %arg2[%c0_206, %c22_207, %c0_208, %c0_209] : memref<2x27x128x128xbf16, #tpu.memory_space<vmem>>, vector<1x1x128x128xbf16>
      %217 = vector.shape_cast %216 : vector<1x1x128x128xbf16> to vector<128x128xbf16>
      %cst_210 = arith.constant dense<0.000000e+00> : vector<80x128xf32>
      %218 = tpu.matmul %215, %217, %cst_210 {dimension_numbers = #tpu.dot_dimension_numbers<[1], [0], [0], [1], [0, 0, 1, 1], [], []>} : vector<80x128xbf16>, vector<128x128xbf16>, vector<80x128xf32> -> vector<80x128xf32>
      %219 = arith.addf %211, %218 : vector<80x128xf32>
      %c2_i32_211 = arith.constant 2 : i32
      %220 = arith.addi %34, %c2_i32_211 : i32
      %c0_212 = arith.constant 0 : index
      %221 = arith.index_cast %220 : i32 to index
      %c12_213 = arith.constant 12 : index
      %c0_214 = arith.constant 0 : index
      %222 = vector.load %arg1[%c0_212, %221, %c12_213, %c0_214] : memref<1x10x104x128xbf16, #tpu.memory_space<vmem>>, vector<1x1x80x128xbf16>
      %223 = vector.shape_cast %222 : vector<1x1x80x128xbf16> to vector<80x128xbf16>
      %c0_215 = arith.constant 0 : index
      %c23 = arith.constant 23 : index
      %c0_216 = arith.constant 0 : index
      %c0_217 = arith.constant 0 : index
      %224 = vector.load %arg2[%c0_215, %c23, %c0_216, %c0_217] : memref<2x27x128x128xbf16, #tpu.memory_space<vmem>>, vector<1x1x128x128xbf16>
      %225 = vector.shape_cast %224 : vector<1x1x128x128xbf16> to vector<128x128xbf16>
      %cst_218 = arith.constant dense<0.000000e+00> : vector<80x128xf32>
      %226 = tpu.matmul %223, %225, %cst_218 {dimension_numbers = #tpu.dot_dimension_numbers<[1], [0], [0], [1], [0, 0, 1, 1], [], []>} : vector<80x128xbf16>, vector<128x128xbf16>, vector<80x128xf32> -> vector<80x128xf32>
      %227 = arith.addf %219, %226 : vector<80x128xf32>
      %c2_i32_219 = arith.constant 2 : i32
      %228 = arith.addi %34, %c2_i32_219 : i32
      %c0_220 = arith.constant 0 : index
      %229 = arith.index_cast %228 : i32 to index
      %c20_221 = arith.constant 20 : index
      %c0_222 = arith.constant 0 : index
      %230 = vector.load %arg1[%c0_220, %229, %c20_221, %c0_222] : memref<1x10x104x128xbf16, #tpu.memory_space<vmem>>, vector<1x1x80x128xbf16>
      %231 = vector.shape_cast %230 : vector<1x1x80x128xbf16> to vector<80x128xbf16>
      %c0_223 = arith.constant 0 : index
      %c24 = arith.constant 24 : index
      %c0_224 = arith.constant 0 : index
      %c0_225 = arith.constant 0 : index
      %232 = vector.load %arg2[%c0_223, %c24, %c0_224, %c0_225] : memref<2x27x128x128xbf16, #tpu.memory_space<vmem>>, vector<1x1x128x128xbf16>
      %233 = vector.shape_cast %232 : vector<1x1x128x128xbf16> to vector<128x128xbf16>
      %cst_226 = arith.constant dense<0.000000e+00> : vector<80x128xf32>
      %234 = tpu.matmul %231, %233, %cst_226 {dimension_numbers = #tpu.dot_dimension_numbers<[1], [0], [0], [1], [0, 0, 1, 1], [], []>} : vector<80x128xbf16>, vector<128x128xbf16>, vector<80x128xf32> -> vector<80x128xf32>
      %235 = arith.addf %227, %234 : vector<80x128xf32>
      %c2_i32_227 = arith.constant 2 : i32
      %236 = arith.addi %34, %c2_i32_227 : i32
      %c0_228 = arith.constant 0 : index
      %237 = arith.index_cast %236 : i32 to index
      %c21_229 = arith.constant 21 : index
      %c0_230 = arith.constant 0 : index
      %238 = vector.load %arg1[%c0_228, %237, %c21_229, %c0_230] : memref<1x10x104x128xbf16, #tpu.memory_space<vmem>>, vector<1x1x80x128xbf16>
      %239 = vector.shape_cast %238 : vector<1x1x80x128xbf16> to vector<80x128xbf16>
      %c0_231 = arith.constant 0 : index
      %c25 = arith.constant 25 : index
      %c0_232 = arith.constant 0 : index
      %c0_233 = arith.constant 0 : index
      %240 = vector.load %arg2[%c0_231, %c25, %c0_232, %c0_233] : memref<2x27x128x128xbf16, #tpu.memory_space<vmem>>, vector<1x1x128x128xbf16>
      %241 = vector.shape_cast %240 : vector<1x1x128x128xbf16> to vector<128x128xbf16>
      %cst_234 = arith.constant dense<0.000000e+00> : vector<80x128xf32>
      %242 = tpu.matmul %239, %241, %cst_234 {dimension_numbers = #tpu.dot_dimension_numbers<[1], [0], [0], [1], [0, 0, 1, 1], [], []>} : vector<80x128xbf16>, vector<128x128xbf16>, vector<80x128xf32> -> vector<80x128xf32>
      %243 = arith.addf %235, %242 : vector<80x128xf32>
      %c2_i32_235 = arith.constant 2 : i32
      %244 = arith.addi %34, %c2_i32_235 : i32
      %c0_236 = arith.constant 0 : index
      %245 = arith.index_cast %244 : i32 to index
      %c22_237 = arith.constant 22 : index
      %c0_238 = arith.constant 0 : index
      %246 = vector.load %arg1[%c0_236, %245, %c22_237, %c0_238] : memref<1x10x104x128xbf16, #tpu.memory_space<vmem>>, vector<1x1x80x128xbf16>
      %247 = vector.shape_cast %246 : vector<1x1x80x128xbf16> to vector<80x128xbf16>
      %c0_239 = arith.constant 0 : index
      %c26 = arith.constant 26 : index
      %c0_240 = arith.constant 0 : index
      %c0_241 = arith.constant 0 : index
      %248 = vector.load %arg2[%c0_239, %c26, %c0_240, %c0_241] : memref<2x27x128x128xbf16, #tpu.memory_space<vmem>>, vector<1x1x128x128xbf16>
      %249 = vector.shape_cast %248 : vector<1x1x128x128xbf16> to vector<128x128xbf16>
      %cst_242 = arith.constant dense<0.000000e+00> : vector<80x128xf32>
      %250 = tpu.matmul %247, %249, %cst_242 {dimension_numbers = #tpu.dot_dimension_numbers<[1], [0], [0], [1], [0, 0, 1, 1], [], []>} : vector<80x128xbf16>, vector<128x128xbf16>, vector<80x128xf32> -> vector<80x128xf32>
      %251 = arith.addf %243, %250 : vector<80x128xf32>
      %c0_243 = arith.constant 0 : index
      %c0_244 = arith.constant 0 : index
      %c0_245 = arith.constant 0 : index
      %252 = vector.load %arg3[%c0_243, %c0_244, %c0_245] : memref<2x1x128xf32, #tpu.memory_space<vmem>>, vector<1x1x128xf32>
      %253 = vector.shape_cast %252 : vector<1x1x128xf32> to vector<1x128xf32>
      %254 = vector.broadcast %253 : vector<1x128xf32> to vector<80x128xf32>
      %255 = arith.addf %251, %254 : vector<80x128xf32>
      %cst_246 = arith.constant 0.000000e+00 : f32
      %256 = vector.broadcast %cst_246 : f32 to vector<80x128xf32>
      %257 = arith.maximumf %255, %256 : vector<80x128xf32>
      %cst_247 = arith.constant 0.000000e+00 : f32
      %258 = vector.shape_cast %30 : vector<80x1xi1> to vector<80x1xi1>
      %259 = vector.broadcast %258 : vector<80x1xi1> to vector<80x128xi1>
      %260 = vector.broadcast %cst_247 : f32 to vector<80x128xf32>
      %261 = arith.select %259, %257, %260 : vector<80x128xi1>, vector<80x128xf32>
      %262 = arith.truncf %261 : vector<80x128xf32> to vector<80x128xbf16>
      %c1_i32_248 = arith.constant 1 : i32
      %263 = arith.addi %34, %c1_i32_248 : i32
      %264 = arith.index_cast %263 : i32 to index
      %c11_249 = arith.constant 11 : index
      %c0_250 = arith.constant 0 : index
      %265 = vector.load %arg5[%264, %c11_249, %c0_250] : memref<10x104x128xbf16, #tpu.memory_space<vmem>>, vector<1x80x128xbf16>
      %266 = vector.shape_cast %265 : vector<1x80x128xbf16> to vector<80x128xbf16>
      %267 = vector.shape_cast %262 : vector<80x128xbf16> to vector<1x80x128xbf16>
      tpu.vector_store %arg5[%264, %c11_249, %c0_250], %267 {strides = array<i32>} : memref<10x104x128xbf16, #tpu.memory_space<vmem>>, vector<1x80x128xbf16>,
    }
    %c8_i32_17 = arith.constant 8 : i32
    %c0_i32_18 = arith.constant 0 : i32
    %c8_i32_19 = arith.constant 8 : i32
    %32 = arith.addi %c0_i32_18, %c8_i32_19 : i32
    %c1_i32_20 = arith.constant 1 : i32
    scf.for %arg6 = %c0_i32_18 to %32 step %c1_i32_20  : i32 {
      %c1_i32_22 = arith.constant 1 : i32
      %33 = arith.muli %arg6, %c1_i32_22 : i32
      %c0_i32_23 = arith.constant 0 : i32
      %34 = arith.addi %c0_i32_23, %33 : i32
      %cst_24 = arith.constant 0.000000e+00 : f32
      %35 = vector.broadcast %cst_24 : f32 to vector<80x128xf32>
      %c0_i32_25 = arith.constant 0 : i32
      %36 = arith.addi %34, %c0_i32_25 : i32
      %37 = arith.index_cast %36 : i32 to index
      %c0_26 = arith.constant 0 : index
      %c0_27 = arith.constant 0 : index
      %38 = vector.load %arg5[%37, %c0_26, %c0_27] : memref<10x104x128xbf16, #tpu.memory_space<vmem>>, vector<1x80x128xbf16>
      %39 = vector.shape_cast %38 : vector<1x80x128xbf16> to vector<80x128xbf16>
      %c1_28 = arith.constant 1 : index
      %c0_29 = arith.constant 0 : index
      %c0_30 = arith.constant 0 : index
      %c0_31 = arith.constant 0 : index
      %40 = vector.load %arg2[%c1_28, %c0_29, %c0_30, %c0_31] : memref<2x27x128x128xbf16, #tpu.memory_space<vmem>>, vector<1x1x128x128xbf16>
      %41 = vector.shape_cast %40 : vector<1x1x128x128xbf16> to vector<128x128xbf16>
      %cst_32 = arith.constant dense<0.000000e+00> : vector<80x128xf32>
      %42 = tpu.matmul %39, %41, %cst_32 {dimension_numbers = #tpu.dot_dimension_numbers<[1], [0], [0], [1], [0, 0, 1, 1], [], []>} : vector<80x128xbf16>, vector<128x128xbf16>, vector<80x128xf32> -> vector<80x128xf32>
      %43 = arith.addf %35, %42 : vector<80x128xf32>
      %c0_i32_33 = arith.constant 0 : i32
      %44 = arith.addi %34, %c0_i32_33 : i32
      %45 = arith.index_cast %44 : i32 to index
      %c1_34 = arith.constant 1 : index
      %c0_35 = arith.constant 0 : index
      %46 = vector.load %arg5[%45, %c1_34, %c0_35] : memref<10x104x128xbf16, #tpu.memory_space<vmem>>, vector<1x80x128xbf16>
      %47 = vector.shape_cast %46 : vector<1x80x128xbf16> to vector<80x128xbf16>
      %c1_36 = arith.constant 1 : index
      %c1_37 = arith.constant 1 : index
      %c0_38 = arith.constant 0 : index
      %c0_39 = arith.constant 0 : index
      %48 = vector.load %arg2[%c1_36, %c1_37, %c0_38, %c0_39] : memref<2x27x128x128xbf16, #tpu.memory_space<vmem>>, vector<1x1x128x128xbf16>
      %49 = vector.shape_cast %48 : vector<1x1x128x128xbf16> to vector<128x128xbf16>
      %cst_40 = arith.constant dense<0.000000e+00> : vector<80x128xf32>
      %50 = tpu.matmul %47, %49, %cst_40 {dimension_numbers = #tpu.dot_dimension_numbers<[1], [0], [0], [1], [0, 0, 1, 1], [], []>} : vector<80x128xbf16>, vector<128x128xbf16>, vector<80x128xf32> -> vector<80x128xf32>
      %51 = arith.addf %43, %50 : vector<80x128xf32>
      %c0_i32_41 = arith.constant 0 : i32
      %52 = arith.addi %34, %c0_i32_41 : i32
      %53 = arith.index_cast %52 : i32 to index
      %c2 = arith.constant 2 : index
      %c0_42 = arith.constant 0 : index
      %54 = vector.load %arg5[%53, %c2, %c0_42] : memref<10x104x128xbf16, #tpu.memory_space<vmem>>, vector<1x80x128xbf16>
      %55 = vector.shape_cast %54 : vector<1x80x128xbf16> to vector<80x128xbf16>
      %c1_43 = arith.constant 1 : index
      %c2_44 = arith.constant 2 : index
      %c0_45 = arith.constant 0 : index
      %c0_46 = arith.constant 0 : index
      %56 = vector.load %arg2[%c1_43, %c2_44, %c0_45, %c0_46] : memref<2x27x128x128xbf16, #tpu.memory_space<vmem>>, vector<1x1x128x128xbf16>
      %57 = vector.shape_cast %56 : vector<1x1x128x128xbf16> to vector<128x128xbf16>
      %cst_47 = arith.constant dense<0.000000e+00> : vector<80x128xf32>
      %58 = tpu.matmul %55, %57, %cst_47 {dimension_numbers = #tpu.dot_dimension_numbers<[1], [0], [0], [1], [0, 0, 1, 1], [], []>} : vector<80x128xbf16>, vector<128x128xbf16>, vector<80x128xf32> -> vector<80x128xf32>
      %59 = arith.addf %51, %58 : vector<80x128xf32>
      %c0_i32_48 = arith.constant 0 : i32
      %60 = arith.addi %34, %c0_i32_48 : i32
      %61 = arith.index_cast %60 : i32 to index
      %c10 = arith.constant 10 : index
      %c0_49 = arith.constant 0 : index
      %62 = vector.load %arg5[%61, %c10, %c0_49] : memref<10x104x128xbf16, #tpu.memory_space<vmem>>, vector<1x80x128xbf16>
      %63 = vector.shape_cast %62 : vector<1x80x128xbf16> to vector<80x128xbf16>
      %c1_50 = arith.constant 1 : index
      %c3 = arith.constant 3 : index
      %c0_51 = arith.constant 0 : index
      %c0_52 = arith.constant 0 : index
      %64 = vector.load %arg2[%c1_50, %c3, %c0_51, %c0_52] : memref<2x27x128x128xbf16, #tpu.memory_space<vmem>>, vector<1x1x128x128xbf16>
      %65 = vector.shape_cast %64 : vector<1x1x128x128xbf16> to vector<128x128xbf16>
      %cst_53 = arith.constant dense<0.000000e+00> : vector<80x128xf32>
      %66 = tpu.matmul %63, %65, %cst_53 {dimension_numbers = #tpu.dot_dimension_numbers<[1], [0], [0], [1], [0, 0, 1, 1], [], []>} : vector<80x128xbf16>, vector<128x128xbf16>, vector<80x128xf32> -> vector<80x128xf32>
      %67 = arith.addf %59, %66 : vector<80x128xf32>
      %c0_i32_54 = arith.constant 0 : i32
      %68 = arith.addi %34, %c0_i32_54 : i32
      %69 = arith.index_cast %68 : i32 to index
      %c11 = arith.constant 11 : index
      %c0_55 = arith.constant 0 : index
      %70 = vector.load %arg5[%69, %c11, %c0_55] : memref<10x104x128xbf16, #tpu.memory_space<vmem>>, vector<1x80x128xbf16>
      %71 = vector.shape_cast %70 : vector<1x80x128xbf16> to vector<80x128xbf16>
      %c1_56 = arith.constant 1 : index
      %c4 = arith.constant 4 : index
      %c0_57 = arith.constant 0 : index
      %c0_58 = arith.constant 0 : index
      %72 = vector.load %arg2[%c1_56, %c4, %c0_57, %c0_58] : memref<2x27x128x128xbf16, #tpu.memory_space<vmem>>, vector<1x1x128x128xbf16>
      %73 = vector.shape_cast %72 : vector<1x1x128x128xbf16> to vector<128x128xbf16>
      %cst_59 = arith.constant dense<0.000000e+00> : vector<80x128xf32>
      %74 = tpu.matmul %71, %73, %cst_59 {dimension_numbers = #tpu.dot_dimension_numbers<[1], [0], [0], [1], [0, 0, 1, 1], [], []>} : vector<80x128xbf16>, vector<128x128xbf16>, vector<80x128xf32> -> vector<80x128xf32>
      %75 = arith.addf %67, %74 : vector<80x128xf32>
      %c0_i32_60 = arith.constant 0 : i32
      %76 = arith.addi %34, %c0_i32_60 : i32
      %77 = arith.index_cast %76 : i32 to index
      %c12 = arith.constant 12 : index
      %c0_61 = arith.constant 0 : index
      %78 = vector.load %arg5[%77, %c12, %c0_61] : memref<10x104x128xbf16, #tpu.memory_space<vmem>>, vector<1x80x128xbf16>
      %79 = vector.shape_cast %78 : vector<1x80x128xbf16> to vector<80x128xbf16>
      %c1_62 = arith.constant 1 : index
      %c5 = arith.constant 5 : index
      %c0_63 = arith.constant 0 : index
      %c0_64 = arith.constant 0 : index
      %80 = vector.load %arg2[%c1_62, %c5, %c0_63, %c0_64] : memref<2x27x128x128xbf16, #tpu.memory_space<vmem>>, vector<1x1x128x128xbf16>
      %81 = vector.shape_cast %80 : vector<1x1x128x128xbf16> to vector<128x128xbf16>
      %cst_65 = arith.constant dense<0.000000e+00> : vector<80x128xf32>
      %82 = tpu.matmul %79, %81, %cst_65 {dimension_numbers = #tpu.dot_dimension_numbers<[1], [0], [0], [1], [0, 0, 1, 1], [], []>} : vector<80x128xbf16>, vector<128x128xbf16>, vector<80x128xf32> -> vector<80x128xf32>
      %83 = arith.addf %75, %82 : vector<80x128xf32>
      %c0_i32_66 = arith.constant 0 : i32
      %84 = arith.addi %34, %c0_i32_66 : i32
      %85 = arith.index_cast %84 : i32 to index
      %c20 = arith.constant 20 : index
      %c0_67 = arith.constant 0 : index
      %86 = vector.load %arg5[%85, %c20, %c0_67] : memref<10x104x128xbf16, #tpu.memory_space<vmem>>, vector<1x80x128xbf16>
      %87 = vector.shape_cast %86 : vector<1x80x128xbf16> to vector<80x128xbf16>
      %c1_68 = arith.constant 1 : index
      %c6 = arith.constant 6 : index
      %c0_69 = arith.constant 0 : index
      %c0_70 = arith.constant 0 : index
      %88 = vector.load %arg2[%c1_68, %c6, %c0_69, %c0_70] : memref<2x27x128x128xbf16, #tpu.memory_space<vmem>>, vector<1x1x128x128xbf16>
      %89 = vector.shape_cast %88 : vector<1x1x128x128xbf16> to vector<128x128xbf16>
      %cst_71 = arith.constant dense<0.000000e+00> : vector<80x128xf32>
      %90 = tpu.matmul %87, %89, %cst_71 {dimension_numbers = #tpu.dot_dimension_numbers<[1], [0], [0], [1], [0, 0, 1, 1], [], []>} : vector<80x128xbf16>, vector<128x128xbf16>, vector<80x128xf32> -> vector<80x128xf32>
      %91 = arith.addf %83, %90 : vector<80x128xf32>
      %c0_i32_72 = arith.constant 0 : i32
      %92 = arith.addi %34, %c0_i32_72 : i32
      %93 = arith.index_cast %92 : i32 to index
      %c21 = arith.constant 21 : index
      %c0_73 = arith.constant 0 : index
      %94 = vector.load %arg5[%93, %c21, %c0_73] : memref<10x104x128xbf16, #tpu.memory_space<vmem>>, vector<1x80x128xbf16>
      %95 = vector.shape_cast %94 : vector<1x80x128xbf16> to vector<80x128xbf16>
      %c1_74 = arith.constant 1 : index
      %c7 = arith.constant 7 : index
      %c0_75 = arith.constant 0 : index
      %c0_76 = arith.constant 0 : index
      %96 = vector.load %arg2[%c1_74, %c7, %c0_75, %c0_76] : memref<2x27x128x128xbf16, #tpu.memory_space<vmem>>, vector<1x1x128x128xbf16>
      %97 = vector.shape_cast %96 : vector<1x1x128x128xbf16> to vector<128x128xbf16>
      %cst_77 = arith.constant dense<0.000000e+00> : vector<80x128xf32>
      %98 = tpu.matmul %95, %97, %cst_77 {dimension_numbers = #tpu.dot_dimension_numbers<[1], [0], [0], [1], [0, 0, 1, 1], [], []>} : vector<80x128xbf16>, vector<128x128xbf16>, vector<80x128xf32> -> vector<80x128xf32>
      %99 = arith.addf %91, %98 : vector<80x128xf32>
      %c0_i32_78 = arith.constant 0 : i32
      %100 = arith.addi %34, %c0_i32_78 : i32
      %101 = arith.index_cast %100 : i32 to index
      %c22 = arith.constant 22 : index
      %c0_79 = arith.constant 0 : index
      %102 = vector.load %arg5[%101, %c22, %c0_79] : memref<10x104x128xbf16, #tpu.memory_space<vmem>>, vector<1x80x128xbf16>
      %103 = vector.shape_cast %102 : vector<1x80x128xbf16> to vector<80x128xbf16>
      %c1_80 = arith.constant 1 : index
      %c8 = arith.constant 8 : index
      %c0_81 = arith.constant 0 : index
      %c0_82 = arith.constant 0 : index
      %104 = vector.load %arg2[%c1_80, %c8, %c0_81, %c0_82] : memref<2x27x128x128xbf16, #tpu.memory_space<vmem>>, vector<1x1x128x128xbf16>
      %105 = vector.shape_cast %104 : vector<1x1x128x128xbf16> to vector<128x128xbf16>
      %cst_83 = arith.constant dense<0.000000e+00> : vector<80x128xf32>
      %106 = tpu.matmul %103, %105, %cst_83 {dimension_numbers = #tpu.dot_dimension_numbers<[1], [0], [0], [1], [0, 0, 1, 1], [], []>} : vector<80x128xbf16>, vector<128x128xbf16>, vector<80x128xf32> -> vector<80x128xf32>
      %107 = arith.addf %99, %106 : vector<80x128xf32>
      %c1_i32_84 = arith.constant 1 : i32
      %108 = arith.addi %34, %c1_i32_84 : i32
      %109 = arith.index_cast %108 : i32 to index
      %c0_85 = arith.constant 0 : index
      %c0_86 = arith.constant 0 : index
      %110 = vector.load %arg5[%109, %c0_85, %c0_86] : memref<10x104x128xbf16, #tpu.memory_space<vmem>>, vector<1x80x128xbf16>
      %111 = vector.shape_cast %110 : vector<1x80x128xbf16> to vector<80x128xbf16>
      %c1_87 = arith.constant 1 : index
      %c9_88 = arith.constant 9 : index
      %c0_89 = arith.constant 0 : index
      %c0_90 = arith.constant 0 : index
      %112 = vector.load %arg2[%c1_87, %c9_88, %c0_89, %c0_90] : memref<2x27x128x128xbf16, #tpu.memory_space<vmem>>, vector<1x1x128x128xbf16>
      %113 = vector.shape_cast %112 : vector<1x1x128x128xbf16> to vector<128x128xbf16>
      %cst_91 = arith.constant dense<0.000000e+00> : vector<80x128xf32>
      %114 = tpu.matmul %111, %113, %cst_91 {dimension_numbers = #tpu.dot_dimension_numbers<[1], [0], [0], [1], [0, 0, 1, 1], [], []>} : vector<80x128xbf16>, vector<128x128xbf16>, vector<80x128xf32> -> vector<80x128xf32>
      %115 = arith.addf %107, %114 : vector<80x128xf32>
      %c1_i32_92 = arith.constant 1 : i32
      %116 = arith.addi %34, %c1_i32_92 : i32
      %117 = arith.index_cast %116 : i32 to index
      %c1_93 = arith.constant 1 : index
      %c0_94 = arith.constant 0 : index
      %118 = vector.load %arg5[%117, %c1_93, %c0_94] : memref<10x104x128xbf16, #tpu.memory_space<vmem>>, vector<1x80x128xbf16>
      %119 = vector.shape_cast %118 : vector<1x80x128xbf16> to vector<80x128xbf16>
      %c1_95 = arith.constant 1 : index
      %c10_96 = arith.constant 10 : index
      %c0_97 = arith.constant 0 : index
      %c0_98 = arith.constant 0 : index
      %120 = vector.load %arg2[%c1_95, %c10_96, %c0_97, %c0_98] : memref<2x27x128x128xbf16, #tpu.memory_space<vmem>>, vector<1x1x128x128xbf16>
      %121 = vector.shape_cast %120 : vector<1x1x128x128xbf16> to vector<128x128xbf16>
      %cst_99 = arith.constant dense<0.000000e+00> : vector<80x128xf32>
      %122 = tpu.matmul %119, %121, %cst_99 {dimension_numbers = #tpu.dot_dimension_numbers<[1], [0], [0], [1], [0, 0, 1, 1], [], []>} : vector<80x128xbf16>, vector<128x128xbf16>, vector<80x128xf32> -> vector<80x128xf32>
      %123 = arith.addf %115, %122 : vector<80x128xf32>
      %c1_i32_100 = arith.constant 1 : i32
      %124 = arith.addi %34, %c1_i32_100 : i32
      %125 = arith.index_cast %124 : i32 to index
      %c2_101 = arith.constant 2 : index
      %c0_102 = arith.constant 0 : index
      %126 = vector.load %arg5[%125, %c2_101, %c0_102] : memref<10x104x128xbf16, #tpu.memory_space<vmem>>, vector<1x80x128xbf16>
      %127 = vector.shape_cast %126 : vector<1x80x128xbf16> to vector<80x128xbf16>
      %c1_103 = arith.constant 1 : index
      %c11_104 = arith.constant 11 : index
      %c0_105 = arith.constant 0 : index
      %c0_106 = arith.constant 0 : index
      %128 = vector.load %arg2[%c1_103, %c11_104, %c0_105, %c0_106] : memref<2x27x128x128xbf16, #tpu.memory_space<vmem>>, vector<1x1x128x128xbf16>
      %129 = vector.shape_cast %128 : vector<1x1x128x128xbf16> to vector<128x128xbf16>
      %cst_107 = arith.constant dense<0.000000e+00> : vector<80x128xf32>
      %130 = tpu.matmul %127, %129, %cst_107 {dimension_numbers = #tpu.dot_dimension_numbers<[1], [0], [0], [1], [0, 0, 1, 1], [], []>} : vector<80x128xbf16>, vector<128x128xbf16>, vector<80x128xf32> -> vector<80x128xf32>
      %131 = arith.addf %123, %130 : vector<80x128xf32>
      %c1_i32_108 = arith.constant 1 : i32
      %132 = arith.addi %34, %c1_i32_108 : i32
      %133 = arith.index_cast %132 : i32 to index
      %c10_109 = arith.constant 10 : index
      %c0_110 = arith.constant 0 : index
      %134 = vector.load %arg5[%133, %c10_109, %c0_110] : memref<10x104x128xbf16, #tpu.memory_space<vmem>>, vector<1x80x128xbf16>
      %135 = vector.shape_cast %134 : vector<1x80x128xbf16> to vector<80x128xbf16>
      %c1_111 = arith.constant 1 : index
      %c12_112 = arith.constant 12 : index
      %c0_113 = arith.constant 0 : index
      %c0_114 = arith.constant 0 : index
      %136 = vector.load %arg2[%c1_111, %c12_112, %c0_113, %c0_114] : memref<2x27x128x128xbf16, #tpu.memory_space<vmem>>, vector<1x1x128x128xbf16>
      %137 = vector.shape_cast %136 : vector<1x1x128x128xbf16> to vector<128x128xbf16>
      %cst_115 = arith.constant dense<0.000000e+00> : vector<80x128xf32>
      %138 = tpu.matmul %135, %137, %cst_115 {dimension_numbers = #tpu.dot_dimension_numbers<[1], [0], [0], [1], [0, 0, 1, 1], [], []>} : vector<80x128xbf16>, vector<128x128xbf16>, vector<80x128xf32> -> vector<80x128xf32>
      %139 = arith.addf %131, %138 : vector<80x128xf32>
      %c1_i32_116 = arith.constant 1 : i32
      %140 = arith.addi %34, %c1_i32_116 : i32
      %141 = arith.index_cast %140 : i32 to index
      %c11_117 = arith.constant 11 : index
      %c0_118 = arith.constant 0 : index
      %142 = vector.load %arg5[%141, %c11_117, %c0_118] : memref<10x104x128xbf16, #tpu.memory_space<vmem>>, vector<1x80x128xbf16>
      %143 = vector.shape_cast %142 : vector<1x80x128xbf16> to vector<80x128xbf16>
      %c1_119 = arith.constant 1 : index
      %c13 = arith.constant 13 : index
      %c0_120 = arith.constant 0 : index
      %c0_121 = arith.constant 0 : index
      %144 = vector.load %arg2[%c1_119, %c13, %c0_120, %c0_121] : memref<2x27x128x128xbf16, #tpu.memory_space<vmem>>, vector<1x1x128x128xbf16>
      %145 = vector.shape_cast %144 : vector<1x1x128x128xbf16> to vector<128x128xbf16>
      %cst_122 = arith.constant dense<0.000000e+00> : vector<80x128xf32>
      %146 = tpu.matmul %143, %145, %cst_122 {dimension_numbers = #tpu.dot_dimension_numbers<[1], [0], [0], [1], [0, 0, 1, 1], [], []>} : vector<80x128xbf16>, vector<128x128xbf16>, vector<80x128xf32> -> vector<80x128xf32>
      %147 = arith.addf %139, %146 : vector<80x128xf32>
      %c1_i32_123 = arith.constant 1 : i32
      %148 = arith.addi %34, %c1_i32_123 : i32
      %149 = arith.index_cast %148 : i32 to index
      %c12_124 = arith.constant 12 : index
      %c0_125 = arith.constant 0 : index
      %150 = vector.load %arg5[%149, %c12_124, %c0_125] : memref<10x104x128xbf16, #tpu.memory_space<vmem>>, vector<1x80x128xbf16>
      %151 = vector.shape_cast %150 : vector<1x80x128xbf16> to vector<80x128xbf16>
      %c1_126 = arith.constant 1 : index
      %c14 = arith.constant 14 : index
      %c0_127 = arith.constant 0 : index
      %c0_128 = arith.constant 0 : index
      %152 = vector.load %arg2[%c1_126, %c14, %c0_127, %c0_128] : memref<2x27x128x128xbf16, #tpu.memory_space<vmem>>, vector<1x1x128x128xbf16>
      %153 = vector.shape_cast %152 : vector<1x1x128x128xbf16> to vector<128x128xbf16>
      %cst_129 = arith.constant dense<0.000000e+00> : vector<80x128xf32>
      %154 = tpu.matmul %151, %153, %cst_129 {dimension_numbers = #tpu.dot_dimension_numbers<[1], [0], [0], [1], [0, 0, 1, 1], [], []>} : vector<80x128xbf16>, vector<128x128xbf16>, vector<80x128xf32> -> vector<80x128xf32>
      %155 = arith.addf %147, %154 : vector<80x128xf32>
      %c1_i32_130 = arith.constant 1 : i32
      %156 = arith.addi %34, %c1_i32_130 : i32
      %157 = arith.index_cast %156 : i32 to index
      %c20_131 = arith.constant 20 : index
      %c0_132 = arith.constant 0 : index
      %158 = vector.load %arg5[%157, %c20_131, %c0_132] : memref<10x104x128xbf16, #tpu.memory_space<vmem>>, vector<1x80x128xbf16>
      %159 = vector.shape_cast %158 : vector<1x80x128xbf16> to vector<80x128xbf16>
      %c1_133 = arith.constant 1 : index
      %c15 = arith.constant 15 : index
      %c0_134 = arith.constant 0 : index
      %c0_135 = arith.constant 0 : index
      %160 = vector.load %arg2[%c1_133, %c15, %c0_134, %c0_135] : memref<2x27x128x128xbf16, #tpu.memory_space<vmem>>, vector<1x1x128x128xbf16>
      %161 = vector.shape_cast %160 : vector<1x1x128x128xbf16> to vector<128x128xbf16>
      %cst_136 = arith.constant dense<0.000000e+00> : vector<80x128xf32>
      %162 = tpu.matmul %159, %161, %cst_136 {dimension_numbers = #tpu.dot_dimension_numbers<[1], [0], [0], [1], [0, 0, 1, 1], [], []>} : vector<80x128xbf16>, vector<128x128xbf16>, vector<80x128xf32> -> vector<80x128xf32>
      %163 = arith.addf %155, %162 : vector<80x128xf32>
      %c1_i32_137 = arith.constant 1 : i32
      %164 = arith.addi %34, %c1_i32_137 : i32
      %165 = arith.index_cast %164 : i32 to index
      %c21_138 = arith.constant 21 : index
      %c0_139 = arith.constant 0 : index
      %166 = vector.load %arg5[%165, %c21_138, %c0_139] : memref<10x104x128xbf16, #tpu.memory_space<vmem>>, vector<1x80x128xbf16>
      %167 = vector.shape_cast %166 : vector<1x80x128xbf16> to vector<80x128xbf16>
      %c1_140 = arith.constant 1 : index
      %c16 = arith.constant 16 : index
      %c0_141 = arith.constant 0 : index
      %c0_142 = arith.constant 0 : index
      %168 = vector.load %arg2[%c1_140, %c16, %c0_141, %c0_142] : memref<2x27x128x128xbf16, #tpu.memory_space<vmem>>, vector<1x1x128x128xbf16>
      %169 = vector.shape_cast %168 : vector<1x1x128x128xbf16> to vector<128x128xbf16>
      %cst_143 = arith.constant dense<0.000000e+00> : vector<80x128xf32>
      %170 = tpu.matmul %167, %169, %cst_143 {dimension_numbers = #tpu.dot_dimension_numbers<[1], [0], [0], [1], [0, 0, 1, 1], [], []>} : vector<80x128xbf16>, vector<128x128xbf16>, vector<80x128xf32> -> vector<80x128xf32>
      %171 = arith.addf %163, %170 : vector<80x128xf32>
      %c1_i32_144 = arith.constant 1 : i32
      %172 = arith.addi %34, %c1_i32_144 : i32
      %173 = arith.index_cast %172 : i32 to index
      %c22_145 = arith.constant 22 : index
      %c0_146 = arith.constant 0 : index
      %174 = vector.load %arg5[%173, %c22_145, %c0_146] : memref<10x104x128xbf16, #tpu.memory_space<vmem>>, vector<1x80x128xbf16>
      %175 = vector.shape_cast %174 : vector<1x80x128xbf16> to vector<80x128xbf16>
      %c1_147 = arith.constant 1 : index
      %c17 = arith.constant 17 : index
      %c0_148 = arith.constant 0 : index
      %c0_149 = arith.constant 0 : index
      %176 = vector.load %arg2[%c1_147, %c17, %c0_148, %c0_149] : memref<2x27x128x128xbf16, #tpu.memory_space<vmem>>, vector<1x1x128x128xbf16>
      %177 = vector.shape_cast %176 : vector<1x1x128x128xbf16> to vector<128x128xbf16>
      %cst_150 = arith.constant dense<0.000000e+00> : vector<80x128xf32>
      %178 = tpu.matmul %175, %177, %cst_150 {dimension_numbers = #tpu.dot_dimension_numbers<[1], [0], [0], [1], [0, 0, 1, 1], [], []>} : vector<80x128xbf16>, vector<128x128xbf16>, vector<80x128xf32> -> vector<80x128xf32>
      %179 = arith.addf %171, %178 : vector<80x128xf32>
      %c2_i32 = arith.constant 2 : i32
      %180 = arith.addi %34, %c2_i32 : i32
      %181 = arith.index_cast %180 : i32 to index
      %c0_151 = arith.constant 0 : index
      %c0_152 = arith.constant 0 : index
      %182 = vector.load %arg5[%181, %c0_151, %c0_152] : memref<10x104x128xbf16, #tpu.memory_space<vmem>>, vector<1x80x128xbf16>
      %183 = vector.shape_cast %182 : vector<1x80x128xbf16> to vector<80x128xbf16>
      %c1_153 = arith.constant 1 : index
      %c18 = arith.constant 18 : index
      %c0_154 = arith.constant 0 : index
      %c0_155 = arith.constant 0 : index
      %184 = vector.load %arg2[%c1_153, %c18, %c0_154, %c0_155] : memref<2x27x128x128xbf16, #tpu.memory_space<vmem>>, vector<1x1x128x128xbf16>
      %185 = vector.shape_cast %184 : vector<1x1x128x128xbf16> to vector<128x128xbf16>
      %cst_156 = arith.constant dense<0.000000e+00> : vector<80x128xf32>
      %186 = tpu.matmul %183, %185, %cst_156 {dimension_numbers = #tpu.dot_dimension_numbers<[1], [0], [0], [1], [0, 0, 1, 1], [], []>} : vector<80x128xbf16>, vector<128x128xbf16>, vector<80x128xf32> -> vector<80x128xf32>
      %187 = arith.addf %179, %186 : vector<80x128xf32>
      %c2_i32_157 = arith.constant 2 : i32
      %188 = arith.addi %34, %c2_i32_157 : i32
      %189 = arith.index_cast %188 : i32 to index
      %c1_158 = arith.constant 1 : index
      %c0_159 = arith.constant 0 : index
      %190 = vector.load %arg5[%189, %c1_158, %c0_159] : memref<10x104x128xbf16, #tpu.memory_space<vmem>>, vector<1x80x128xbf16>
      %191 = vector.shape_cast %190 : vector<1x80x128xbf16> to vector<80x128xbf16>
      %c1_160 = arith.constant 1 : index
      %c19 = arith.constant 19 : index
      %c0_161 = arith.constant 0 : index
      %c0_162 = arith.constant 0 : index
      %192 = vector.load %arg2[%c1_160, %c19, %c0_161, %c0_162] : memref<2x27x128x128xbf16, #tpu.memory_space<vmem>>, vector<1x1x128x128xbf16>
      %193 = vector.shape_cast %192 : vector<1x1x128x128xbf16> to vector<128x128xbf16>
      %cst_163 = arith.constant dense<0.000000e+00> : vector<80x128xf32>
      %194 = tpu.matmul %191, %193, %cst_163 {dimension_numbers = #tpu.dot_dimension_numbers<[1], [0], [0], [1], [0, 0, 1, 1], [], []>} : vector<80x128xbf16>, vector<128x128xbf16>, vector<80x128xf32> -> vector<80x128xf32>
      %195 = arith.addf %187, %194 : vector<80x128xf32>
      %c2_i32_164 = arith.constant 2 : i32
      %196 = arith.addi %34, %c2_i32_164 : i32
      %197 = arith.index_cast %196 : i32 to index
      %c2_165 = arith.constant 2 : index
      %c0_166 = arith.constant 0 : index
      %198 = vector.load %arg5[%197, %c2_165, %c0_166] : memref<10x104x128xbf16, #tpu.memory_space<vmem>>, vector<1x80x128xbf16>
      %199 = vector.shape_cast %198 : vector<1x80x128xbf16> to vector<80x128xbf16>
      %c1_167 = arith.constant 1 : index
      %c20_168 = arith.constant 20 : index
      %c0_169 = arith.constant 0 : index
      %c0_170 = arith.constant 0 : index
      %200 = vector.load %arg2[%c1_167, %c20_168, %c0_169, %c0_170] : memref<2x27x128x128xbf16, #tpu.memory_space<vmem>>, vector<1x1x128x128xbf16>
      %201 = vector.shape_cast %200 : vector<1x1x128x128xbf16> to vector<128x128xbf16>
      %cst_171 = arith.constant dense<0.000000e+00> : vector<80x128xf32>
      %202 = tpu.matmul %199, %201, %cst_171 {dimension_numbers = #tpu.dot_dimension_numbers<[1], [0], [0], [1], [0, 0, 1, 1], [], []>} : vector<80x128xbf16>, vector<128x128xbf16>, vector<80x128xf32> -> vector<80x128xf32>
      %203 = arith.addf %195, %202 : vector<80x128xf32>
      %c2_i32_172 = arith.constant 2 : i32
      %204 = arith.addi %34, %c2_i32_172 : i32
      %205 = arith.index_cast %204 : i32 to index
      %c10_173 = arith.constant 10 : index
      %c0_174 = arith.constant 0 : index
      %206 = vector.load %arg5[%205, %c10_173, %c0_174] : memref<10x104x128xbf16, #tpu.memory_space<vmem>>, vector<1x80x128xbf16>
      %207 = vector.shape_cast %206 : vector<1x80x128xbf16> to vector<80x128xbf16>
      %c1_175 = arith.constant 1 : index
      %c21_176 = arith.constant 21 : index
      %c0_177 = arith.constant 0 : index
      %c0_178 = arith.constant 0 : index
      %208 = vector.load %arg2[%c1_175, %c21_176, %c0_177, %c0_178] : memref<2x27x128x128xbf16, #tpu.memory_space<vmem>>, vector<1x1x128x128xbf16>
      %209 = vector.shape_cast %208 : vector<1x1x128x128xbf16> to vector<128x128xbf16>
      %cst_179 = arith.constant dense<0.000000e+00> : vector<80x128xf32>
      %210 = tpu.matmul %207, %209, %cst_179 {dimension_numbers = #tpu.dot_dimension_numbers<[1], [0], [0], [1], [0, 0, 1, 1], [], []>} : vector<80x128xbf16>, vector<128x128xbf16>, vector<80x128xf32> -> vector<80x128xf32>
      %211 = arith.addf %203, %210 : vector<80x128xf32>
      %c2_i32_180 = arith.constant 2 : i32
      %212 = arith.addi %34, %c2_i32_180 : i32
      %213 = arith.index_cast %212 : i32 to index
      %c11_181 = arith.constant 11 : index
      %c0_182 = arith.constant 0 : index
      %214 = vector.load %arg5[%213, %c11_181, %c0_182] : memref<10x104x128xbf16, #tpu.memory_space<vmem>>, vector<1x80x128xbf16>
      %215 = vector.shape_cast %214 : vector<1x80x128xbf16> to vector<80x128xbf16>
      %c1_183 = arith.constant 1 : index
      %c22_184 = arith.constant 22 : index
      %c0_185 = arith.constant 0 : index
      %c0_186 = arith.constant 0 : index
      %216 = vector.load %arg2[%c1_183, %c22_184, %c0_185, %c0_186] : memref<2x27x128x128xbf16, #tpu.memory_space<vmem>>, vector<1x1x128x128xbf16>
      %217 = vector.shape_cast %216 : vector<1x1x128x128xbf16> to vector<128x128xbf16>
      %cst_187 = arith.constant dense<0.000000e+00> : vector<80x128xf32>
      %218 = tpu.matmul %215, %217, %cst_187 {dimension_numbers = #tpu.dot_dimension_numbers<[1], [0], [0], [1], [0, 0, 1, 1], [], []>} : vector<80x128xbf16>, vector<128x128xbf16>, vector<80x128xf32> -> vector<80x128xf32>
      %219 = arith.addf %211, %218 : vector<80x128xf32>
      %c2_i32_188 = arith.constant 2 : i32
      %220 = arith.addi %34, %c2_i32_188 : i32
      %221 = arith.index_cast %220 : i32 to index
      %c12_189 = arith.constant 12 : index
      %c0_190 = arith.constant 0 : index
      %222 = vector.load %arg5[%221, %c12_189, %c0_190] : memref<10x104x128xbf16, #tpu.memory_space<vmem>>, vector<1x80x128xbf16>
      %223 = vector.shape_cast %222 : vector<1x80x128xbf16> to vector<80x128xbf16>
      %c1_191 = arith.constant 1 : index
      %c23 = arith.constant 23 : index
      %c0_192 = arith.constant 0 : index
      %c0_193 = arith.constant 0 : index
      %224 = vector.load %arg2[%c1_191, %c23, %c0_192, %c0_193] : memref<2x27x128x128xbf16, #tpu.memory_space<vmem>>, vector<1x1x128x128xbf16>
      %225 = vector.shape_cast %224 : vector<1x1x128x128xbf16> to vector<128x128xbf16>
      %cst_194 = arith.constant dense<0.000000e+00> : vector<80x128xf32>
      %226 = tpu.matmul %223, %225, %cst_194 {dimension_numbers = #tpu.dot_dimension_numbers<[1], [0], [0], [1], [0, 0, 1, 1], [], []>} : vector<80x128xbf16>, vector<128x128xbf16>, vector<80x128xf32> -> vector<80x128xf32>
      %227 = arith.addf %219, %226 : vector<80x128xf32>
      %c2_i32_195 = arith.constant 2 : i32
      %228 = arith.addi %34, %c2_i32_195 : i32
      %229 = arith.index_cast %228 : i32 to index
      %c20_196 = arith.constant 20 : index
      %c0_197 = arith.constant 0 : index
      %230 = vector.load %arg5[%229, %c20_196, %c0_197] : memref<10x104x128xbf16, #tpu.memory_space<vmem>>, vector<1x80x128xbf16>
      %231 = vector.shape_cast %230 : vector<1x80x128xbf16> to vector<80x128xbf16>
      %c1_198 = arith.constant 1 : index
      %c24 = arith.constant 24 : index
      %c0_199 = arith.constant 0 : index
      %c0_200 = arith.constant 0 : index
      %232 = vector.load %arg2[%c1_198, %c24, %c0_199, %c0_200] : memref<2x27x128x128xbf16, #tpu.memory_space<vmem>>, vector<1x1x128x128xbf16>
      %233 = vector.shape_cast %232 : vector<1x1x128x128xbf16> to vector<128x128xbf16>
      %cst_201 = arith.constant dense<0.000000e+00> : vector<80x128xf32>
      %234 = tpu.matmul %231, %233, %cst_201 {dimension_numbers = #tpu.dot_dimension_numbers<[1], [0], [0], [1], [0, 0, 1, 1], [], []>} : vector<80x128xbf16>, vector<128x128xbf16>, vector<80x128xf32> -> vector<80x128xf32>
      %235 = arith.addf %227, %234 : vector<80x128xf32>
      %c2_i32_202 = arith.constant 2 : i32
      %236 = arith.addi %34, %c2_i32_202 : i32
      %237 = arith.index_cast %236 : i32 to index
      %c21_203 = arith.constant 21 : index
      %c0_204 = arith.constant 0 : index
      %238 = vector.load %arg5[%237, %c21_203, %c0_204] : memref<10x104x128xbf16, #tpu.memory_space<vmem>>, vector<1x80x128xbf16>
      %239 = vector.shape_cast %238 : vector<1x80x128xbf16> to vector<80x128xbf16>
      %c1_205 = arith.constant 1 : index
      %c25 = arith.constant 25 : index
      %c0_206 = arith.constant 0 : index
      %c0_207 = arith.constant 0 : index
      %240 = vector.load %arg2[%c1_205, %c25, %c0_206, %c0_207] : memref<2x27x128x128xbf16, #tpu.memory_space<vmem>>, vector<1x1x128x128xbf16>
      %241 = vector.shape_cast %240 : vector<1x1x128x128xbf16> to vector<128x128xbf16>
      %cst_208 = arith.constant dense<0.000000e+00> : vector<80x128xf32>
      %242 = tpu.matmul %239, %241, %cst_208 {dimension_numbers = #tpu.dot_dimension_numbers<[1], [0], [0], [1], [0, 0, 1, 1], [], []>} : vector<80x128xbf16>, vector<128x128xbf16>, vector<80x128xf32> -> vector<80x128xf32>
      %243 = arith.addf %235, %242 : vector<80x128xf32>
      %c2_i32_209 = arith.constant 2 : i32
      %244 = arith.addi %34, %c2_i32_209 : i32
      %245 = arith.index_cast %244 : i32 to index
      %c22_210 = arith.constant 22 : index
      %c0_211 = arith.constant 0 : index
      %246 = vector.load %arg5[%245, %c22_210, %c0_211] : memref<10x104x128xbf16, #tpu.memory_space<vmem>>, vector<1x80x128xbf16>
      %247 = vector.shape_cast %246 : vector<1x80x128xbf16> to vector<80x128xbf16>
      %c1_212 = arith.constant 1 : index
      %c26 = arith.constant 26 : index
      %c0_213 = arith.constant 0 : index
      %c0_214 = arith.constant 0 : index
      %248 = vector.load %arg2[%c1_212, %c26, %c0_213, %c0_214] : memref<2x27x128x128xbf16, #tpu.memory_space<vmem>>, vector<1x1x128x128xbf16>
      %249 = vector.shape_cast %248 : vector<1x1x128x128xbf16> to vector<128x128xbf16>
      %cst_215 = arith.constant dense<0.000000e+00> : vector<80x128xf32>
      %250 = tpu.matmul %247, %249, %cst_215 {dimension_numbers = #tpu.dot_dimension_numbers<[1], [0], [0], [1], [0, 0, 1, 1], [], []>} : vector<80x128xbf16>, vector<128x128xbf16>, vector<80x128xf32> -> vector<80x128xf32>
      %251 = arith.addf %243, %250 : vector<80x128xf32>
      %c1_216 = arith.constant 1 : index
      %c0_217 = arith.constant 0 : index
      %c0_218 = arith.constant 0 : index
      %252 = vector.load %arg3[%c1_216, %c0_217, %c0_218] : memref<2x1x128xf32, #tpu.memory_space<vmem>>, vector<1x1x128xf32>
      %253 = vector.shape_cast %252 : vector<1x1x128xf32> to vector<1x128xf32>
      %254 = vector.broadcast %253 : vector<1x128xf32> to vector<80x128xf32>
      %255 = arith.addf %251, %254 : vector<80x128xf32>
      %cst_219 = arith.constant 0.000000e+00 : f32
      %256 = vector.broadcast %cst_219 : f32 to vector<80x128xf32>
      %257 = arith.maximumf %255, %256 : vector<80x128xf32>
      %c0_220 = arith.constant 0 : index
      %258 = arith.index_cast %34 : i32 to index
      %c0_221 = arith.constant 0 : index
      %c0_222 = arith.constant 0 : index
      %259 = vector.load %arg4[%c0_220, %258, %c0_221, %c0_222] : memref<1x8x80x128xf32, #tpu.memory_space<vmem>>, vector<1x1x80x128xf32>
      %260 = vector.shape_cast %259 : vector<1x1x80x128xf32> to vector<80x128xf32>
      %261 = vector.shape_cast %257 : vector<80x128xf32> to vector<1x1x80x128xf32>
      tpu.vector_store %arg4[%c0_220, %258, %c0_221, %c0_222], %261 {strides = array<i32>} : memref<1x8x80x128xf32, #tpu.memory_space<vmem>>, vector<1x1x80x128xf32>,
    }
    %c8_i32_21 = arith.constant 8 : i32
    return
  }
  func.func @transform_0(%arg0: i32) -> (i32, i32, i32, i32) {
    %c0_i32 = arith.constant 0 : i32
    %c0_i32_0 = arith.constant 0 : i32
    %c0_i32_1 = arith.constant 0 : i32
    %c0_i32_2 = arith.constant 0 : i32
    return %arg0, %c0_i32, %c0_i32_0, %c0_i32_1 : i32, i32, i32, i32
  }
  func.func @transform_1(%arg0: i32) -> (i32, i32, i32, i32) {
    %c0_i32 = arith.constant 0 : i32
    %c0_i32_0 = arith.constant 0 : i32
    %c0_i32_1 = arith.constant 0 : i32
    %c0_i32_2 = arith.constant 0 : i32
    %c0_i32_3 = arith.constant 0 : i32
    return %c0_i32, %c0_i32_0, %c0_i32_1, %c0_i32_2 : i32, i32, i32, i32
  }
  func.func @transform_2(%arg0: i32) -> (i32, i32, i32) {
    %c0_i32 = arith.constant 0 : i32
    %c0_i32_0 = arith.constant 0 : i32
    %c0_i32_1 = arith.constant 0 : i32
    %c0_i32_2 = arith.constant 0 : i32
    return %c0_i32, %c0_i32_0, %c0_i32_1 : i32, i32, i32
  }
  func.func @transform_3(%arg0: i32) -> (i32, i32, i32, i32) {
    %c0_i32 = arith.constant 0 : i32
    %c0_i32_0 = arith.constant 0 : i32
    %c0_i32_1 = arith.constant 0 : i32
    %c0_i32_2 = arith.constant 0 : i32
    return %arg0, %c0_i32, %c0_i32_0, %c0_i32_1 : i32, i32, i32, i32
  }
}

</mosaic_0001>

<bundles_post_ra>
// kernel: conv_block_forward.1
= control target key start
LH: loop header
LB: loop body
LE: loop exit
PB: predicated region body
PF: predicated region fallthrough
CT: control target
= control target key end

     0   :  { %s16299_s12 = smov 0   ;;  %s20659_s0 = inlined_call_operand.vmem [shape: bf16[2,10,104,128], index: 0, kind: input, shape index: {}]   ;;  %s20660_s1 = inlined_call_operand.vmem [shape: bf16[2,27,128,128], index: 1, kind: input, shape index: {}]   ;;  %s20661_s2 = inlined_call_operand.vmem [shape: f32[2,1,128], index: 2, kind: input, shape index: {}]   ;;  %s20662_s3 = inlined_call_operand.vmem [shape: f32[2,8,80,128], index: 3, kind: output, shape index: {}]  }
   0x1 LB: > { %s11252_s13 = sadd.s32 4294967295, %s16264_s12   ;;  %p11256_p0 = scmp.ge.s32.totalorder %s16264_s12, 1  ;;  %s16264_s12 = sphi %s16299_s12, %s13_s12  }
   0x2   : > { %p137_p1 = scmp.lt.s32.totalorder %s16264_s12, 3 }
   0x4   : > { %p138_p2 = pnand %p11256_p0, %p137_p1 }
   0x5   : > { %p16309_p3 = scmp.lt.s32.totalorder (!%p138_p2), %s11252_s13, 1  ;;  %s16596_s23 = smov (!%p138_p2), 0  }
   0x6   : > { %141 = sbr.rel (%p138_p2) target bundleno = 1625 (0x659), region = 32 }
   0xb   : > { %v270_v0 = vlaneseq  ;;  %vm201_vm0 = vcmask 1041408   ;;  %vm20663_vm1 = vsmask.f32 1280  ;;  %v16274_v1 = vmov 0   ;;  %v204_v3 = vld [vmem:[#allocation2 + $0x38] sm:$0x3] }
   0xc   : > { %172 = vst [vmem:[#allocation2] sm:$0xf] %v16274_v1  ;;  %173 = vst [vmem:[#allocation2 + $0x4] sm:$0xf] %v16274_v1  ;;  %v208_v4 = vld [vmem:[#allocation2 + $0x6c] sm:$0x3] }
   0xd   : > { %174 = vst [vmem:[#allocation2 + $0x8] sm:$0xf] %v16274_v1  ;;  %175 = vst [vmem:[#allocation2 + $0xc] sm:$0xf] %v16274_v1  ;;  %s20837_s13 = smov (!%p16309_p3, %s11252_s13), 1  ;;  %v271_v5 = vshrl.u32 %v270_v0, 7 }
   0xe   : > { %176 = vst [vmem:[#allocation2 + $0x10] sm:$0xf] %v16274_v1  ;;  %177 = vst [vmem:[#allocation2 + $0x14] sm:$0xf] %v16274_v1  ;;  %v212_v8 = vld [vmem:[#allocation2 + $0xa0] sm:$0x3] }
   0xf   : > { %178 = vst [vmem:[#allocation2 + $0x18] sm:$0xf] %v16274_v1  ;;  %179 = vst [vmem:[#allocation2 + $0x1c] sm:$0xf] %v16274_v1  ;;  %v216_v10 = vld [vmem:[#allocation2 + $0xd4] sm:$0x3] }
  0x10   : > { %180 = vst [vmem:[#allocation2 + $0x20] sm:$0xf] %v16274_v1  ;;  %181 = vst [vmem:[#allocation2 + $0x24] sm:$0xf] %v16274_v1  ;;  %s15609_s15 = smul.u32 520, %s20837_s13  ;;  %v272_v11 = vadd.s32 8, %v271_v5 }
  0x11   : > { %182 = vst [vmem:[#allocation2 + $0x28] sm:$0xf] %v16274_v1  ;;  %183 = vst [vmem:[#allocation2 + $0x2c] sm:$0xf] %v16274_v1  ;;  %v273_v12 = vadd.s32 16, %v271_v5  ;;  %v274_v13 = vadd.s32 24, %v271_v5 }
  0x12   : > { %184 = vst [vmem:[#allocation2 + $0x30] sm:$0xf] %v16274_v1  ;;  %186 = vst [vmem:[#allocation2 + $0x1d4] sm:$0xf] %v16274_v1  ;;  %v275_v14 = vadd.s32 32, %v271_v5  ;;  %s15610_s16 = smul.u32 640, %s20837_s13  ;;  %s16334_s19 = scalar_lea.vmem %s20659_s0, %s15609_s15 }
  0x13   : > { %187 = vst [vmem:[#allocation2 + $0x1d8] sm:$0xf] %v16274_v1  ;;  %188 = vst [vmem:[#allocation2 + $0x1dc] sm:$0xf] %v16274_v1  ;;  %v276_v15 = vadd.s32 40, %v271_v5  ;;  %v277_v16 = vadd.s32 48, %v271_v5 }
  0x14   : > { %189 = vst [vmem:[#allocation2 + $0x1e0] sm:$0xf] %v16274_v1  ;;  %190 = vst [vmem:[#allocation2 + $0x1e4] sm:$0xf] %v16274_v1  ;;  %v278_v17 = vadd.s32 56, %v271_v5  ;;  %v16329_v18 = vadd.s32 64, %v271_v5  ;;  %s16346_s22 = scalar_lea.vmem %s20662_s3, %s15610_s16 }
  0x15   : > { %191 = vst [vmem:[#allocation2 + $0x1e8] sm:$0xf] %v16274_v1  ;;  %192 = vst [vmem:[#allocation2 + $0x1ec] sm:$0xf] %v16274_v1  ;;  %v16336_v19 = vadd.s32 72, %v271_v5  ;;  %vm235_vm7 = vcmask 1043457  }
  0x16   : > { %193 = vst [vmem:[#allocation2 + $0x1f0] sm:$0xf] %v16274_v1  ;;  %194 = vst [vmem:[#allocation2 + $0x1f4] sm:$0xf] %v16274_v1  ;;  %v16338_v20 = vmul.u32.u64.low 3435973837, %v271_v5  ;;  %v16339_v21 = vmul.u32.u64.high 3435973837, %v271_v5, %v16338_v20 }
  0x17   : > { %195 = vst [vmem:[#allocation2 + $0x1f8] sm:$0xf] %v16274_v1  ;;  %196 = vst [vmem:[#allocation2 + $0x1fc] sm:$0xf] %v16274_v1  ;;  %v16348_v23 = vmul.u32.u64.low 3435973837, %v272_v11  ;;  %v16349_v24 = vmul.u32.u64.high 3435973837, %v272_v11, %v16348_v23 }
  0x18   : > { %197 = vst [vmem:[#allocation2 + $0x200] sm:$0xf] %v16274_v1  ;;  %198 = vst [vmem:[#allocation2 + $0x204] sm:$0xf] %v16274_v1  ;;  %v16351_v25 = vmul.u32.u64.low 3435973837, %v273_v12  ;;  %v16352_v26 = vmul.u32.u64.high 3435973837, %v273_v12, %v16351_v25 }
  0x19   : > { %200 = vst [vmem:[#allocation2 + $0x34] sm:$0xf] %v16274_v1  ;;  %207 = vst [vmem:[#allocation2 + $0x68] sm:$0xf] %v16274_v1  ;;  %v220_v27 = vld [vmem:[#allocation2 + $0x108] sm:$0x3] }
  0x1a   : > { %211 = vst [vmem:[#allocation2 + $0x9c] sm:$0xf] %v16274_v1  ;;  %215 = vst [vmem:[#allocation2 + $0xd0] sm:$0xf] %v16274_v1  ;;  %v16354_v28 = vmul.u32.u64.low 3435973837, %v274_v13  ;;  %v16355_v29 = vmul.u32.u64.high 3435973837, %v274_v13, %v16354_v28 }
  0x1b   : > { %219 = vst [vmem:[#allocation2 + $0x104] sm:$0xf] %v16274_v1  ;;  %223 = vst [vmem:[#allocation2 + $0x138] sm:$0xf] %v16274_v1  ;;  %v16357_v30 = vmul.u32.u64.low 3435973837, %v275_v14  ;;  %v16358_v31 = vmul.u32.u64.high 3435973837, %v275_v14, %v16357_v30 }
  0x1c   : > { %227 = vst [vmem:[#allocation2 + $0x16c] sm:$0xf] %v16274_v1  ;;  %231 = vst [vmem:[#allocation2 + $0x1a0] sm:$0xf] %v16274_v1  ;;  %v16360_v32 = vmul.u32.u64.low 3435973837, %v276_v15  ;;  %v16361_v33 = vmul.u32.u64.high 3435973837, %v276_v15, %v16360_v32 }
  0x1d   : > { %241 = vst [vmem:[#allocation2 + $0x64] sm:$0xf] %v16274_v1  ;;  %245 = vst [vmem:[#allocation2 + $0x98] sm:$0xf] %v16274_v1  ;;  %v16363_v34 = vmul.u32.u64.low 3435973837, %v277_v16  ;;  %v16364_v35 = vmul.u32.u64.high 3435973837, %v277_v16, %v16363_v34 }
  0x1e   : > { %249 = vst [vmem:[#allocation2 + $0xcc] sm:$0xf] %v16274_v1  ;;  %253 = vst [vmem:[#allocation2 + $0x100] sm:$0xf] %v16274_v1  ;;  %v224_v36 = vld [vmem:[#allocation2 + $0x13c] sm:$0x3] }
  0x1f   : > { %257 = vst [vmem:[#allocation2 + $0x134] sm:$0xf] %v16274_v1  ;;  %261 = vst [vmem:[#allocation2 + $0x168] sm:$0xf] %v16274_v1  ;;  %v287_v37 = vshrl.u32 %v16339_v21, 3  ;;  %v298_v41 = vshrl.u32 %v16349_v24, 3 }
  0x20   : > { %265 = vst [vmem:[#allocation2 + $0x19c] sm:$0xf] %v16274_v1  ;;  %269 = vst [vmem:[#allocation2 + $0x1d0] sm:$0xf] %v16274_v1  ;;  %v16367_v38 = vmul.u32.u64.low 3435973837, %v278_v17  ;;  %v16368_v39 = vmul.u32.u64.high 3435973837, %v278_v17, %v16367_v38 }
  0x21   : > { %vm16315_vm2 = vmand %vm201_vm0, %vm20663_vm1  ;;  %v309_v42 = vshrl.u32 %v16352_v26, 3  ;;  %v16375_v43 = vmul.u32.u64.low 3435973837, %v16329_v18  ;;  %v16376_v44 = vmul.u32.u64.high 3435973837, %v16329_v18, %v16375_v43  ;;  %v288_v45 = vmul.u32 10, %v287_v37  ;;  %v228_v38 = vld [vmem:[#allocation2 + $0x170] sm:$0x3] }
  0x22   : > { %v205_v6 = vsel %vm16315_vm2, 0, %v204_v3  ;;  %v209_v7 = vsel %vm16315_vm2, 0, %v208_v4  ;;  %v213_v9 = vsel %vm16315_vm2, 0, %v212_v8  ;;  %v217_v22 = vsel %vm16315_vm2, 0, %v216_v10 }
  0x23   : > { %206 = vst [vmem:[#allocation2 + $0x38] sm:$0x3] %v205_v6  ;;  %210 = vst [vmem:[#allocation2 + $0x6c] sm:$0x3] %v209_v7  ;;  %v221_v40 = vsel %vm16315_vm2, 0, %v220_v27  ;;  %v320_v46 = vshrl.u32 %v16355_v29, 3  ;;  %v16384_v53 = vsub.s32 %v271_v5, %v288_v45 }
  0x24   : > { %214 = vst [vmem:[#allocation2 + $0xa0] sm:$0x3] %v213_v9  ;;  %218 = vst [vmem:[#allocation2 + $0xd4] sm:$0x3] %v217_v22  ;;  %v331_v47 = vshrl.u32 %v16358_v31, 3  ;;  %v225_v48 = vsel %vm16315_vm2, 0, %v224_v36 }
  0x25   : > { %222 = vst [vmem:[#allocation2 + $0x108] sm:$0x3] %v221_v40  ;;  %v299_v49 = vmul.u32 10, %v298_v41  ;;  %v310_v50 = vmul.u32 10, %v309_v42  ;;  %v342_v51 = vshrl.u32 %v16361_v33, 3  ;;  %v353_v52 = vshrl.u32 %v16364_v35, 3 }
  0x26   : > { %226 = vst [vmem:[#allocation2 + $0x13c] sm:$0x3] %v225_v48  ;;  %v321_v54 = vmul.u32 10, %v320_v46  ;;  %v332_v55 = vmul.u32 10, %v331_v47  ;;  %v364_v56 = vshrl.u32 %v16368_v39, 3  ;;  %v375_v0 = vshrl.u32 %v16376_v44, 3 }
  0x27   : > { %v16387_v57 = vsub.s32 %v272_v11, %v299_v49  ;;  %v16389_v58 = vsub.s32 %v273_v12, %v310_v50  ;;  %v343_v59 = vmul.u32 10, %v342_v51  ;;  %v354_v60 = vmul.u32 10, %v353_v52  ;;  %v232_v39 = vld [vmem:[#allocation2 + $0x1a4] sm:$0x3]  ;;  %v238_v45 = vld [vmem:[#allocation2 + $0x60] sm:$0xe] }
  0x28   : > { %v16391_v61 = vsub.s32 %v274_v13, %v321_v54  ;;  %v16393_v62 = vsub.s32 %v275_v14, %v332_v55  ;;  %v365_v63 = vmul.u32 10, %v364_v56  ;;  %v376_v7 = vmul.u32 10, %v375_v0  ;;  %v242_v46 = vld [vmem:[#allocation2 + $0x94] sm:$0xe]  ;;  %v246_v47 = vld [vmem:[#allocation2 + $0xc8] sm:$0xe] }
  0x29   : > { %v16396_v1 = vsub.s32 %v276_v15, %v343_v59  ;;  %v16398_v3 = vsub.s32 %v277_v16, %v354_v60  ;;  %v16401_v4 = vmul.u32.u64.low 3435973837, %v16336_v19  ;;  %v16402_v5 = vmul.u32.u64.high 3435973837, %v16336_v19, %v16401_v4  ;;  %v250_v48 = vld [vmem:[#allocation2 + $0xfc] sm:$0xe]  ;;  %v258_v54 = vld [vmem:[#allocation2 + $0x164] sm:$0xe] }
  0x2a   : > { %v16404_v6 = vsub.s32 %v278_v17, %v365_v63  ;;  %vm391_vm3 = vcmp.ne.s32.totalorder %v16384_v53, 0  ;;  %vm392_vm4 = vcmp.ne.s32.totalorder %v16387_v57, 0  ;;  %vm393_vm5 = vcmp.ne.s32.totalorder %v16389_v58, 0  ;;  %v262_v59 = vld [vmem:[#allocation2 + $0x198] sm:$0xe] }
  0x2b   : > { %vm394_vm6 = vcmp.ne.s32.totalorder %v16391_v61, 0  ;;  %v16413_v8 = vsub.s32 %v16329_v18, %v376_v7  ;;  %vm401_vm11 = vcmp.lt.s32.totalorder %v16384_v53, 0  ;;  %v386_v9 = vshrl.u32 %v16402_v5, 3 }
  0x2c   : > { %vm402_vm12 = vcmp.lt.s32.totalorder %v16387_v57, 0  ;;  %vm403_vm13 = vcmp.lt.s32.totalorder %v16389_v58, 0  ;;  %vm404_vm14 = vcmp.lt.s32.totalorder %v16391_v61, 0  ;;  %vm16424_vm15 = vmand %vm401_vm11, %vm391_vm3  ;;  %vm405_vm1 = vcmp.lt.s32.totalorder %v16393_v62, 0 }
  0x2d   : > { %vm406_vm10 = vcmp.lt.s32.totalorder %v16396_v1, 0  ;;  %vm407_vm9 = vcmp.lt.s32.totalorder %v16398_v3, 0  ;;  %vm16434_vm8 = vmand %vm402_vm12, %vm392_vm4  ;;  %v387_v12 = vmul.u32 10, %v386_v9  ;;  %vm408_vm3 = vcmp.lt.s32.totalorder %v16404_v6, 0 }
  0x2e   : > { %vm409_vm11 = vcmp.lt.s32.totalorder %v16413_v8, 0  ;;  %vm16442_vm0 = vmand %vm403_vm13, %vm393_vm5  ;;  %v421_v14 = vadd.s32 10, %v16384_v53  ;;  %v422_v16 = vadd.s32 10, %v16387_v57  ;;  %v423_v17 = vadd.s32 10, %v16389_v58 }
  0x2f   : > { %vm16449_vm4 = vmand %vm404_vm14, %vm394_vm6  ;;  %v424_v18 = vadd.s32 10, %v16391_v61  ;;  %v425_v20 = vadd.s32 10, %v16393_v62  ;;  %v388_v21 = vsub.s32 %v16336_v19, %v387_v12  ;;  %vm20680_vm5 = vcmp.ne.s32.totalorder %v16393_v62, 0 }
  0x30   : > { %vm16462_vm12 = vmand %vm405_vm1, %vm20680_vm5  ;;  %v426_v23 = vadd.s32 10, %v16396_v1  ;;  %v427_v24 = vadd.s32 10, %v16398_v3  ;;  %v428_v25 = vadd.s32 10, %v16404_v6  ;;  %vm20683_vm6 = vcmp.ne.s32.totalorder %v16396_v1, 0 }
  0x31   : > { %vm16473_vm13 = vmand %vm406_vm10, %vm20683_vm6  ;;  %v429_v26 = vadd.s32 10, %v16413_v8  ;;  %v431_v27 = vsel %vm16424_vm15, %v421_v14, %v16384_v53  ;;  %v432_v28 = vsel %vm16434_vm8, %v422_v16, %v16387_v57  ;;  %v433_v29 = vsel %vm16442_vm0, %v423_v17, %v16389_v58  ;;  %v254_v53 = vld [vmem:[#allocation2 + $0x130] sm:$0xe] }
  0x32   : > { %vm400_vm1 = vcmp.ne.s32.totalorder %v388_v21, 0  ;;  %vm410_vm14 = vcmp.lt.s32.totalorder %v388_v21, 0  ;;  %vm20686_vm10 = vcmp.ne.s32.totalorder %v16398_v3, 0  ;;  %v430_v31 = vadd.s32 10, %v388_v21 }
  0x33   : > { %vm16491_vm5 = vmand %vm407_vm9, %vm20686_vm10  ;;  %v434_v32 = vsel %vm16449_vm4, %v424_v18, %v16391_v61  ;;  %vm20689_vm8 = vcmp.ne.s32.totalorder %v16404_v6, 0  ;;  %v435_v34 = vsel %vm16462_vm12, %v425_v20, %v16393_v62  ;;  %v436_v35 = vsel %vm16473_vm13, %v426_v23, %v16396_v1  ;;  %v266_v62 = vld [vmem:[#allocation2 + $0x1cc] sm:$0xe] }
  0x34   : > { %vm16502_vm15 = vmand %vm408_vm3, %vm20689_vm8  ;;  %v437_v36 = vsel %vm16491_vm5, %v427_v24, %v16398_v3  ;;  %vm16515_vm9 = vcmp.lt.s32.totalorder %v431_v27, 8  ;;  %vm20694_vm0 = vcmp.ne.s32.totalorder %v16413_v8, 0  ;;  %vm16530_vm4 = vcmp.lt.s32.totalorder %v432_v28, 8 }
  0x35   : > { %vm16523_vm3 = vmand %vm409_vm11, %vm20694_vm0  ;;  %v438_v41 = vsel %vm16502_vm15, %v428_v25, %v16404_v6  ;;  %vm16534_vm12 = vcmp.lt.s32.totalorder %v433_v29, 8  ;;  %vm16538_vm6 = vcmp.lt.s32.totalorder %v434_v32, 8  ;;  %vm16547_vm13 = vcmp.lt.s32.totalorder %v435_v34, 8 }
  0x36   : > { %vm420_vm11 = vmand %vm410_vm14, %vm400_vm1  ;;  %v439_v49 = vsel %vm16523_vm3, %v429_v26, %v16413_v8  ;;  %vm16551_vm10 = vcmp.lt.s32.totalorder %v436_v35, 8  ;;  %vm16555_vm5 = vcmp.lt.s32.totalorder %v437_v36, 8  ;;  %vm16559_vm1 = vcmp.lt.s32.totalorder %v438_v41, 8 }
  0x37   : > { %v440_v55 = vsel %vm420_vm11, %v430_v31, %v388_v21  ;;  %vm16563_vm14 = vcmp.lt.s32.totalorder %v439_v49, 8  ;;  %v229_v58 = vsel %vm16315_vm2, 0, %v228_v38  ;;  %v233_v61 = vsel %vm16315_vm2, 0, %v232_v39 }
  0x38   : > { %vm16569_vm8 = vcmp.lt.s32.totalorder %v440_v55, 8  ;;  %230 = vst [vmem:[#allocation2 + $0x170] sm:$0x3] %v229_v58  ;;  %vm236_vm15 = vsmask.f32 7942 }
  0x39   : > { %234 = vst [vmem:[#allocation2 + $0x1a4] sm:$0x3] %v233_v61  ;;  %vm16576_vm0 = vmand %vm235_vm7, %vm236_vm15 }
  0x3a   : > { %v239_v0 = vsel %vm16576_vm0, 0, %v238_v45  ;;  %v243_v1 = vsel %vm16576_vm0, 0, %v242_v46  ;;  %v247_v3 = vsel %vm16576_vm0, 0, %v246_v47  ;;  %v251_v4 = vsel %vm16576_vm0, 0, %v250_v48 }
  0x3b   : > { %240 = vst [vmem:[#allocation2 + $0x60] sm:$0xe] %v239_v0  ;;  %244 = vst [vmem:[#allocation2 + $0x94] sm:$0xe] %v243_v1  ;;  %v255_v5 = vsel %vm16576_vm0, 0, %v254_v53  ;;  %v259_v6 = vsel %vm16576_vm0, 0, %v258_v54 }
  0x3c   : > { %248 = vst [vmem:[#allocation2 + $0xc8] sm:$0xe] %v247_v3  ;;  %252 = vst [vmem:[#allocation2 + $0xfc] sm:$0xe] %v251_v4  ;;  %v263_v7 = vsel %vm16576_vm0, 0, %v262_v59  ;;  %v267_v8 = vsel %vm16576_vm0, 0, %v266_v62 }
  0x3d   : > { %256 = vst [vmem:[#allocation2 + $0x130] sm:$0xe] %v255_v5  ;;  %260 = vst [vmem:[#allocation2 + $0x164] sm:$0xe] %v259_v6 }
  0x3e   : > { %264 = vst [vmem:[#allocation2 + $0x198] sm:$0xe] %v263_v7  ;;  %268 = vst [vmem:[#allocation2 + $0x1cc] sm:$0xe] %v267_v8 }
  0x3f LB: >> { %v15660_v9 = vld [vmem:[%s20660_s1 + $0x78] sm:$0xff]   ;;  %v16275_v10 = vmov 0.0   ;;  %v15662_v12 = vld [vmem:[%s20660_s1 + $0x70] sm:$0xff]   ;;  %vm16276_vm7 = vmmov 0   ;;  %v15664_v14 = vld [vmem:[%s20660_s1 + $0x68] sm:$0xff]   ;;  %s12919_s9 = smul.u32 52, %s16268_s23  ;;  %s16268_s23 = sphi %s16596_s23, %s456_s23  }
  0x40   : >> { %13633 = vmatprep.subr.bf16.mxu0 %v16275_v10  ;;  %13669 = vmatprep.subr.bf16.mxu1 %v16275_v10  ;;  %v15661_v11 = vld [vmem:[%s20660_s1 + $0x38] sm:$0xff]   ;;  %v15663_v13 = vld [vmem:[%s20660_s1 + $0x30] sm:$0xff]   ;;  %v15665_v15 = vld [vmem:[%s20660_s1 + $0x28] sm:$0xff]   ;;  %vm20666_vm3 = vsmask.f32 7424  ;;  %vm20664_vm11 = vcmask 1046528  }
  0x41   : >> { %13634 = vmatpush3.bf16.msra.mxu0 %v15660_v9  ;;  %13649 = vmatprep.mubr.msk.bf16.mxu0 %vm16276_vm7, %v16275_v10  ;;  %v15666_v16 = vld [vmem:[%s20660_s1 + $0x60] sm:$0xff]   ;;  %s16641_s15 = scalar_lea.vmem %s16334_s19, %s12919_s9  ;;  %v15668_v18 = vld [vmem:[%s20660_s1 + $0x58] sm:$0xff]   ;;  %v15670_v23 = vld [vmem:[%s20660_s1 + $0x50] sm:$0xff]   ;;  %vm20665_vm15 = vsmask.f32 6400  ;;  %s18583_s11 = scalar_lea.vmem [#allocation2], %s12919_s9 }
  0x42   : >> { %13670 = vmatpush3.bf16.msra.mxu1 %v15661_v11  ;;  %13635 = vmatprep.subr.bf16.mxu0 %v16275_v10  ;;  %v15667_v17 = vld [vmem:[%s20660_s1 + $0x20] sm:$0xff]   ;;  %v15669_v20 = vld [vmem:[%s20660_s1 + $0x18] sm:$0xff]   ;;  %v16660_v25 = vld [vmem:[%s16641_s15 + $0x8] sm:$0xff]   ;;  %s456_s23 = sadd.s32 1, %s16268_s23  }
  0x43   : >> { %13671 = vmatprep.subr.bf16.mxu1 %v16275_v10  ;;  %13685 = vmatprep.mubr.msk.bf16.mxu1 %vm16276_vm7, %v16275_v10  ;;  %v460_v21 = vld [vmem:[%s16641_s15] sm:$0xf]  ;;  %v16653_v22 = vld [vmem:[%s16641_s15 + $0x4] sm:$0xf]  ;;  %v15671_v19 = vld [vmem:[%s20660_s1 + $0x10] sm:$0xff]   ;;  %v541_v30 = vshll.u32 %v16660_v25, 16 }
  0x44   : >> { %v11276_v24 = vcombine.low %v460_v21, %v16653_v22  ;;  %v15672_v27 = vld [vmem:[%s20660_s1 + $0x48] sm:$0xff]   ;;  %v15674_v32 = vld [vmem:[%s20660_s1 + $0x40] sm:$0xff]   ;;  %v16683_v36 = vld [vmem:[%s16641_s15 + $0x10] sm:$0xff]   ;;  %v545_v40 = vshrl.u32 %v16660_v25, 16  ;;  %p453_p4 = scmp.ge.s32.totalorder %s456_s23, 8  }
  0x45   : >> { %13636 = vmatpush3.bf16.msra.mxu0 %v15662_v12  ;;  %v15673_v31 = vld [vmem:[%s20660_s1 + $0x8] sm:$0xff]   ;;  %v15675_v33 = vld [vmem:[%s20660_s1] sm:$0xff]   ;;  %v543_v35 = vrot.slane %v541_v30, 1  ;;  %v15678_v38 = vld [vmem:[%s20660_s1 + $0xb8] sm:$0xff]   ;;  %v549_v41 = vshll.u32 %v16683_v36, 16  ;;  %v553_v59 = vshrl.u32 %v16683_v36, 16 }
  0x46   : >> { %13672 = vmatpush3.bf16.msra.mxu1 %v15663_v13  ;;  %13637 = vmatprep.subr.bf16.mxu0 %v16275_v10  ;;  %v536_v26 = vshll.u32 %v11276_v24, 16  ;;  %v534_v28 = vshrl.u32 %v11276_v24, 16  ;;  %v15681_v45 = vld [vmem:[%s20660_s1 + $0xf8] sm:$0xff]   ;;  %v15679_v47 = vld [vmem:[%s20660_s1 + $0xb0] sm:$0xff]   ;;  %v15682_v58 = vld [vmem:[%s20660_s1 + $0xa8] sm:$0xff]   ;;  %s18654_s9 = smov (%p453_p4), 0  }
  0x47   : >> { %13673 = vmatprep.subr.bf16.mxu1 %v16275_v10  ;;  %v16699_v46 = vld [vmem:[%s16641_s15 + $0x18] sm:$0xff]   ;;  %v547_v48 = vor.u32 %v545_v40, %v543_v35  ;;  %v551_v49 = vrot.slane %v549_v41, 1  ;;  %v15683_v53 = vld [vmem:[%s20660_s1 + $0xf0] sm:$0xff]   ;;  %v15686_v61 = vld [vmem:[%s20660_s1 + $0xe8] sm:$0xff]  }
  0x48   : >> { %v538_v29 = vrot.slane %v536_v26, 1  ;;  %v557_v54 = vshll.u32 %v16699_v46, 16  ;;  %v15685_v0 = vld [vmem:[%s20660_s1 + $0xa0] sm:$0xff]   ;;  %v15687_v5 = vld [vmem:[%s20660_s1 + $0x98] sm:$0xff]   ;;  %v561_v7 = vshrl.u32 %v16699_v46, 16  ;;  %v15695_v21 = vld [vmem:[%s20660_s1 + $0xc8] sm:$0xff]  }
  0x49   : >> { %13638 = vmatpush3.bf16.msra.mxu0 %v15664_v14  ;;  %v552_v55 = vsel %vm20666_vm3, %v547_v48, %v551_v49  ;;  %v16728_v1 = vld [vmem:[%s16641_s15 + $0x20] sm:$0xff]   ;;  %v555_v3 = vor.u32 %v553_v59, %v551_v49  ;;  %v15690_v9 = vld [vmem:[%s20660_s1 + $0xd8] sm:$0xff]   ;;  %v16751_v11 = vld [vmem:[%s16641_s15 + $0x28] ss:$0 sps:$4 sm:$0x11]   ;;  %v854_v48 = vrot.slane %v16683_v36, 1 }
  0x4a   : >> { %13674 = vmatpush3.bf16.msra.mxu1 %v15665_v15  ;;  %13639 = vmatprep.subr.bf16.mxu0 %v16275_v10  ;;  %v539_v34 = vor.u32 %v538_v29, %v534_v28  ;;  %v559_v62 = vrot.slane %v557_v54, 1  ;;  %v15688_v4 = vld [vmem:[%s20660_s1 + $0xe0] sm:$0xff]   ;;  %v565_v8 = vshll.u32 %v16728_v1, 16  ;;  %v15691_v14 = vld [vmem:[%s20660_s1 + $0x90] sm:$0xff]   ;;  %v16793_v29 = vld [vmem:[%s16641_s15 + $0x8] sm:$0xf] }
  0x4b   : >> { %13675 = vmatprep.subr.bf16.mxu1 %v16275_v10  ;;  %v15692_v15 = vld [vmem:[%s20660_s1 + $0xd0] sm:$0xff]   ;;  %v15697_v26 = vld [vmem:[%s20660_s1 + $0xc0] sm:$0xff]   ;;  %v15701_v40 = vld [vmem:[%s20660_s1 + $0x138] sm:$0xff]  }
  0x4c   : >> { %v544_v39 = vsel %vm20666_vm3, %v539_v34, %v543_v35  ;;  %v560_v6 = vsel %vm20666_vm3, %v555_v3, %v559_v62  ;;  %v563_v12 = vor.u32 %v561_v7, %v559_v62  ;;  %v567_v13 = vrot.slane %v565_v8, 1  ;;  %v998_v28 = vld [vmem:[%s16641_s15 + $0x4] sm:$0xe]  ;;  %v15705_v54 = vld [vmem:[%s20660_s1 + $0x128] sm:$0xff]   ;;  %v15713_v7 = vld [vmem:[%s20660_s1 + $0x158] sm:$0xff]  }
  0x4d   : >> { %13640 = vmatpush3.bf16.msra.mxu0 %v15666_v16  ;;  %v852_v34 = vrot.slane %v16660_v25, 1  ;;  %v15709_v59 = vld [vmem:[%s20660_s1 + $0x168] sm:$0xff]   ;;  %v15708_v62 = vld [vmem:[%s20660_s1 + $0x120] sm:$0xff]   ;;  %v858_v8 = vrot.slane %v16728_v1, 1 }
  0x4e   : >> { %13676 = vmatpush3.bf16.msra.mxu1 %v15667_v17  ;;  %13641 = vmatprep.subr.bf16.mxu0 %v16275_v10  ;;  %v568_v16 = vsel %vm20666_vm3, %v563_v12, %v567_v13  ;;  %v569_v17 = vshrl.u32 %v16728_v1, 16  ;;  %v15711_v3 = vld [vmem:[%s20660_s1 + $0x160] sm:$0xff]  }
  0x4f   : >> { %13677 = vmatprep.subr.bf16.mxu1 %v16275_v10 }
  0x51   : >> { %13642 = vmatpush3.bf16.msra.mxu0 %v15668_v18  ;;  %v573_v18 = vshll.u32 %v16751_v11, 16 }
  0x52   : >> { %13678 = vmatpush3.bf16.msra.mxu1 %v15669_v20  ;;  %13643 = vmatprep.subr.bf16.mxu0 %v16275_v10  ;;  %v15693_v20 = vld [vmem:[%s20660_s1 + $0x88] sm:$0xff]  }
  0x53   : >> { %13679 = vmatprep.subr.bf16.mxu1 %v16275_v10 }
  0x55   : >> { %13644 = vmatpush3.bf16.msra.mxu0 %v15670_v23  ;;  %v15696_v23 = vld [vmem:[%s20660_s1 + $0x80] sm:$0xff]  }
  0x56   : >> { %13680 = vmatpush3.bf16.msra.mxu1 %v15671_v19  ;;  %13645 = vmatprep.subr.bf16.mxu0 %v16275_v10  ;;  %v575_v19 = vrot.slane %v573_v18, 1 }
  0x57   : >> { %13681 = vmatprep.subr.bf16.mxu1 %v16275_v10 }
  0x59   : >> { %13646 = vmatpush3.bf16.msra.mxu0 %v15672_v27  ;;  %v829_v27 = vld [vmem:[%s16641_s15] sm:$0xe] }
  0x5a   : >> { %13682 = vmatpush3.bf16.msra.mxu1 %v15673_v31  ;;  %13647 = vmatprep.subr.bf16.mxu0 %v16275_v10  ;;  %v11314_v31 = vcombine.low %v829_v27, %v16653_v22  ;;  %v1412_v27 = vld [vmem:[%s16641_s15 + $0x4] sm:$0xc] }
  0x5b   : >> { %13683 = vmatprep.subr.bf16.mxu1 %v16275_v10 }
  0x5c   : >> { %v851_v22 = vrot.slane %v11314_v31, 1 }
  0x5d   : >> { %13648 = vmatpush3.bf16.msra.mxu0 %v15674_v32  ;;  %v16799_v32 = vcombine.low %v998_v28, %v16793_v29 }
  0x5e   : >> { %13684 = vmatpush3.bf16.msra.mxu1 %v15675_v33  ;;  %13705 = vmatprep.subr.bf16.mxu0 %v16275_v10  ;;  %v16802_v33 = vld [vmem:[%s16641_s15 + $0xc] sm:$0xff]  }
  0x5f   : >> { %13741 = vmatprep.subr.bf16.mxu1 %v16275_v10  ;;  %v1054_v35 = vrot.slane %v16799_v32, 1  ;;  %v1224_v18 = vshrl.u32 %v16799_v32, 16 }
  0x60   : >> { %13650 = vmatmul.mubr.bf16.vlgmr.msra.gmra.mxu0 %v544_v39  ;;  %v853_v39 = vsel %vm20664_vm11, %v851_v22, %v852_v34 }
  0x61   : >> { %13686 = vmatmul.mubr.bf16.vlgmr.msra.gmra.mxu1 %v11276_v24  ;;  %13706 = vmatpush3.bf16.msra.mxu0 %v15678_v38  ;;  %v571_v24 = vor.u32 %v569_v17, %v567_v13  ;;  %v1055_v38 = vrot.slane %v16802_v33, 1  ;;  %v15715_v13 = vld [vmem:[%s20660_s1 + $0x150] sm:$0xff]   ;;  %v15718_v17 = vld [vmem:[%s20660_s1 + $0x148] sm:$0xff]   ;;  %v1226_v28 = vrot.slane %v1224_v18, 1 }
  0x62   : >> { %13707 = vmatprep.subr.bf16.mxu0 %v16275_v10  ;;  %13653 = vmatprep.mubr.msk.bf16.mxu0 %vm16276_vm7, %v16275_v10 }
  0x63   : >> { %13689 = vmatprep.mubr.msk.bf16.mxu1 %vm16276_vm7, %v16275_v10  ;;  %13742 = vmatpush3.bf16.msra.mxu1 %v15681_v45  ;;  %v576_v30 = vsel %vm20666_vm3, %v571_v24, %v575_v19  ;;  %v1056_v41 = vsel %vm20664_vm11, %v1054_v35, %v1055_v38  ;;  %v16820_v45 = vld [vmem:[%s16641_s15 + $0x14] sm:$0xff]   ;;  %v1235_v24 = vshll.u32 %v16802_v33, 16  ;;  %v11394_v35 = vcombine.low %v1412_v27, %v16793_v29  ;;  %v17002_v27 = vld [vmem:[%s16641_s15 + $0xc] sm:$0xf] }
  0x64   : >> { %13743 = vmatprep.subr.bf16.mxu1 %v16275_v10  ;;  %v1057_v49 = vrot.slane %v16820_v45, 1  ;;  %vm20667_vm3 = vcmask 1044480  }
  0x65   : >> { %13708 = vmatpush3.bf16.msra.mxu0 %v15679_v47  ;;  %v15702_v47 = vld [vmem:[%s20660_s1 + $0x130] sm:$0xff]   ;;  %v1237_v22 = vrot.slane %v1235_v24, 2  ;;  %v1434_v29 = vrot.slane %v11394_v35, 2 }
  0x66   : >> { %13709 = vmatprep.subr.bf16.mxu0 %v16275_v10 }
  0x67   : >> { %13744 = vmatpush3.bf16.msra.mxu1 %v15683_v53  ;;  %v15706_v53 = vld [vmem:[%s20660_s1 + $0x170] sm:$0xff]  }
  0x68   : >> { %13654 = vmatmul.mubr.bf16.gmra.mxu0 %v552_v55  ;;  %13745 = vmatprep.subr.bf16.mxu1 %v16275_v10  ;;  %v1058_v55 = vsel %vm20664_vm11, %v1055_v38, %v1057_v49  ;;  %v1241_v38 = vshrl.u32 %v16820_v45, 16 }
  0x69   : >> { %13690 = vmatmul.mubr.bf16.gmra.mxu1 %v16660_v25  ;;  %13710 = vmatpush3.bf16.msra.mxu0 %v15682_v58  ;;  %v15704_v25 = vld [vmem:[%s20660_s1 + $0x178] sm:$0xff]  }
  0x6a   : >> { %13657 = vmatprep.mubr.msk.bf16.mxu0 %vm16276_vm7, %v16275_v10  ;;  %13693 = vmatprep.mubr.msk.bf16.mxu1 %vm16276_vm7, %v16275_v10  ;;  %v16846_v58 = vld [vmem:[%s16641_s15 + $0x1c] sm:$0xff]  }
  0x6b   : >> { %13711 = vmatprep.subr.bf16.mxu0 %v16275_v10  ;;  %13746 = vmatpush3.bf16.msra.mxu1 %v15686_v61  ;;  %v856_v61 = vrot.slane %v16699_v46, 1 }
  0x6c   : >> { %13747 = vmatprep.subr.bf16.mxu1 %v16275_v10 }
  0x6d   : >> { %13712 = vmatpush3.bf16.msra.mxu0 %v15685_v0  ;;  %v1059_v0 = vrot.slane %v16846_v58, 1 }
  0x6e   : >> { %13713 = vmatprep.subr.bf16.mxu0 %v16275_v10 }
  0x6f   : >> { %13748 = vmatpush3.bf16.msra.mxu1 %v15688_v4  ;;  %v15710_v4 = vld [vmem:[%s20660_s1 + $0x118] sm:$0xff]  }
  0x70   : >> { %13658 = vmatmul.mubr.bf16.gmra.mxu0 %v560_v6  ;;  %13749 = vmatprep.subr.bf16.mxu1 %v16275_v10  ;;  %v16873_v6 = vld [vmem:[%s16641_s15 + $0x24] sm:$0xff]  }
  0x71   : >> { %13694 = vmatmul.mubr.bf16.gmra.mxu1 %v16683_v36  ;;  %13714 = vmatpush3.bf16.msra.mxu0 %v15687_v5  ;;  %v855_v36 = vsel %vm20664_vm11, %v852_v34, %v854_v48  ;;  %v1060_v5 = vsel %vm20664_vm11, %v1057_v49, %v1059_v0  ;;  %v1061_v12 = vrot.slane %v16873_v6, 1  ;;  %v15722_v49 = vld [vmem:[%s20660_s1 + $0x1b8] sm:$0xff]  }
  0x72   : >> { %13661 = vmatprep.mubr.msk.bf16.mxu0 %vm16276_vm7, %v16275_v10  ;;  %13697 = vmatprep.mubr.msk.bf16.mxu1 %vm16276_vm7, %v16275_v10 }
  0x73   : >> { %13715 = vmatprep.subr.bf16.mxu0 %v16275_v10  ;;  %13750 = vmatpush3.bf16.msra.mxu1 %v15690_v9  ;;  %v15714_v9 = vld [vmem:[%s20660_s1 + $0x110] sm:$0xff]  }
  0x74   : >> { %13751 = vmatprep.subr.bf16.mxu1 %v16275_v10 }
  0x75   : >> { %13716 = vmatpush3.bf16.msra.mxu0 %v15691_v14  ;;  %v859_v14 = vsel %vm20664_vm11, %v856_v61, %v858_v8 }
  0x76   : >> { %13717 = vmatprep.subr.bf16.mxu0 %v16275_v10 }
  0x77   : >> { %13752 = vmatpush3.bf16.msra.mxu1 %v15692_v15  ;;  %v1062_v15 = vsel %vm20664_vm11, %v1059_v0, %v1061_v12  ;;  %v15726_v0 = vld [vmem:[%s20660_s1 + $0x1f0] sm:$0xff]  }
  0x78   : >> { %13662 = vmatmul.mubr.bf16.gmra.mxu0 %v568_v16  ;;  %13753 = vmatprep.subr.bf16.mxu1 %v16275_v10  ;;  %v15716_v16 = vld [vmem:[%s20660_s1 + $0x108] sm:$0xff]  }
  0x79   : >> { %13698 = vmatmul.mubr.bf16.gmra.mxu1 %v16699_v46  ;;  %13665 = vmatprep.mubr.msk.bf16.mxu0 %vm16276_vm7, %v16275_v10  ;;  %v857_v46 = vsel %vm20664_vm11, %v854_v48, %v856_v61  ;;  %v1253_v61 = vshll.u32 %v16846_v58, 16 }
  0x7a   : >> { %13701 = vmatprep.mubr.msk.bf16.mxu1 %vm16276_vm7, %v16275_v10  ;;  %13718 = vmatpush3.bf16.msra.mxu0 %v15693_v20  ;;  %v1227_v20 = vshll.u32 %v16799_v32, 16 }
  0x7b   : >> { %13754 = vmatpush3.bf16.msra.mxu1 %v15695_v21  ;;  %13719 = vmatprep.subr.bf16.mxu0 %v16275_v10  ;;  %v860_v21 = vrot.slane %v16751_v11, 1  ;;  %v15720_v11 = vld [vmem:[%s20660_s1 + $0x140] sm:$0xff]  }
  0x7c   : >> { %13755 = vmatprep.subr.bf16.mxu1 %v16275_v10 }
  0x7d   : >> { %v861_v31 = vsel %vm20664_vm11, %v858_v8, %v860_v21  ;;  %v15727_v8 = vld [vmem:[%s20660_s1 + $0x1a0] sm:$0xff]   ;;  %v15731_v21 = vld [vmem:[%s20660_s1 + $0x1d8] sm:$0xff]  }
  0x7e   : >> { %13720 = vmatpush3.bf16.msra.mxu0 %v15696_v23  ;;  %v1232_v23 = vshrl.u32 %v16802_v33, 16 }
  0x7f   : >> { %13756 = vmatpush3.bf16.msra.mxu1 %v15697_v26  ;;  %13777 = vmatprep.subr.bf16.mxu0 %v16275_v10  ;;  %v15719_v26 = vld [vmem:[%s20660_s1 + $0x100] sm:$0xff]  }
  0x80   : >> { %13666 = vmatmul.mubr.bf16.gmra.mxu0 %v576_v30  ;;  %13813 = vmatprep.subr.bf16.mxu1 %v16275_v10  ;;  %v1229_v30 = vrot.slane %v1227_v20, 2  ;;  %v1234_v32 = vrot.slane %v1232_v23, 1  ;;  %v15732_v23 = vld [vmem:[%s20660_s1 + $0x190] sm:$0xff]  }
  0x81   : >> { %13702 = vmatmul.mubr.bf16.gmra.mxu1 %v16728_v1  ;;  %13721 = vmatprep.mubr.msk.bf16.mxu0 %vm16276_vm7, %v16275_v10  ;;  %v15717_v1 = vld [vmem:[%s16641_s15 + $0x2c] ss:$0 sps:$4 sm:$0x11]  }
  0x82   : >> { %13757 = vmatprep.mubr.msk.bf16.mxu1 %vm16276_vm7, %v16275_v10  ;;  %v1063_v19 = vrot.slane %v15717_v1, 1  ;;  %v1439_v1 = vrot.slane %v16846_v58, 2 }
  0x84   : >> { %v1064_v34 = vsel %vm20664_vm11, %v1061_v12, %v1063_v19  ;;  %vm1433_vm11 = vcmask 1045504   ;;  %v1259_v12 = vshrl.u32 %v16873_v6, 16 }
  0x88   : >> { %13722 = vmatmul.mubr.bf16.vlgmr.msra.gmra.mxu0 %v853_v39  ;;  %v1244_v39 = vshll.u32 %v16820_v45, 16 }
  0x89   : >> { %13758 = vmatmul.mubr.bf16.vlgmr.msra.gmra.mxu1 %v1056_v41  ;;  %13778 = vmatpush3.bf16.msra.mxu0 %v15701_v40  ;;  %v1230_v40 = vor.u32 %v1229_v30, %v1226_v28  ;;  %v1238_v41 = vor.u32 %v1237_v22, %v1234_v32  ;;  %v1441_v28 = vrot.slane %v16873_v6, 2  ;;  %v15733_v30 = vld [vmem:[%s20660_s1 + $0x1d0] sm:$0xff]  }
  0x8a   : >> { %13779 = vmatprep.subr.bf16.mxu0 %v16275_v10  ;;  %13725 = vmatprep.mubr.msk.bf16.mxu0 %vm16276_vm7, %v16275_v10  ;;  %v17016_v32 = vld [vmem:[%s16641_s15 + $0x10] sm:$0xff]  }
  0x8b   : >> { %13761 = vmatprep.mubr.msk.bf16.mxu1 %vm16276_vm7, %v16275_v10  ;;  %13814 = vmatpush3.bf16.msra.mxu1 %v15704_v25  ;;  %v1435_v25 = vrot.slane %v16802_v33, 2  ;;  %v1239_v48 = vsel %vm20665_vm15, %v1230_v40, %v1238_v41  ;;  %v15723_v33 = vld [vmem:[%s20660_s1 + $0x1b0] sm:$0xff]  }
  0x8c   : >> { %13815 = vmatprep.subr.bf16.mxu1 %v16275_v10 }
  0x8d   : >> { %13780 = vmatpush3.bf16.msra.mxu0 %v15702_v47  ;;  %v1243_v47 = vrot.slane %v1241_v38, 1  ;;  %v15734_v38 = vld [vmem:[%s20660_s1 + $0x188] sm:$0xff]  }
  0x8e   : >> { %13781 = vmatprep.subr.bf16.mxu0 %v16275_v10 }
  0x8f   : >> { %13816 = vmatpush3.bf16.msra.mxu1 %v15706_v53  ;;  %v1246_v53 = vrot.slane %v1244_v39, 2  ;;  %v15736_v39 = vld [vmem:[%s20660_s1 + $0x1c8] sm:$0xff]  }
  0x90   : >> { %13726 = vmatmul.mubr.bf16.gmra.mxu0 %v855_v36  ;;  %13817 = vmatprep.subr.bf16.mxu1 %v16275_v10  ;;  %v1436_v36 = vsel %vm1433_vm11, %v1434_v29, %v1435_v25  ;;  %v1815_v29 = vshrl.u32 %v17016_v32, 16 }
  0x91   : >> { %13762 = vmatmul.mubr.bf16.gmra.mxu1 %v1058_v55  ;;  %13782 = vmatpush3.bf16.msra.mxu0 %v15705_v54  ;;  %v15724_v54 = vld [vmem:[%s20660_s1 + $0x1f8] sm:$0xff]   ;;  %v1247_v55 = vor.u32 %v1246_v53, %v1243_v47  ;;  %v15738_v53 = vld [vmem:[%s20660_s1 + $0x1c0] sm:$0xff]  }
  0x92   : >> { %13729 = vmatprep.mubr.msk.bf16.mxu0 %vm16276_vm7, %v16275_v10  ;;  %13765 = vmatprep.mubr.msk.bf16.mxu1 %vm16276_vm7, %v16275_v10 }
  0x93   : >> { %13783 = vmatprep.subr.bf16.mxu0 %v16275_v10  ;;  %13818 = vmatpush3.bf16.msra.mxu1 %v15709_v59  ;;  %v1250_v59 = vshrl.u32 %v16846_v58, 16  ;;  %v1261_v58 = vrot.slane %v1259_v12, 1 }
  0x94   : >> { %13819 = vmatprep.subr.bf16.mxu1 %v16275_v10 }
  0x95   : >> { %13784 = vmatpush3.bf16.msra.mxu0 %v15708_v62  ;;  %v1437_v62 = vrot.slane %v16820_v45, 2 }
  0x96   : >> { %13785 = vmatprep.subr.bf16.mxu0 %v16275_v10 }
  0x97   : >> { %13820 = vmatpush3.bf16.msra.mxu1 %v15711_v3  ;;  %v15725_v3 = vld [vmem:[%s20660_s1 + $0x1a8] sm:$0xff]   ;;  %v1438_v45 = vsel %vm1433_vm11, %v1435_v25, %v1437_v62  ;;  %v1440_v20 = vsel %vm1433_vm11, %v1437_v62, %v1439_v1  ;;  %v1818_v25 = vshll.u32 %v17016_v32, 16 }
  0x98   : >> { %13730 = vmatmul.mubr.bf16.gmra.mxu0 %v857_v46  ;;  %13821 = vmatprep.subr.bf16.mxu1 %v16275_v10  ;;  %v1248_v46 = vsel %vm20665_vm15, %v1238_v41, %v1247_v55 }
  0x99   : >> { %13766 = vmatmul.mubr.bf16.gmra.mxu1 %v1060_v5  ;;  %13786 = vmatpush3.bf16.msra.mxu0 %v15710_v4  ;;  %v1252_v4 = vrot.slane %v1250_v59, 1  ;;  %v1255_v5 = vrot.slane %v1253_v61, 2  ;;  %v1820_v59 = vrot.slane %v1818_v25, 3  ;;  %v17045_v61 = vld [vmem:[%s16641_s15 + $0x18] sm:$0xff]  }
  0x9a   : >> { %13733 = vmatprep.mubr.msk.bf16.mxu0 %vm16276_vm7, %v16275_v10  ;;  %13769 = vmatprep.mubr.msk.bf16.mxu1 %vm16276_vm7, %v16275_v10  ;;  %v17118_v25 = vld [vmem:[%s16641_s15 + $0x30] ss:$0 sps:$4 sm:$0x77]  }
  0x9b   : >> { %13787 = vmatprep.subr.bf16.mxu0 %v16275_v10  ;;  %13822 = vmatpush3.bf16.msra.mxu1 %v15713_v7  ;;  %v15728_v7 = vld [vmem:[%s20660_s1 + $0x1e8] sm:$0xff]  }
  0x9c   : >> { %13823 = vmatprep.subr.bf16.mxu1 %v16275_v10 }
  0x9d   : >> { %13788 = vmatpush3.bf16.msra.mxu0 %v15714_v9  ;;  %v1256_v9 = vor.u32 %v1255_v5, %v1252_v4  ;;  %v1824_v5 = vshrl.u32 %v17045_v61, 16 }
  0x9e   : >> { %13789 = vmatprep.subr.bf16.mxu0 %v16275_v10 }
  0x9f   : >> { %13824 = vmatpush3.bf16.msra.mxu1 %v15715_v13  ;;  %v1262_v13 = vshll.u32 %v16873_v6, 16  ;;  %v1442_v6 = vsel %vm1433_vm11, %v1439_v1, %v1441_v28 }
  0xa0   : >> { %13734 = vmatmul.mubr.bf16.gmra.mxu0 %v859_v14  ;;  %13825 = vmatprep.subr.bf16.mxu1 %v16275_v10  ;;  %v15730_v14 = vld [vmem:[%s20660_s1 + $0x1e0] sm:$0xff]  }
  0xa1   : >> { %13770 = vmatmul.mubr.bf16.gmra.mxu1 %v1062_v15  ;;  %13737 = vmatprep.mubr.msk.bf16.mxu0 %vm16276_vm7, %v16275_v10  ;;  %v16983_v15 = vld [vmem:[%s16641_s15 + $0x2c] ss:$0 sps:$4 sm:$0x33]   ;;  %v1264_v18 = vrot.slane %v1262_v13, 2  ;;  %v1826_v13 = vrot.slane %v1824_v5, 2 }
  0xa2   : >> { %13773 = vmatprep.mubr.msk.bf16.mxu1 %vm16276_vm7, %v16275_v10  ;;  %13790 = vmatpush3.bf16.msra.mxu0 %v15716_v16  ;;  %v1257_v16 = vsel %vm20665_vm15, %v1247_v55, %v1256_v9  ;;  %v1268_v24 = vshrl.u32 %v16983_v15, 16  ;;  %v1271_v19 = vshll.u32 %v16983_v15, 16  ;;  %v1995_v5 = vld [vmem:[%s16641_s15 + $0x8] sm:$0x8] }
  0xa3   : >> { %13826 = vmatpush3.bf16.msra.mxu1 %v15718_v17  ;;  %13791 = vmatprep.subr.bf16.mxu0 %v16275_v10  ;;  %v15729_v17 = vld [vmem:[%s20660_s1 + $0x198] sm:$0xff]  }
  0xa4   : >> { %13827 = vmatprep.subr.bf16.mxu1 %v16275_v10  ;;  %v1273_v35 = vrot.slane %v1271_v19, 2 }
  0xa6   : >> { %13792 = vmatpush3.bf16.msra.mxu0 %v15719_v26  ;;  %v1265_v26 = vor.u32 %v1264_v18, %v1261_v58 }
  0xa7   : >> { %13828 = vmatpush3.bf16.msra.mxu1 %v15720_v11  ;;  %13849 = vmatprep.subr.bf16.mxu0 %v16275_v10  ;;  %v1581_v11 = vld [vmem:[%s16641_s15 + $0x8] sm:$0xc] }
  0xa8   : >> { %13738 = vmatmul.mubr.bf16.gmra.mxu0 %v861_v31  ;;  %13885 = vmatprep.subr.bf16.mxu1 %v16275_v10  ;;  %v11419_v31 = vcombine.low %v1581_v11, %v17002_v27  ;;  %v1266_v22 = vsel %vm20665_vm15, %v1256_v9, %v1265_v26  ;;  %v17062_v9 = vld [vmem:[%s16641_s15 + $0x20] sm:$0xff]  }
  0xa9   : >> { %13774 = vmatmul.mubr.bf16.gmra.mxu1 %v1064_v34  ;;  %13793 = vmatprep.mubr.msk.bf16.mxu0 %vm16276_vm7, %v16275_v10  ;;  %v1270_v34 = vrot.slane %v1268_v24, 1  ;;  %v1836_v58 = vshll.u32 %v17062_v9, 16 }
  0xaa   : >> { %13829 = vmatprep.mubr.msk.bf16.mxu1 %vm16276_vm7, %v16275_v10  ;;  %v1807_v40 = vshrl.u32 %v11419_v31, 16  ;;  %v1810_v41 = vshll.u32 %v11419_v31, 16 }
  0xab   : >> { %v1274_v47 = vor.u32 %v1273_v35, %v1270_v34 }
  0xac   : >> { %v1812_v55 = vrot.slane %v1810_v41, 3 }
  0xb0   : >> { %13794 = vmatmul.mubr.bf16.vlgmr.msra.gmra.mxu0 %v1239_v48  ;;  %v1443_v48 = vrot.slane %v16983_v15, 2  ;;  %v15742_v15 = vld [vmem:[%s20660_s1 + $0x230] sm:$0xff]  }
  0xb1   : >> { %13830 = vmatmul.mubr.bf16.vlgmr.msra.gmra.mxu1 %v1436_v36  ;;  %13850 = vmatpush3.bf16.msra.mxu0 %v15722_v49  ;;  %v15737_v49 = vld [vmem:[%s20660_s1 + $0x180] sm:$0xff]   ;;  %v1817_v36 = vrot.slane %v1815_v29, 2 }
  0xb2   : >> { %13851 = vmatprep.subr.bf16.mxu0 %v16275_v10  ;;  %13797 = vmatprep.mubr.msk.bf16.mxu0 %vm16276_vm7, %v16275_v10  ;;  %v1444_v62 = vsel %vm1433_vm11, %v1441_v28, %v1443_v48  ;;  %v15749_v28 = vld [vmem:[%s20660_s1 + $0x268] sm:$0xff]  }
  0xb3   : >> { %13833 = vmatprep.mubr.msk.bf16.mxu1 %vm16276_vm7, %v16275_v10  ;;  %13886 = vmatpush3.bf16.msra.mxu1 %v15724_v54  ;;  %v1275_v54 = vsel %vm20665_vm15, %v1265_v26, %v1274_v47  ;;  %v1821_v4 = vor.u32 %v1820_v59, %v1817_v36  ;;  %vm20668_vm15 = vsmask.f32 5376  ;;  %v1838_v26 = vrot.slane %v1836_v58, 3  ;;  %v15753_v47 = vld [vmem:[%s20660_s1 + $0x258] sm:$0xff]  }
  0xb4   : >> { %13887 = vmatprep.subr.bf16.mxu1 %v16275_v10  ;;  %v1851_v36 = vshrl.u32 %v17118_v25, 16  ;;  %v15757_v59 = vld [vmem:[%s16641_s15 + $0x30] ss:$0 sps:$4 sm:$0x33]   ;;  %v15767_v58 = vld [vmem:[%s20660_s1 + $0x2f8] sm:$0xff]  }
  0xb5   : >> { %13852 = vmatpush3.bf16.msra.mxu0 %v15723_v33  ;;  %v1809_v33 = vrot.slane %v1807_v40, 2 }
  0xb6   : >> { %13853 = vmatprep.subr.bf16.mxu0 %v16275_v10 }
  0xb7   : >> { %13888 = vmatpush3.bf16.msra.mxu1 %v15726_v0  ;;  %v1637_v0 = vrot.slane %v11419_v31, 2  ;;  %v1642_v31 = vrot.slane %v17062_v9, 2 }
  0xb8   : >> { %13798 = vmatmul.mubr.bf16.gmra.mxu0 %v1248_v46  ;;  %13889 = vmatprep.subr.bf16.mxu1 %v16275_v10  ;;  %v1813_v46 = vor.u32 %v1812_v55, %v1809_v33  ;;  %v15755_v33 = vld [vmem:[%s20660_s1 + $0x250] sm:$0xff]   ;;  %v15756_v55 = vld [vmem:[%s20660_s1 + $0x208] sm:$0xff]  }
  0xb9   : >> { %13834 = vmatmul.mubr.bf16.gmra.mxu1 %v1438_v45  ;;  %13854 = vmatpush3.bf16.msra.mxu0 %v15725_v3  ;;  %v1638_v3 = vrot.slane %v17016_v32, 2  ;;  %v1827_v45 = vshll.u32 %v17045_v61, 16 }
  0xba   : >> { %13801 = vmatprep.mubr.msk.bf16.mxu0 %vm16276_vm7, %v16275_v10  ;;  %13837 = vmatprep.mubr.msk.bf16.mxu1 %vm16276_vm7, %v16275_v10  ;;  %v1822_v12 = vsel %vm20668_vm15, %v1813_v46, %v1821_v4  ;;  %v1853_v46 = vrot.slane %v1851_v36, 2 }
  0xbb   : >> { %13855 = vmatprep.subr.bf16.mxu0 %v16275_v10  ;;  %13890 = vmatpush3.bf16.msra.mxu1 %v15728_v7  ;;  %v15741_v7 = vld [vmem:[%s20660_s1 + $0x238] sm:$0xff]   ;;  %v1829_v1 = vrot.slane %v1827_v45, 3  ;;  %v1646_v45 = vrot.slane %v15757_v59, 2 }
  0xbc   : >> { %13891 = vmatprep.subr.bf16.mxu1 %v16275_v10  ;;  %v15780_v59 = vld [vmem:[%s16641_s15 + $0x54] sm:$0xff]  }
  0xbd   : >> { %13856 = vmatpush3.bf16.msra.mxu0 %v15727_v8  ;;  %v1639_v8 = vsel %vm1433_vm11, %v1637_v0, %v1638_v3  ;;  %v1830_v18 = vor.u32 %v1829_v1, %v1826_v13  ;;  %v15759_v0 = vld [vmem:[%s20660_s1 + $0x248] sm:$0xff]   ;;  %v15761_v13 = vld [vmem:[%s20660_s1 + $0x240] sm:$0xff]  }
  0xbe   : >> { %13857 = vmatprep.subr.bf16.mxu0 %v16275_v10 }
  0xbf   : >> { %13892 = vmatpush3.bf16.msra.mxu1 %v15730_v14  ;;  %v15744_v14 = vld [vmem:[%s20660_s1 + $0x278] sm:$0xff]   ;;  %v1831_v11 = vsel %vm20668_vm15, %v1821_v4, %v1830_v18 }
  0xc0   : >> { %13802 = vmatmul.mubr.bf16.gmra.mxu0 %v1257_v16  ;;  %13893 = vmatprep.subr.bf16.mxu1 %v16275_v10  ;;  %v1640_v16 = vrot.slane %v17045_v61, 2 }
  0xc1   : >> { %13838 = vmatmul.mubr.bf16.gmra.mxu1 %v1440_v20  ;;  %13858 = vmatpush3.bf16.msra.mxu0 %v15729_v17  ;;  %v1833_v17 = vshrl.u32 %v17062_v9, 16  ;;  %v15745_v20 = vld [vmem:[%s20660_s1 + $0x228] sm:$0xff]  }
  0xc2   : >> { %13805 = vmatprep.mubr.msk.bf16.mxu0 %vm16276_vm7, %v16275_v10  ;;  %13841 = vmatprep.mubr.msk.bf16.mxu1 %vm16276_vm7, %v16275_v10  ;;  %v1641_v24 = vsel %vm1433_vm11, %v1638_v3, %v1640_v16  ;;  %v1643_v40 = vsel %vm1433_vm11, %v1640_v16, %v1642_v31  ;;  %v2018_v16 = vrot.slane %v17016_v32, 3 }
  0xc3   : >> { %13859 = vmatprep.subr.bf16.mxu0 %v16275_v10  ;;  %13894 = vmatpush3.bf16.msra.mxu1 %v15731_v21  ;;  %v15746_v21 = vld [vmem:[%s20660_s1 + $0x270] sm:$0xff]   ;;  %v1835_v19 = vrot.slane %v1833_v17, 2  ;;  %v15764_v17 = vld [vmem:[%s20660_s1 + $0x2b8] sm:$0xff]  }
  0xc4   : >> { %13895 = vmatprep.subr.bf16.mxu1 %v16275_v10 }
  0xc5   : >> { %13860 = vmatpush3.bf16.msra.mxu0 %v15732_v23  ;;  %v17087_v23 = vld [vmem:[%s16641_s15 + $0x28] sm:$0xff]   ;;  %v1839_v34 = vor.u32 %v1838_v26, %v1835_v19 }
  0xc6   : >> { %13861 = vmatprep.subr.bf16.mxu0 %v16275_v10  ;;  %v1845_v35 = vshll.u32 %v17087_v23, 16  ;;  %v1644_v48 = vrot.slane %v17087_v23, 2  ;;  %v15772_v26 = vld [vmem:[%s20660_s1 + $0x2e8] sm:$0xff]  }
  0xc7   : >> { %13896 = vmatpush3.bf16.msra.mxu1 %v15733_v30  ;;  %v1842_v30 = vshrl.u32 %v17087_v23, 16  ;;  %v1840_v41 = vsel %vm20668_vm15, %v1830_v18, %v1839_v34  ;;  %v15765_v18 = vld [vmem:[%s20660_s1 + $0x2b0] sm:$0xff]  }
  0xc8   : >> { %13806 = vmatmul.mubr.bf16.gmra.mxu0 %v1266_v22  ;;  %13897 = vmatprep.subr.bf16.mxu1 %v16275_v10  ;;  %v15748_v22 = vld [vmem:[%s20660_s1 + $0x220] sm:$0xff]   ;;  %v1847_v29 = vrot.slane %v1845_v35, 3  ;;  %v1647_v1 = vsel %vm1433_vm11, %v1644_v48, %v1646_v45  ;;  %v15776_v35 = vld [vmem:[%s20660_s1 + $0x2d8] sm:$0xff]  }
  0xc9   : >> { %13842 = vmatmul.mubr.bf16.gmra.mxu1 %v1442_v6  ;;  %13809 = vmatprep.mubr.msk.bf16.mxu0 %vm16276_vm7, %v16275_v10  ;;  %v15751_v6 = vld [vmem:[%s20660_s1 + $0x260] sm:$0xff]  }
  0xca   : >> { %13845 = vmatprep.mubr.msk.bf16.mxu1 %vm16276_vm7, %v16275_v10  ;;  %13862 = vmatpush3.bf16.msra.mxu0 %v15734_v38  ;;  %v15750_v38 = vld [vmem:[%s20660_s1 + $0x218] sm:$0xff]  }
  0xcb   : >> { %13898 = vmatpush3.bf16.msra.mxu1 %v15736_v39  ;;  %13863 = vmatprep.subr.bf16.mxu0 %v16275_v10  ;;  %v1844_v39 = vrot.slane %v1842_v30, 2  ;;  %v15770_v30 = vld [vmem:[%s16641_s15 + $0x44] sm:$0xff]  }
  0xcc   : >> { %13899 = vmatprep.subr.bf16.mxu1 %v16275_v10 }
  0xce   : >> { %13864 = vmatpush3.bf16.msra.mxu0 %v15737_v49  ;;  %v15754_v49 = vld [vmem:[%s20660_s1 + $0x210] sm:$0xff]  }
  0xcf   : >> { %13900 = vmatpush3.bf16.msra.mxu1 %v15738_v53  ;;  %13921 = vmatprep.subr.bf16.mxu0 %v16275_v10  ;;  %v1848_v53 = vor.u32 %v1847_v29, %v1844_v39  ;;  %v11523_v39 = vld [vmem:[%s16641_s15 + $0x38] sm:$0xf] }
  0xd0   : >> { %13810 = vmatmul.mubr.bf16.gmra.mxu0 %v1275_v54  ;;  %13957 = vmatprep.subr.bf16.mxu1 %v16275_v10  ;;  %v1854_v54 = vshll.u32 %v17118_v25, 16 }
  0xd1   : >> { %13846 = vmatmul.mubr.bf16.gmra.mxu1 %v1444_v62  ;;  %13865 = vmatprep.mubr.msk.bf16.mxu0 %vm16276_vm7, %v16275_v10  ;;  %v1645_v62 = vsel %vm1433_vm11, %v1642_v31, %v1644_v48  ;;  %v1849_v3 = vsel %vm20668_vm15, %v1839_v34, %v1848_v53  ;;  %v15773_v31 = vld [vmem:[%s20660_s1 + $0x298] sm:$0xff]   ;;  %v2024_v34 = vrot.slane %v17087_v23, 3  ;;  %v15778_v23 = vld [vmem:[%s20660_s1 + $0x2d0] sm:$0xff]   ;;  %v15781_v48 = vld [vmem:[%s20660_s1 + $0x2c8] sm:$0xff]  }
  0xd2   : >> { %13901 = vmatprep.mubr.msk.bf16.mxu1 %vm16276_vm7, %v16275_v10  ;;  %v1856_v4 = vrot.slane %v1854_v54, 3  ;;  %v15782_v54 = vld [vmem:[%s20660_s1 + $0x280] sm:$0xff]  }
  0xd8   : >> { %13866 = vmatmul.mubr.bf16.vlgmr.msra.gmra.mxu0 %v1639_v8  ;;  %v1857_v8 = vor.u32 %v1856_v4, %v1853_v46 }
  0xd9   : >> { %13902 = vmatmul.mubr.bf16.vlgmr.msra.gmra.mxu1 %v1822_v12  ;;  %13922 = vmatpush3.bf16.msra.mxu0 %v15741_v7  ;;  %v15760_v7 = vld [vmem:[%s20660_s1 + $0x200] sm:$0xff]   ;;  %v11474_v12 = vcombine.low %v1995_v5, %v17002_v27  ;;  %v15763_v27 = vld [vmem:[%s16641_s15 + $0x34] sm:$0xff]  }
  0xda   : >> { %13923 = vmatprep.subr.bf16.mxu0 %v16275_v10  ;;  %13869 = vmatprep.mubr.msk.bf16.mxu0 %vm16276_vm7, %v16275_v10  ;;  %v17274_v5 = vld [vmem:[%s16641_s15 + $0x44] sm:$0xff]  }
  0xdb   : >> { %13905 = vmatprep.mubr.msk.bf16.mxu1 %vm16276_vm7, %v16275_v10  ;;  %13958 = vmatpush3.bf16.msra.mxu1 %v15744_v14  ;;  %v1858_v14 = vsel %vm20668_vm15, %v1848_v53, %v1857_v8  ;;  %v2026_v53 = vrot.slane %v17118_v25, 3  ;;  %v15783_v25 = vld [vmem:[%s20660_s1 + $0x2c0] sm:$0xff]   ;;  %vm20718_vm15 = vcmask 1046528  }
  0xdc   : >> { %13959 = vmatprep.subr.bf16.mxu1 %v16275_v10 }
  0xdd   : >> { %13924 = vmatpush3.bf16.msra.mxu0 %v15742_v15  ;;  %v2017_v15 = vrot.slane %v11474_v12, 3 }
  0xde   : >> { %13925 = vmatprep.subr.bf16.mxu0 %v16275_v10 }
  0xdf   : >> { %13960 = vmatpush3.bf16.msra.mxu1 %v15746_v21  ;;  %v2019_v32 = vsel %vm20667_vm3, %v2017_v15, %v2018_v16  ;;  %v15769_v21 = vld [vmem:[%s20660_s1 + $0x2f0] sm:$0xff]  }
  0xe0   : >> { %13870 = vmatmul.mubr.bf16.gmra.mxu0 %v1641_v24  ;;  %13961 = vmatprep.subr.bf16.mxu1 %v16275_v10  ;;  %v15766_v24 = vld [vmem:[%s16641_s15 + $0x3c] sm:$0xff]  }
  0xe1   : >> { %13906 = vmatmul.mubr.bf16.gmra.mxu1 %v1831_v11  ;;  %13926 = vmatpush3.bf16.msra.mxu0 %v15745_v20  ;;  %v2020_v20 = vrot.slane %v17045_v61, 3  ;;  %v15768_v61 = vld [vmem:[%s20660_s1 + $0x2a8] sm:$0xff]   ;;  %v2022_v11 = vrot.slane %v17062_v9, 3  ;;  %v15774_v9 = vld [vmem:[%s20660_s1 + $0x2e0] sm:$0xff]  }
  0xe2   : >> { %13873 = vmatprep.mubr.msk.bf16.mxu0 %vm16276_vm7, %v16275_v10  ;;  %13909 = vmatprep.mubr.msk.bf16.mxu1 %vm16276_vm7, %v16275_v10 }
  0xe3   : >> { %13927 = vmatprep.subr.bf16.mxu0 %v16275_v10  ;;  %13962 = vmatpush3.bf16.msra.mxu1 %v15749_v28  ;;  %v2021_v19 = vsel %vm20667_vm3, %v2018_v16, %v2020_v20  ;;  %v15771_v28 = vld [vmem:[%s20660_s1 + $0x2a0] sm:$0xff]   ;;  %v15787_v16 = vld [vmem:[%s20660_s1 + $0x338] sm:$0xff]  }
  0xe4   : >> { %13963 = vmatprep.subr.bf16.mxu1 %v16275_v10 }
  0xe5   : >> { %13928 = vmatpush3.bf16.msra.mxu0 %v15748_v22  ;;  %v2023_v22 = vsel %vm20667_vm3, %v2020_v20, %v2022_v11 }
  0xe6   : >> { %13929 = vmatprep.subr.bf16.mxu0 %v16275_v10 }
  0xe7   : >> { %13964 = vmatpush3.bf16.msra.mxu1 %v15751_v6  ;;  %v15777_v6 = vld [vmem:[%s20660_s1 + $0x290] sm:$0xff]  }
  0xe8   : >> { %13874 = vmatmul.mubr.bf16.gmra.mxu0 %v1643_v40  ;;  %13965 = vmatprep.subr.bf16.mxu1 %v16275_v10  ;;  %v15775_v40 = vld [vmem:[%s16641_s15 + $0x4c] sm:$0xff]  }
  0xe9   : >> { %13910 = vmatmul.mubr.bf16.gmra.mxu1 %v1840_v41  ;;  %13930 = vmatpush3.bf16.msra.mxu0 %v15750_v38  ;;  %v11522_v38 = vld [vmem:[%s16641_s15 + $0x34] sm:$0xf]  ;;  %v15779_v41 = vld [vmem:[%s20660_s1 + $0x288] sm:$0xff]  }
  0xea   : >> { %13877 = vmatprep.mubr.msk.bf16.mxu0 %vm16276_vm7, %v16275_v10  ;;  %13913 = vmatprep.mubr.msk.bf16.mxu1 %vm16276_vm7, %v16275_v10  ;;  %v11549_v29 = vcombine.low %v11522_v38, %v11523_v39  ;;  %v15792_v38 = vld [vmem:[%s20660_s1 + $0x370] sm:$0xff]  }
  0xeb   : >> { %13931 = vmatprep.subr.bf16.mxu0 %v16275_v10  ;;  %13966 = vmatpush3.bf16.msra.mxu1 %v15753_v47  ;;  %v2025_v47 = vsel %vm20667_vm3, %v2022_v11, %v2024_v34 }
  0xec   : >> { %13967 = vmatprep.subr.bf16.mxu1 %v16275_v10  ;;  %v2415_v36 = vshll.u32 %v11549_v29, 16 }
  0xed   : >> { %13932 = vmatpush3.bf16.msra.mxu0 %v15754_v49  ;;  %v17252_v49 = vld [vmem:[%s16641_s15 + $0x3c] sm:$0xff]  }
  0xee   : >> { %13933 = vmatprep.subr.bf16.mxu0 %v16275_v10 }
  0xef   : >> { %13968 = vmatpush3.bf16.msra.mxu1 %v15755_v33  ;;  %v11563_v33 = vld [vmem:[%s16641_s15 + $0x34] sm:$0xe] }
  0xf0   : >> { %13878 = vmatmul.mubr.bf16.gmra.mxu0 %v1645_v62  ;;  %13969 = vmatprep.subr.bf16.mxu1 %v16275_v10  ;;  %v2413_v62 = vshrl.u32 %v11549_v29, 16  ;;  %v11580_v46 = vcombine.low %v11563_v33, %v11523_v39 }
  0xf1   : >> { %13914 = vmatmul.mubr.bf16.gmra.mxu1 %v1849_v3  ;;  %13881 = vmatprep.mubr.msk.bf16.mxu0 %vm16276_vm7, %v16275_v10  ;;  %v2027_v3 = vsel %vm20667_vm3, %v2024_v34, %v2026_v53  ;;  %vm20717_vm3 = vsmask.f32 7424 }
  0xf2   : >> { %13917 = vmatprep.mubr.msk.bf16.mxu1 %vm16276_vm7, %v16275_v10  ;;  %13934 = vmatpush3.bf16.msra.mxu0 %v15756_v55  ;;  %v2420_v55 = vshll.u32 %v17252_v49, 16 }
  0xf3   : >> { %13970 = vmatpush3.bf16.msra.mxu1 %v15759_v0  ;;  %13935 = vmatprep.subr.bf16.mxu0 %v16275_v10  ;;  %v2417_v0 = vrot.slane %v2415_v36, 1 }
  0xf4   : >> { %13971 = vmatprep.subr.bf16.mxu1 %v16275_v10  ;;  %v2422_v4 = vrot.slane %v2420_v55, 1 }
  0xf5   : >> { %v2418_v8 = vor.u32 %v2417_v0, %v2413_v62 }
  0xf6   : >> { %13936 = vmatpush3.bf16.msra.mxu0 %v15760_v7 }
  0xf7   : >> { %13972 = vmatpush3.bf16.msra.mxu1 %v15761_v13  ;;  %13993 = vmatprep.subr.bf16.mxu0 %v16275_v10 }
  0xf8   : >> { %13882 = vmatmul.mubr.bf16.gmra.mxu0 %v1647_v1  ;;  %14029 = vmatprep.subr.bf16.mxu1 %v16275_v10  ;;  %v2613_v1 = vrot.slane %v11580_v46, 1 }
  0xf9   : >> { %13918 = vmatmul.mubr.bf16.gmra.mxu1 %v1858_v14  ;;  %13937 = vmatprep.mubr.msk.bf16.mxu0 %vm16276_vm7, %v16275_v10  ;;  %v2614_v14 = vrot.slane %v17252_v49, 1 }
  0xfa   : >> { %13973 = vmatprep.mubr.msk.bf16.mxu1 %vm16276_vm7, %v16275_v10 }
 0x100   : >> { %13938 = vmatmul.mubr.bf16.vlgmr.msra.gmra.mxu0 %v2019_v32  ;;  %v2428_v32 = vshll.u32 %v17274_v5, 16 }
 0x101   : >> { %13974 = vmatmul.mubr.bf16.vlgmr.msra.gmra.mxu1 %v15763_v27  ;;  %13994 = vmatpush3.bf16.msra.mxu0 %v15764_v17  ;;  %v2424_v17 = vshrl.u32 %v17252_v49, 16 }
 0x102   : >> { %13995 = vmatprep.subr.bf16.mxu0 %v16275_v10  ;;  %13941 = vmatprep.mubr.msk.bf16.mxu0 %vm16276_vm7, %v16275_v10 }
 0x103   : >> { %13977 = vmatprep.mubr.msk.bf16.mxu1 %vm16276_vm7, %v16275_v10  ;;  %14030 = vmatpush3.bf16.msra.mxu1 %v15767_v58 }
 0x104   : >> { %14031 = vmatprep.subr.bf16.mxu1 %v16275_v10 }
 0x105   : >> { %13996 = vmatpush3.bf16.msra.mxu0 %v15765_v18  ;;  %v2423_v18 = vsel %vm20717_vm3, %v2418_v8, %v2422_v4 }
 0x106   : >> { %13997 = vmatprep.subr.bf16.mxu0 %v16275_v10 }
 0x107   : >> { %14032 = vmatpush3.bf16.msra.mxu1 %v15769_v21 }
 0x108   : >> { %13942 = vmatmul.mubr.bf16.gmra.mxu0 %v2021_v19  ;;  %14033 = vmatprep.subr.bf16.mxu1 %v16275_v10  ;;  %v15788_v19 = vld [vmem:[%s20660_s1 + $0x330] sm:$0xff]  }
 0x109   : >> { %13978 = vmatmul.mubr.bf16.gmra.mxu1 %v15766_v24  ;;  %13998 = vmatpush3.bf16.msra.mxu0 %v15768_v61  ;;  %v2615_v24 = vsel %vm20718_vm15, %v2613_v1, %v2614_v14 }
 0x10a   : >> { %13945 = vmatprep.mubr.msk.bf16.mxu0 %vm16276_vm7, %v16275_v10  ;;  %13981 = vmatprep.mubr.msk.bf16.mxu1 %vm16276_vm7, %v16275_v10 }
 0x10b   : >> { %13999 = vmatprep.subr.bf16.mxu0 %v16275_v10  ;;  %14034 = vmatpush3.bf16.msra.mxu1 %v15772_v26  ;;  %v15790_v26 = vld [vmem:[%s20660_s1 + $0x378] sm:$0xff]  }
 0x10c   : >> { %14035 = vmatprep.subr.bf16.mxu1 %v16275_v10 }
 0x10d   : >> { %14000 = vmatpush3.bf16.msra.mxu0 %v15771_v28  ;;  %v2430_v28 = vrot.slane %v2428_v32, 1 }
 0x10e   : >> { %14001 = vmatprep.subr.bf16.mxu0 %v16275_v10 }
 0x10f   : >> { %14036 = vmatpush3.bf16.msra.mxu1 %v15774_v9  ;;  %v17300_v9 = vld [vmem:[%s16641_s15 + $0x4c] sm:$0xff]  }
 0x110   : >> { %13946 = vmatmul.mubr.bf16.gmra.mxu0 %v2023_v22  ;;  %14037 = vmatprep.subr.bf16.mxu1 %v16275_v10  ;;  %v2440_v1 = vshrl.u32 %v17300_v9, 16 }
 0x111   : >> { %13982 = vmatmul.mubr.bf16.gmra.mxu1 %v15770_v30  ;;  %14002 = vmatpush3.bf16.msra.mxu0 %v15773_v31  ;;  %v2426_v31 = vor.u32 %v2424_v17, %v2422_v4  ;;  %v2618_v4 = vrot.slane %v17300_v9, 1 }
 0x112   : >> { %13949 = vmatprep.mubr.msk.bf16.mxu0 %vm16276_vm7, %v16275_v10  ;;  %13985 = vmatprep.mubr.msk.bf16.mxu1 %vm16276_vm7, %v16275_v10 }
 0x113   : >> { %14003 = vmatprep.subr.bf16.mxu0 %v16275_v10  ;;  %14038 = vmatpush3.bf16.msra.mxu1 %v15776_v35  ;;  %v2616_v35 = vrot.slane %v17274_v5, 1 }
 0x114   : >> { %14039 = vmatprep.subr.bf16.mxu1 %v16275_v10 }
 0x115   : >> { %14004 = vmatpush3.bf16.msra.mxu0 %v15777_v6  ;;  %v2617_v36 = vsel %vm20718_vm15, %v2614_v14, %v2616_v35  ;;  %v2619_v32 = vsel %vm20718_vm15, %v2616_v35, %v2618_v4  ;;  %v15801_v35 = vld [vmem:[%s20660_s1 + $0x350] sm:$0xff]  }
 0x116   : >> { %14005 = vmatprep.subr.bf16.mxu0 %v16275_v10 }
 0x117   : >> { %14040 = vmatpush3.bf16.msra.mxu1 %v15778_v23  ;;  %v15791_v23 = vld [vmem:[%s20660_s1 + $0x328] sm:$0xff]  }
 0x118   : >> { %13950 = vmatmul.mubr.bf16.gmra.mxu0 %v2025_v47  ;;  %14041 = vmatprep.subr.bf16.mxu1 %v16275_v10  ;;  %v2431_v47 = vsel %vm20717_vm3, %v2426_v31, %v2430_v28 }
 0x119   : >> { %13986 = vmatmul.mubr.bf16.gmra.mxu1 %v15775_v40  ;;  %13953 = vmatprep.mubr.msk.bf16.mxu0 %vm16276_vm7, %v16275_v10  ;;  %v2432_v40 = vshrl.u32 %v17274_v5, 16 }
 0x11a   : >> { %13989 = vmatprep.mubr.msk.bf16.mxu1 %vm16276_vm7, %v16275_v10  ;;  %14006 = vmatpush3.bf16.msra.mxu0 %v15779_v41  ;;  %v2436_v41 = vshll.u32 %v17300_v9, 16 }
 0x11b   : >> { %14042 = vmatpush3.bf16.msra.mxu1 %v15781_v48  ;;  %14007 = vmatprep.subr.bf16.mxu0 %v16275_v10  ;;  %v15795_v48 = vld [vmem:[%s20660_s1 + $0x368] sm:$0xff]   ;;  %v2434_v0 = vor.u32 %v2432_v40, %v2430_v28 }
 0x11c   : >> { %14043 = vmatprep.subr.bf16.mxu1 %v16275_v10  ;;  %v2438_v55 = vrot.slane %v2436_v41, 1 }
 0x11e   : >> { %14008 = vmatpush3.bf16.msra.mxu0 %v15782_v54  ;;  %v17328_v54 = vld [vmem:[%s16641_s15 + $0x54] sm:$0xff]   ;;  %v2442_v28 = vor.u32 %v2440_v1, %v2438_v55 }
 0x11f   : >> { %14044 = vmatpush3.bf16.msra.mxu1 %v15783_v25  ;;  %14065 = vmatprep.subr.bf16.mxu0 %v16275_v10  ;;  %v2620_v31 = vrot.slane %v17328_v54, 1 }
 0x120   : >> { %v664_v45 = vpop.f32.mrf.mxu0  ;;  %13954 = vmatmul.mubr.bf16.gmra.mxu0 %v2027_v3  ;;  %14101 = vmatprep.subr.bf16.mxu1 %v16275_v10 }
 0x121   : >> { %v790_v7 = vpop.f32.mrf.mxu1  ;;  %13990 = vmatmul.mubr.bf16.gmra.mxu1 %v15780_v59  ;;  %14009 = vmatprep.mubr.msk.bf16.mxu0 %vm16276_vm7, %v16275_v10  ;;  %v15794_v59 = vld [vmem:[%s20660_s1 + $0x320] sm:$0xff]  }
 0x122   : >> { %v17279_v12 = vadd.f32 %v790_v7, %v664_v45  ;;  %v13651_v13 = vpop.f32.mrf.mxu0  ;;  %14045 = vmatprep.mubr.msk.bf16.mxu1 %vm16276_vm7, %v16275_v10  ;;  %v15797_v45 = vld [vmem:[%s20660_s1 + $0x360] sm:$0xff]   ;;  %v2444_v7 = vshll.u32 %v17328_v54, 16 }
 0x123   : >> { %v13687_v15 = vpop.f32.mrf.mxu1  ;;  %v15796_v13 = vld [vmem:[%s20660_s1 + $0x318] sm:$0xff]  }
 0x124   : >> { %v667_v27 = vpop.f32.mrf.mxu0  ;;  %v2439_v15 = vsel %vm20717_vm3, %v2434_v0, %v2438_v55  ;;  %v15804_v55 = vld [vmem:[%s20660_s1 + $0x348] sm:$0xff]  }
 0x125   : >> { %v793_v58 = vpop.f32.mrf.mxu1 }
 0x126   : >> { %v17290_v20 = vadd.f32 %v793_v58, %v667_v27  ;;  %v13652_v21 = vpop.f32.mrf.mxu0  ;;  %v15799_v58 = vld [vmem:[%s20660_s1 + $0x358] sm:$0xff]  }
 0x127   : >> { %v13688_v61 = vpop.f32.mrf.mxu1  ;;  %v2446_v21 = vrot.slane %v2444_v7, 1  ;;  %v17414_v7 = vld [vmem:[%s16641_s15 + $0x48] sm:$0xff]  }
 0x128   : >> { %v672_v11 = vpop.f32.mrf.mxu0  ;;  %14010 = vmatmul.mubr.bf16.vlgmr.msra.gmra.mxu0 %v2423_v18 }
 0x129   : >> { %v798_v30 = vpop.f32.mrf.mxu1  ;;  %14046 = vmatmul.mubr.bf16.vlgmr.msra.gmra.mxu1 %v2615_v24  ;;  %14066 = vmatpush3.bf16.msra.mxu0 %v15787_v16  ;;  %v17353_v16 = vld [vmem:[%s16641_s15 + $0x5c] ss:$0 sps:$4 sm:$0x11]   ;;  %v15800_v24 = vld [vmem:[%s20660_s1 + $0x310] sm:$0xff]  }
 0x12a   : >> { %v17302_v22 = vadd.f32 %v798_v30, %v672_v11  ;;  %v13655_v34 = vpop.f32.mrf.mxu0  ;;  %14067 = vmatprep.subr.bf16.mxu0 %v16275_v10  ;;  %14013 = vmatprep.mubr.msk.bf16.mxu0 %vm16276_vm7, %v16275_v10 }
 0x12b   : >> { %v13691_v6 = vpop.f32.mrf.mxu1  ;;  %14049 = vmatprep.mubr.msk.bf16.mxu1 %vm16276_vm7, %v16275_v10  ;;  %14102 = vmatpush3.bf16.msra.mxu1 %v15790_v26  ;;  %v17368_v26 = vld [vmem:[%s16641_s15 + $0x3c] sm:$0xf] }
 0x12c   : >> { %v675_v39 = vpop.f32.mrf.mxu0  ;;  %14103 = vmatprep.subr.bf16.mxu1 %v16275_v10  ;;  %v2452_v6 = vshll.u32 %v17353_v16, 16 }
 0x12d   : >> { %v801_v29 = vpop.f32.mrf.mxu1  ;;  %14068 = vmatpush3.bf16.msra.mxu0 %v15788_v19  ;;  %v11589_v19 = vld [vmem:[%s16641_s15 + $0x38] sm:$0xe] }
 0x12e   : >> { %v17323_v49 = vadd.f32 %v801_v29, %v675_v39  ;;  %v13656_v53 = vpop.f32.mrf.mxu0  ;;  %14069 = vmatprep.subr.bf16.mxu0 %v16275_v10  ;;  %v15802_v39 = vld [vmem:[%s20660_s1 + $0x308] sm:$0xff]   ;;  %v17388_v40 = vcombine.low %v11589_v19, %v17368_v26  ;;  %v2447_v29 = vsel %vm20717_vm3, %v2442_v28, %v2446_v21 }
 0x12f   : >> { %v13692_v33 = vpop.f32.mrf.mxu1  ;;  %14104 = vmatpush3.bf16.msra.mxu1 %v15792_v38  ;;  %v2621_v53 = vsel %vm20718_vm15, %v2618_v4, %v2620_v31 }
 0x130   : >> { %v680_v25 = vpop.f32.mrf.mxu0  ;;  %14014 = vmatmul.mubr.bf16.gmra.mxu0 %v2431_v47  ;;  %14105 = vmatprep.subr.bf16.mxu1 %v16275_v10  ;;  %v2985_v0 = vshrl.u32 %v17388_v40, 16 }
 0x131   : >> { %v806_v62 = vpop.f32.mrf.mxu1  ;;  %14050 = vmatmul.mubr.bf16.gmra.mxu1 %v2617_v36  ;;  %14070 = vmatpush3.bf16.msra.mxu0 %v15791_v23  ;;  %v2448_v23 = vshrl.u32 %v17328_v54, 16  ;;  %v17396_v36 = vld [vmem:[%s16641_s15 + $0x40] sm:$0xff]   ;;  %v2454_v54 = vrot.slane %v2452_v6, 1 }
 0x132   : >> { %v17334_v3 = vadd.f32 %v806_v62, %v680_v25  ;;  %v13659_v46 = vpop.f32.mrf.mxu0  ;;  %14017 = vmatprep.mubr.msk.bf16.mxu0 %vm16276_vm7, %v16275_v10  ;;  %14053 = vmatprep.mubr.msk.bf16.mxu1 %vm16276_vm7, %v16275_v10  ;;  %v2622_v25 = vrot.slane %v17353_v16, 1  ;;  %v15805_v62 = vld [vmem:[%s20660_s1 + $0x300] sm:$0xff]   ;;  %v2993_v1 = vshrl.u32 %v17396_v36, 16 }
 0x133   : >> { %v13695_v5 = vpop.f32.mrf.mxu1  ;;  %14071 = vmatprep.subr.bf16.mxu0 %v16275_v10  ;;  %14106 = vmatpush3.bf16.msra.mxu1 %v15795_v48  ;;  %v2988_v46 = vshll.u32 %v17388_v40, 16 }
 0x134   : >> { %v683_v8 = vpop.f32.mrf.mxu0  ;;  %14107 = vmatprep.subr.bf16.mxu1 %v16275_v10  ;;  %v2450_v5 = vor.u32 %v2448_v23, %v2446_v21  ;;  %v2623_v19 = vsel %vm20718_vm15, %v2620_v31, %v2622_v25 }
 0x135   : >> { %v809_v14 = vpop.f32.mrf.mxu1  ;;  %14072 = vmatpush3.bf16.msra.mxu0 %v15794_v59 }
 0x136   : >> { %v17355_v27 = vadd.f32 %v809_v14, %v683_v8  ;;  %v13660_v17 = vpop.f32.mrf.mxu0  ;;  %14073 = vmatprep.subr.bf16.mxu0 %v16275_v10  ;;  %v2996_v14 = vshll.u32 %v17396_v36, 16  ;;  %v2455_v21 = vsel %vm20717_vm3, %v2450_v5, %v2454_v54  ;;  %vm20719_vm3 = vmmov %vm20718_vm15  ;;  %vm20720_vm15 = vsmask.f32 6400 }
 0x137   : >> { %v13696_v18 = vpop.f32.mrf.mxu1  ;;  %14108 = vmatpush3.bf16.msra.mxu1 %v15797_v45  ;;  %v15806_v45 = vld [vmem:[%s20660_s1 + $0x340] sm:$0xff]   ;;  %v2816_v17 = vrot.slane %v17388_v40, 1 }
 0x138   : >> { %v688_v61 = vpop.f32.mrf.mxu0  ;;  %14018 = vmatmul.mubr.bf16.gmra.mxu0 %v2439_v15  ;;  %14109 = vmatprep.subr.bf16.mxu1 %v16275_v10  ;;  %v2998_v28 = vrot.slane %v2996_v14, 2 }
 0x139   : >> { %v814_v11 = vpop.f32.mrf.mxu1  ;;  %14054 = vmatmul.mubr.bf16.gmra.mxu1 %v2619_v32  ;;  %14074 = vmatpush3.bf16.msra.mxu0 %v15796_v13  ;;  %v2987_v32 = vrot.slane %v2985_v0, 1 }
 0x13a   : >> { %v17370_v9 = vadd.f32 %v814_v11, %v688_v61  ;;  %v13663_v30 = vpop.f32.mrf.mxu0  ;;  %14021 = vmatprep.mubr.msk.bf16.mxu0 %vm16276_vm7, %v16275_v10  ;;  %14057 = vmatprep.mubr.msk.bf16.mxu1 %vm16276_vm7, %v16275_v10  ;;  %v2995_v11 = vrot.slane %v2993_v1, 1  ;;  %v2819_v1 = vrot.slane %v17414_v7, 1 }
 0x13b   : >> { %v13699_v34 = vpop.f32.mrf.mxu1  ;;  %14075 = vmatprep.subr.bf16.mxu0 %v16275_v10  ;;  %14110 = vmatpush3.bf16.msra.mxu1 %v15799_v58  ;;  %v2990_v58 = vrot.slane %v2988_v46, 2  ;;  %v17448_v46 = vld [vmem:[%s16641_s15 + $0x50] sm:$0xff]  }
 0x13c   : >> { %v691_v38 = vpop.f32.mrf.mxu0  ;;  %14111 = vmatprep.subr.bf16.mxu1 %v16275_v10  ;;  %v2817_v34 = vrot.slane %v17396_v36, 1  ;;  %v2999_v40 = vor.u32 %v2998_v28, %v2995_v11 }
 0x13d   : >> { %v817_v41 = vpop.f32.mrf.mxu1  ;;  %14076 = vmatpush3.bf16.msra.mxu0 %v15800_v24  ;;  %v2991_v23 = vor.u32 %v2990_v58, %v2987_v32  ;;  %v3011_v32 = vshrl.u32 %v17448_v46, 16  ;;  %v3014_v58 = vshll.u32 %v17448_v46, 16 }
 0x13e   : >> { %v17391_v47 = vadd.f32 %v817_v41, %v691_v38  ;;  %v13664_v48 = vpop.f32.mrf.mxu0  ;;  %14077 = vmatprep.subr.bf16.mxu0 %v16275_v10  ;;  %v3005_v41 = vshll.u32 %v17414_v7, 16  ;;  %v2820_v28 = vsel %vm20719_vm3, %v2817_v34, %v2819_v1 }
 0x13f   : >> { %v13700_v33 = vpop.f32.mrf.mxu1  ;;  %14112 = vmatpush3.bf16.msra.mxu1 %v15801_v35  ;;  %v3002_v35 = vshrl.u32 %v17414_v7, 16 }
 0x140   : >> { %v696_v59 = vpop.f32.mrf.mxu0  ;;  %14022 = vmatmul.mubr.bf16.gmra.mxu0 %v2447_v29  ;;  %14113 = vmatprep.subr.bf16.mxu1 %v16275_v10  ;;  %v3007_v0 = vrot.slane %v3005_v41, 2 }
 0x141   : >> { %v822_v4 = vpop.f32.mrf.mxu1  ;;  %14058 = vmatmul.mubr.bf16.gmra.mxu1 %v2621_v53  ;;  %14025 = vmatprep.mubr.msk.bf16.mxu0 %vm16276_vm7, %v16275_v10  ;;  %v3004_v33 = vrot.slane %v3002_v35, 1 }
 0x142   : >> { %v17416_v8 = vadd.f32 %v822_v4, %v696_v59  ;;  %v13667_v13 = vpop.f32.mrf.mxu0  ;;  %14061 = vmatprep.mubr.msk.bf16.mxu1 %vm16276_vm7, %v16275_v10  ;;  %14078 = vmatpush3.bf16.msra.mxu0 %v15802_v39 }
 0x143   : >> { %v13703_v15 = vpop.f32.mrf.mxu1  ;;  %14114 = vmatpush3.bf16.msra.mxu1 %v15804_v55  ;;  %14079 = vmatprep.subr.bf16.mxu0 %v16275_v10  ;;  %v2818_v55 = vsel %vm20719_vm3, %v2816_v17, %v2817_v34  ;;  %v3008_v17 = vor.u32 %v3007_v0, %v3004_v33  ;;  %v15817_v34 = vld [vmem:[%s20660_s1 + $0x3e8] sm:$0xff]  }
 0x144   : >> { %v699_v16 = vpop.f32.mrf.mxu0  ;;  %14115 = vmatprep.subr.bf16.mxu1 %v16275_v10 }
 0x145   : >> { %v825_v18 = vpop.f32.mrf.mxu1 }
 0x146   : >> { %v17426_v24 = vadd.f32 %v825_v18, %v699_v16  ;;  %v13668_v61 = vpop.f32.mrf.mxu0  ;;  %14080 = vmatpush3.bf16.msra.mxu0 %v15805_v62  ;;  %v3000_v62 = vsel %vm20720_vm15, %v2991_v23, %v2999_v40 }
 0x147   : >> { %v13704_v30 = vpop.f32.mrf.mxu1  ;;  %14116 = vmatpush3.bf16.msra.mxu1 %v15806_v45  ;;  %14137 = vmatprep.subr.bf16.mxu0 %v16275_v10  ;;  %v15812_v45 = vld [vmem:[%s20660_s1 + $0x3f8] sm:$0xff]  }
 0x148   : >> { %v949_v6 = vpop.f32.mrf.mxu0  ;;  %14026 = vmatmul.mubr.bf16.gmra.mxu0 %v2455_v21  ;;  %14173 = vmatprep.subr.bf16.mxu1 %v16275_v10  ;;  %v15813_v30 = vld [vmem:[%s20660_s1 + $0x3a8] sm:$0xff]  }
 0x149   : >> { %v988_v38 = vadd.f32 %v949_v6, %v17279_v12  ;;  %v1152_v39 = vpop.f32.mrf.mxu1  ;;  %14062 = vmatmul.mubr.bf16.gmra.mxu1 %v2623_v19  ;;  %14081 = vmatprep.mubr.msk.bf16.mxu0 %vm16276_vm7, %v16275_v10  ;;  %v15809_v12 = vld [vmem:[%s20660_s1 + $0x3b8] sm:$0xff]   ;;  %v3009_v6 = vsel %vm20720_vm15, %v2999_v40, %v3008_v17 }
 0x14a   : >> { %v13723_v31 = vpop.f32.mrf.mxu0  ;;  %14117 = vmatprep.mubr.msk.bf16.mxu1 %vm16276_vm7, %v16275_v10 }
 0x14b   : >> { %v17439_v29 = vadd.f32 %v1152_v39, %v988_v38  ;;  %v13759_v48 = vpop.f32.mrf.mxu1  ;;  %v3013_v38 = vrot.slane %v3011_v32, 1  ;;  %v3016_v39 = vrot.slane %v3014_v58, 2  ;;  %v17481_v31 = vld [vmem:[%s16641_s15 + $0x58] sm:$0xff]   ;;  %v17515_v58 = vld [vmem:[%s16641_s15 + $0x60] ss:$0 sps:$4 sm:$0x33]  }
 0x14c   : >> { %v952_v53 = vpop.f32.mrf.mxu0 }
 0x14d   : >> { %v989_v54 = vadd.f32 %v952_v53, %v17290_v20  ;;  %v1155_v25 = vpop.f32.mrf.mxu1  ;;  %v15810_v20 = vld [vmem:[%s20660_s1 + $0x3b0] sm:$0xff]   ;;  %v2821_v53 = vrot.slane %v17448_v46, 1 }
 0x14e   : >> { %v13724_v59 = vpop.f32.mrf.mxu0 }
 0x14f   : >> { %v17450_v4 = vadd.f32 %v1155_v25, %v989_v54  ;;  %v13760_v5 = vpop.f32.mrf.mxu1  ;;  %v3017_v54 = vor.u32 %v3016_v39, %v3013_v38  ;;  %v3020_v25 = vshrl.u32 %v17481_v31, 16  ;;  %v15823_v39 = vld [vmem:[%s20660_s1 + $0x3d0] sm:$0xff]  }
 0x150   : >> { %v957_v13 = vpop.f32.mrf.mxu0  ;;  %14082 = vmatmul.mubr.bf16.vlgmr.msra.gmra.mxu0 %v2818_v55 }
 0x151   : >> { %v990_v14 = vadd.f32 %v957_v13, %v17302_v22  ;;  %v1160_v15 = vpop.f32.mrf.mxu1  ;;  %14118 = vmatmul.mubr.bf16.vlgmr.msra.gmra.mxu1 %v3000_v62  ;;  %14138 = vmatpush3.bf16.msra.mxu0 %v15809_v12  ;;  %v15814_v22 = vld [vmem:[%s20660_s1 + $0x3f0] sm:$0xff]   ;;  %v15816_v12 = vld [vmem:[%s20660_s1 + $0x3a0] sm:$0xff]   ;;  %v2822_v13 = vsel %vm20719_vm3, %v2819_v1, %v2821_v53  ;;  %v15821_v1 = vld [vmem:[%s20660_s1 + $0x3d8] sm:$0xff]  }
 0x152   : >> { %v13727_v16 = vpop.f32.mrf.mxu0  ;;  %14139 = vmatprep.subr.bf16.mxu0 %v16275_v10  ;;  %14085 = vmatprep.mubr.msk.bf16.mxu0 %vm16276_vm7, %v16275_v10  ;;  %v15819_v62 = vld [vmem:[%s20660_s1 + $0x3e0] sm:$0xff]  }
 0x153   : >> { %v17465_v18 = vadd.f32 %v1160_v15, %v990_v14  ;;  %v13763_v21 = vpop.f32.mrf.mxu1  ;;  %14121 = vmatprep.mubr.msk.bf16.mxu1 %vm16276_vm7, %v16275_v10  ;;  %14174 = vmatpush3.bf16.msra.mxu1 %v15812_v45  ;;  %v3018_v15 = vsel %vm20720_vm15, %v3008_v17, %v3017_v54  ;;  %v3022_v16 = vrot.slane %v3020_v25, 1  ;;  %v15824_v25 = vld [vmem:[%s20660_s1 + $0x388] sm:$0xff]  }
 0x154   : >> { %v960_v61 = vpop.f32.mrf.mxu0  ;;  %14175 = vmatprep.subr.bf16.mxu1 %v16275_v10 }
 0x155   : >> { %v991_v19 = vadd.f32 %v960_v61, %v17323_v49  ;;  %v1163_v11 = vpop.f32.mrf.mxu1  ;;  %14140 = vmatpush3.bf16.msra.mxu0 %v15810_v20  ;;  %v15818_v20 = vld [vmem:[%s20660_s1 + $0x398] sm:$0xff]  }
 0x156   : >> { %v13728_v35 = vpop.f32.mrf.mxu0  ;;  %14141 = vmatprep.subr.bf16.mxu0 %v16275_v10 }
 0x157   : >> { %v17483_v23 = vadd.f32 %v1163_v11, %v991_v19  ;;  %v13764_v49 = vpop.f32.mrf.mxu1  ;;  %14176 = vmatpush3.bf16.msra.mxu1 %v15814_v22  ;;  %v2823_v19 = vrot.slane %v17481_v31, 1  ;;  %v15822_v11 = vld [vmem:[%s20660_s1 + $0x390] sm:$0xff]   ;;  %v3032_v35 = vshll.u32 %v17515_v58, 16 }
 0x158   : >> { %v965_v41 = vpop.f32.mrf.mxu0  ;;  %14086 = vmatmul.mubr.bf16.gmra.mxu0 %v2820_v28  ;;  %14177 = vmatprep.subr.bf16.mxu1 %v16275_v10 }
 0x159   : >> { %v992_v40 = vadd.f32 %v965_v41, %v17334_v3  ;;  %v1168_v48 = vpop.f32.mrf.mxu1  ;;  %14122 = vmatmul.mubr.bf16.gmra.mxu1 %v3009_v6  ;;  %14142 = vmatpush3.bf16.msra.mxu0 %v15813_v30  ;;  %v3023_v3 = vshll.u32 %v17481_v31, 16 }
 0x15a   : >> { %v13731_v33 = vpop.f32.mrf.mxu0  ;;  %14089 = vmatprep.mubr.msk.bf16.mxu0 %vm16276_vm7, %v16275_v10  ;;  %14125 = vmatprep.mubr.msk.bf16.mxu1 %vm16276_vm7, %v16275_v10 }
 0x15b   : >> { %v17500_v55 = vadd.f32 %v1168_v48, %v992_v40  ;;  %v13767_v59 = vpop.f32.mrf.mxu1  ;;  %14143 = vmatprep.subr.bf16.mxu0 %v16275_v10  ;;  %14178 = vmatpush3.bf16.msra.mxu1 %v15817_v34  ;;  %v3025_v32 = vrot.slane %v3023_v3, 2  ;;  %v2824_v40 = vsel %vm20719_vm3, %v2821_v53, %v2823_v19  ;;  %v15825_v48 = vld [vmem:[%s16641_s15 + $0x60] ss:$0 sps:$4 sm:$0x11]  }
 0x15c   : >> { %v968_v0 = vpop.f32.mrf.mxu0  ;;  %14179 = vmatprep.subr.bf16.mxu1 %v16275_v10  ;;  %v3034_v59 = vrot.slane %v3032_v35, 2 }
 0x15d   : >> { %v993_v5 = vadd.f32 %v968_v0, %v17355_v27  ;;  %v1171_v45 = vpop.f32.mrf.mxu1  ;;  %14144 = vmatpush3.bf16.msra.mxu0 %v15816_v12  ;;  %v3026_v30 = vor.u32 %v3025_v32, %v3022_v16  ;;  %v15829_v32 = vld [vmem:[%s20660_s1 + $0x3c0] sm:$0xff]  }
 0x15e   : >> { %v13732_v14 = vpop.f32.mrf.mxu0  ;;  %14145 = vmatprep.subr.bf16.mxu0 %v16275_v10 }
 0x15f   : >> { %v17517_v21 = vadd.f32 %v1171_v45, %v993_v5  ;;  %v13768_v27 = vpop.f32.mrf.mxu1  ;;  %14180 = vmatpush3.bf16.msra.mxu1 %v15819_v62  ;;  %v3027_v33 = vsel %vm20720_vm15, %v3017_v54, %v3026_v30  ;;  %v2825_v45 = vrot.slane %v15825_v48, 1  ;;  %v15828_v14 = vld [vmem:[%s20660_s1 + $0x380] sm:$0xff]  }
 0x160   : >> { %v973_v22 = vpop.f32.mrf.mxu0  ;;  %14090 = vmatmul.mubr.bf16.gmra.mxu0 %v2822_v13  ;;  %14181 = vmatprep.subr.bf16.mxu1 %v16275_v10  ;;  %v11682_v27 = vld [vmem:[%s16641_s15 + $0x3c] sm:$0xc] }
 0x161   : >> { %v994_v17 = vadd.f32 %v973_v22, %v17370_v9  ;;  %v1176_v61 = vpop.f32.mrf.mxu1  ;;  %14126 = vmatmul.mubr.bf16.gmra.mxu1 %v3018_v15  ;;  %14146 = vmatpush3.bf16.msra.mxu0 %v15818_v20  ;;  %v3029_v9 = vshrl.u32 %v17515_v58, 16  ;;  %v11656_v15 = vld [vmem:[%s16641_s15 + $0x38] sm:$0xc] }
 0x162   : >> { %v13735_v28 = vpop.f32.mrf.mxu0  ;;  %14093 = vmatprep.mubr.msk.bf16.mxu0 %vm16276_vm7, %v16275_v10  ;;  %14129 = vmatprep.mubr.msk.bf16.mxu1 %vm16276_vm7, %v16275_v10 }
 0x163   : >> { %v17534_v6 = vadd.f32 %v1176_v61, %v994_v17  ;;  %v13771_v38 = vpop.f32.mrf.mxu1  ;;  %14147 = vmatprep.subr.bf16.mxu0 %v16275_v10  ;;  %14182 = vmatpush3.bf16.msra.mxu1 %v15821_v1  ;;  %v3031_v3 = vrot.slane %v3029_v9, 1  ;;  %v17572_v1 = vld [vmem:[%s16641_s15 + $0x40] sm:$0xf]  ;;  %v11673_v28 = vcombine.low %v11656_v15, %v17368_v26  ;;  %v15834_v15 = vld [vmem:[%s20660_s1 + $0x430] sm:$0xff]  }
 0x164   : >> { %v976_v49 = vpop.f32.mrf.mxu0  ;;  %14183 = vmatprep.subr.bf16.mxu1 %v16275_v10  ;;  %v17580_v38 = vcombine.low %v11682_v27, %v17572_v1 }
 0x165   : >> { %v995_v34 = vadd.f32 %v976_v49, %v17391_v47  ;;  %v1179_v41 = vpop.f32.mrf.mxu1  ;;  %14148 = vmatpush3.bf16.msra.mxu0 %v15822_v11  ;;  %v15827_v47 = vld [vmem:[%s20660_s1 + $0x3c8] sm:$0xff]   ;;  %v3035_v20 = vor.u32 %v3034_v59, %v3031_v3  ;;  %v2826_v11 = vsel %vm20719_vm3, %v2823_v19, %v2825_v45  ;;  %vm20721_vm3 = vsmask.f32 5376 }
 0x166   : >> { %v13736_v12 = vpop.f32.mrf.mxu0  ;;  %14149 = vmatprep.subr.bf16.mxu0 %v16275_v10  ;;  %v3397_v48 = vrot.slane %v17580_v38, 2 }
 0x167   : >> { %v17549_v62 = vadd.f32 %v1179_v41, %v995_v34  ;;  %v13772_v0 = vpop.f32.mrf.mxu1  ;;  %14184 = vmatpush3.bf16.msra.mxu1 %v15823_v39  ;;  %v3036_v35 = vsel %vm20720_vm15, %v3026_v30, %v3035_v20  ;;  %v17583_v39 = vld [vmem:[%s16641_s15 + $0x44] sm:$0xff]   ;;  %v3194_v30 = vrot.slane %v11673_v28, 2  ;;  %v3195_v41 = vrot.slane %v17396_v36, 2  ;;  %v15833_v36 = vld [vmem:[%s20660_s1 + $0x438] sm:$0xff]  }
 0x168   : >> { %v981_v53 = vpop.f32.mrf.mxu0  ;;  %14094 = vmatmul.mubr.bf16.gmra.mxu0 %v2824_v40  ;;  %14185 = vmatprep.subr.bf16.mxu1 %v16275_v10  ;;  %v3398_v12 = vrot.slane %v17583_v39, 2  ;;  %vm20722_vm15 = vcmask 1044480  }
 0x169   : >> { %v996_v54 = vadd.f32 %v981_v53, %v17416_v8  ;;  %v1184_v5 = vpop.f32.mrf.mxu1  ;;  %14130 = vmatmul.mubr.bf16.gmra.mxu1 %v3027_v33  ;;  %14097 = vmatprep.mubr.msk.bf16.mxu0 %vm16276_vm7, %v16275_v10  ;;  %v3196_v0 = vsel %vm1433_vm11, %v3194_v30, %v3195_v41 }
 0x16a   : >> { %v13739_v13 = vpop.f32.mrf.mxu0  ;;  %14133 = vmatprep.mubr.msk.bf16.mxu1 %vm16276_vm7, %v16275_v10  ;;  %14150 = vmatpush3.bf16.msra.mxu0 %v15824_v25  ;;  %v3399_v53 = vsel %vm1433_vm11, %v3397_v48, %v3398_v12  ;;  %v3199_v48 = vrot.slane %v17448_v46, 2  ;;  %v15843_v46 = vld [vmem:[%s20660_s1 + $0x460] sm:$0xff]  }
 0x16b   : >> { %v17564_v8 = vadd.f32 %v1184_v5, %v996_v54  ;;  %v13775_v16 = vpop.f32.mrf.mxu1  ;;  %14186 = vmatpush3.bf16.msra.mxu1 %v15827_v47  ;;  %14151 = vmatprep.subr.bf16.mxu0 %v16275_v10  ;;  %v17606_v54 = vld [vmem:[%s16641_s15 + $0x4c] sm:$0xff]   ;;  %v15836_v13 = vld [vmem:[%s20660_s1 + $0x478] sm:$0xff]  }
 0x16c   : >> { %v984_v22 = vpop.f32.mrf.mxu0  ;;  %14187 = vmatprep.subr.bf16.mxu1 %v16275_v10  ;;  %v3197_v16 = vrot.slane %v17414_v7, 2  ;;  %v3400_v27 = vrot.slane %v17606_v54, 2  ;;  %v15838_v7 = vld [vmem:[%s20660_s1 + $0x470] sm:$0xff]  }
 0x16d   : >> { %v997_v17 = vadd.f32 %v984_v22, %v17426_v24  ;;  %v1187_v61 = vpop.f32.mrf.mxu1 }
 0x16e   : >> { %v13740_v9 = vpop.f32.mrf.mxu0  ;;  %14152 = vmatpush3.bf16.msra.mxu0 %v15828_v14  ;;  %v3198_v28 = vsel %vm1433_vm11, %v3195_v41, %v3197_v16 }
 0x16f   : >> { %v17585_v49 = vadd.f32 %v1187_v61, %v997_v17  ;;  %v13776_v34 = vpop.f32.mrf.mxu1  ;;  %14188 = vmatpush3.bf16.msra.mxu1 %v15829_v32  ;;  %14209 = vmatprep.subr.bf16.mxu0 %v16275_v10  ;;  %v15837_v9 = vld [vmem:[%s20660_s1 + $0x428] sm:$0xff]  }
 0x170   : >> { %v1363_v24 = vpop.f32.mrf.mxu0  ;;  %14098 = vmatmul.mubr.bf16.gmra.mxu0 %v2826_v11  ;;  %14245 = vmatprep.subr.bf16.mxu1 %v16275_v10  ;;  %v3401_v34 = vsel %vm1433_vm11, %v3398_v12, %v3400_v27  ;;  %v15840_v12 = vld [vmem:[%s20660_s1 + $0x420] sm:$0xff]  }
 0x171   : >> { %v1402_v26 = vadd.f32 %v1363_v24, %v17439_v29  ;;  %v1532_v19 = vpop.f32.mrf.mxu1  ;;  %14134 = vmatmul.mubr.bf16.gmra.mxu1 %v3036_v35  ;;  %14153 = vmatprep.mubr.msk.bf16.mxu0 %vm16276_vm7, %v16275_v10  ;;  %v17638_v24 = vld [vmem:[%s16641_s15 + $0x54] sm:$0xff]  }
 0x172   : >> { %v13795_v40 = vpop.f32.mrf.mxu0  ;;  %14189 = vmatprep.mubr.msk.bf16.mxu1 %vm16276_vm7, %v16275_v10 }
 0x173   : >> { %v17597_v33 = vadd.f32 %v1532_v19, %v1402_v26  ;;  %v13831_v29 = vpop.f32.mrf.mxu1 }
 0x174   : >> { %v1366_v25 = vpop.f32.mrf.mxu0 }
 0x175   : >> { %v1403_v3 = vadd.f32 %v1366_v25, %v17450_v4  ;;  %v1535_v59 = vpop.f32.mrf.mxu1  ;;  %v3402_v25 = vrot.slane %v17638_v24, 2 }
 0x176   : >> { %v13796_v47 = vpop.f32.mrf.mxu0 }
 0x177   : >> { %v17608_v5 = vadd.f32 %v1535_v59, %v1403_v3  ;;  %v13832_v45 = vpop.f32.mrf.mxu1  ;;  %v3200_v47 = vsel %vm1433_vm11, %v3197_v16, %v3199_v48 }
 0x178   : >> { %v1371_v4 = vpop.f32.mrf.mxu0  ;;  %14154 = vmatmul.mubr.bf16.vlgmr.msra.gmra.mxu0 %v3196_v0 }
 0x179   : >> { %v1404_v20 = vadd.f32 %v1371_v4, %v17465_v18  ;;  %v1540_v14 = vpop.f32.mrf.mxu1  ;;  %14190 = vmatmul.mubr.bf16.vlgmr.msra.gmra.mxu1 %v3399_v53  ;;  %14210 = vmatpush3.bf16.msra.mxu0 %v15833_v36  ;;  %v15842_v53 = vld [vmem:[%s20660_s1 + $0x418] sm:$0xff]  }
 0x17a   : >> { %v13799_v32 = vpop.f32.mrf.mxu0  ;;  %14211 = vmatprep.subr.bf16.mxu0 %v16275_v10  ;;  %14157 = vmatprep.mubr.msk.bf16.mxu0 %vm16276_vm7, %v16275_v10  ;;  %v17671_v4 = vld [vmem:[%s16641_s15 + $0x5c] sm:$0xff]  }
 0x17b   : >> { %v17622_v22 = vadd.f32 %v1540_v14, %v1404_v20  ;;  %v13835_v18 = vpop.f32.mrf.mxu1  ;;  %14193 = vmatprep.mubr.msk.bf16.mxu1 %vm16276_vm7, %v16275_v10  ;;  %14246 = vmatpush3.bf16.msra.mxu1 %v15836_v13  ;;  %v3403_v13 = vsel %vm1433_vm11, %v3400_v27, %v3402_v25  ;;  %v3201_v27 = vrot.slane %v17481_v31, 2  ;;  %v15847_v31 = vld [vmem:[%s20660_s1 + $0x450] sm:$0xff]  }
 0x17c   : >> { %v1374_v17 = vpop.f32.mrf.mxu0  ;;  %14247 = vmatprep.subr.bf16.mxu1 %v16275_v10  ;;  %v15846_v18 = vld [vmem:[%s20660_s1 + $0x410] sm:$0xff]  }
 0x17d   : >> { %v1405_v61 = vadd.f32 %v1374_v17, %v17483_v23  ;;  %v1543_v11 = vpop.f32.mrf.mxu1  ;;  %14212 = vmatpush3.bf16.msra.mxu0 %v15834_v15  ;;  %v15841_v23 = vld [vmem:[%s20660_s1 + $0x468] sm:$0xff]   ;;  %v3404_v17 = vrot.slane %v17671_v4, 2 }
 0x17e   : >> { %v13800_v35 = vpop.f32.mrf.mxu0  ;;  %14213 = vmatprep.subr.bf16.mxu0 %v16275_v10 }
 0x17f   : >> { %v17640_v26 = vadd.f32 %v1543_v11, %v1405_v61  ;;  %v13836_v19 = vpop.f32.mrf.mxu1  ;;  %14248 = vmatpush3.bf16.msra.mxu1 %v15838_v7  ;;  %v3202_v35 = vsel %vm1433_vm11, %v3199_v48, %v3201_v27 }
 0x180   : >> { %v1379_v30 = vpop.f32.mrf.mxu0  ;;  %14158 = vmatmul.mubr.bf16.gmra.mxu0 %v3198_v28  ;;  %14249 = vmatprep.subr.bf16.mxu1 %v16275_v10  ;;  %v3405_v19 = vsel %vm1433_vm11, %v3402_v25, %v3404_v17 }
 0x181   : >> { %v1406_v41 = vadd.f32 %v1379_v30, %v17500_v55  ;;  %v1548_v40 = vpop.f32.mrf.mxu1  ;;  %14194 = vmatmul.mubr.bf16.gmra.mxu1 %v3401_v34  ;;  %14214 = vmatpush3.bf16.msra.mxu0 %v15837_v9  ;;  %v15849_v30 = vld [vmem:[%s16641_s15 + $0x64] ss:$0 sps:$4 sm:$0x33]  }
 0x182   : >> { %v13803_v29 = vpop.f32.mrf.mxu0  ;;  %14161 = vmatprep.mubr.msk.bf16.mxu0 %vm16276_vm7, %v16275_v10  ;;  %14197 = vmatprep.mubr.msk.bf16.mxu1 %vm16276_vm7, %v16275_v10 }
 0x183   : >> { %v17656_v55 = vadd.f32 %v1548_v40, %v1406_v41  ;;  %v13839_v3 = vpop.f32.mrf.mxu1  ;;  %14215 = vmatprep.subr.bf16.mxu0 %v16275_v10  ;;  %14250 = vmatpush3.bf16.msra.mxu1 %v15841_v23  ;;  %v15848_v23 = vld [vmem:[%s20660_s1 + $0x408] sm:$0xff]   ;;  %v3569_v29 = vshll.u32 %v17580_v38, 16 }
 0x184   : >> { %v1382_v59 = vpop.f32.mrf.mxu0  ;;  %14251 = vmatprep.subr.bf16.mxu1 %v16275_v10 }
 0x185   : >> { %v1407_v0 = vadd.f32 %v1382_v59, %v17517_v21  ;;  %v1551_v36 = vpop.f32.mrf.mxu1  ;;  %14216 = vmatpush3.bf16.msra.mxu0 %v15840_v12  ;;  %v15845_v21 = vld [vmem:[%s20660_s1 + $0x458] sm:$0xff]   ;;  %v3566_v12 = vshrl.u32 %v17580_v38, 16  ;;  %v3574_v59 = vshrl.u32 %v17583_v39, 16  ;;  %v3406_v38 = vrot.slane %v15849_v30, 2 }
 0x186   : >> { %v13804_v45 = vpop.f32.mrf.mxu0  ;;  %14217 = vmatprep.subr.bf16.mxu0 %v16275_v10 }
 0x187   : >> { %v17673_v20 = vadd.f32 %v1551_v36, %v1407_v0  ;;  %v13840_v14 = vpop.f32.mrf.mxu1  ;;  %14252 = vmatpush3.bf16.msra.mxu1 %v15843_v46  ;;  %v3203_v46 = vrot.slane %v17515_v58, 2  ;;  %v3577_v0 = vshll.u32 %v17583_v39, 16  ;;  %v15852_v58 = vld [vmem:[%s20660_s1 + $0x440] sm:$0xff]   ;;  %v11749_v45 = vld [vmem:[%s16641_s15 + $0x3c] sm:$0x8] }
 0x188   : >> { %v1387_v15 = vpop.f32.mrf.mxu0  ;;  %14162 = vmatmul.mubr.bf16.gmra.mxu0 %v3200_v47  ;;  %14253 = vmatprep.subr.bf16.mxu1 %v16275_v10  ;;  %v3568_v14 = vrot.slane %v3566_v12, 2 }
 0x189   : >> { %v1408_v16 = vadd.f32 %v1387_v15, %v17534_v6  ;;  %v1556_v32 = vpop.f32.mrf.mxu1  ;;  %14198 = vmatmul.mubr.bf16.gmra.mxu1 %v3403_v13  ;;  %14218 = vmatpush3.bf16.msra.mxu0 %v15842_v53 }
 0x18a   : >> { %v13807_v7 = vpop.f32.mrf.mxu0  ;;  %14165 = vmatprep.mubr.msk.bf16.mxu0 %vm16276_vm7, %v16275_v10  ;;  %14201 = vmatprep.mubr.msk.bf16.mxu1 %vm16276_vm7, %v16275_v10 }
 0x18b   : >> { %v17689_v6 = vadd.f32 %v1556_v32, %v1408_v16  ;;  %v13843_v61 = vpop.f32.mrf.mxu1  ;;  %14219 = vmatprep.subr.bf16.mxu0 %v16275_v10  ;;  %14254 = vmatpush3.bf16.msra.mxu1 %v15845_v21  ;;  %v3571_v21 = vrot.slane %v3569_v29, 3  ;;  %v3204_v32 = vsel %vm1433_vm11, %v3201_v27, %v3203_v46  ;;  %v3579_v7 = vrot.slane %v3577_v0, 3 }
 0x18c   : >> { %v1390_v11 = vpop.f32.mrf.mxu0  ;;  %14255 = vmatprep.subr.bf16.mxu1 %v16275_v10 }
 0x18d   : >> { %v1409_v28 = vadd.f32 %v1390_v11, %v17549_v62  ;;  %v1559_v9 = vpop.f32.mrf.mxu1  ;;  %14220 = vmatpush3.bf16.msra.mxu0 %v15846_v18  ;;  %v15850_v62 = vld [vmem:[%s20660_s1 + $0x448] sm:$0xff]   ;;  %v3576_v18 = vrot.slane %v3574_v59, 2  ;;  %v11766_v11 = vcombine.low %v11749_v45, %v17572_v1  ;;  %v3583_v1 = vshrl.u32 %v17606_v54, 16  ;;  %v15855_v45 = vld [vmem:[%s20660_s1 + $0x4b0] sm:$0xff]  }
 0x18e   : >> { %v13808_v34 = vpop.f32.mrf.mxu0  ;;  %14221 = vmatprep.subr.bf16.mxu0 %v16275_v10 }
 0x18f   : >> { %v17704_v41 = vadd.f32 %v1559_v9, %v1409_v28  ;;  %v13844_v40 = vpop.f32.mrf.mxu1  ;;  %14256 = vmatpush3.bf16.msra.mxu1 %v15847_v31  ;;  %v3407_v31 = vsel %vm1433_vm11, %v3404_v17, %v3406_v38  ;;  %v3580_v17 = vor.u32 %v3579_v7, %v3576_v18  ;;  %v3775_v30 = vrot.slane %v11766_v11, 3  ;;  %v15858_v18 = vld [vmem:[%s20660_s1 + $0x4f0] sm:$0xff]   ;;  %v15857_v11 = vld [vmem:[%s20660_s1 + $0x4a8] sm:$0xff]  }
 0x190   : >> { %v1395_v48 = vpop.f32.mrf.mxu0  ;;  %14166 = vmatmul.mubr.bf16.gmra.mxu0 %v3202_v35  ;;  %14257 = vmatprep.subr.bf16.mxu1 %v16275_v10  ;;  %v3776_v40 = vrot.slane %v17583_v39, 3  ;;  %v3585_v46 = vrot.slane %v3583_v1, 2 }
 0x191   : >> { %v1410_v25 = vadd.f32 %v1395_v48, %v17564_v8  ;;  %v1564_v3 = vpop.f32.mrf.mxu1  ;;  %14202 = vmatmul.mubr.bf16.gmra.mxu1 %v3405_v19  ;;  %14169 = vmatprep.mubr.msk.bf16.mxu0 %vm16276_vm7, %v16275_v10  ;;  %v15851_v8 = vld [vmem:[%s20660_s1 + $0x400] sm:$0xff]   ;;  %v3586_v19 = vshll.u32 %v17606_v54, 16 }
 0x192   : >> { %v13811_v36 = vpop.f32.mrf.mxu0  ;;  %14205 = vmatprep.mubr.msk.bf16.mxu1 %vm16276_vm7, %v16275_v10  ;;  %14222 = vmatpush3.bf16.msra.mxu0 %v15848_v23 }
 0x193   : >> { %v17723_v47 = vadd.f32 %v1564_v3, %v1410_v25  ;;  %v13847_v53 = vpop.f32.mrf.mxu1  ;;  %14258 = vmatpush3.bf16.msra.mxu1 %v15850_v62  ;;  %14223 = vmatprep.subr.bf16.mxu0 %v16275_v10  ;;  %v15854_v3 = vld [vmem:[%s20660_s1 + $0x4b8] sm:$0xff]   ;;  %v3588_v59 = vrot.slane %v3586_v19, 3  ;;  %v3777_v36 = vsel %vm20722_vm15, %v3775_v30, %v3776_v40 }
 0x194   : >> { %v1398_v13 = vpop.f32.mrf.mxu0  ;;  %14259 = vmatprep.subr.bf16.mxu1 %v16275_v10 }
 0x195   : >> { %v1411_v15 = vadd.f32 %v1398_v13, %v17585_v49  ;;  %v1567_v16 = vpop.f32.mrf.mxu1  ;;  %v3572_v49 = vor.u32 %v3571_v21, %v3568_v14  ;;  %v3589_v13 = vor.u32 %v3588_v59, %v3585_v46  ;;  %v3592_v14 = vshrl.u32 %v17638_v24, 16 }
 0x196   : >> { %v13812_v61 = vpop.f32.mrf.mxu0  ;;  %14224 = vmatpush3.bf16.msra.mxu0 %v15851_v8  ;;  %v15856_v8 = vld [vmem:[%s20660_s1 + $0x4f8] sm:$0xff]   ;;  %v3595_v21 = vshll.u32 %v17638_v24, 16 }
 0x197   : >> { %v17735_v28 = vadd.f32 %v1567_v16, %v1411_v15  ;;  %v13848_v9 = vpop.f32.mrf.mxu1  ;;  %14260 = vmatpush3.bf16.msra.mxu1 %v15852_v58  ;;  %14281 = vmatprep.subr.bf16.mxu0 %v16275_v10  ;;  %v3581_v25 = vsel %vm20721_vm3, %v3572_v49, %v3580_v17 }
 0x198   : >> { %v1735_v35 = vpop.f32.mrf.mxu0  ;;  %14170 = vmatmul.mubr.bf16.gmra.mxu0 %v3204_v32  ;;  %14317 = vmatprep.subr.bf16.mxu1 %v16275_v10  ;;  %v3594_v9 = vrot.slane %v3592_v14, 2 }
 0x199   : >> { %v1774_v27 = vadd.f32 %v1735_v35, %v17597_v33  ;;  %v1946_v34 = vpop.f32.mrf.mxu1  ;;  %14206 = vmatmul.mubr.bf16.gmra.mxu1 %v3407_v31  ;;  %14225 = vmatprep.mubr.msk.bf16.mxu0 %vm16276_vm7, %v16275_v10  ;;  %v3597_v35 = vrot.slane %v3595_v21, 3 }
 0x19a   : >> { %v13867_v23 = vpop.f32.mrf.mxu0  ;;  %14261 = vmatprep.mubr.msk.bf16.mxu1 %vm16276_vm7, %v16275_v10 }
 0x19b   : >> { %v17747_v62 = vadd.f32 %v1946_v34, %v1774_v27  ;;  %v13903_v33 = vpop.f32.mrf.mxu1  ;;  %v3598_v30 = vor.u32 %v3597_v35, %v3594_v9  ;;  %v11814_v9 = vld [vmem:[%s16641_s15 + $0x68] sm:$0xf]  ;;  %v17844_v35 = vld [vmem:[%s16641_s15 + $0x6c] sm:$0xf] }
 0x19c   : >> { %v1738_v48 = vpop.f32.mrf.mxu0  ;;  %v3601_v33 = vshrl.u32 %v17671_v4, 16 }
 0x19d   : >> { %v1775_v12 = vadd.f32 %v1738_v48, %v17608_v5  ;;  %v1949_v29 = vpop.f32.mrf.mxu1  ;;  %v3604_v48 = vshll.u32 %v17671_v4, 16 }
 0x19e   : >> { %v13868_v0 = vpop.f32.mrf.mxu0 }
 0x19f   : >> { %v17755_v38 = vadd.f32 %v1949_v29, %v1775_v12  ;;  %v13904_v39 = vpop.f32.mrf.mxu1 }
 0x1a0   : >> { %v1743_v5 = vpop.f32.mrf.mxu0  ;;  %14226 = vmatmul.mubr.bf16.vlgmr.msra.gmra.mxu0 %v3581_v25  ;;  %v3603_v39 = vrot.slane %v3601_v33, 2  ;;  %v11841_v33 = vcombine.low %v11814_v9, %v17844_v35  ;;  %v17894_v9 = vld [vmem:[%s16641_s15 + $0x78] sm:$0xff]  }
 0x1a1   : >> { %v1776_v53 = vadd.f32 %v1743_v5, %v17622_v22  ;;  %v1954_v58 = vpop.f32.mrf.mxu1  ;;  %14262 = vmatmul.mubr.bf16.vlgmr.msra.gmra.mxu1 %v3777_v36  ;;  %14282 = vmatpush3.bf16.msra.mxu0 %v15854_v3  ;;  %v3778_v22 = vrot.slane %v17606_v54, 3  ;;  %v3590_v54 = vsel %vm20721_vm3, %v3580_v17, %v3589_v13  ;;  %v15862_v3 = vld [vmem:[%s20660_s1 + $0x4e0] sm:$0xff]   ;;  %v3599_v36 = vsel %vm20721_vm3, %v3589_v13, %v3598_v30  ;;  %v15863_v13 = vld [vmem:[%s20660_s1 + $0x4d8] sm:$0xff]  }
 0x1a2   : >> { %v13871_v15 = vpop.f32.mrf.mxu0  ;;  %14283 = vmatprep.subr.bf16.mxu0 %v16275_v10  ;;  %14229 = vmatprep.mubr.msk.bf16.mxu0 %vm16276_vm7, %v16275_v10  ;;  %v17815_v5 = vld [vmem:[%s16641_s15 + $0x64] ss:$0 sps:$4 sm:$0x77]  }
 0x1a3   : >> { %v17770_v16 = vadd.f32 %v1954_v58, %v1776_v53  ;;  %v13907_v32 = vpop.f32.mrf.mxu1  ;;  %14265 = vmatprep.mubr.msk.bf16.mxu1 %vm16276_vm7, %v16275_v10  ;;  %14318 = vmatpush3.bf16.msra.mxu1 %v15856_v8  ;;  %v3779_v27 = vsel %vm20722_vm15, %v3776_v40, %v3778_v22  ;;  %v15859_v40 = vld [vmem:[%s20660_s1 + $0x4a0] sm:$0xff]   ;;  %v3606_v8 = vrot.slane %v3604_v48, 3 }
 0x1a4   : >> { %v1746_v7 = vpop.f32.mrf.mxu0  ;;  %14319 = vmatprep.subr.bf16.mxu1 %v16275_v10  ;;  %v15864_v32 = vld [vmem:[%s20660_s1 + $0x490] sm:$0xff]  }
 0x1a5   : >> { %v1777_v61 = vadd.f32 %v1746_v7, %v17640_v26  ;;  %v1957_v31 = vpop.f32.mrf.mxu1  ;;  %14284 = vmatpush3.bf16.msra.mxu0 %v15855_v45  ;;  %v15860_v26 = vld [vmem:[%s20660_s1 + $0x4e8] sm:$0xff]   ;;  %v3613_v7 = vshll.u32 %v17815_v5, 16 }
 0x1a6   : >> { %v13872_v49 = vpop.f32.mrf.mxu0  ;;  %14285 = vmatprep.subr.bf16.mxu0 %v16275_v10 }
 0x1a7   : >> { %v17785_v34 = vadd.f32 %v1957_v31, %v1777_v61  ;;  %v13908_v1 = vpop.f32.mrf.mxu1  ;;  %14320 = vmatpush3.bf16.msra.mxu1 %v15858_v18  ;;  %v3610_v18 = vshrl.u32 %v17815_v5, 16 }
 0x1a8   : >> { %v1751_v17 = vpop.f32.mrf.mxu0  ;;  %14230 = vmatmul.mubr.bf16.gmra.mxu0 %v3590_v54  ;;  %14321 = vmatprep.subr.bf16.mxu1 %v16275_v10 }
 0x1a9   : >> { %v1778_v19 = vadd.f32 %v1751_v17, %v17656_v55  ;;  %v1962_v23 = vpop.f32.mrf.mxu1  ;;  %14266 = vmatmul.mubr.bf16.gmra.mxu1 %v3779_v27  ;;  %14286 = vmatpush3.bf16.msra.mxu0 %v15857_v11  ;;  %v3780_v55 = vrot.slane %v17638_v24, 3  ;;  %v15861_v24 = vld [vmem:[%s20660_s1 + $0x498] sm:$0xff]   ;;  %v15865_v11 = vld [vmem:[%s20660_s1 + $0x4d0] sm:$0xff]   ;;  %v3615_v17 = vrot.slane %v3613_v7, 3 }
 0x1aa   : >> { %v13875_v12 = vpop.f32.mrf.mxu0  ;;  %14233 = vmatprep.mubr.msk.bf16.mxu0 %vm16276_vm7, %v16275_v10  ;;  %14269 = vmatprep.mubr.msk.bf16.mxu1 %vm16276_vm7, %v16275_v10 }
 0x1ab   : >> { %v17802_v29 = vadd.f32 %v1962_v23, %v1778_v19  ;;  %v13911_v25 = vpop.f32.mrf.mxu1  ;;  %14287 = vmatprep.subr.bf16.mxu0 %v16275_v10  ;;  %14322 = vmatpush3.bf16.msra.mxu1 %v15860_v26  ;;  %v3781_v58 = vsel %vm20722_vm15, %v3778_v22, %v3780_v55  ;;  %v3607_v22 = vor.u32 %v3606_v8, %v3603_v39  ;;  %v3612_v26 = vrot.slane %v3610_v18, 2  ;;  %v15870_v8 = vld [vmem:[%s20660_s1 + $0x4c0] sm:$0xff]  }
 0x1ac   : >> { %v1754_v46 = vpop.f32.mrf.mxu0  ;;  %14323 = vmatprep.subr.bf16.mxu1 %v16275_v10 }
 0x1ad   : >> { %v1779_v59 = vadd.f32 %v1754_v46, %v17673_v20  ;;  %v1965_v0 = vpop.f32.mrf.mxu1  ;;  %14288 = vmatpush3.bf16.msra.mxu0 %v15859_v40  ;;  %v15866_v40 = vld [vmem:[%s20660_s1 + $0x488] sm:$0xff]  }
 0x1ae   : >> { %v13876_v53 = vpop.f32.mrf.mxu0  ;;  %14289 = vmatprep.subr.bf16.mxu0 %v16275_v10 }
 0x1af   : >> { %v17819_v45 = vadd.f32 %v1965_v0, %v1779_v59  ;;  %v13912_v20 = vpop.f32.mrf.mxu1  ;;  %14324 = vmatpush3.bf16.msra.mxu1 %v15862_v3  ;;  %v3616_v3 = vor.u32 %v3615_v17, %v3612_v26  ;;  %v3784_v59 = vrot.slane %v17815_v5, 3  ;;  %v15869_v0 = vld [vmem:[%s20660_s1 + $0x480] sm:$0xff]   ;;  %v15874_v17 = vld [vmem:[%s20660_s1 + $0x538] sm:$0xff]  }
 0x1b0   : >> { %v1759_v14 = vpop.f32.mrf.mxu0  ;;  %14234 = vmatmul.mubr.bf16.gmra.mxu0 %v3599_v36  ;;  %14325 = vmatprep.subr.bf16.mxu1 %v16275_v10  ;;  %v17871_v36 = vld [vmem:[%s16641_s15 + $0x70] sm:$0xff]  }
 0x1b1   : >> { %v1780_v21 = vadd.f32 %v1759_v14, %v17689_v6  ;;  %v1970_v15 = vpop.f32.mrf.mxu1  ;;  %14270 = vmatmul.mubr.bf16.gmra.mxu1 %v3781_v58  ;;  %14290 = vmatpush3.bf16.msra.mxu0 %v15861_v24  ;;  %v3782_v6 = vrot.slane %v17671_v4, 3  ;;  %v3608_v4 = vsel %vm20721_vm3, %v3598_v30, %v3607_v22  ;;  %v15868_v30 = vld [vmem:[%s20660_s1 + $0x4c8] sm:$0xff]   ;;  %v3617_v20 = vsel %vm20721_vm3, %v3607_v22, %v3616_v3  ;;  %v15875_v3 = vld [vmem:[%s20660_s1 + $0x530] sm:$0xff]  }
 0x1b2   : >> { %v13879_v61 = vpop.f32.mrf.mxu0  ;;  %14237 = vmatprep.mubr.msk.bf16.mxu0 %vm16276_vm7, %v16275_v10  ;;  %14273 = vmatprep.mubr.msk.bf16.mxu1 %vm16276_vm7, %v16275_v10  ;;  %vm20723_vm3 = vsmask.f32 7424 }
 0x1b3   : >> { %v17836_v31 = vadd.f32 %v1970_v15, %v1780_v21  ;;  %v13915_v54 = vpop.f32.mrf.mxu1  ;;  %14291 = vmatprep.subr.bf16.mxu0 %v16275_v10  ;;  %14326 = vmatpush3.bf16.msra.mxu1 %v15863_v13  ;;  %v3783_v23 = vsel %vm20722_vm15, %v3780_v55, %v3782_v6  ;;  %v3785_v14 = vsel %vm20722_vm15, %v3782_v6, %v3784_v59  ;;  %v4171_v21 = vshrl.u32 %v11841_v33, 16  ;;  %vm20724_vm15 = vmmov %vm20723_vm3 }
 0x1b4   : >> { %v1762_v49 = vpop.f32.mrf.mxu0  ;;  %14327 = vmatprep.subr.bf16.mxu1 %v16275_v10 }
 0x1b5   : >> { %v1781_v27 = vadd.f32 %v1762_v49, %v17704_v41  ;;  %v1973_v1 = vpop.f32.mrf.mxu1  ;;  %14292 = vmatpush3.bf16.msra.mxu0 %v15864_v32  ;;  %v4178_v32 = vshll.u32 %v17871_v36, 16 }
 0x1b6   : >> { %v13880_v19 = vpop.f32.mrf.mxu0  ;;  %14293 = vmatprep.subr.bf16.mxu0 %v16275_v10 }
 0x1b7   : >> { %v17855_v48 = vadd.f32 %v1973_v1, %v1781_v27  ;;  %v13916_v41 = vpop.f32.mrf.mxu1  ;;  %14328 = vmatpush3.bf16.msra.mxu1 %v15865_v11  ;;  %v4180_v11 = vrot.slane %v4178_v32, 1 }
 0x1b8   : >> { %v1767_v12 = vpop.f32.mrf.mxu0  ;;  %14238 = vmatmul.mubr.bf16.gmra.mxu0 %v3608_v4  ;;  %14329 = vmatprep.subr.bf16.mxu1 %v16275_v10  ;;  %v15871_v4 = vld [vmem:[%s16641_s15 + $0x68] sm:$0xff]  }
 0x1b9   : >> { %v1782_v55 = vadd.f32 %v1767_v12, %v17723_v47  ;;  %v1978_v25 = vpop.f32.mrf.mxu1  ;;  %14274 = vmatmul.mubr.bf16.gmra.mxu1 %v3783_v23  ;;  %14241 = vmatprep.mubr.msk.bf16.mxu0 %vm16276_vm7, %v16275_v10  ;;  %v4173_v47 = vshll.u32 %v11841_v33, 16  ;;  %v4186_v33 = vshll.u32 %v17894_v9, 16 }
 0x1ba   : >> { %v13883_v46 = vpop.f32.mrf.mxu0  ;;  %14277 = vmatprep.mubr.msk.bf16.mxu1 %vm16276_vm7, %v16275_v10  ;;  %14294 = vmatpush3.bf16.msra.mxu0 %v15866_v40  ;;  %v4182_v40 = vshrl.u32 %v17871_v36, 16 }
 0x1bb   : >> { %v17873_v24 = vadd.f32 %v1978_v25, %v1782_v55  ;;  %v13919_v39 = vpop.f32.mrf.mxu1  ;;  %14330 = vmatpush3.bf16.msra.mxu1 %v15868_v30  ;;  %14295 = vmatprep.subr.bf16.mxu0 %v16275_v10  ;;  %v4175_v15 = vrot.slane %v4173_v47, 1  ;;  %v17919_v47 = vld [vmem:[%s16641_s15 + $0x80] sm:$0xff]  }
 0x1bc   : >> { %v1770_v53 = vpop.f32.mrf.mxu0  ;;  %14331 = vmatprep.subr.bf16.mxu1 %v16275_v10  ;;  %v4184_v59 = vor.u32 %v4182_v40, %v4180_v11  ;;  %v4194_v32 = vshll.u32 %v17919_v47, 16 }
 0x1bd   : >> { %v1783_v5 = vadd.f32 %v1770_v53, %v17735_v28  ;;  %v1981_v58 = vpop.f32.mrf.mxu1  ;;  %v4176_v54 = vor.u32 %v4175_v15, %v4171_v21  ;;  %v4190_v15 = vshrl.u32 %v17894_v9, 16 }
 0x1be   : >> { %v13884_v13 = vpop.f32.mrf.mxu0  ;;  %14296 = vmatpush3.bf16.msra.mxu0 %v15869_v0  ;;  %v4188_v0 = vrot.slane %v4186_v33, 1  ;;  %v15885_v33 = vld [vmem:[%s20660_s1 + $0x518] sm:$0xff]  }
 0x1bf   : >> { %v17884_v18 = vadd.f32 %v1981_v58, %v1783_v5  ;;  %v13920_v7 = vpop.f32.mrf.mxu1  ;;  %14332 = vmatpush3.bf16.msra.mxu1 %v15870_v8  ;;  %14353 = vmatprep.subr.bf16.mxu0 %v16275_v10  ;;  %v4181_v23 = vsel %vm20723_vm3, %v4176_v54, %v4180_v11  ;;  %v15880_v8 = vld [vmem:[%s20660_s1 + $0x570] sm:$0xff]   ;;  %v15879_v13 = vld [vmem:[%s20660_s1 + $0x528] sm:$0xff]   ;;  %v15883_v54 = vld [vmem:[%s20660_s1 + $0x520] sm:$0xff]  }
 0x1c0   : >> { %v2115_v28 = vpop.f32.mrf.mxu0  ;;  %14242 = vmatmul.mubr.bf16.gmra.mxu0 %v3617_v20  ;;  %14389 = vmatprep.subr.bf16.mxu1 %v16275_v10  ;;  %v15876_v5 = vld [vmem:[%s16641_s15 + $0x70] sm:$0xff]   ;;  %v4189_v21 = vsel %vm20724_vm15, %v4184_v59, %v4188_v0  ;;  %vm20725_vm15 = vmmov %vm20723_vm3 }
 0x1c1   : >> { %v2154_v22 = vadd.f32 %v2115_v28, %v17747_v62  ;;  %v2307_v61 = vpop.f32.mrf.mxu1  ;;  %14278 = vmatmul.mubr.bf16.gmra.mxu1 %v3785_v14  ;;  %14297 = vmatprep.mubr.msk.bf16.mxu0 %vm16276_vm7, %v16275_v10 }
 0x1c2   : >> { %v13939_v6 = vpop.f32.mrf.mxu0  ;;  %14333 = vmatprep.mubr.msk.bf16.mxu1 %vm16276_vm7, %v16275_v10 }
 0x1c3   : >> { %v17896_v49 = vadd.f32 %v2307_v61, %v2154_v22  ;;  %v13975_v27 = vpop.f32.mrf.mxu1 }
 0x1c4   : >> { %v2118_v1 = vpop.f32.mrf.mxu0  ;;  %v4192_v27 = vor.u32 %v4190_v15, %v4188_v0 }
 0x1c5   : >> { %v2155_v62 = vadd.f32 %v2118_v1, %v17755_v38  ;;  %v2310_v26 = vpop.f32.mrf.mxu1  ;;  %v15878_v38 = vld [vmem:[%s20660_s1 + $0x578] sm:$0xff]   ;;  %v4196_v1 = vrot.slane %v4194_v32, 1 }
 0x1c6   : >> { %v13940_v19 = vpop.f32.mrf.mxu0 }
 0x1c7   : >> { %v17906_v41 = vadd.f32 %v2310_v26, %v2155_v62  ;;  %v13976_v30 = vpop.f32.mrf.mxu1  ;;  %v15886_v26 = vld [vmem:[%s20660_s1 + $0x560] sm:$0xff]   ;;  %v15881_v19 = vld [vmem:[%s16641_s15 + $0x78] sm:$0xff]  }
 0x1c8   : >> { %v2123_v12 = vpop.f32.mrf.mxu0  ;;  %14298 = vmatmul.mubr.bf16.vlgmr.msra.gmra.mxu0 %v15871_v4  ;;  %v17953_v4 = vld [vmem:[%s16641_s15 + $0x88] sm:$0xff]  }
 0x1c9   : >> { %v2156_v55 = vadd.f32 %v2123_v12, %v17770_v16  ;;  %v2315_v25 = vpop.f32.mrf.mxu1  ;;  %14334 = vmatmul.mubr.bf16.vlgmr.msra.gmra.mxu1 %v4181_v23  ;;  %14354 = vmatpush3.bf16.msra.mxu0 %v15874_v17  ;;  %v4198_v12 = vshrl.u32 %v17919_v47, 16 }
 0x1ca   : >> { %v13943_v46 = vpop.f32.mrf.mxu0  ;;  %14355 = vmatprep.subr.bf16.mxu0 %v16275_v10  ;;  %14301 = vmatprep.mubr.msk.bf16.mxu0 %vm16276_vm7, %v16275_v10 }
 0x1cb   : >> { %v17921_v39 = vadd.f32 %v2315_v25, %v2156_v55  ;;  %v13979_v16 = vpop.f32.mrf.mxu1  ;;  %14337 = vmatprep.mubr.msk.bf16.mxu1 %vm16276_vm7, %v16275_v10  ;;  %14390 = vmatpush3.bf16.msra.mxu1 %v15878_v38  ;;  %v4197_v38 = vsel %vm20723_vm3, %v4192_v27, %v4196_v1  ;;  %v4202_v55 = vshll.u32 %v17953_v4, 16 }
 0x1cc   : >> { %v2126_v53 = vpop.f32.mrf.mxu0  ;;  %14391 = vmatprep.subr.bf16.mxu1 %v16275_v10  ;;  %v15890_v16 = vld [vmem:[%s20660_s1 + $0x510] sm:$0xff]  }
 0x1cd   : >> { %v2157_v58 = vadd.f32 %v2126_v53, %v17785_v34  ;;  %v2318_v20 = vpop.f32.mrf.mxu1  ;;  %14356 = vmatpush3.bf16.msra.mxu0 %v15875_v3  ;;  %v15884_v34 = vld [vmem:[%s20660_s1 + $0x568] sm:$0xff]   ;;  %v4200_v53 = vor.u32 %v4198_v12, %v4196_v1  ;;  %v18027_v12 = vld [vmem:[%s16641_s15 + $0x70] sm:$0xf] }
 0x1ce   : >> { %v13944_v14 = vpop.f32.mrf.mxu0  ;;  %14357 = vmatprep.subr.bf16.mxu0 %v16275_v10 }
 0x1cf   : >> { %v17938_v7 = vadd.f32 %v2318_v20, %v2157_v58  ;;  %v13980_v28 = vpop.f32.mrf.mxu1  ;;  %14392 = vmatpush3.bf16.msra.mxu1 %v15880_v8  ;;  %v17986_v58 = vld [vmem:[%s16641_s15 + $0x90] ss:$0 sps:$4 sm:$0x11]  }
 0x1d0   : >> { %v2131_v22 = vpop.f32.mrf.mxu0  ;;  %14302 = vmatmul.mubr.bf16.gmra.mxu0 %v15876_v5  ;;  %14393 = vmatprep.subr.bf16.mxu1 %v16275_v10  ;;  %v4204_v5 = vrot.slane %v4202_v55, 1 }
 0x1d1   : >> { %v2158_v61 = vadd.f32 %v2131_v22, %v17802_v29  ;;  %v2323_v6 = vpop.f32.mrf.mxu1  ;;  %14338 = vmatmul.mubr.bf16.gmra.mxu1 %v4189_v21  ;;  %14358 = vmatpush3.bf16.msra.mxu0 %v15879_v13  ;;  %v15891_v13 = vld [vmem:[%s20660_s1 + $0x550] sm:$0xff]   ;;  %v15887_v21 = vld [vmem:[%s16641_s15 + $0x80] sm:$0xff]   ;;  %v15892_v22 = vld [vmem:[%s20660_s1 + $0x508] sm:$0xff]  }
 0x1d2   : >> { %v13947_v11 = vpop.f32.mrf.mxu0  ;;  %14305 = vmatprep.mubr.msk.bf16.mxu0 %vm16276_vm7, %v16275_v10  ;;  %14341 = vmatprep.mubr.msk.bf16.mxu1 %vm16276_vm7, %v16275_v10 }
 0x1d3   : >> { %v17955_v29 = vadd.f32 %v2323_v6, %v2158_v61  ;;  %v13983_v62 = vpop.f32.mrf.mxu1  ;;  %14359 = vmatprep.subr.bf16.mxu0 %v16275_v10  ;;  %14394 = vmatpush3.bf16.msra.mxu1 %v15884_v34  ;;  %v4205_v34 = vsel %vm20725_vm15, %v4200_v53, %v4204_v5  ;;  %v4206_v61 = vshrl.u32 %v17953_v4, 16  ;;  %v4210_v6 = vshll.u32 %v17986_v58, 16  ;;  %v18038_v53 = vld [vmem:[%s16641_s15 + $0x74] sm:$0xff]  }
 0x1d4   : >> { %v2134_v17 = vpop.f32.mrf.mxu0  ;;  %14395 = vmatprep.subr.bf16.mxu1 %v16275_v10  ;;  %vm20726_vm15 = vcmask 1046528  }
 0x1d5   : >> { %v2159_v23 = vadd.f32 %v2134_v17, %v17819_v45  ;;  %v2326_v40 = vpop.f32.mrf.mxu1  ;;  %14360 = vmatpush3.bf16.msra.mxu0 %v15883_v54  ;;  %v15889_v45 = vld [vmem:[%s20660_s1 + $0x558] sm:$0xff]   ;;  %v4208_v17 = vor.u32 %v4206_v61, %v4204_v5 }
 0x1d6   : >> { %v13948_v30 = vpop.f32.mrf.mxu0  ;;  %14361 = vmatprep.subr.bf16.mxu0 %v16275_v10 }
 0x1d7   : >> { %v17971_v25 = vadd.f32 %v2326_v40, %v2159_v23  ;;  %v13984_v3 = vpop.f32.mrf.mxu1  ;;  %14396 = vmatpush3.bf16.msra.mxu1 %v15886_v26  ;;  %v15896_v23 = vld [vmem:[%s20660_s1 + $0x500] sm:$0xff]  }
 0x1d8   : >> { %v2139_v46 = vpop.f32.mrf.mxu0  ;;  %14306 = vmatmul.mubr.bf16.gmra.mxu0 %v15881_v19  ;;  %14397 = vmatprep.subr.bf16.mxu1 %v16275_v10  ;;  %v4212_v19 = vrot.slane %v4210_v6, 1  ;;  %v15897_v30 = vld [vmem:[%s20660_s1 + $0x540] sm:$0xff]   ;;  %v15893_v3 = vld [vmem:[%s16641_s15 + $0x88] sm:$0xff]  }
 0x1d9   : >> { %v2160_v59 = vadd.f32 %v2139_v46, %v17836_v31  ;;  %v2331_v0 = vpop.f32.mrf.mxu1  ;;  %14342 = vmatmul.mubr.bf16.gmra.mxu1 %v4197_v38  ;;  %14362 = vmatpush3.bf16.msra.mxu0 %v15885_v33  ;;  %v11881_v38 = vld [vmem:[%s16641_s15 + $0x6c] sm:$0xe] }
 0x1da   : >> { %v13951_v8 = vpop.f32.mrf.mxu0  ;;  %14309 = vmatprep.mubr.msk.bf16.mxu0 %vm16276_vm7, %v16275_v10  ;;  %14345 = vmatprep.mubr.msk.bf16.mxu1 %vm16276_vm7, %v16275_v10 }
 0x1db   : >> { %v17988_v31 = vadd.f32 %v2331_v0, %v2160_v59  ;;  %v13987_v20 = vpop.f32.mrf.mxu1  ;;  %14363 = vmatprep.subr.bf16.mxu0 %v16275_v10  ;;  %14398 = vmatpush3.bf16.msra.mxu1 %v15889_v45  ;;  %v18035_v8 = vcombine.low %v11881_v38, %v18027_v12 }
 0x1dc   : >> { %v2142_v14 = vpop.f32.mrf.mxu0  ;;  %14399 = vmatprep.subr.bf16.mxu1 %v16275_v10 }
 0x1dd   : >> { %v2161_v15 = vadd.f32 %v2142_v14, %v17855_v48  ;;  %v2334_v32 = vpop.f32.mrf.mxu1  ;;  %14364 = vmatpush3.bf16.msra.mxu0 %v15890_v16  ;;  %v15895_v48 = vld [vmem:[%s20660_s1 + $0x548] sm:$0xff]   ;;  %v4213_v16 = vsel %vm20723_vm3, %v4208_v17, %v4212_v19  ;;  %vm20727_vm3 = vmmov %vm20726_vm15  ;;  %v15904_v17 = vld [vmem:[%s20660_s1 + $0x5f8] sm:$0xff]  }
 0x1de   : >> { %v13952_v28 = vpop.f32.mrf.mxu0  ;;  %14365 = vmatprep.subr.bf16.mxu0 %v16275_v10 }
 0x1df   : >> { %v18004_v54 = vadd.f32 %v2334_v32, %v2161_v15  ;;  %v13988_v11 = vpop.f32.mrf.mxu1  ;;  %14400 = vmatpush3.bf16.msra.mxu1 %v15891_v13  ;;  %v4574_v32 = vrot.slane %v18035_v8, 1  ;;  %v4575_v28 = vrot.slane %v18038_v53, 1 }
 0x1e0   : >> { %v2147_v27 = vpop.f32.mrf.mxu0  ;;  %14310 = vmatmul.mubr.bf16.gmra.mxu0 %v15887_v21  ;;  %14401 = vmatprep.subr.bf16.mxu1 %v16275_v10  ;;  %v4372_v21 = vrot.slane %v17871_v36, 1  ;;  %v15901_v36 = vld [vmem:[%s20660_s1 + $0x5b8] sm:$0xff]  }
 0x1e1   : >> { %v2162_v1 = vadd.f32 %v2147_v27, %v17873_v24  ;;  %v2339_v62 = vpop.f32.mrf.mxu1  ;;  %14346 = vmatmul.mubr.bf16.gmra.mxu1 %v4205_v34  ;;  %14313 = vmatprep.mubr.msk.bf16.mxu0 %vm16276_vm7, %v16275_v10  ;;  %v11855_v24 = vld [vmem:[%s16641_s15 + $0x68] sm:$0xe]  ;;  %v4576_v27 = vsel %vm20727_vm3, %v4574_v32, %v4575_v28  ;;  %v4376_v32 = vrot.slane %v17919_v47, 1  ;;  %v15911_v47 = vld [vmem:[%s20660_s1 + $0x5e0] sm:$0xff]  }
 0x1e2   : >> { %v13955_v26 = vpop.f32.mrf.mxu0  ;;  %14349 = vmatprep.mubr.msk.bf16.mxu1 %vm16276_vm7, %v16275_v10  ;;  %14366 = vmatpush3.bf16.msra.mxu0 %v15892_v22  ;;  %v11872_v59 = vcombine.low %v11855_v24, %v17844_v35  ;;  %v15902_v24 = vld [vmem:[%s20660_s1 + $0x5b0] sm:$0xff]  }
 0x1e3   : >> { %v18019_v40 = vadd.f32 %v2339_v62, %v2162_v1  ;;  %v13991_v33 = vpop.f32.mrf.mxu1  ;;  %14402 = vmatpush3.bf16.msra.mxu1 %v15895_v48  ;;  %14367 = vmatprep.subr.bf16.mxu0 %v16275_v10  ;;  %v18061_v1 = vld [vmem:[%s16641_s15 + $0x7c] sm:$0xff]  }
 0x1e4   : >> { %v2150_v55 = vpop.f32.mrf.mxu0  ;;  %14403 = vmatprep.subr.bf16.mxu1 %v16275_v10  ;;  %v4371_v14 = vrot.slane %v11872_v59, 1  ;;  %v4374_v33 = vrot.slane %v17894_v9, 1  ;;  %v4577_v38 = vrot.slane %v18061_v1, 1  ;;  %v15906_v9 = vld [vmem:[%s20660_s1 + $0x5f0] sm:$0xff]  }
 0x1e5   : >> { %v2163_v45 = vadd.f32 %v2150_v55, %v17884_v18  ;;  %v2342_v46 = vpop.f32.mrf.mxu1 }
 0x1e6   : >> { %v13956_v0 = vpop.f32.mrf.mxu0  ;;  %14368 = vmatpush3.bf16.msra.mxu0 %v15896_v23  ;;  %v4373_v11 = vsel %vm20726_vm15, %v4371_v14, %v4372_v21  ;;  %vm20728_vm15 = vmmov %vm20727_vm3 }
 0x1e7   : >> { %v18040_v5 = vadd.f32 %v2342_v46, %v2163_v45  ;;  %v13992_v20 = vpop.f32.mrf.mxu1  ;;  %14404 = vmatpush3.bf16.msra.mxu1 %v15897_v30  ;;  %14425 = vmatprep.subr.bf16.mxu0 %v16275_v10  ;;  %v4375_v59 = vsel %vm20728_vm15, %v4372_v21, %v4374_v33  ;;  %v15905_v0 = vld [vmem:[%s20660_s1 + $0x5a8] sm:$0xff]   ;;  %vm20729_vm15 = vmmov %vm20727_vm3 }
 0x1e8   : >> { %v2543_v13 = vpop.f32.mrf.mxu0  ;;  %14314 = vmatmul.mubr.bf16.gmra.mxu0 %v15893_v3  ;;  %14461 = vmatprep.subr.bf16.mxu1 %v16275_v10  ;;  %v4578_v20 = vsel %vm20727_vm3, %v4575_v28, %v4577_v38  ;;  %v15908_v28 = vld [vmem:[%s20660_s1 + $0x5a0] sm:$0xff]  }
 0x1e9   : >> { %v2582_v35 = vadd.f32 %v2543_v13, %v17896_v49  ;;  %v2711_v18 = vpop.f32.mrf.mxu1  ;;  %14350 = vmatmul.mubr.bf16.gmra.mxu1 %v4213_v16  ;;  %14369 = vmatprep.mubr.msk.bf16.mxu0 %vm16276_vm7, %v16275_v10  ;;  %v18093_v13 = vld [vmem:[%s16641_s15 + $0x84] sm:$0xff]  }
 0x1ea   : >> { %v14011_v15 = vpop.f32.mrf.mxu0  ;;  %14405 = vmatprep.mubr.msk.bf16.mxu1 %vm16276_vm7, %v16275_v10 }
 0x1eb   : >> { %v18052_v34 = vadd.f32 %v2711_v18, %v2582_v35  ;;  %v14047_v49 = vpop.f32.mrf.mxu1 }
 0x1ec   : >> { %v2546_v22 = vpop.f32.mrf.mxu0 }
 0x1ed   : >> { %v2583_v61 = vadd.f32 %v2546_v22, %v17906_v41  ;;  %v2714_v6 = vpop.f32.mrf.mxu1  ;;  %v4579_v22 = vrot.slane %v18093_v13, 1 }
 0x1ee   : >> { %v14012_v48 = vpop.f32.mrf.mxu0 }
 0x1ef   : >> { %v18063_v62 = vadd.f32 %v2714_v6, %v2583_v61  ;;  %v14048_v26 = vpop.f32.mrf.mxu1  ;;  %v4377_v48 = vsel %vm20729_vm15, %v4374_v33, %v4376_v32  ;;  %vm20730_vm15 = vmmov %vm20727_vm3 }
 0x1f0   : >> { %v2551_v41 = vpop.f32.mrf.mxu0  ;;  %14370 = vmatmul.mubr.bf16.vlgmr.msra.gmra.mxu0 %v4373_v11 }
 0x1f1   : >> { %v2584_v19 = vadd.f32 %v2551_v41, %v17921_v39  ;;  %v2719_v23 = vpop.f32.mrf.mxu1  ;;  %14406 = vmatmul.mubr.bf16.vlgmr.msra.gmra.mxu1 %v4576_v27  ;;  %14426 = vmatpush3.bf16.msra.mxu0 %v15901_v36  ;;  %v15910_v27 = vld [vmem:[%s20660_s1 + $0x598] sm:$0xff]   ;;  %v18126_v41 = vld [vmem:[%s16641_s15 + $0x8c] sm:$0xff]  }
 0x1f2   : >> { %v14015_v30 = vpop.f32.mrf.mxu0  ;;  %14427 = vmatprep.subr.bf16.mxu0 %v16275_v10  ;;  %14373 = vmatprep.mubr.msk.bf16.mxu0 %vm16276_vm7, %v16275_v10 }
 0x1f3   : >> { %v18077_v55 = vadd.f32 %v2719_v23, %v2584_v19  ;;  %v14051_v39 = vpop.f32.mrf.mxu1  ;;  %14409 = vmatprep.mubr.msk.bf16.mxu1 %vm16276_vm7, %v16275_v10  ;;  %14462 = vmatpush3.bf16.msra.mxu1 %v15904_v17  ;;  %v4580_v17 = vsel %vm20727_vm3, %v4577_v38, %v4579_v22  ;;  %v4378_v38 = vrot.slane %v17953_v4, 1  ;;  %v15915_v4 = vld [vmem:[%s20660_s1 + $0x5d0] sm:$0xff]  }
 0x1f4   : >> { %v2554_v3 = vpop.f32.mrf.mxu0  ;;  %14463 = vmatprep.subr.bf16.mxu1 %v16275_v10  ;;  %v15914_v39 = vld [vmem:[%s20660_s1 + $0x590] sm:$0xff]  }
 0x1f5   : >> { %v2585_v45 = vadd.f32 %v2554_v3, %v17938_v7  ;;  %v2722_v46 = vpop.f32.mrf.mxu1  ;;  %14428 = vmatpush3.bf16.msra.mxu0 %v15902_v24  ;;  %v15909_v7 = vld [vmem:[%s20660_s1 + $0x5e8] sm:$0xff]   ;;  %v4581_v3 = vrot.slane %v18126_v41, 1 }
 0x1f6   : >> { %v14016_v16 = vpop.f32.mrf.mxu0  ;;  %14429 = vmatprep.subr.bf16.mxu0 %v16275_v10 }
 0x1f7   : >> { %v18095_v35 = vadd.f32 %v2722_v46, %v2585_v45  ;;  %v14052_v18 = vpop.f32.mrf.mxu1  ;;  %14464 = vmatpush3.bf16.msra.mxu1 %v15906_v9  ;;  %v4379_v16 = vsel %vm20730_vm15, %v4376_v32, %v4378_v38  ;;  %vm20731_vm15 = vmmov %vm20727_vm3 }
 0x1f8   : >> { %v2559_v14 = vpop.f32.mrf.mxu0  ;;  %14374 = vmatmul.mubr.bf16.gmra.mxu0 %v4375_v59  ;;  %14465 = vmatprep.subr.bf16.mxu1 %v16275_v10  ;;  %v4582_v18 = vsel %vm20727_vm3, %v4579_v22, %v4581_v3 }
 0x1f9   : >> { %v2586_v21 = vadd.f32 %v2559_v14, %v17955_v29  ;;  %v2727_v15 = vpop.f32.mrf.mxu1  ;;  %14410 = vmatmul.mubr.bf16.gmra.mxu1 %v4578_v20  ;;  %14430 = vmatpush3.bf16.msra.mxu0 %v15905_v0  ;;  %v15917_v14 = vld [vmem:[%s16641_s15 + $0x94] ss:$0 sps:$4 sm:$0x11]  }
 0x1fa   : >> { %v14019_v49 = vpop.f32.mrf.mxu0  ;;  %14377 = vmatprep.mubr.msk.bf16.mxu0 %vm16276_vm7, %v16275_v10  ;;  %14413 = vmatprep.mubr.msk.bf16.mxu1 %vm16276_vm7, %v16275_v10 }
 0x1fb   : >> { %v18111_v29 = vadd.f32 %v2727_v15, %v2586_v21  ;;  %v14055_v61 = vpop.f32.mrf.mxu1  ;;  %14431 = vmatprep.subr.bf16.mxu0 %v16275_v10  ;;  %14466 = vmatpush3.bf16.msra.mxu1 %v15909_v7  ;;  %v15916_v7 = vld [vmem:[%s20660_s1 + $0x588] sm:$0xff]   ;;  %v4746_v49 = vshll.u32 %v18035_v8, 16 }
 0x1fc   : >> { %v2562_v6 = vpop.f32.mrf.mxu0  ;;  %14467 = vmatprep.subr.bf16.mxu1 %v16275_v10 }
 0x1fd   : >> { %v2587_v11 = vadd.f32 %v2562_v6, %v17971_v25  ;;  %v2730_v36 = vpop.f32.mrf.mxu1  ;;  %14432 = vmatpush3.bf16.msra.mxu0 %v15908_v28  ;;  %v15913_v25 = vld [vmem:[%s20660_s1 + $0x5d8] sm:$0xff]   ;;  %v4743_v28 = vshrl.u32 %v18035_v8, 16  ;;  %v4751_v6 = vshrl.u32 %v18038_v53, 16  ;;  %v4583_v8 = vrot.slane %v15917_v14, 1 }
 0x1fe   : >> { %v14020_v26 = vpop.f32.mrf.mxu0  ;;  %14433 = vmatprep.subr.bf16.mxu0 %v16275_v10 }
 0x1ff   : >> { %v18128_v19 = vadd.f32 %v2730_v36, %v2587_v11  ;;  %v14056_v23 = vpop.f32.mrf.mxu1  ;;  %14468 = vmatpush3.bf16.msra.mxu1 %v15911_v47  ;;  %v4380_v47 = vrot.slane %v17986_v58, 1  ;;  %v4754_v11 = vshll.u32 %v18038_v53, 16  ;;  %v15920_v58 = vld [vmem:[%s20660_s1 + $0x5c0] sm:$0xff]   ;;  %v11948_v26 = vld [vmem:[%s16641_s15 + $0x6c] sm:$0xc] }
 0x200   : >> { %v2567_v24 = vpop.f32.mrf.mxu0  ;;  %14378 = vmatmul.mubr.bf16.gmra.mxu0 %v4377_v48  ;;  %14469 = vmatprep.subr.bf16.mxu1 %v16275_v10  ;;  %v4745_v23 = vrot.slane %v4743_v28, 1 }
 0x201   : >> { %v2588_v33 = vadd.f32 %v2567_v24, %v17988_v31  ;;  %v2735_v30 = vpop.f32.mrf.mxu1  ;;  %14414 = vmatmul.mubr.bf16.gmra.mxu1 %v4580_v17  ;;  %14434 = vmatpush3.bf16.msra.mxu0 %v15910_v27 }
 0x202   : >> { %v14023_v9 = vpop.f32.mrf.mxu0  ;;  %14381 = vmatprep.mubr.msk.bf16.mxu0 %vm16276_vm7, %v16275_v10  ;;  %14417 = vmatprep.mubr.msk.bf16.mxu1 %vm16276_vm7, %v16275_v10 }
 0x203   : >> { %v18144_v31 = vadd.f32 %v2735_v30, %v2588_v33  ;;  %v14059_v45 = vpop.f32.mrf.mxu1  ;;  %14435 = vmatprep.subr.bf16.mxu0 %v16275_v10  ;;  %14470 = vmatpush3.bf16.msra.mxu1 %v15913_v25  ;;  %v4748_v25 = vrot.slane %v4746_v49, 2  ;;  %v4381_v30 = vsel %vm20731_vm15, %v4378_v38, %v4380_v47  ;;  %v4756_v9 = vrot.slane %v4754_v11, 2 }
 0x204   : >> { %v2570_v46 = vpop.f32.mrf.mxu0  ;;  %14471 = vmatprep.subr.bf16.mxu1 %v16275_v10  ;;  %vm20732_vm15 = vsmask.f32 6400 }
 0x205   : >> { %v2589_v59 = vadd.f32 %v2570_v46, %v18004_v54  ;;  %v2738_v0 = vpop.f32.mrf.mxu1  ;;  %14436 = vmatpush3.bf16.msra.mxu0 %v15914_v39  ;;  %v15918_v54 = vld [vmem:[%s20660_s1 + $0x5c8] sm:$0xff]   ;;  %v4753_v39 = vrot.slane %v4751_v6, 1  ;;  %v11965_v46 = vcombine.low %v11948_v26, %v18027_v12  ;;  %v4760_v12 = vshrl.u32 %v18061_v1, 16  ;;  %v15923_v26 = vld [vmem:[%s20660_s1 + $0x630] sm:$0xff]  }
 0x206   : >> { %v14024_v20 = vpop.f32.mrf.mxu0  ;;  %14437 = vmatprep.subr.bf16.mxu0 %v16275_v10 }
 0x207   : >> { %v18159_v21 = vadd.f32 %v2738_v0, %v2589_v59  ;;  %v14060_v15 = vpop.f32.mrf.mxu1  ;;  %14472 = vmatpush3.bf16.msra.mxu1 %v15915_v4  ;;  %v4584_v4 = vsel %vm20727_vm3, %v4581_v3, %v4583_v8  ;;  %v4757_v3 = vor.u32 %v4756_v9, %v4753_v39  ;;  %v4952_v14 = vrot.slane %v11965_v46, 2  ;;  %v15926_v39 = vld [vmem:[%s20660_s1 + $0x670] sm:$0xff]   ;;  %vm20733_vm3 = vmmov %vm20732_vm15  ;;  %v15925_v46 = vld [vmem:[%s20660_s1 + $0x628] sm:$0xff]  }
 0x208   : >> { %v2575_v32 = vpop.f32.mrf.mxu0  ;;  %14382 = vmatmul.mubr.bf16.gmra.mxu0 %v4379_v16  ;;  %14473 = vmatprep.subr.bf16.mxu1 %v16275_v10  ;;  %v4953_v15 = vrot.slane %v18038_v53, 2  ;;  %v4762_v47 = vrot.slane %v4760_v12, 1 }
 0x209   : >> { %v2590_v22 = vadd.f32 %v2575_v32, %v18019_v40  ;;  %v2743_v61 = vpop.f32.mrf.mxu1  ;;  %14418 = vmatmul.mubr.bf16.gmra.mxu1 %v4582_v18  ;;  %14385 = vmatprep.mubr.msk.bf16.mxu0 %vm16276_vm7, %v16275_v10  ;;  %v15919_v40 = vld [vmem:[%s20660_s1 + $0x580] sm:$0xff]   ;;  %v4763_v18 = vshll.u32 %v18061_v1, 16 }
 0x20a   : >> { %v14027_v36 = vpop.f32.mrf.mxu0  ;;  %14421 = vmatprep.mubr.msk.bf16.mxu1 %vm16276_vm7, %v16275_v10  ;;  %14438 = vmatpush3.bf16.msra.mxu0 %v15916_v7 }
 0x20b   : >> { %v18178_v48 = vadd.f32 %v2743_v61, %v2590_v22  ;;  %v14063_v27 = vpop.f32.mrf.mxu1  ;;  %14474 = vmatpush3.bf16.msra.mxu1 %v15918_v54  ;;  %14439 = vmatprep.subr.bf16.mxu0 %v16275_v10  ;;  %v15922_v61 = vld [vmem:[%s20660_s1 + $0x638] sm:$0xff]   ;;  %v4765_v6 = vrot.slane %v4763_v18, 2  ;;  %v4954_v36 = vsel %vm1433_vm11, %v4952_v14, %v4953_v15 }
 0x20c   : >> { %v2578_v17 = vpop.f32.mrf.mxu0  ;;  %14475 = vmatprep.subr.bf16.mxu1 %v16275_v10 }
 0x20d   : >> { %v2591_v24 = vadd.f32 %v2578_v17, %v18040_v5  ;;  %v2746_v33 = vpop.f32.mrf.mxu1  ;;  %v4749_v5 = vor.u32 %v4748_v25, %v4745_v23  ;;  %v4766_v17 = vor.u32 %v4765_v6, %v4762_v47  ;;  %v4769_v23 = vshrl.u32 %v18093_v13, 16 }
 0x20e   : >> { %v14028_v45 = vpop.f32.mrf.mxu0  ;;  %14440 = vmatpush3.bf16.msra.mxu0 %v15919_v40  ;;  %v15924_v40 = vld [vmem:[%s20660_s1 + $0x678] sm:$0xff]   ;;  %v4772_v25 = vshll.u32 %v18093_v13, 16 }
 0x20f   : >> { %v18190_v59 = vadd.f32 %v2746_v33, %v2591_v24  ;;  %v14064_v0 = vpop.f32.mrf.mxu1  ;;  %14476 = vmatpush3.bf16.msra.mxu1 %v15920_v58  ;;  %14497 = vmatprep.subr.bf16.mxu0 %v16275_v10  ;;  %v4758_v22 = vsel %vm20732_vm15, %v4749_v5, %v4757_v3  ;;  %vm20734_vm15 = vmmov %vm20733_vm3 }
 0x210   : >> { %v2914_v16 = vpop.f32.mrf.mxu0  ;;  %14386 = vmatmul.mubr.bf16.gmra.mxu0 %v4381_v30  ;;  %14533 = vmatprep.subr.bf16.mxu1 %v16275_v10  ;;  %v4771_v0 = vrot.slane %v4769_v23, 1 }
 0x211   : >> { %v2953_v38 = vadd.f32 %v2914_v16, %v18052_v34  ;;  %v3124_v20 = vpop.f32.mrf.mxu1  ;;  %14422 = vmatmul.mubr.bf16.gmra.mxu1 %v4584_v4  ;;  %14441 = vmatprep.mubr.msk.bf16.mxu0 %vm16276_vm7, %v16275_v10  ;;  %v4774_v16 = vrot.slane %v4772_v25, 2 }
 0x212   : >> { %v14083_v7 = vpop.f32.mrf.mxu0  ;;  %14477 = vmatprep.mubr.msk.bf16.mxu1 %vm16276_vm7, %v16275_v10 }
 0x213   : >> { %v18202_v54 = vadd.f32 %v3124_v20, %v2953_v38  ;;  %v14119_v34 = vpop.f32.mrf.mxu1  ;;  %v4775_v14 = vor.u32 %v4774_v16, %v4771_v0  ;;  %v11974_v0 = vld [vmem:[%s16641_s15 + $0x70] sm:$0xc]  ;;  %v18299_v16 = vld [vmem:[%s16641_s15 + $0x74] sm:$0xf] }
 0x214   : >> { %v2917_v32 = vpop.f32.mrf.mxu0  ;;  %v4778_v34 = vshrl.u32 %v18126_v41, 16 }
 0x215   : >> { %v2954_v28 = vadd.f32 %v2917_v32, %v18063_v62  ;;  %v3127_v49 = vpop.f32.mrf.mxu1  ;;  %v4781_v32 = vshll.u32 %v18126_v41, 16 }
 0x216   : >> { %v14084_v11 = vpop.f32.mrf.mxu0 }
 0x217   : >> { %v18210_v8 = vadd.f32 %v3127_v49, %v2954_v28  ;;  %v14120_v53 = vpop.f32.mrf.mxu1 }
 0x218   : >> { %v2922_v62 = vpop.f32.mrf.mxu0  ;;  %14442 = vmatmul.mubr.bf16.vlgmr.msra.gmra.mxu0 %v4758_v22  ;;  %v4780_v53 = vrot.slane %v4778_v34, 1  ;;  %v18310_v34 = vcombine.low %v11974_v0, %v18299_v16 }
 0x219   : >> { %v2955_v27 = vadd.f32 %v2922_v62, %v18077_v55  ;;  %v3132_v58 = vpop.f32.mrf.mxu1  ;;  %14478 = vmatmul.mubr.bf16.vlgmr.msra.gmra.mxu1 %v4954_v36  ;;  %14498 = vmatpush3.bf16.msra.mxu0 %v15922_v61  ;;  %v4955_v55 = vrot.slane %v18061_v1, 2  ;;  %v4767_v1 = vsel %vm20733_vm3, %v4757_v3, %v4766_v17  ;;  %v15930_v61 = vld [vmem:[%s20660_s1 + $0x660] sm:$0xff]   ;;  %v4776_v36 = vsel %vm20734_vm15, %v4766_v17, %v4775_v14  ;;  %v18270_v62 = vld [vmem:[%s16641_s15 + $0x94] ss:$0 sps:$4 sm:$0x33]   ;;  %v15931_v17 = vld [vmem:[%s20660_s1 + $0x658] sm:$0xff]  }
 0x21a   : >> { %v14087_v24 = vpop.f32.mrf.mxu0  ;;  %14499 = vmatprep.subr.bf16.mxu0 %v16275_v10  ;;  %14445 = vmatprep.mubr.msk.bf16.mxu0 %vm16276_vm7, %v16275_v10  ;;  %vm20735_vm15 = vmmov %vm20733_vm3 }
 0x21b   : >> { %v18225_v33 = vadd.f32 %v3132_v58, %v2955_v27  ;;  %v14123_v30 = vpop.f32.mrf.mxu1  ;;  %14481 = vmatprep.mubr.msk.bf16.mxu1 %vm16276_vm7, %v16275_v10  ;;  %14534 = vmatpush3.bf16.msra.mxu1 %v15924_v40  ;;  %v4956_v38 = vsel %vm1433_vm11, %v4953_v15, %v4955_v55  ;;  %v15927_v15 = vld [vmem:[%s20660_s1 + $0x620] sm:$0xff]   ;;  %v4783_v40 = vrot.slane %v4781_v32, 2  ;;  %v18313_v32 = vld [vmem:[%s16641_s15 + $0x78] sm:$0xff]  }
 0x21c   : >> { %v2925_v9 = vpop.f32.mrf.mxu0  ;;  %14535 = vmatprep.subr.bf16.mxu1 %v16275_v10  ;;  %v15932_v30 = vld [vmem:[%s20660_s1 + $0x610] sm:$0xff]  }
 0x21d   : >> { %v2956_v45 = vadd.f32 %v2925_v9, %v18095_v35  ;;  %v3135_v4 = vpop.f32.mrf.mxu1  ;;  %14500 = vmatpush3.bf16.msra.mxu0 %v15923_v26  ;;  %v15928_v35 = vld [vmem:[%s20660_s1 + $0x668] sm:$0xff]   ;;  %v4790_v9 = vshll.u32 %v18270_v62, 16 }
 0x21e   : >> { %v14088_v5 = vpop.f32.mrf.mxu0  ;;  %14501 = vmatprep.subr.bf16.mxu0 %v16275_v10 }
 0x21f   : >> { %v18240_v20 = vadd.f32 %v3135_v4, %v2956_v45  ;;  %v14124_v12 = vpop.f32.mrf.mxu1  ;;  %14536 = vmatpush3.bf16.msra.mxu1 %v15926_v39  ;;  %v4787_v39 = vshrl.u32 %v18270_v62, 16 }
 0x220   : >> { %v2930_v3 = vpop.f32.mrf.mxu0  ;;  %14446 = vmatmul.mubr.bf16.gmra.mxu0 %v4767_v1  ;;  %14537 = vmatprep.subr.bf16.mxu1 %v16275_v10 }
 0x221   : >> { %v2957_v18 = vadd.f32 %v2930_v3, %v18111_v29  ;;  %v3140_v7 = vpop.f32.mrf.mxu1  ;;  %14482 = vmatmul.mubr.bf16.gmra.mxu1 %v4956_v38  ;;  %14502 = vmatpush3.bf16.msra.mxu0 %v15925_v46  ;;  %v4957_v29 = vrot.slane %v18093_v13, 2  ;;  %v15929_v13 = vld [vmem:[%s20660_s1 + $0x618] sm:$0xff]   ;;  %v15933_v46 = vld [vmem:[%s20660_s1 + $0x650] sm:$0xff]   ;;  %v4792_v3 = vrot.slane %v4790_v9, 2 }
 0x222   : >> { %v14091_v28 = vpop.f32.mrf.mxu0  ;;  %14449 = vmatprep.mubr.msk.bf16.mxu0 %vm16276_vm7, %v16275_v10  ;;  %14485 = vmatprep.mubr.msk.bf16.mxu1 %vm16276_vm7, %v16275_v10 }
 0x223   : >> { %v18257_v49 = vadd.f32 %v3140_v7, %v2957_v18  ;;  %v14127_v22 = vpop.f32.mrf.mxu1  ;;  %14503 = vmatprep.subr.bf16.mxu0 %v16275_v10  ;;  %14538 = vmatpush3.bf16.msra.mxu1 %v15928_v35  ;;  %v4958_v58 = vsel %vm1433_vm11, %v4955_v55, %v4957_v29  ;;  %v4784_v55 = vor.u32 %v4783_v40, %v4780_v53  ;;  %v4789_v35 = vrot.slane %v4787_v39, 1  ;;  %v15936_v28 = vld [vmem:[%s20660_s1 + $0x648] sm:$0xff]  }
 0x224   : >> { %v2933_v47 = vpop.f32.mrf.mxu0  ;;  %14539 = vmatprep.subr.bf16.mxu1 %v16275_v10  ;;  %v5332_v53 = vshrl.u32 %v18313_v32, 16  ;;  %v5335_v40 = vshll.u32 %v18313_v32, 16 }
 0x225   : >> { %v2958_v6 = vadd.f32 %v2933_v47, %v18128_v19  ;;  %v3143_v11 = vpop.f32.mrf.mxu1  ;;  %14504 = vmatpush3.bf16.msra.mxu0 %v15927_v15  ;;  %v4785_v12 = vsel %vm20733_vm3, %v4775_v14, %v4784_v55  ;;  %v15934_v15 = vld [vmem:[%s20660_s1 + $0x608] sm:$0xff]   ;;  %v4793_v47 = vor.u32 %v4792_v3, %v4789_v35  ;;  %vm20736_vm3 = vsmask.f32 5376 }
 0x226   : >> { %v14092_v27 = vpop.f32.mrf.mxu0  ;;  %14505 = vmatprep.subr.bf16.mxu0 %v16275_v10 }
 0x227   : >> { %v18274_v26 = vadd.f32 %v3143_v11, %v2958_v6  ;;  %v14128_v19 = vpop.f32.mrf.mxu1  ;;  %14540 = vmatpush3.bf16.msra.mxu1 %v15930_v61  ;;  %v4961_v6 = vrot.slane %v18270_v62, 2 }
 0x228   : >> { %v2938_v23 = vpop.f32.mrf.mxu0  ;;  %14450 = vmatmul.mubr.bf16.gmra.mxu0 %v4776_v36  ;;  %14541 = vmatprep.subr.bf16.mxu1 %v16275_v10  ;;  %v15937_v36 = vld [vmem:[%s20660_s1 + $0x600] sm:$0xff]  }
 0x229   : >> { %v2959_v25 = vadd.f32 %v2938_v23, %v18144_v31  ;;  %v3148_v24 = vpop.f32.mrf.mxu1  ;;  %14486 = vmatmul.mubr.bf16.gmra.mxu1 %v4958_v58  ;;  %14506 = vmatpush3.bf16.msra.mxu0 %v15929_v13  ;;  %v4959_v31 = vrot.slane %v18126_v41, 2  ;;  %v5324_v13 = vshrl.u32 %v18310_v34, 16  ;;  %v15938_v58 = vld [vmem:[%s20660_s1 + $0x640] sm:$0xff]  }
 0x22a   : >> { %v14095_v45 = vpop.f32.mrf.mxu0  ;;  %14453 = vmatprep.mubr.msk.bf16.mxu0 %vm16276_vm7, %v16275_v10  ;;  %14489 = vmatprep.mubr.msk.bf16.mxu1 %vm16276_vm7, %v16275_v10 }
 0x22b   : >> { %v18291_v4 = vadd.f32 %v3148_v24, %v2959_v25  ;;  %v14131_v1 = vpop.f32.mrf.mxu1  ;;  %14507 = vmatprep.subr.bf16.mxu0 %v16275_v10  ;;  %14542 = vmatpush3.bf16.msra.mxu1 %v15931_v17  ;;  %v4960_v7 = vsel %vm1433_vm11, %v4957_v29, %v4959_v31  ;;  %v4794_v25 = vsel %vm20735_vm15, %v4784_v55, %v4793_v47  ;;  %v5326_v39 = vrot.slane %v5324_v13, 2  ;;  %vm20737_vm15 = vmmov %vm20736_vm3 }
 0x22c   : >> { %v2941_v5 = vpop.f32.mrf.mxu0  ;;  %14543 = vmatprep.subr.bf16.mxu1 %v16275_v10  ;;  %v4962_v24 = vsel %vm1433_vm11, %v4959_v31, %v4961_v6  ;;  %v5334_v45 = vrot.slane %v5332_v53, 2  ;;  %v5337_v1 = vrot.slane %v5335_v40, 3 }
 0x22d   : >> { %v2960_v38 = vadd.f32 %v2941_v5, %v18159_v21  ;;  %v3151_v41 = vpop.f32.mrf.mxu1  ;;  %14508 = vmatpush3.bf16.msra.mxu0 %v15932_v30 }
 0x22e   : >> { %v14096_v18 = vpop.f32.mrf.mxu0  ;;  %14509 = vmatprep.subr.bf16.mxu0 %v16275_v10  ;;  %v5338_v3 = vor.u32 %v5337_v1, %v5334_v45  ;;  %v15944_v1 = vld [vmem:[%s20660_s1 + $0x6a8] sm:$0xff]  }
 0x22f   : >> { %v18315_v21 = vadd.f32 %v3151_v41, %v2960_v38  ;;  %v14132_v14 = vpop.f32.mrf.mxu1  ;;  %14544 = vmatpush3.bf16.msra.mxu1 %v15933_v46  ;;  %v18345_v46 = vld [vmem:[%s16641_s15 + $0x80] sm:$0xff]   ;;  %v5155_v38 = vrot.slane %v18310_v34, 2  ;;  %v5156_v41 = vrot.slane %v18313_v32, 2 }
 0x230   : >> { %v2946_v29 = vpop.f32.mrf.mxu0  ;;  %14454 = vmatmul.mubr.bf16.gmra.mxu0 %v4785_v12  ;;  %14545 = vmatprep.subr.bf16.mxu1 %v16275_v10  ;;  %v5341_v18 = vshrl.u32 %v18345_v46, 16 }
 0x231   : >> { %v2961_v22 = vadd.f32 %v2946_v29, %v18178_v48  ;;  %v3156_v61 = vpop.f32.mrf.mxu1  ;;  %14490 = vmatmul.mubr.bf16.gmra.mxu1 %v4960_v7  ;;  %14457 = vmatprep.mubr.msk.bf16.mxu0 %vm16276_vm7, %v16275_v10  ;;  %v5327_v48 = vshll.u32 %v18310_v34, 16  ;;  %v5157_v29 = vsel %vm1433_vm11, %v5155_v38, %v5156_v41  ;;  %v18396_v38 = vld [vmem:[%s16641_s15 + $0x90] sm:$0xff]  }
 0x232   : >> { %v14099_v11 = vpop.f32.mrf.mxu0  ;;  %14493 = vmatprep.mubr.msk.bf16.mxu1 %vm16276_vm7, %v16275_v10  ;;  %14510 = vmatpush3.bf16.msra.mxu0 %v15934_v15  ;;  %v5343_v6 = vrot.slane %v5341_v18, 2 }
 0x233   : >> { %v18334_v27 = vadd.f32 %v3156_v61, %v2961_v22  ;;  %v14135_v62 = vpop.f32.mrf.mxu1  ;;  %14546 = vmatpush3.bf16.msra.mxu1 %v15936_v28  ;;  %14511 = vmatprep.subr.bf16.mxu0 %v16275_v10  ;;  %v5329_v9 = vrot.slane %v5327_v48, 3  ;;  %v15941_v22 = vld [vmem:[%s20660_s1 + $0x6b8] sm:$0xff]  }
 0x234   : >> { %v2949_v19 = vpop.f32.mrf.mxu0  ;;  %14547 = vmatprep.subr.bf16.mxu1 %v16275_v10  ;;  %v15942_v62 = vld [vmem:[%s20660_s1 + $0x6b0] sm:$0xff]  }
 0x235   : >> { %v2962_v17 = vadd.f32 %v2949_v19, %v18190_v59  ;;  %v3159_v23 = vpop.f32.mrf.mxu1  ;;  %v5330_v35 = vor.u32 %v5329_v9, %v5326_v39 }
 0x236   : >> { %v14100_v30 = vpop.f32.mrf.mxu0  ;;  %14512 = vmatpush3.bf16.msra.mxu0 %v15937_v36  ;;  %v18369_v36 = vld [vmem:[%s16641_s15 + $0x88] sm:$0xff]  }
 0x237   : >> { %v18347_v0 = vadd.f32 %v3159_v23, %v2962_v17  ;;  %v14136_v5 = vpop.f32.mrf.mxu1  ;;  %14548 = vmatpush3.bf16.msra.mxu1 %v15938_v58  ;;  %14569 = vmatprep.subr.bf16.mxu0 %v16275_v10  ;;  %v5339_v47 = vsel %vm20736_vm3, %v5330_v35, %v5338_v3  ;;  %v5158_v58 = vrot.slane %v18345_v46, 2  ;;  %v5350_v23 = vshrl.u32 %v18369_v36, 16 }
 0x238   : >> { %v3292_v59 = vpop.f32.mrf.mxu0  ;;  %14458 = vmatmul.mubr.bf16.gmra.mxu0 %v4794_v25  ;;  %15577 = vmatprep.subr.bf16.mxu1 %v16275_v10 }
 0x239   : >> { %v3331_v55 = vadd.f32 %v3292_v59, %v18202_v54  ;;  %v3495_v31 = vpop.f32.mrf.mxu1  ;;  %14494 = vmatmul.mubr.bf16.gmra.mxu1 %v4962_v24  ;;  %14513 = vmatprep.mubr.msk.bf16.mxu0 %vm16276_vm7, %v16275_v10  ;;  %v5344_v54 = vshll.u32 %v18345_v46, 16  ;;  %v5159_v45 = vsel %vm1433_vm11, %v5156_v41, %v5158_v58 }
 0x23a   : >> { %v14155_v12 = vpop.f32.mrf.mxu0  ;;  %14549 = vmatprep.mubr.msk.bf16.mxu1 %vm16276_vm7, %v16275_v10 }
 0x23b   : >> { %v18360_v7 = vadd.f32 %v3495_v31, %v3331_v55  ;;  %v14191_v15 = vpop.f32.mrf.mxu1  ;;  %v5346_v11 = vrot.slane %v5344_v54, 3  ;;  %v5352_v55 = vrot.slane %v5350_v23, 2  ;;  %v15946_v54 = vld [vmem:[%s20660_s1 + $0x6a0] sm:$0xff]  }
 0x23c   : >> { %v3295_v14 = vpop.f32.mrf.mxu0 }
 0x23d   : >> { %v3332_v28 = vadd.f32 %v3295_v14, %v18210_v8  ;;  %v3498_v34 = vpop.f32.mrf.mxu1  ;;  %v5347_v17 = vor.u32 %v5346_v11, %v5343_v6  ;;  %v15947_v11 = vld [vmem:[%s20660_s1 + $0x698] sm:$0xff]  }
 0x23e   : >> { %v14156_v61 = vpop.f32.mrf.mxu0 }
 0x23f   : >> { %v18371_v13 = vadd.f32 %v3498_v34, %v3332_v28  ;;  %v14192_v48 = vpop.f32.mrf.mxu1  ;;  %v5348_v59 = vsel %vm20737_vm15, %v5338_v3, %v5347_v17  ;;  %v5160_v3 = vrot.slane %v18369_v36, 2  ;;  %v5359_v28 = vshrl.u32 %v18396_v38, 16  ;;  %vm20738_vm15 = vmmov %vm20736_vm3 }
 0x240   : >> { %v3300_v53 = vpop.f32.mrf.mxu0  ;;  %14514 = vmatmul.mubr.bf16.vlgmr.msra.gmra.mxu0 %v5157_v29 }
 0x241   : >> { %v3333_v8 = vadd.f32 %v3300_v53, %v18225_v33  ;;  %v3503_v40 = vpop.f32.mrf.mxu1  ;;  %14550 = vmatmul.mubr.bf16.vlgmr.msra.gmra.mxu1 %v5339_v47  ;;  %14570 = vmatpush3.bf16.msra.mxu0 %v15941_v22  ;;  %v5353_v33 = vshll.u32 %v18369_v36, 16  ;;  %v5161_v6 = vsel %vm1433_vm11, %v5158_v58, %v5160_v3 }
 0x242   : >> { %v14159_v19 = vpop.f32.mrf.mxu0  ;;  %14571 = vmatprep.subr.bf16.mxu0 %v16275_v10  ;;  %14517 = vmatprep.mubr.msk.bf16.mxu0 %vm16276_vm7, %v16275_v10 }
 0x243   : >> { %v18383_v25 = vadd.f32 %v3503_v40, %v3333_v8  ;;  %v14195_v24 = vpop.f32.mrf.mxu1  ;;  %14553 = vmatprep.mubr.msk.bf16.mxu1 %vm16276_vm7, %v16275_v10  ;;  %15585 = vmatpush3.bf16.msra.mxu1 %v15941_v22  ;;  %v5355_v31 = vrot.slane %v5353_v33, 3  ;;  %v5361_v8 = vrot.slane %v5359_v28, 2 }
 0x244   : >> { %v3303_v30 = vpop.f32.mrf.mxu0  ;;  %15578 = vmatprep.subr.bf16.mxu1 %v16275_v10  ;;  %v15949_v24 = vld [vmem:[%s20660_s1 + $0x690] sm:$0xff]  }
 0x245   : >> { %v3334_v39 = vadd.f32 %v3303_v30, %v18240_v20  ;;  %v3506_v9 = vpop.f32.mrf.mxu1  ;;  %14572 = vmatpush3.bf16.msra.mxu0 %v15942_v62  ;;  %v5356_v14 = vor.u32 %v5355_v31, %v5352_v55 }
 0x246   : >> { %v14160_v5 = vpop.f32.mrf.mxu0  ;;  %14573 = vmatprep.subr.bf16.mxu0 %v16275_v10 }
 0x247   : >> { %v18398_v12 = vadd.f32 %v3506_v9, %v3334_v39  ;;  %v14196_v20 = vpop.f32.mrf.mxu1  ;;  %15586 = vmatpush3.bf16.msra.mxu1 %v15942_v62  ;;  %v5357_v53 = vsel %vm20736_vm3, %v5347_v17, %v5356_v14  ;;  %v18424_v62 = vld [vmem:[%s16641_s15 + $0x98] ss:$0 sps:$4 sm:$0x77]   ;;  %v5162_v17 = vrot.slane %v18396_v38, 2 }
 0x248   : >> { %v3308_v35 = vpop.f32.mrf.mxu0  ;;  %14518 = vmatmul.mubr.bf16.gmra.mxu0 %v5159_v45  ;;  %15579 = vmatprep.subr.bf16.mxu1 %v16275_v10  ;;  %v5371_v9 = vshll.u32 %v18424_v62, 16  ;;  %v15951_v20 = vld [vmem:[%s16641_s15 + $0x98] ss:$0 sps:$4 sm:$0x33]  }
 0x249   : >> { %v3335_v41 = vadd.f32 %v3308_v35, %v18257_v49  ;;  %v3511_v18 = vpop.f32.mrf.mxu1  ;;  %14554 = vmatmul.mubr.bf16.gmra.mxu1 %v5348_v59  ;;  %14574 = vmatpush3.bf16.msra.mxu0 %v15944_v1  ;;  %v5362_v49 = vshll.u32 %v18396_v38, 16  ;;  %v5163_v31 = vsel %vm1433_vm11, %v5160_v3, %v5162_v17 }
 0x24a   : >> { %v14163_v15 = vpop.f32.mrf.mxu0  ;;  %14521 = vmatprep.mubr.msk.bf16.mxu0 %vm16276_vm7, %v16275_v10  ;;  %14557 = vmatprep.mubr.msk.bf16.mxu1 %vm16276_vm7, %v16275_v10 }
 0x24b   : >> { %v18412_v34 = vadd.f32 %v3511_v18, %v3335_v41  ;;  %v14199_v29 = vpop.f32.mrf.mxu1  ;;  %14575 = vmatprep.subr.bf16.mxu0 %v16275_v10  ;;  %15587 = vmatpush3.bf16.msra.mxu1 %v15944_v1  ;;  %v5364_v40 = vrot.slane %v5362_v49, 3  ;;  %v15950_v18 = vld [vmem:[%s20660_s1 + $0x688] sm:$0xff]   ;;  %v5373_v15 = vrot.slane %v5371_v9, 3 }
 0x24c   : >> { %v3311_v22 = vpop.f32.mrf.mxu0  ;;  %15580 = vmatprep.subr.bf16.mxu1 %v16275_v10  ;;  %v5164_v29 = vrot.slane %v15951_v20, 2 }
 0x24d   : >> { %v3336_v61 = vadd.f32 %v3311_v22, %v18274_v26  ;;  %v3514_v47 = vpop.f32.mrf.mxu1  ;;  %14576 = vmatpush3.bf16.msra.mxu0 %v15946_v54  ;;  %v5365_v39 = vor.u32 %v5364_v40, %v5361_v8 }
 0x24e   : >> { %v14164_v48 = vpop.f32.mrf.mxu0  ;;  %14577 = vmatprep.subr.bf16.mxu0 %v16275_v10  ;;  %v5165_v40 = vsel %vm1433_vm11, %v5162_v17, %v5164_v29 }
 0x24f   : >> { %v18426_v19 = vadd.f32 %v3514_v47, %v3336_v61  ;;  %v14200_v26 = vpop.f32.mrf.mxu1  ;;  %15588 = vmatpush3.bf16.msra.mxu1 %v15946_v54  ;;  %v5366_v41 = vsel %vm20738_vm15, %v5356_v14, %v5365_v39  ;;  %v15953_v47 = vld [vmem:[%s20660_s1 + $0x680] sm:$0xff]   ;;  %vm20739_vm15 = vcmask 1044480  }
 0x250   : >> { %v3316_v23 = vpop.f32.mrf.mxu0  ;;  %14522 = vmatmul.mubr.bf16.gmra.mxu0 %v5161_v6  ;;  %15581 = vmatprep.subr.bf16.mxu1 %v16275_v10  ;;  %v12041_v6 = vld [vmem:[%s16641_s15 + $0x70] sm:$0x8] }
 0x251   : >> { %v3337_v58 = vadd.f32 %v3316_v23, %v18291_v4  ;;  %v3519_v33 = vpop.f32.mrf.mxu1  ;;  %14558 = vmatmul.mubr.bf16.gmra.mxu1 %v5357_v53  ;;  %14578 = vmatpush3.bf16.msra.mxu0 %v15947_v11  ;;  %v5368_v4 = vshrl.u32 %v18424_v62, 16  ;;  %v12058_v26 = vcombine.low %v12041_v6, %v18299_v16  ;;  %v5534_v16 = vrot.slane %v18313_v32, 3 }
 0x252   : >> { %v14167_v30 = vpop.f32.mrf.mxu0  ;;  %14525 = vmatprep.mubr.msk.bf16.mxu0 %vm16276_vm7, %v16275_v10  ;;  %14561 = vmatprep.mubr.msk.bf16.mxu1 %vm16276_vm7, %v16275_v10 }
 0x253   : >> { %v18440_v45 = vadd.f32 %v3519_v33, %v3337_v58  ;;  %v14203_v1 = vpop.f32.mrf.mxu1  ;;  %15589 = vmatpush3.bf16.msra.mxu1 %v15947_v11  ;;  %14579 = vmatprep.subr.bf16.mxu0 %v16275_v10  ;;  %v5370_v54 = vrot.slane %v5368_v4, 2 }
 0x254   : >> { %v3319_v5 = vpop.f32.mrf.mxu0  ;;  %15582 = vmatprep.subr.bf16.mxu1 %v16275_v10  ;;  %v5540_v1 = vrot.slane %v18396_v38, 3 }
 0x255   : >> { %v3338_v59 = vadd.f32 %v3319_v5, %v18315_v21  ;;  %v3522_v55 = vpop.f32.mrf.mxu1  ;;  %14580 = vmatpush3.bf16.msra.mxu0 %v15949_v24  ;;  %v5374_v61 = vor.u32 %v5373_v15, %v5370_v54 }
 0x256   : >> { %v14168_v35 = vpop.f32.mrf.mxu0  ;;  %14581 = vmatprep.subr.bf16.mxu0 %v16275_v10 }
 0x257   : >> { %v18452_v28 = vadd.f32 %v3522_v55, %v3338_v59  ;;  %v14204_v21 = vpop.f32.mrf.mxu1  ;;  %15590 = vmatpush3.bf16.msra.mxu1 %v15949_v24  ;;  %v5375_v58 = vsel %vm20736_vm3, %v5365_v39, %v5374_v61  ;;  %v5538_v39 = vrot.slane %v18369_v36, 3  ;;  %vm20740_vm3 = vmmov %vm20739_vm15 }
 0x258   : >> { %v3324_v49 = vpop.f32.mrf.mxu0  ;;  %14526 = vmatmul.mubr.bf16.gmra.mxu0 %v5163_v31  ;;  %15583 = vmatprep.subr.bf16.mxu1 %v16275_v10  ;;  %v5542_v21 = vrot.slane %v18424_v62, 3 }
 0x259   : >> { %v3339_v3 = vadd.f32 %v3324_v49, %v18334_v27  ;;  %v3527_v14 = vpop.f32.mrf.mxu1  ;;  %14562 = vmatmul.mubr.bf16.gmra.mxu1 %v5366_v41  ;;  %14529 = vmatprep.mubr.msk.bf16.mxu0 %vm16276_vm7, %v16275_v10  ;;  %v5541_v32 = vsel %vm20740_vm3, %v5538_v39, %v5540_v1 }
 0x25a   : >> { %v14171_v22 = vpop.f32.mrf.mxu0  ;;  %14565 = vmatprep.mubr.msk.bf16.mxu1 %vm16276_vm7, %v16275_v10  ;;  %14582 = vmatpush3.bf16.msra.mxu0 %v15950_v18 }
 0x25b   : >> { %v18464_v11 = vadd.f32 %v3527_v14, %v3339_v3  ;;  %v14207_v27 = vpop.f32.mrf.mxu1  ;;  %15591 = vmatpush3.bf16.msra.mxu1 %v15950_v18  ;;  %14583 = vmatprep.subr.bf16.mxu0 %v16275_v10 }
 0x25c   : >> { %v3327_v48 = vpop.f32.mrf.mxu0  ;;  %15584 = vmatprep.subr.bf16.mxu1 %v16275_v10 }
 0x25d   : >> { %v3340_v53 = vadd.f32 %v3327_v48, %v18347_v0  ;;  %v3530_v8 = vpop.f32.mrf.mxu1  ;;  %v5533_v0 = vrot.slane %v12058_v26, 3 }
 0x25e   : >> { %v14172_v23 = vpop.f32.mrf.mxu0  ;;  %14584 = vmatpush3.bf16.msra.mxu0 %v15953_v47 }
 0x25f   : >> { %v18472_v33 = vadd.f32 %v3530_v8, %v3340_v53  ;;  %v14208_v24 = vpop.f32.mrf.mxu1  ;;  %15592 = vmatpush3.bf16.msra.mxu1 %v15953_v47  ;;  %v5535_v20 = vsel %vm20739_vm15, %v5533_v0, %v5534_v16  ;;  %vm20741_vm15 = vmmov %vm20740_vm3  ;;  %v5543_v47 = vsel %vm20740_vm3, %v5540_v1, %v5542_v21 }
 0x260   : >> { %v3705_v30 = vpop.f32.mrf.mxu0  ;;  %14530 = vmatmul.mubr.bf16.gmra.mxu0 %v5165_v40 }
 0x261   : >> { %v3744_v4 = vadd.f32 %v3705_v30, %v18360_v7  ;;  %v3873_v9 = vpop.f32.mrf.mxu1  ;;  %14566 = vmatmul.mubr.bf16.gmra.mxu1 %v5375_v58  ;;  %14585 = vmatprep.mubr.msk.bf16.mxu0 %vm16276_vm7, %v16275_v10 }
 0x262   : >> { %v14227_v17 = vpop.f32.mrf.mxu0  ;;  %14597 = vmatprep.mubr.msk.bf16.mxu1 %vm16276_vm7, %v16275_v10 }
 0x263   : >> { %v18482_v5 = vadd.f32 %v3873_v9, %v3744_v4  ;;  %v14263_v59 = vpop.f32.mrf.mxu1 }
 0x264   : >> { %v3708_v7 = vpop.f32.mrf.mxu0 }
 0x265   : >> { %v3745_v55 = vadd.f32 %v3708_v7, %v18371_v13  ;;  %v3876_v31 = vpop.f32.mrf.mxu1  ;;  %v5536_v13 = vrot.slane %v18345_v46, 3 }
 0x266   : >> { %v14228_v35 = vpop.f32.mrf.mxu0 }
 0x267   : >> { %v18487_v41 = vadd.f32 %v3876_v31, %v3745_v55  ;;  %v14264_v18 = vpop.f32.mrf.mxu1  ;;  %v5537_v22 = vsel %vm20741_vm15, %v5534_v16, %v5536_v13  ;;  %vm20742_vm15 = vmmov %vm20740_vm3  ;;  %vm20743_vm3 = vsmask.f32 1280 }
 0x268   : >> { %v3713_v54 = vpop.f32.mrf.mxu0  ;;  %14586 = vmatmul.mubr.bf16.vlgmr.msra.gmra.mxu0 %v5535_v20  ;;  %v5539_v58 = vsel %vm20742_vm15, %v5536_v13, %v5538_v39 }
 0x269   : >> { %v3746_v36 = vadd.f32 %v3713_v54, %v18383_v25  ;;  %v3881_v38 = vpop.f32.mrf.mxu1  ;;  %14598 = vmatmul.mubr.bf16.vlgmr.msra.gmra.mxu1 %v5541_v32  ;;  %14589 = vmatprep.mubr.msk.bf16.mxu0 %vm16276_vm7, %v16275_v10 }
 0x26a   : >> { %v14231_v15 = vpop.f32.mrf.mxu0  ;;  %14601 = vmatprep.mubr.msk.bf16.mxu1 %vm16276_vm7, %v16275_v10 }
 0x26b   : >> { %v18496_v49 = vadd.f32 %v3881_v38, %v3746_v36  ;;  %v14267_v3 = vpop.f32.mrf.mxu1 }
 0x26c   : >> { %v3716_v14 = vpop.f32.mrf.mxu0 }
 0x26d   : >> { %v3747_v29 = vadd.f32 %v3716_v14, %v18398_v12  ;;  %v3884_v25 = vpop.f32.mrf.mxu1 }
 0x26e   : >> { %v14232_v61 = vpop.f32.mrf.mxu0 }
 0x26f   : >> { %v3915_v6 = vadd.f32 %v3884_v25, %v3747_v29  ;;  %v14268_v46 = vpop.f32.mrf.mxu1 }
 0x270   : >> { %v3721_v27 = vpop.f32.mrf.mxu0  ;;  %14590 = vmatmul.mubr.bf16.gmra.mxu0 %v5537_v22 }
 0x271   : >> { %v3748_v48 = vadd.f32 %v3721_v27, %v18412_v34  ;;  %v3889_v53 = vpop.f32.mrf.mxu1  ;;  %14602 = vmatmul.mubr.bf16.gmra.mxu1 %v5543_v47  ;;  %14593 = vmatprep.mubr.msk.bf16.mxu0 %vm16276_vm7, %v16275_v10  ;;  %vm5767_vm7 = vsmask.f32 5392 }
 0x272   : >> { %v14235_v62 = vpop.f32.mrf.mxu0  ;;  %vm18597_vm15 = vmor %vm20743_vm3, %vm5767_vm7 }
 0x273   : >> { %v3916_v8 = vadd.f32 %v3889_v53, %v3748_v48  ;;  %v14271_v12 = vpop.f32.mrf.mxu1 }
 0x274   : >> { %v3724_v40 = vpop.f32.mrf.mxu0 }
 0x275   : >> { %v3749_v26 = vadd.f32 %v3724_v40, %v18426_v19  ;;  %v3892_v23 = vpop.f32.mrf.mxu1 }
 0x276   : >> { %v14236_v24 = vpop.f32.mrf.mxu0 }
 0x277   : >> { %v3917_v30 = vadd.f32 %v3892_v23, %v3749_v26  ;;  %v14272_v4 = vpop.f32.mrf.mxu1 }
 0x278   : >> { %v3729_v9 = vpop.f32.mrf.mxu0  ;;  %14594 = vmatmul.mubr.bf16.gmra.mxu0 %v5539_v58 }
 0x279   : >> { %v3750_v34 = vadd.f32 %v3729_v9, %v18440_v45  ;;  %v3897_v0 = vpop.f32.mrf.mxu1 }
 0x27a   : >> { %v14239_v16 = vpop.f32.mrf.mxu0 }
 0x27b   : >> { %v3918_v17 = vadd.f32 %v3897_v0, %v3750_v34  ;;  %v14275_v10 = vpop.f32.mrf.mxu1 }
 0x27c   : >> { %v3732_v1 = vpop.f32.mrf.mxu0 }
 0x27d   : >> { %v3751_v59 = vadd.f32 %v3732_v1, %v18452_v28  ;;  %v3900_v7 = vpop.f32.mrf.mxu1 }
 0x27e   : >> { %v14240_v55 = vpop.f32.mrf.mxu0 }
 0x27f   : >> { %v3919_v19 = vadd.f32 %v3900_v7, %v3751_v59  ;;  %v14276_v31 = vpop.f32.mrf.mxu1 }
 0x280   : >> { %v3737_v20 = vpop.f32.mrf.mxu0 }
 0x281   : >> { %v3752_v39 = vadd.f32 %v3737_v20, %v18464_v11  ;;  %v3905_v35 = vpop.f32.mrf.mxu1 }
 0x282   : >> { %v14243_v32 = vpop.f32.mrf.mxu0 }
 0x283   : >> { %v3920_v18 = vadd.f32 %v3905_v35, %v3752_v39  ;;  %v14279_v54 = vpop.f32.mrf.mxu1 }
 0x284   : >> { %v3740_v36 = vpop.f32.mrf.mxu0 }
 0x285   : >> { %v3753_v45 = vadd.f32 %v3740_v36, %v18472_v33  ;;  %v3908_v38 = vpop.f32.mrf.mxu1 }
 0x286   : >> { %v14244_v13 = vpop.f32.mrf.mxu0 }
 0x287   : >> { %v3921_v15 = vadd.f32 %v3908_v38, %v3753_v45  ;;  %v14280_v21 = vpop.f32.mrf.mxu1 }
 0x288   : >> { %v4065_v3 = vpop.f32.mrf.mxu0 }
 0x289   : >> { %v4104_v28 = vadd.f32 %v4065_v3, %v18482_v5  ;;  %v4301_v14 = vpop.f32.mrf.mxu1 }
 0x28a   : >> { %v14299_v29 = vpop.f32.mrf.mxu0 }
 0x28b   : >> { %v4340_v25 = vadd.f32 %v4301_v14, %v4104_v28  ;;  %v14335_v22 = vpop.f32.mrf.mxu1 }
 0x28c   : >> { %v4068_v61 = vpop.f32.mrf.mxu0 }
 0x28d   : >> { %v4105_v11 = vadd.f32 %v4068_v61, %v18487_v41  ;;  %v4304_v47 = vpop.f32.mrf.mxu1 }
 0x28e   : >> { %v14300_v46 = vpop.f32.mrf.mxu0 }
 0x28f   : >> { %v4341_v27 = vadd.f32 %v4304_v47, %v4105_v11  ;;  %v14336_v48 = vpop.f32.mrf.mxu1 }
 0x290   : >> { %v4073_v53 = vpop.f32.mrf.mxu0 }
 0x291   : >> { %v4106_v33 = vadd.f32 %v4073_v53, %v18496_v49  ;;  %v4309_v62 = vpop.f32.mrf.mxu1 }
 0x292   : >> { %v14303_v12 = vpop.f32.mrf.mxu0 }
 0x293   : >> { %v4342_v40 = vadd.f32 %v4309_v62, %v4106_v33  ;;  %v14339_v26 = vpop.f32.mrf.mxu1 }
 0x294   : >> { %v4076_v23 = vpop.f32.mrf.mxu0 }
 0x295   : >> { %v4107_v5 = vadd.f32 %v4076_v23, %v3915_v6  ;;  %v4312_v58 = vpop.f32.mrf.mxu1 }
 0x296   : >> { %v14304_v24 = vpop.f32.mrf.mxu0 }
 0x297   : >> { %v4343_v4 = vadd.f32 %v4312_v58, %v4107_v5  ;;  %v14340_v9 = vpop.f32.mrf.mxu1 }
 0x298   : >> { %v4081_v34 = vpop.f32.mrf.mxu0 }
 0x299   : >> { %v4108_v0 = vadd.f32 %v4081_v34, %v3916_v8  ;;  %v4317_v41 = vpop.f32.mrf.mxu1 }
 0x29a   : >> { %v14307_v16 = vpop.f32.mrf.mxu0 }
 0x29b   : >> { %v4344_v10 = vadd.f32 %v4317_v41, %v4108_v0  ;;  %v14343_v1 = vpop.f32.mrf.mxu1 }
 0x29c   : >> { %v4084_v59 = vpop.f32.mrf.mxu0 }
 0x29d   : >> { %v4109_v7 = vadd.f32 %v4084_v59, %v3917_v30  ;;  %v4320_v55 = vpop.f32.mrf.mxu1 }
 0x29e   : >> { %v14308_v49 = vpop.f32.mrf.mxu0 }
 0x29f   : >> { %v4345_v31 = vadd.f32 %v4320_v55, %v4109_v7  ;;  %v14344_v20 = vpop.f32.mrf.mxu1 }
 0x2a0   : >> { %v4089_v39 = vpop.f32.mrf.mxu0 }
 0x2a1   : >> { %v4110_v35 = vadd.f32 %v4089_v39, %v3918_v17  ;;  %v4325_v32 = vpop.f32.mrf.mxu1 }
 0x2a2   : >> { %v14311_v6 = vpop.f32.mrf.mxu0 }
 0x2a3   : >> { %v4346_v54 = vadd.f32 %v4325_v32, %v4110_v35  ;;  %v14347_v36 = vpop.f32.mrf.mxu1 }
 0x2a4   : >> { %v4092_v45 = vpop.f32.mrf.mxu0 }
 0x2a5   : >> { %v4111_v38 = vadd.f32 %v4092_v45, %v3919_v19  ;;  %v4328_v13 = vpop.f32.mrf.mxu1 }
 0x2a6   : >> { %v14312_v8 = vpop.f32.mrf.mxu0 }
 0x2a7   : >> { %v4347_v21 = vadd.f32 %v4328_v13, %v4111_v38  ;;  %v14348_v3 = vpop.f32.mrf.mxu1 }
 0x2a8   : >> { %v4097_v28 = vpop.f32.mrf.mxu0 }
 0x2a9   : >> { %v4112_v14 = vadd.f32 %v4097_v28, %v3920_v18  ;;  %v4333_v29 = vpop.f32.mrf.mxu1 }
 0x2aa   : >> { %v14315_v30 = vpop.f32.mrf.mxu0 }
 0x2ab   : >> { %v4348_v22 = vadd.f32 %v4333_v29, %v4112_v14  ;;  %v14351_v61 = vpop.f32.mrf.mxu1 }
 0x2ac   : >> { %v4100_v11 = vpop.f32.mrf.mxu0 }
 0x2ad   : >> { %v4113_v47 = vadd.f32 %v4100_v11, %v3921_v15  ;;  %v4336_v46 = vpop.f32.mrf.mxu1 }
 0x2ae   : >> { %v14316_v17 = vpop.f32.mrf.mxu0 }
 0x2af   : >> { %v4349_v48 = vadd.f32 %v4336_v46, %v4113_v47  ;;  %v14352_v53 = vpop.f32.mrf.mxu1 }
 0x2b0   : >> { %v4469_v33 = vpop.f32.mrf.mxu0 }
 0x2b1   : >> { %v4508_v62 = vadd.f32 %v4469_v33, %v4340_v25  ;;  %v4672_v12 = vpop.f32.mrf.mxu1 }
 0x2b2   : >> { %v14371_v19 = vpop.f32.mrf.mxu0 }
 0x2b3   : >> { %v4711_v26 = vadd.f32 %v4672_v12, %v4508_v62  ;;  %v14407_v23 = vpop.f32.mrf.mxu1 }
 0x2b4   : >> { %v4472_v5 = vpop.f32.mrf.mxu0 }
 0x2b5   : >> { %v4509_v58 = vadd.f32 %v4472_v5, %v4341_v27  ;;  %v4675_v24 = vpop.f32.mrf.mxu1 }
 0x2b6   : >> { %v14372_v18 = vpop.f32.mrf.mxu0 }
 0x2b7   : >> { %v4712_v9 = vadd.f32 %v4675_v24, %v4509_v58  ;;  %v14408_v34 = vpop.f32.mrf.mxu1 }
 0x2b8   : >> { %v4477_v0 = vpop.f32.mrf.mxu0 }
 0x2b9   : >> { %v4510_v41 = vadd.f32 %v4477_v0, %v4342_v40  ;;  %v4680_v16 = vpop.f32.mrf.mxu1 }
 0x2ba   : >> { %v14375_v15 = vpop.f32.mrf.mxu0 }
 0x2bb   : >> { %v4713_v1 = vadd.f32 %v4680_v16, %v4510_v41  ;;  %v14411_v59 = vpop.f32.mrf.mxu1 }
 0x2bc   : >> { %v4480_v7 = vpop.f32.mrf.mxu0 }
 0x2bd   : >> { %v4511_v55 = vadd.f32 %v4480_v7, %v4343_v4  ;;  %v4683_v49 = vpop.f32.mrf.mxu1 }
 0x2be   : >> { %v14376_v25 = vpop.f32.mrf.mxu0 }
 0x2bf   : >> { %v4714_v20 = vadd.f32 %v4683_v49, %v4511_v55  ;;  %v14412_v39 = vpop.f32.mrf.mxu1 }
 0x2c0   : >> { %v4485_v35 = vpop.f32.mrf.mxu0 }
 0x2c1   : >> { %v4512_v32 = vadd.f32 %v4485_v35, %v4344_v10  ;;  %v4688_v6 = vpop.f32.mrf.mxu1 }
 0x2c2   : >> { %v14379_v27 = vpop.f32.mrf.mxu0 }
 0x2c3   : >> { %v4715_v36 = vadd.f32 %v4688_v6, %v4512_v32  ;;  %v14415_v45 = vpop.f32.mrf.mxu1 }
 0x2c4   : >> { %v4488_v38 = vpop.f32.mrf.mxu0 }
 0x2c5   : >> { %v4513_v13 = vadd.f32 %v4488_v38, %v4345_v31  ;;  %v4691_v8 = vpop.f32.mrf.mxu1 }
 0x2c6   : >> { %v14380_v40 = vpop.f32.mrf.mxu0 }
 0x2c7   : >> { %v4716_v3 = vadd.f32 %v4691_v8, %v4513_v13  ;;  %v14416_v28 = vpop.f32.mrf.mxu1 }
 0x2c8   : >> { %v4493_v14 = vpop.f32.mrf.mxu0 }
 0x2c9   : >> { %v4514_v29 = vadd.f32 %v4493_v14, %v4346_v54  ;;  %v4696_v30 = vpop.f32.mrf.mxu1 }
 0x2ca   : >> { %v14383_v4 = vpop.f32.mrf.mxu0 }
 0x2cb   : >> { %v18513_v61 = vadd.f32 %v4696_v30, %v4514_v29  ;;  %v14419_v11 = vpop.f32.mrf.mxu1 }
 0x2cc   : >> { %v4496_v47 = vpop.f32.mrf.mxu0 }
 0x2cd   : >> { %v4515_v46 = vadd.f32 %v4496_v47, %v4347_v21  ;;  %v4699_v10 = vpop.f32.mrf.mxu1 }
 0x2ce   : >> { %v14384_v17 = vpop.f32.mrf.mxu0 }
 0x2cf   : >> { %v18515_v53 = vadd.f32 %v4699_v10, %v4515_v46  ;;  %v14420_v33 = vpop.f32.mrf.mxu1 }
 0x2d0   : >> { %v4501_v62 = vpop.f32.mrf.mxu0 }
 0x2d1   : >> { %v4516_v31 = vadd.f32 %v4501_v62, %v4348_v22  ;;  %v4704_v12 = vpop.f32.mrf.mxu1 }
 0x2d2   : >> { %v14387_v19 = vpop.f32.mrf.mxu0 }
 0x2d3   : >> { %v18517_v23 = vadd.f32 %v4704_v12, %v4516_v31  ;;  %v14423_v5 = vpop.f32.mrf.mxu1 }
 0x2d4   : >> { %v4504_v54 = vpop.f32.mrf.mxu0 }
 0x2d5   : >> { %v4517_v58 = vadd.f32 %v4504_v54, %v4349_v48  ;;  %v4707_v24 = vpop.f32.mrf.mxu1 }
 0x2d6   : >> { %v14388_v18 = vpop.f32.mrf.mxu0 }
 0x2d7   : >> { %v18519_v34 = vadd.f32 %v4707_v24, %v4517_v58  ;;  %v14424_v0 = vpop.f32.mrf.mxu1 }
 0x2d8   : >> { %v4882_v21 = vpop.f32.mrf.mxu0 }
 0x2d9   : >> { %v4921_v41 = vadd.f32 %v4882_v21, %v4711_v26  ;;  %v5050_v16 = vpop.f32.mrf.mxu1 }
 0x2da   : >> { %v14443_v15 = vpop.f32.mrf.mxu0 }
 0x2db   : >> { %v18521_v59 = vadd.f32 %v5050_v16, %v4921_v41  ;;  %v14479_v7 = vpop.f32.mrf.mxu1 }
 0x2dc   : >> { %v4885_v22 = vpop.f32.mrf.mxu0 }
 0x2dd   : >> { %v4922_v55 = vadd.f32 %v4885_v22, %v4712_v9  ;;  %v5053_v49 = vpop.f32.mrf.mxu1 }
 0x2de   : >> { %v14444_v25 = vpop.f32.mrf.mxu0 }
 0x2df   : >> { %v18523_v39 = vadd.f32 %v5053_v49, %v4922_v55  ;;  %v14480_v35 = vpop.f32.mrf.mxu1 }
 0x2e0   : >> { %v4890_v48 = vpop.f32.mrf.mxu0 }
 0x2e1   : >> { %v4923_v32 = vadd.f32 %v4890_v48, %v4713_v1  ;;  %v5058_v6 = vpop.f32.mrf.mxu1 }
 0x2e2   : >> { %v14447_v27 = vpop.f32.mrf.mxu0 }
 0x2e3   : >> { %v18525_v45 = vadd.f32 %v5058_v6, %v4923_v32  ;;  %v14483_v38 = vpop.f32.mrf.mxu1 }
 0x2e4   : >> { %v4893_v26 = vpop.f32.mrf.mxu0 }
 0x2e5   : >> { %v4924_v13 = vadd.f32 %v4893_v26, %v4714_v20  ;;  %v5061_v8 = vpop.f32.mrf.mxu1 }
 0x2e6   : >> { %v14448_v40 = vpop.f32.mrf.mxu0 }
 0x2e7   : >> { %v18527_v28 = vadd.f32 %v5061_v8, %v4924_v13  ;;  %v14484_v14 = vpop.f32.mrf.mxu1 }
 0x2e8   : >> { %v4898_v9 = vpop.f32.mrf.mxu0 }
 0x2e9   : >> { %v4925_v29 = vadd.f32 %v4898_v9, %v4715_v36  ;;  %v5066_v30 = vpop.f32.mrf.mxu1 }
 0x2ea   : >> { %v14451_v4 = vpop.f32.mrf.mxu0 }
 0x2eb   : >> { %v18529_v11 = vadd.f32 %v5066_v30, %v4925_v29  ;;  %v14487_v47 = vpop.f32.mrf.mxu1 }
 0x2ec   : >> { %v4901_v1 = vpop.f32.mrf.mxu0 }
 0x2ed   : >> { %v4926_v46 = vadd.f32 %v4901_v1, %v4716_v3  ;;  %v5069_v10 = vpop.f32.mrf.mxu1 }
 0x2ee   : >> { %v14452_v17 = vpop.f32.mrf.mxu0 }
 0x2ef   : >> { %v18531_v33 = vadd.f32 %v5069_v10, %v4926_v46  ;;  %v14488_v62 = vpop.f32.mrf.mxu1 }
 0x2f0   : >> { %v4906_v20 = vpop.f32.mrf.mxu0 }
 0x2f1   : >> { %v5074_v31 = vpop.f32.mrf.mxu1 }
 0x2f2   : >> { %v14455_v12 = vpop.f32.mrf.mxu0 }
 0x2f3   : >> { %v14491_v19 = vpop.f32.mrf.mxu1 }
 0x2f4   : >> { %v4909_v5 = vpop.f32.mrf.mxu0 }
 0x2f5   : >> { %v5077_v54 = vpop.f32.mrf.mxu1 }
 0x2f6   : >> { %v14456_v58 = vpop.f32.mrf.mxu0 }
 0x2f7   : >> { %v14492_v36 = vpop.f32.mrf.mxu1 }
 0x2f8   : >> { %v4914_v24 = vpop.f32.mrf.mxu0 }
 0x2f9   : >> { %v18533_v18 = vpop.f32.mrf.mxu1 }
 0x2fa   : >> { %v14459_v0 = vpop.f32.mrf.mxu0 }
 0x2fb   : >> { %v14495_v21 = vpop.f32.mrf.mxu1  ;;  %v4927_v0 = vadd.f32 %v4906_v20, %v18513_v61 }
 0x2fc   : >> { %v4917_v41 = vpop.f32.mrf.mxu0 }
 0x2fd   : >> { %v18535_v3 = vpop.f32.mrf.mxu1  ;;  %v4930_v61 = vadd.f32 %v4917_v41, %v18519_v34 }
 0x2fe   : >> { %v14460_v16 = vpop.f32.mrf.mxu0 }
 0x2ff   : >> { %v14496_v15 = vpop.f32.mrf.mxu1 }
 0x300   : >> { %v5253_v7 = vpop.f32.mrf.mxu0 }
 0x301   : >> { %v5463_v22 = vpop.f32.mrf.mxu1 }
 0x302   : >> { %v14515_v55 = vpop.f32.mrf.mxu0 }
 0x303   : >> { %v14551_v49 = vpop.f32.mrf.mxu1 }
 0x304   : >> { %v5256_v25 = vpop.f32.mrf.mxu0  ;;  %v5095_v49 = vadd.f32 %v5074_v31, %v4927_v0 }
 0x305   : >> { %v5466_v35 = vpop.f32.mrf.mxu1 }
 0x306   : >> { %v14516_v48 = vpop.f32.mrf.mxu0 }
 0x307   : >> { %v14552_v32 = vpop.f32.mrf.mxu1  ;;  %v4928_v48 = vadd.f32 %v4909_v5, %v18515_v53 }
 0x308   : >> { %v5261_v6 = vpop.f32.mrf.mxu0 }
 0x309   : >> { %v18537_v27 = vpop.f32.mrf.mxu1 }
 0x30a   : >> { %v14519_v38 = vpop.f32.mrf.mxu0 }
 0x30b   : >> { %v14555_v26 = vpop.f32.mrf.mxu1  ;;  %v5292_v38 = vadd.f32 %v5253_v7, %v18521_v59  ;;  %v18552_v59 = vld [vmem:[%s20661_s2] ss:$0 sm:$0xff] }
 0x30c   : >> { %v5264_v13 = vpop.f32.mrf.mxu0 }
 0x30d   : >> { %v5474_v8 = vpop.f32.mrf.mxu1  ;;  %v5502_v20 = vadd.f32 %v5463_v22, %v5292_v38  ;;  %v5295_v34 = vadd.f32 %v5264_v13, %v18527_v28 }
 0x30e   : >> { %v14520_v40 = vpop.f32.mrf.mxu0 }
 0x30f   : >> { %v14556_v14 = vpop.f32.mrf.mxu1  ;;  %v18562_v13 = vadd.f32 %v5474_v8, %v5295_v34 }
 0x310   : >> { %v5269_v9 = vpop.f32.mrf.mxu0 }
 0x311   : >> { %v18539_v29 = vpop.f32.mrf.mxu1 }
 0x312   : >> { %v14523_v30 = vpop.f32.mrf.mxu0 }
 0x313   : >> { %v14559_v4 = vpop.f32.mrf.mxu1 }
 0x314   : >> { %v5272_v47 = vpop.f32.mrf.mxu0  ;;  %v5096_v4 = vadd.f32 %v5077_v54, %v4928_v48 }
 0x315   : >> { %v18541_v1 = vpop.f32.mrf.mxu1 }
 0x316   : >> { %v14524_v46 = vpop.f32.mrf.mxu0 }
 0x317   : >> { %v14560_v10 = vpop.f32.mrf.mxu1  ;;  %v4929_v46 = vadd.f32 %v4914_v24, %v18517_v23  ;;  %v5294_v23 = vadd.f32 %v5261_v6, %v18525_v45 }
 0x318   : >> { %v5277_v17 = vpop.f32.mrf.mxu0 }
 0x319   : >> { %v5487_v62 = vpop.f32.mrf.mxu1  ;;  %v5298_v40 = vadd.f32 %v5277_v17, %v5095_v49  ;;  %v5097_v54 = vadd.f32 %v18533_v18, %v4929_v46  ;;  %v5504_v28 = vadd.f32 %v18537_v27, %v5294_v23 }
 0x31a   : >> { %v14527_v12 = vpop.f32.mrf.mxu0 }
 0x31b   : >> { %v14563_v19 = vpop.f32.mrf.mxu1  ;;  %v5293_v12 = vadd.f32 %v5256_v25, %v18523_v39  ;;  %v5508_v31 = vadd.f32 %v5487_v62, %v5298_v40  ;;  %v5098_v39 = vadd.f32 %v18535_v3, %v4930_v61  ;;  %v5296_v25 = vadd.f32 %v5269_v9, %v18529_v11 }
 0x31c   : >> { %v5280_v58 = vpop.f32.mrf.mxu0 }
 0x31d   : >> { %v5490_v36 = vpop.f32.mrf.mxu1  ;;  %v5299_v0 = vadd.f32 %v5280_v58, %v5096_v4  ;;  %v5503_v22 = vadd.f32 %v5466_v35, %v5293_v12  ;;  %v18565_v9 = vadd.f32 %v18539_v29, %v5296_v25 }
 0x31e   : >> { %v14528_v21 = vpop.f32.mrf.mxu0 }
 0x31f   : >> { %v14564_v16 = vpop.f32.mrf.mxu1  ;;  %v5509_v58 = vadd.f32 %v5490_v36, %v5299_v0  ;;  %v18568_v36 = vadd.f32 %v5272_v47, %v18531_v33 }
 0x320   : >> { %v5285_v15 = vpop.f32.mrf.mxu0 }
 0x321   : >> { %v5495_v55 = vpop.f32.mrf.mxu1  ;;  %v5300_v21 = vadd.f32 %v5285_v15, %v5097_v54 }
 0x322   : >> { %v14531_v32 = vpop.f32.mrf.mxu0 }
 0x323   : >> { %v14567_v26 = vpop.f32.mrf.mxu1 }
 0x324   : >> { %v5288_v14 = vpop.f32.mrf.mxu0  ;;  %v5510_v26 = vadd.f32 %v5495_v55, %v5300_v21 }
 0x325   : >> { %v5498_v30 = vpop.f32.mrf.mxu1  ;;  %v5301_v18 = vadd.f32 %v5288_v14, %v5098_v39 }
 0x326   : >> { %v14532_v10 = vpop.f32.mrf.mxu0 }
 0x327   : >> { %v14568_v19 = vpop.f32.mrf.mxu1  ;;  %v5511_v4 = vadd.f32 %v5498_v30, %v5301_v18 }
 0x328   : >> { %v5631_v53 = vpop.f32.mrf.mxu0 }
 0x329   : >> { %v5670_v5 = vadd.f32 %v5631_v53, %v5502_v20  ;;  %v5655_v7 = vpop.f32.mrf.mxu1 }
 0x32a   : >> { %v5676_v24 = vadd.f32 %v5655_v7, %v5508_v31  ;;  %v14587_v41 = vpop.f32.mrf.mxu0 }
 0x32b   : >> { %v5687_v17 = vadd.f32 %v18552_v59, %v5670_v5  ;;  %v14599_v62 = vpop.f32.mrf.mxu1 }
 0x32c   : >> { %v5693_v16 = vadd.f32 %v18552_v59, %v5676_v24  ;;  %v5634_v49 = vpop.f32.mrf.mxu0  ;;  %v12078_v24 = vld [vmem:[%s18583_s11 + $0x38] sm:$0xe] }
 0x32d   : >> { %v5697_v48 = vmax.f32 %v5687_v17, 0.0  ;;  %v5671_v45 = vadd.f32 %v5634_v49, %v5503_v22  ;;  %v5658_v6 = vpop.f32.mrf.mxu1 }
 0x32e   : >> { %v5703_v3 = vmax.f32 %v5693_v16, 0.0  ;;  %v5677_v35 = vadd.f32 %v5658_v6, %v5509_v58  ;;  %v14588_v11 = vpop.f32.mrf.mxu0 }
 0x32f   : >> { %v5727_v15 = vsel %vm16515_vm9, %v5697_v48, 0.0  ;;  %v5688_v32 = vadd.f32 %v18552_v59, %v5671_v45  ;;  %v14600_v38 = vpop.f32.mrf.mxu1 }
 0x330   : >> { %v12920_v27 = vpack.c.bf16 %v5727_v15, %v5727_v15  ;;  %v5733_v8 = vsel %vm16555_vm5, %v5703_v3, 0.0  ;;  %v5694_v40 = vadd.f32 %v18552_v59, %v5677_v35  ;;  %v5639_v14 = vpop.f32.mrf.mxu0 }
 0x331   : >> { %v12926_v29 = vpack.c.bf16 %v5733_v8, %v5733_v8  ;;  %v5698_v46 = vmax.f32 %v5688_v32, 0.0  ;;  %v5672_v10 = vadd.f32 %v5639_v14, %v5504_v28  ;;  %v5663_v33 = vpop.f32.mrf.mxu1 }
 0x332   : >> { %v5770_v47 = vshrl.u32 %v12920_v27, 16  ;;  %v5773_v61 = vshll.u32 %v12920_v27, 16  ;;  %v5704_v20 = vmax.f32 %v5694_v40, 0.0  ;;  %v5678_v12 = vadd.f32 %v5663_v33, %v5510_v26  ;;  %v14591_v19 = vpop.f32.mrf.mxu0 }
 0x333   : >> { %v5829_v31 = vshrl.u32 %v12926_v29, 16  ;;  %v5832_v55 = vshll.u32 %v12926_v29, 16  ;;  %v5728_v0 = vsel %vm16530_vm4, %v5698_v46, 0.0  ;;  %v5689_v53 = vadd.f32 %v18552_v59, %v5672_v10  ;;  %v14603_v5 = vpop.f32.mrf.mxu1 }
 0x334   : >> { %v5772_v7 = vrot.slane %v5770_v47, 6  ;;  %v5775_v30 = vrot.slane %v5773_v61, 7  ;;  %v12921_v54 = vpack.c.bf16 %v5728_v0, %v5728_v0  ;;  %v5734_v23 = vsel %vm16559_vm1, %v5704_v20, 0.0  ;;  %v5642_v34 = vpop.f32.mrf.mxu0 }
 0x335   : >> { %v5831_v41 = vrot.slane %v5829_v31, 6  ;;  %v5834_v39 = vrot.slane %v5832_v55, 7  ;;  %v12927_v22 = vpack.c.bf16 %v5734_v23, %v5734_v23  ;;  %v5699_v25 = vmax.f32 %v5689_v53, 0.0  ;;  %v5666_v17 = vpop.f32.mrf.mxu1 }
 0x336   : >> { %v5776_v62 = vor.u32 %v5775_v30, %v5772_v7  ;;  %v5779_v58 = vshrl.u32 %v12921_v54, 16  ;;  %v5782_v21 = vshll.u32 %v12921_v54, 16  ;;  %v5695_v16 = vadd.f32 %v18552_v59, %v5678_v12  ;;  %v14592_v49 = vpop.f32.mrf.mxu0 }
 0x337   : >> { %v18587_v18 = vor.u32 %v5834_v39, %v5831_v41  ;;  %v5839_v48 = vshrl.u32 %v12927_v22, 16  ;;  %v5842_v45 = vshll.u32 %v12927_v22, 16  ;;  %v5729_v6 = vsel %vm16534_vm12, %v5699_v25, 0.0  ;;  %v14604_v28 = vpop.f32.mrf.mxu1 }
 0x338   : >> { %v5777_v3 = vrot.slane %v5776_v62, 4  ;;  %v5882_v35 = vsel %vm16576_vm0, %v5776_v62, %v12078_v24  ;;  %v5781_v11 = vrot.slane %v5779_v58, 6  ;;  %v5784_v15 = vrot.slane %v5782_v21, 7  ;;  %v5647_v32 = vpop.f32.mrf.mxu0 }
 0x339   : >> { %12079 = vst [vmem:[%s18583_s11 + $0x38] sm:$0xe] %v5882_v35  ;;  %v5837_v38 = vrot.slane %v18587_v18, 4  ;;  %v5841_v27 = vrot.slane %v5839_v48, 6  ;;  %v5844_v8 = vrot.slane %v5842_v45, 7  ;;  %v12922_v40 = vpack.c.bf16 %v5729_v6, %v5729_v6 }
 0x33a   : >> { %v5785_v14 = vor.u32 %v5784_v15, %v5781_v11  ;;  %v5705_v29 = vmax.f32 %v5695_v16, 0.0  ;;  %v5673_v46 = vadd.f32 %v5642_v34, %v18562_v13  ;;  %v5679_v10 = vadd.f32 %v5666_v17, %v5511_v4  ;;  %v14595_v33 = vpop.f32.mrf.mxu0 }
 0x33b   : >> { %v5845_v47 = vor.u32 %v5844_v8, %v5841_v27  ;;  %v5789_v61 = vshrl.u32 %v12922_v40, 16  ;;  %v5792_v20 = vshll.u32 %v12922_v40, 16  ;;  %v5674_v12 = vadd.f32 %v5647_v32, %v18565_v9 }
 0x33c   : >> { %v5786_v19 = vsel %vm18597_vm15, %v5777_v3, %v5785_v14  ;;  %v5735_v31 = vsel %vm16563_vm14, %v5705_v29, 0.0  ;;  %v5690_v55 = vadd.f32 %v18552_v59, %v5673_v46  ;;  %v5650_v0 = vpop.f32.mrf.mxu0  ;;  %v5507_v13 = vadd.f32 %v18541_v1, %v18568_v36 }
 0x33d   : >> { %12080 = vst [vmem:[%s18583_s11 + $0x3c] sm:$0xf] %v5786_v19  ;;  %v5846_v4 = vsel %vm18597_vm15, %v5837_v38, %v5845_v47  ;;  %v5791_v53 = vrot.slane %v5789_v61, 6  ;;  %v5794_v5 = vrot.slane %v5792_v20, 7  ;;  %v12928_v9 = vpack.c.bf16 %v5735_v31, %v5735_v31 }
 0x33e   : >> { %12086 = vst [vmem:[%s18583_s11 + $0x54] sm:$0xf] %v5846_v4  ;;  %v5700_v7 = vmax.f32 %v5690_v55, 0.0  ;;  %v5696_v30 = vadd.f32 %v18552_v59, %v5679_v10  ;;  %v5691_v54 = vadd.f32 %v18552_v59, %v5674_v12  ;;  %v14596_v23 = vpop.f32.mrf.mxu0  ;;  %v5787_v34 = vrot.slane %v5785_v14, 4 }
 0x33f   : >> { %v5795_v24 = vor.u32 %v5794_v5, %v5791_v53  ;;  %v5675_v41 = vadd.f32 %v5650_v0, %v5507_v13  ;;  %v5849_v39 = vshrl.u32 %v12928_v9, 16  ;;  %v5852_v1 = vshll.u32 %v12928_v9, 16  ;;  %v12089_v13 = vld [vmem:[%s18583_s11 + $0x60] sm:$0x3] }
 0x340   : >> { %v5730_v36 = vsel %vm16538_vm6, %v5700_v7, 0.0  ;;  %v5706_v22 = vmax.f32 %v5696_v30, 0.0  ;;  %v5701_v62 = vmax.f32 %v5691_v54, 0.0  ;;  %v5847_v3 = vrot.slane %v5845_v47, 4 }
 0x341   : >> { %v5796_v25 = vsel %vm18597_vm15, %v5787_v34, %v5795_v24  ;;  %v12923_v17 = vpack.c.bf16 %v5730_v36, %v5730_v36  ;;  %v5851_v58 = vrot.slane %v5849_v39, 6  ;;  %v5854_v21 = vrot.slane %v5852_v1, 7 }
 0x342   : >> { %12081 = vst [vmem:[%s18583_s11 + $0x40] sm:$0xf] %v5796_v25  ;;  %v5736_v16 = vsel %vm16569_vm8, %v5706_v22, 0.0  ;;  %v5692_v49 = vadd.f32 %v18552_v59, %v5675_v41  ;;  %v5731_v28 = vsel %vm16547_vm13, %v5701_v62, 0.0  ;;  %v5797_v40 = vrot.slane %v5795_v24, 4 }
 0x343   : >> { %v5799_v48 = vshrl.u32 %v12923_v17, 16  ;;  %v5802_v45 = vshll.u32 %v12923_v17, 16  ;;  %v12929_v6 = vpack.c.bf16 %v5736_v16, %v5736_v16  ;;  %v5855_v35 = vor.u32 %v5854_v21, %v5851_v58 }
 0x344   : >> { %v12924_v11 = vpack.c.bf16 %v5731_v28, %v5731_v28  ;;  %v5702_v15 = vmax.f32 %v5692_v49, 0.0 }
 0x345   : >> { %v5801_v32 = vrot.slane %v5799_v48, 6  ;;  %v5804_v38 = vrot.slane %v5802_v45, 7  ;;  %v5859_v27 = vshrl.u32 %v12929_v6, 16  ;;  %v5862_v8 = vshll.u32 %v12929_v6, 16 }
 0x346   : >> { %v5856_v59 = vsel %vm18597_vm15, %v5847_v3, %v5855_v35  ;;  %v5809_v14 = vshrl.u32 %v12924_v11, 16  ;;  %v5812_v29 = vshll.u32 %v12924_v11, 16  ;;  %v5732_v47 = vsel %vm16551_vm10, %v5702_v15, 0.0 }
 0x347   : >> { %12087 = vst [vmem:[%s18583_s11 + $0x58] sm:$0xf] %v5856_v59  ;;  %v5805_v46 = vor.u32 %v5804_v38, %v5801_v32  ;;  %v5861_v10 = vrot.slane %v5859_v27, 6  ;;  %v5864_v33 = vrot.slane %v5862_v8, 7  ;;  %v12925_v12 = vpack.c.bf16 %v5732_v47, %v5732_v47 }
 0x348   : >> { %v5811_v61 = vrot.slane %v5809_v14, 6  ;;  %v5814_v20 = vrot.slane %v5812_v29, 7  ;;  %v5857_v19 = vrot.slane %v5855_v35, 4 }
 0x349   : >> { %v5806_v31 = vsel %vm18597_vm15, %v5797_v40, %v5805_v46  ;;  %v5865_v55 = vor.u32 %v5864_v33, %v5861_v10  ;;  %v5807_v0 = vrot.slane %v5805_v46, 4  ;;  %v5819_v53 = vshrl.u32 %v12925_v12, 16 }
 0x34a   : >> { %12082 = vst [vmem:[%s18583_s11 + $0x44] sm:$0xf] %v5806_v31  ;;  %v5815_v4 = vor.u32 %v5814_v20, %v5811_v61  ;;  %v5822_v5 = vshll.u32 %v12925_v12, 16 }
 0x34b   : >> { %v5866_v9 = vsel %vm18597_vm15, %v5857_v19, %v5865_v55  ;;  %v5867_v7 = vrot.slane %v5865_v55, 4  ;;  %v5821_v54 = vrot.slane %v5819_v53, 6 }
 0x34c   : >> { %12088 = vst [vmem:[%s18583_s11 + $0x5c] sm:$0xf] %v5866_v9  ;;  %v5816_v30 = vsel %vm18597_vm15, %v5807_v0, %v5815_v4  ;;  %v5824_v23 = vrot.slane %v5822_v5, 7  ;;  %v5817_v24 = vrot.slane %v5815_v4, 4 }
 0x34d   : >> { %v5894_v34 = vsel %vm16315_vm2, %v5867_v7, %v12089_v13  ;;  %12083 = vst [vmem:[%s18583_s11 + $0x48] sm:$0xf] %v5816_v30 }
 0x34e   : >> { %12090 = vst [vmem:[%s18583_s11 + $0x60] sm:$0x3] %v5894_v34  ;;  %v5825_v41 = vor.u32 %v5824_v23, %v5821_v54 }
 0x34f   : > { %455 = sbr.rel (!%p453_p4) target bundleno = 63 (0x3f), region = 140 }
 0x350   : >> { %v5826_v39 = vsel %vm18597_vm15, %v5817_v24, %v5825_v41  ;;  %v5827_v1 = vrot.slane %v5825_v41, 4 }
 0x351   : >> { %12084 = vst [vmem:[%s18583_s11 + $0x4c] sm:$0xf] %v5826_v39 }
 0x352   : >> { %v5836_v36 = vsel %vm18597_vm15, %v5827_v1, %v18587_v18 }
 0x353   : >> { %12085 = vst [vmem:[%s18583_s11 + $0x50] sm:$0xf] %v5836_v36 }
 0x354 LB: >> { %v15955_v22 = vld [vmem:[%s20660_s1 + $0x738] sm:$0xff]   ;;  %v16277_v26 = vmov 0.0   ;;  %v15957_v2 = vld [vmem:[%s20660_s1 + $0x730] sm:$0xff]   ;;  %vm16278_vm2 = vmmov 0   ;;  %v15959_v42 = vld [vmem:[%s20660_s1 + $0x728] sm:$0xff]   ;;  %s12930_s27 = smul.u32 52, %s16272_s9  ;;  %s16272_s9 = sphi %s18654_s9, %s5901_s9  }
 0x355   : >> { %14605 = vmatprep.subr.bf16.mxu0 %v16277_v26  ;;  %14641 = vmatprep.subr.bf16.mxu1 %v16277_v26  ;;  %v15956_v18 = vld [vmem:[%s20660_s1 + $0x6f8] sm:$0xff]   ;;  %v15958_v37 = vld [vmem:[%s20660_s1 + $0x6f0] sm:$0xff]   ;;  %v15960_v43 = vld [vmem:[%s20660_s1 + $0x6e8] sm:$0xff]   ;;  %vm20746_vm9 = vsmask.f32 7424  ;;  %vm20751_vm10 = vcmask 1046528  }
 0x356   : >> { %14606 = vmatpush3.bf16.msra.mxu0 %v15955_v22  ;;  %14621 = vmatprep.mubr.msk.bf16.mxu0 %vm16278_vm2, %v16277_v26  ;;  %v15961_v44 = vld [vmem:[%s20660_s1 + $0x720] sm:$0xff]   ;;  %v15963_v51 = vld [vmem:[%s20660_s1 + $0x718] sm:$0xff]   ;;  %s18704_s15 = scalar_lea.vmem [#allocation2], %s12930_s27  ;;  %v15965_v60 = vld [vmem:[%s20660_s1 + $0x710] sm:$0xff]   ;;  %s11154_s8 = smul.u32 80, %s16272_s9 }
 0x357   : >> { %14642 = vmatpush3.bf16.msra.mxu1 %v15956_v18  ;;  %14607 = vmatprep.subr.bf16.mxu0 %v16277_v26  ;;  %v15962_v50 = vld [vmem:[%s20660_s1 + $0x6e0] sm:$0xff]   ;;  %v15964_v52 = vld [vmem:[%s20660_s1 + $0x6d8] sm:$0xff]   ;;  %v15966_v17 = vld [vmem:[%s20660_s1 + $0x6d0] sm:$0xff]   ;;  %s5901_s9 = sadd.s32 1, %s16272_s9  }
 0x358   : >> { %14643 = vmatprep.subr.bf16.mxu1 %v16277_v26  ;;  %14657 = vmatprep.mubr.msk.bf16.mxu1 %vm16278_vm2, %v16277_v26  ;;  %v15967_v58 = vld [vmem:[%s20660_s1 + $0x708] sm:$0xff]   ;;  %v15969_v45 = vld [vmem:[%s20660_s1 + $0x700] sm:$0xff]   ;;  %v15973_v11 = vld [vmem:[%s20660_s1 + $0x778] sm:$0xff]   ;;  %s20621_s10 = scalar_lea.vmem %s16346_s22, %s11154_s8  ;;  %p5898_p5 = scmp.ge.s32.totalorder %s5901_s9, 8  }
 0x359   : >> { %v15968_v48 = vld [vmem:[%s20660_s1 + $0x6c8] sm:$0xff]   ;;  %v15970_v35 = vld [vmem:[%s20660_s1 + $0x6c0] sm:$0xff]   ;;  %v15976_v27 = vld [vmem:[%s20660_s1 + $0x7b8] sm:$0xff]  }
 0x35a   : >> { %14608 = vmatpush3.bf16.msra.mxu0 %v15957_v2  ;;  %v5905_v56 = vld [vmem:[%s18704_s15] sm:$0xf]  ;;  %v18708_v57 = vld [vmem:[%s18704_s15 + $0x4] sm:$0xf]  ;;  %v18715_v25 = vld [vmem:[%s18704_s15 + $0x8] sm:$0xff]  }
 0x35b   : >> { %14644 = vmatpush3.bf16.msra.mxu1 %v15958_v37  ;;  %14609 = vmatprep.subr.bf16.mxu0 %v16277_v26  ;;  %v12124_v63 = vcombine.low %v5905_v56, %v18708_v57  ;;  %v5987_v49 = vshll.u32 %v18715_v25, 16  ;;  %v18735_v3 = vld [vmem:[%s18704_s15 + $0x10] sm:$0xff]   ;;  %v5991_v32 = vshrl.u32 %v18715_v25, 16  ;;  %v18754_v8 = vld [vmem:[%s18704_s15 + $0x18] sm:$0xff]   ;;  %vm20747_vm4 = vmmov %vm20746_vm9 }
 0x35c   : >> { %14645 = vmatprep.subr.bf16.mxu1 %v16277_v26  ;;  %v5995_v38 = vshll.u32 %v18735_v3, 16  ;;  %v15974_v40 = vld [vmem:[%s20660_s1 + $0x770] sm:$0xff]   ;;  %v6003_v46 = vshll.u32 %v18754_v8, 16  ;;  %v15977_v33 = vld [vmem:[%s20660_s1 + $0x768] sm:$0xff]   ;;  %v5999_v47 = vshrl.u32 %v18735_v3, 16  ;;  %v15980_v12 = vld [vmem:[%s20660_s1 + $0x760] sm:$0xff]  }
 0x35d   : >> { %v5982_v62 = vshll.u32 %v12124_v63, 16  ;;  %v5980_v21 = vshrl.u32 %v12124_v63, 16  ;;  %v5989_v28 = vrot.slane %v5987_v49, 1  ;;  %v15978_v29 = vld [vmem:[%s20660_s1 + $0x7b0] sm:$0xff]   ;;  %v15981_v61 = vld [vmem:[%s20660_s1 + $0x7a8] sm:$0xff]   ;;  %v18783_v19 = vld [vmem:[%s18704_s15 + $0x20] sm:$0xff]  }
 0x35e   : >> { %14610 = vmatpush3.bf16.msra.mxu0 %v15959_v42  ;;  %v5997_v14 = vrot.slane %v5995_v38, 1  ;;  %v6005_v20 = vrot.slane %v6003_v46, 1  ;;  %v15983_v55 = vld [vmem:[%s20660_s1 + $0x7a0] sm:$0xff]   ;;  %v15982_v0 = vld [vmem:[%s20660_s1 + $0x758] sm:$0xff]   ;;  %vm20748_vm12 = vmmov %vm20747_vm4  ;;  %v6007_v4 = vshrl.u32 %v18754_v8, 16  ;;  %v6011_v53 = vshll.u32 %v18783_v19, 16 }
 0x35f   : >> { %14646 = vmatpush3.bf16.msra.mxu1 %v15960_v43  ;;  %14611 = vmatprep.subr.bf16.mxu0 %v16277_v26  ;;  %v5984_v16 = vrot.slane %v5982_v62, 1  ;;  %v5993_v59 = vor.u32 %v5991_v32, %v5989_v28  ;;  %v15985_v5 = vld [vmem:[%s20660_s1 + $0x798] sm:$0xff]   ;;  %v18806_v9 = vld [vmem:[%s18704_s15 + $0x28] ss:$0 sps:$4 sm:$0x11]   ;;  %v15986_v54 = vld [vmem:[%s20660_s1 + $0x750] sm:$0xff]  }
 0x360   : >> { %14647 = vmatprep.subr.bf16.mxu1 %v16277_v26  ;;  %v6001_v31 = vor.u32 %v5999_v47, %v5997_v14  ;;  %v6009_v7 = vor.u32 %v6007_v4, %v6005_v20  ;;  %v6013_v30 = vrot.slane %v6011_v53, 1  ;;  %v15987_v23 = vld [vmem:[%s20660_s1 + $0x790] sm:$0xff]   ;;  %vm20749_vm6 = vmmov %vm20747_vm4  ;;  %v6015_v24 = vshrl.u32 %v18783_v19, 16  ;;  %v15988_v39 = vld [vmem:[%s20660_s1 + $0x748] sm:$0xff]  }
 0x361   : >> { %v5985_v6 = vor.u32 %v5984_v16, %v5980_v21  ;;  %v5998_v10 = vsel %vm20747_vm4, %v5993_v59, %v5997_v14  ;;  %v6019_v41 = vshll.u32 %v18806_v9, 16  ;;  %v15990_v1 = vld [vmem:[%s20660_s1 + $0x788] sm:$0xff]   ;;  %v15991_v36 = vld [vmem:[%s20660_s1 + $0x740] sm:$0xff]   ;;  %vm20750_vm13 = vmmov %vm20747_vm4  ;;  %v6300_v49 = vrot.slane %v18735_v3, 1 }
 0x362   : >> { %14612 = vmatpush3.bf16.msra.mxu0 %v15961_v44  ;;  %v6006_v13 = vsel %vm20748_vm12, %v6001_v31, %v6005_v20  ;;  %v6014_v34 = vsel %vm20749_vm6, %v6009_v7, %v6013_v30  ;;  %v6275_v22 = vld [vmem:[%s18704_s15] sm:$0xe]  ;;  %v6017_v18 = vor.u32 %v6015_v24, %v6013_v30  ;;  %v6444_v42 = vld [vmem:[%s18704_s15 + $0x4] sm:$0xe]  ;;  %v18848_v43 = vld [vmem:[%s18704_s15 + $0x8] sm:$0xf] }
 0x363   : >> { %14648 = vmatpush3.bf16.msra.mxu1 %v15962_v50  ;;  %14613 = vmatprep.subr.bf16.mxu0 %v16277_v26  ;;  %v5990_v15 = vsel %vm20746_vm9, %v5985_v6, %v5989_v28  ;;  %v6021_v2 = vrot.slane %v6019_v41, 1  ;;  %v15992_v37 = vld [vmem:[%s20660_s1 + $0x780] sm:$0xff]   ;;  %v12162_v50 = vcombine.low %v6275_v22, %v18708_v57  ;;  %v6298_v57 = vrot.slane %v18715_v25, 1  ;;  %vm20752_vm5 = vmmov %vm20751_vm10  ;;  %v15997_v16 = vld [vmem:[%s20660_s1 + $0x7f0] sm:$0xff]  }
 0x364   : >> { %14649 = vmatprep.subr.bf16.mxu1 %v16277_v26  ;;  %vm20753_vm1 = vmmov %vm20752_vm5  ;;  %v16000_v28 = vld [vmem:[%s20660_s1 + $0x7e8] sm:$0xff]   ;;  %v16003_v32 = vld [vmem:[%s20660_s1 + $0x7e0] sm:$0xff]   ;;  %v6304_v46 = vrot.slane %v18783_v19, 1  ;;  %vm20761_vm4 = vsmask.f32 6400 }
 0x365   : >> { %v6022_v44 = vsel %vm20750_vm13, %v6017_v18, %v6021_v2  ;;  %v6297_v56 = vrot.slane %v12162_v50, 1  ;;  %v6301_v6 = vsel %vm20753_vm1, %v6298_v57, %v6300_v49  ;;  %vm20754_vm14 = vmmov %vm20753_vm1  ;;  %v18928_v14 = vld [vmem:[%s18704_s15 + $0x24] sm:$0xff]   ;;  %v16010_v47 = vld [vmem:[%s20660_s1 + $0x810] sm:$0xff]  }
 0x366   : >> { %14614 = vmatpush3.bf16.msra.mxu0 %v15963_v51  ;;  %v18854_v51 = vcombine.low %v6444_v42, %v18848_v43  ;;  %vm20755_vm8 = vmmov %vm20753_vm1  ;;  %v16012_v20 = vld [vmem:[%s18704_s15 + $0x2c] ss:$0 sps:$4 sm:$0x11]   ;;  %v16014_v7 = vld [vmem:[%s20660_s1 + $0x7c0] sm:$0xff]  }
 0x367   : >> { %14650 = vmatpush3.bf16.msra.mxu1 %v15964_v52  ;;  %14615 = vmatprep.subr.bf16.mxu0 %v16277_v26  ;;  %v18857_v52 = vld [vmem:[%s18704_s15 + $0xc] sm:$0xff]   ;;  %v6299_v62 = vsel %vm20751_vm10, %v6297_v56, %v6298_v57  ;;  %vm20756_vm0 = vmmov %vm20753_vm1  ;;  %v16015_v30 = vld [vmem:[%s20660_s1 + $0x800] sm:$0xff]  }
 0x368   : >> { %14651 = vmatprep.subr.bf16.mxu1 %v16277_v26  ;;  %vm20757_vm7 = vmmov %vm20756_vm0  ;;  %v16013_v31 = vld [vmem:[%s20660_s1 + $0x808] sm:$0xff]   ;;  %v6678_v4 = vshrl.u32 %v18857_v52, 16  ;;  %v6681_v53 = vshll.u32 %v18857_v52, 16  ;;  %v6881_v42 = vrot.slane %v18857_v52, 2  ;;  %v16017_v50 = vld [vmem:[%s20660_s1 + $0x878] sm:$0xff]  }
 0x369   : >> { %vm20758_vm3 = vmmov %vm20756_vm0  ;;  %v16019_v57 = vld [vmem:[%s20660_s1 + $0x8b8] sm:$0xff]  }
 0x36a   : >> { %14616 = vmatpush3.bf16.msra.mxu0 %v15965_v60  ;;  %v6500_v60 = vrot.slane %v18854_v51, 1  ;;  %vm20759_vm15 = vmmov %vm20756_vm0  ;;  %v6680_v24 = vrot.slane %v6678_v4, 1  ;;  %v6683_v41 = vrot.slane %v6681_v53, 2  ;;  %v19071_v4 = vld [vmem:[%s18704_s15 + $0x10] sm:$0xff]  }
 0x36b   : >> { %14652 = vmatpush3.bf16.msra.mxu1 %v15966_v17  ;;  %14617 = vmatprep.subr.bf16.mxu0 %v16277_v26  ;;  %v15996_v17 = vld [vmem:[%s20660_s1 + $0x7f8] sm:$0xff]   ;;  %vm20760_vm9 = vmmov %vm20756_vm0 }
 0x36c   : >> { %14653 = vmatprep.subr.bf16.mxu1 %v16277_v26  ;;  %v6684_v18 = vor.u32 %v6683_v41, %v6680_v24  ;;  %vm20762_vm12 = vmmov %vm20761_vm4  ;;  %v7264_v24 = vshll.u32 %v19071_v4, 16  ;;  %v16033_v41 = vld [vmem:[%s20660_s1 + $0x880] sm:$0xff]  }
 0x36d   : >> { %vm20763_vm6 = vmmov %vm20761_vm4 }
 0x36e   : >> { %14618 = vmatpush3.bf16.msra.mxu0 %v15967_v58  ;;  %v18874_v58 = vld [vmem:[%s18704_s15 + $0x14] sm:$0xff]   ;;  %vm20764_vm13 = vmmov %vm20761_vm4 }
 0x36f   : >> { %14654 = vmatpush3.bf16.msra.mxu1 %v15968_v48  ;;  %14619 = vmatprep.subr.bf16.mxu0 %v16277_v26  ;;  %v6503_v48 = vrot.slane %v18874_v58, 1  ;;  %v6690_v2 = vshll.u32 %v18874_v58, 16  ;;  %vm20765_vm10 = vmmov %vm20761_vm4 }
 0x370   : >> { %14655 = vmatprep.subr.bf16.mxu1 %v16277_v26 }
 0x372   : >> { %14620 = vmatpush3.bf16.msra.mxu0 %v15969_v45  ;;  %v16001_v45 = vld [vmem:[%s20660_s1 + $0x830] sm:$0xff]  }
 0x373   : >> { %14656 = vmatpush3.bf16.msra.mxu1 %v15970_v35  ;;  %14677 = vmatprep.subr.bf16.mxu0 %v16277_v26  ;;  %v18901_v35 = vld [vmem:[%s18704_s15 + $0x1c] sm:$0xff]  }
 0x374   : >> { %14713 = vmatprep.subr.bf16.mxu1 %v16277_v26  ;;  %v6505_v38 = vrot.slane %v18901_v35, 1 }
 0x375   : >> { %14622 = vmatmul.mubr.bf16.vlgmr.msra.gmra.mxu0 %v5990_v15  ;;  %v6302_v15 = vrot.slane %v18754_v8, 1 }
 0x376   : >> { %14658 = vmatmul.mubr.bf16.vlgmr.msra.gmra.mxu1 %v12124_v63  ;;  %14678 = vmatpush3.bf16.msra.mxu0 %v15973_v11  ;;  %v6501_v63 = vrot.slane %v18857_v52, 1  ;;  %v16004_v11 = vld [vmem:[%s20660_s1 + $0x828] sm:$0xff]   ;;  %v6506_v59 = vsel %vm20756_vm0, %v6503_v48, %v6505_v38 }
 0x377   : >> { %14679 = vmatprep.subr.bf16.mxu0 %v16277_v26  ;;  %14625 = vmatprep.mubr.msk.bf16.mxu0 %vm16278_vm2, %v16277_v26 }
 0x378   : >> { %14661 = vmatprep.mubr.msk.bf16.mxu1 %vm16278_vm2, %v16277_v26  ;;  %14714 = vmatpush3.bf16.msra.mxu1 %v15976_v27  ;;  %v6502_v21 = vsel %vm20752_vm5, %v6500_v60, %v6501_v63  ;;  %v16006_v27 = vld [vmem:[%s20660_s1 + $0x820] sm:$0xff]   ;;  %v16018_v60 = vld [vmem:[%s20660_s1 + $0x870] sm:$0xff]   ;;  %vm20766_vm5 = vsmask.f32 5376 }
 0x379   : >> { %14715 = vmatprep.subr.bf16.mxu1 %v16277_v26  ;;  %vm20767_vm1 = vmmov %vm20766_vm5 }
 0x37a   : >> { %14680 = vmatpush3.bf16.msra.mxu0 %v15974_v40  ;;  %v16005_v40 = vld [vmem:[%s20660_s1 + $0x7d8] sm:$0xff]   ;;  %vm20770_vm0 = vmmov %vm20767_vm1 }
 0x37b   : >> { %14681 = vmatprep.subr.bf16.mxu0 %v16277_v26 }
 0x37c   : >> { %14716 = vmatpush3.bf16.msra.mxu1 %v15978_v29  ;;  %v16008_v29 = vld [vmem:[%s20660_s1 + $0x818] sm:$0xff]  }
 0x37d   : >> { %14626 = vmatmul.mubr.bf16.gmra.mxu0 %v5998_v10  ;;  %14717 = vmatprep.subr.bf16.mxu1 %v16277_v26  ;;  %v16009_v10 = vld [vmem:[%s20660_s1 + $0x7d0] sm:$0xff]  }
 0x37e   : >> { %14662 = vmatmul.mubr.bf16.gmra.mxu1 %v18715_v25  ;;  %14682 = vmatpush3.bf16.msra.mxu0 %v15977_v33  ;;  %v15999_v25 = vld [vmem:[%s20660_s1 + $0x838] sm:$0xff]   ;;  %v6507_v33 = vrot.slane %v18928_v14, 1 }
 0x37f   : >> { %14629 = vmatprep.mubr.msk.bf16.mxu0 %vm16278_vm2, %v16277_v26  ;;  %14665 = vmatprep.mubr.msk.bf16.mxu1 %vm16278_vm2, %v16277_v26 }
 0x380   : >> { %14683 = vmatprep.subr.bf16.mxu0 %v16277_v26  ;;  %14718 = vmatpush3.bf16.msra.mxu1 %v15981_v61  ;;  %v6305_v61 = vsel %vm20757_vm7, %v6302_v15, %v6304_v46  ;;  %vm20771_vm7 = vcmask 1044480  }
 0x381   : >> { %14719 = vmatprep.subr.bf16.mxu1 %v16277_v26 }
 0x382   : >> { %14684 = vmatpush3.bf16.msra.mxu0 %v15980_v12  ;;  %v6508_v12 = vsel %vm20758_vm3, %v6505_v38, %v6507_v33  ;;  %v16024_v38 = vld [vmem:[%s20660_s1 + $0x858] sm:$0xff]   ;;  %vm20772_vm3 = vmmov %vm20771_vm7 }
 0x383   : >> { %14685 = vmatprep.subr.bf16.mxu0 %v16277_v26 }
 0x384   : >> { %14720 = vmatpush3.bf16.msra.mxu1 %v15983_v55  ;;  %v6670_v55 = vshrl.u32 %v18854_v51, 16 }
 0x385   : >> { %14630 = vmatmul.mubr.bf16.gmra.mxu0 %v6006_v13  ;;  %14721 = vmatprep.subr.bf16.mxu1 %v16277_v26  ;;  %v6306_v13 = vrot.slane %v18806_v9, 1  ;;  %v6858_v9 = vld [vmem:[%s18704_s15 + $0x4] sm:$0xc] }
 0x386   : >> { %14666 = vmatmul.mubr.bf16.gmra.mxu1 %v18735_v3  ;;  %14686 = vmatpush3.bf16.msra.mxu0 %v15982_v0  ;;  %v6504_v3 = vsel %vm20754_vm14, %v6501_v63, %v6503_v48  ;;  %v6673_v0 = vshll.u32 %v18854_v51, 16  ;;  %v6692_v51 = vrot.slane %v6690_v2, 2  ;;  %v6696_v63 = vshrl.u32 %v18901_v35, 16  ;;  %vm20768_vm14 = vmmov %vm20767_vm1 }
 0x387   : >> { %14633 = vmatprep.mubr.msk.bf16.mxu0 %vm16278_vm2, %v16277_v26  ;;  %14669 = vmatprep.mubr.msk.bf16.mxu1 %vm16278_vm2, %v16277_v26 }
 0x388   : >> { %14687 = vmatprep.subr.bf16.mxu0 %v16277_v26  ;;  %14722 = vmatpush3.bf16.msra.mxu1 %v15985_v5  ;;  %v6509_v5 = vrot.slane %v16012_v20, 1 }
 0x389   : >> { %14723 = vmatprep.subr.bf16.mxu1 %v16277_v26 }
 0x38a   : >> { %14688 = vmatpush3.bf16.msra.mxu0 %v15986_v54  ;;  %v6672_v54 = vrot.slane %v6670_v55, 1 }
 0x38b   : >> { %14689 = vmatprep.subr.bf16.mxu0 %v16277_v26 }
 0x38c   : >> { %14724 = vmatpush3.bf16.msra.mxu1 %v15987_v23  ;;  %v6675_v23 = vrot.slane %v6673_v0, 2  ;;  %v16029_v0 = vld [vmem:[%s20660_s1 + $0x848] sm:$0xff]  }
 0x38d   : >> { %14634 = vmatmul.mubr.bf16.gmra.mxu0 %v6014_v34  ;;  %14725 = vmatprep.subr.bf16.mxu1 %v16277_v26  ;;  %v6307_v34 = vsel %vm20759_vm15, %v6304_v46, %v6306_v13  ;;  %v7027_v46 = vld [vmem:[%s18704_s15 + $0x8] sm:$0xc]  ;;  %vm20773_vm15 = vmmov %vm20772_vm3 }
 0x38e   : >> { %14670 = vmatmul.mubr.bf16.gmra.mxu1 %v18754_v8  ;;  %14637 = vmatprep.mubr.msk.bf16.mxu0 %vm16278_vm2, %v16277_v26  ;;  %v6303_v8 = vsel %vm20755_vm8, %v6300_v49, %v6302_v15  ;;  %v6676_v22 = vor.u32 %v6675_v23, %v6672_v54  ;;  %v6698_v49 = vrot.slane %v6696_v63, 1  ;;  %v6885_v15 = vrot.slane %v18901_v35, 2  ;;  %v16032_v23 = vld [vmem:[%s20660_s1 + $0x840] sm:$0xff]   ;;  %vm20769_vm8 = vmmov %vm20767_vm1 }
 0x38f   : >> { %14673 = vmatprep.mubr.msk.bf16.mxu1 %vm16278_vm2, %v16277_v26  ;;  %14690 = vmatpush3.bf16.msra.mxu0 %v15988_v39  ;;  %v6510_v39 = vsel %vm20760_vm9, %v6507_v33, %v6509_v5  ;;  %v16031_v5 = vld [vmem:[%s20660_s1 + $0x888] sm:$0xff]   ;;  %vm20774_vm9 = vmmov %vm20772_vm3 }
 0x390   : >> { %14726 = vmatpush3.bf16.msra.mxu1 %v15990_v1  ;;  %14691 = vmatprep.subr.bf16.mxu0 %v16277_v26  ;;  %v12242_v1 = vcombine.low %v6858_v9, %v18848_v43 }
 0x391   : >> { %14727 = vmatprep.subr.bf16.mxu1 %v16277_v26 }
 0x393   : >> { %14692 = vmatpush3.bf16.msra.mxu0 %v15991_v36  ;;  %v6687_v36 = vshrl.u32 %v18874_v58, 16 }
 0x394   : >> { %14728 = vmatpush3.bf16.msra.mxu1 %v15992_v37  ;;  %14749 = vmatprep.subr.bf16.mxu0 %v16277_v26  ;;  %v6880_v37 = vrot.slane %v12242_v1, 2 }
 0x395   : >> { %14638 = vmatmul.mubr.bf16.gmra.mxu0 %v6022_v44  ;;  %14785 = vmatprep.subr.bf16.mxu1 %v16277_v26  ;;  %v6689_v43 = vrot.slane %v6687_v36, 1  ;;  %v6685_v44 = vsel %vm20761_vm4, %v6676_v22, %v6684_v18  ;;  %v19094_v36 = vld [vmem:[%s18704_s15 + $0x18] sm:$0xff]   ;;  %vm20775_vm4 = vmmov %vm20772_vm3 }
 0x396   : >> { %14674 = vmatmul.mubr.bf16.gmra.mxu1 %v18783_v19  ;;  %14693 = vmatprep.mubr.msk.bf16.mxu0 %vm16278_vm2, %v16277_v26  ;;  %v16011_v19 = vld [vmem:[%s20660_s1 + $0x7c8] sm:$0xff]   ;;  %v6882_v56 = vsel %vm1433_vm11, %v6880_v37, %v6881_v42  ;;  %v7266_v37 = vrot.slane %v7264_v24, 3 }
 0x397   : >> { %14729 = vmatprep.mubr.msk.bf16.mxu1 %vm16278_vm2, %v16277_v26  ;;  %v6693_v52 = vor.u32 %v6692_v51, %v6689_v43  ;;  %v7084_v43 = vrot.slane %v19071_v4, 2  ;;  %v7270_v51 = vshrl.u32 %v19094_v36, 16  ;;  %v7441_v24 = vld [vmem:[%s18704_s15 + $0x8] sm:$0x8] }
 0x39d   : >> { %14694 = vmatmul.mubr.bf16.vlgmr.msra.gmra.mxu0 %v6299_v62  ;;  %v6883_v62 = vrot.slane %v18874_v58, 2 }
 0x39e   : >> { %14730 = vmatmul.mubr.bf16.vlgmr.msra.gmra.mxu1 %v6502_v21  ;;  %14750 = vmatpush3.bf16.msra.mxu0 %v15996_v17  ;;  %v6699_v17 = vshll.u32 %v18901_v35, 16  ;;  %v16021_v21 = vld [vmem:[%s20660_s1 + $0x8b0] sm:$0xff]   ;;  %v16030_v35 = vld [vmem:[%s18704_s15 + $0x2c] ss:$0 sps:$4 sm:$0x33]  }
 0x39f   : >> { %14751 = vmatprep.subr.bf16.mxu0 %v16277_v26  ;;  %14697 = vmatprep.mubr.msk.bf16.mxu0 %vm16278_vm2, %v16277_v26  ;;  %v6884_v58 = vsel %vm1433_vm11, %v6881_v42, %v6883_v62  ;;  %v6717_v20 = vshll.u32 %v16030_v35, 16  ;;  %v6889_v54 = vrot.slane %v16030_v35, 2 }
 0x3a0   : >> { %14733 = vmatprep.mubr.msk.bf16.mxu1 %vm16278_vm2, %v16277_v26  ;;  %14786 = vmatpush3.bf16.msra.mxu1 %v15999_v25  ;;  %v16020_v25 = vld [vmem:[%s20660_s1 + $0x868] sm:$0xff]   ;;  %v6701_v48 = vrot.slane %v6699_v17, 2  ;;  %v7272_v17 = vrot.slane %v7270_v51, 2  ;;  %v16060_v51 = vld [vmem:[%s20660_s1 + $0x970] sm:$0xff]  }
 0x3a1   : >> { %14787 = vmatprep.subr.bf16.mxu1 %v16277_v26 }
 0x3a2   : >> { %14752 = vmatpush3.bf16.msra.mxu0 %v15997_v16  ;;  %v6694_v16 = vsel %vm20762_vm12, %v6684_v18, %v6693_v52  ;;  %vm20776_vm12 = vsmask.f32 7424 }
 0x3a3   : >> { %14753 = vmatprep.subr.bf16.mxu0 %v16277_v26 }
 0x3a4   : >> { %14788 = vmatpush3.bf16.msra.mxu1 %v16001_v45  ;;  %v16023_v45 = vld [vmem:[%s20660_s1 + $0x8a8] sm:$0xff]  }
 0x3a5   : >> { %14698 = vmatmul.mubr.bf16.gmra.mxu0 %v6301_v6  ;;  %14789 = vmatprep.subr.bf16.mxu1 %v16277_v26  ;;  %v6705_v6 = vshrl.u32 %v18928_v14, 16 }
 0x3a6   : >> { %14734 = vmatmul.mubr.bf16.gmra.mxu1 %v6504_v3  ;;  %14754 = vmatpush3.bf16.msra.mxu0 %v16000_v28  ;;  %v6702_v28 = vor.u32 %v6701_v48, %v6698_v49  ;;  %v16022_v3 = vld [vmem:[%s20660_s1 + $0x860] sm:$0xff]  }
 0x3a7   : >> { %14701 = vmatprep.mubr.msk.bf16.mxu0 %vm16278_vm2, %v16277_v26  ;;  %14737 = vmatprep.mubr.msk.bf16.mxu1 %vm16278_vm2, %v16277_v26 }
 0x3a8   : >> { %14755 = vmatprep.subr.bf16.mxu0 %v16277_v26  ;;  %14790 = vmatpush3.bf16.msra.mxu1 %v16004_v11  ;;  %v6708_v11 = vshll.u32 %v18928_v14, 16 }
 0x3a9   : >> { %14791 = vmatprep.subr.bf16.mxu1 %v16277_v26 }
 0x3aa   : >> { %14756 = vmatpush3.bf16.msra.mxu0 %v16003_v32  ;;  %v16025_v32 = vld [vmem:[%s20660_s1 + $0x8a0] sm:$0xff]  }
 0x3ab   : >> { %14757 = vmatprep.subr.bf16.mxu0 %v16277_v26 }
 0x3ac   : >> { %14792 = vmatpush3.bf16.msra.mxu1 %v16006_v27  ;;  %v6707_v27 = vrot.slane %v6705_v6, 1  ;;  %v16040_v6 = vld [vmem:[%s20660_s1 + $0x8e8] sm:$0xff]  }
 0x3ad   : >> { %14702 = vmatmul.mubr.bf16.gmra.mxu0 %v6303_v8  ;;  %14793 = vmatprep.subr.bf16.mxu1 %v16277_v26  ;;  %v6703_v8 = vsel %vm20763_vm6, %v6693_v52, %v6702_v28  ;;  %v19112_v52 = vld [vmem:[%s18704_s15 + $0x20] sm:$0xff]   ;;  %vm20777_vm6 = vcmask 1046528  }
 0x3ae   : >> { %14738 = vmatmul.mubr.bf16.gmra.mxu1 %v6506_v59  ;;  %14758 = vmatpush3.bf16.msra.mxu0 %v16005_v40  ;;  %v6710_v40 = vrot.slane %v6708_v11, 2  ;;  %v6886_v59 = vsel %vm1433_vm11, %v6883_v62, %v6885_v15  ;;  %v7279_v49 = vshrl.u32 %v19112_v52, 16  ;;  %v7282_v48 = vshll.u32 %v19112_v52, 16 }
 0x3af   : >> { %14705 = vmatprep.mubr.msk.bf16.mxu0 %vm16278_vm2, %v16277_v26  ;;  %14741 = vmatprep.mubr.msk.bf16.mxu1 %vm16278_vm2, %v16277_v26 }
 0x3b0   : >> { %14759 = vmatprep.subr.bf16.mxu0 %v16277_v26  ;;  %14794 = vmatpush3.bf16.msra.mxu1 %v16008_v29  ;;  %v16026_v29 = vld [vmem:[%s20660_s1 + $0x898] sm:$0xff]   ;;  %v6711_v33 = vor.u32 %v6710_v40, %v6707_v27  ;;  %v7088_v27 = vrot.slane %v19112_v52, 2 }
 0x3b1   : >> { %14795 = vmatprep.subr.bf16.mxu1 %v16277_v26 }
 0x3b2   : >> { %14760 = vmatpush3.bf16.msra.mxu0 %v16009_v10  ;;  %v19050_v10 = vld [vmem:[%s18704_s15 + $0xc] sm:$0xf]  ;;  %v6712_v55 = vsel %vm20764_vm13, %v6702_v28, %v6711_v33  ;;  %vm20778_vm13 = vmmov %vm20776_vm12 }
 0x3b3   : >> { %14761 = vmatprep.subr.bf16.mxu0 %v16277_v26 }
 0x3b4   : >> { %14796 = vmatpush3.bf16.msra.mxu1 %v16010_v47  ;;  %v16027_v47 = vld [vmem:[%s20660_s1 + $0x850] sm:$0xff]  }
 0x3b5   : >> { %14706 = vmatmul.mubr.bf16.gmra.mxu0 %v6305_v61  ;;  %14797 = vmatprep.subr.bf16.mxu1 %v16277_v26  ;;  %v6714_v61 = vshrl.u32 %v16030_v35, 16 }
 0x3b6   : >> { %14742 = vmatmul.mubr.bf16.gmra.mxu1 %v6508_v12  ;;  %14709 = vmatprep.mubr.msk.bf16.mxu0 %vm16278_vm2, %v16277_v26  ;;  %v6887_v12 = vrot.slane %v18928_v14, 2  ;;  %v6719_v14 = vrot.slane %v6717_v20, 2 }
 0x3b7   : >> { %14745 = vmatprep.mubr.msk.bf16.mxu1 %vm16278_vm2, %v16277_v26  ;;  %14762 = vmatpush3.bf16.msra.mxu0 %v16011_v19  ;;  %v16028_v19 = vld [vmem:[%s20660_s1 + $0x890] sm:$0xff]   ;;  %v6716_v13 = vrot.slane %v6714_v61, 1 }
 0x3b8   : >> { %14798 = vmatpush3.bf16.msra.mxu1 %v16013_v31  ;;  %14763 = vmatprep.subr.bf16.mxu0 %v16277_v26  ;;  %v12267_v31 = vcombine.low %v7027_v46, %v19050_v10  ;;  %v6888_v53 = vsel %vm1433_vm11, %v6885_v15, %v6887_v12  ;;  %v6890_v18 = vsel %vm1433_vm11, %v6887_v12, %v6889_v54  ;;  %v7281_v15 = vrot.slane %v7279_v49, 2  ;;  %v19162_v46 = vld [vmem:[%s18704_s15 + $0x30] ss:$0 sps:$4 sm:$0x77]  }
 0x3b9   : >> { %14799 = vmatprep.subr.bf16.mxu1 %v16277_v26  ;;  %v6720_v9 = vor.u32 %v6719_v14, %v6716_v13  ;;  %v7297_v13 = vshrl.u32 %v19162_v46, 16  ;;  %v7300_v14 = vshll.u32 %v19162_v46, 16 }
 0x3ba   : >> { %v7083_v42 = vrot.slane %v12267_v31, 2 }
 0x3bb   : >> { %14764 = vmatpush3.bf16.msra.mxu0 %v16014_v7  ;;  %v7253_v7 = vshrl.u32 %v12267_v31, 16  ;;  %v6721_v22 = vsel %vm20765_vm10, %v6711_v33, %v6720_v9  ;;  %v16054_v9 = vld [vmem:[%s20660_s1 + $0x908] sm:$0xff]   ;;  %vm20779_vm10 = vmmov %vm20777_vm6 }
 0x3bc   : >> { %14800 = vmatpush3.bf16.msra.mxu1 %v16015_v30  ;;  %14821 = vmatprep.subr.bf16.mxu0 %v16277_v26  ;;  %v7256_v30 = vshll.u32 %v12267_v31, 16 }
 0x3bd   : >> { %14710 = vmatmul.mubr.bf16.gmra.mxu0 %v6307_v34  ;;  %14857 = vmatprep.subr.bf16.mxu1 %v16277_v26  ;;  %v7261_v34 = vshrl.u32 %v19071_v4, 16 }
 0x3be   : >> { %14746 = vmatmul.mubr.bf16.gmra.mxu1 %v6510_v39  ;;  %14765 = vmatprep.mubr.msk.bf16.mxu0 %vm16278_vm2, %v16277_v26  ;;  %v7255_v39 = vrot.slane %v7253_v7, 2  ;;  %v7258_v1 = vrot.slane %v7256_v30, 3  ;;  %v16052_v7 = vld [vmem:[%s18704_s15 + $0x30] ss:$0 sps:$4 sm:$0x33]  }
 0x3bf   : >> { %14801 = vmatprep.mubr.msk.bf16.mxu1 %vm16278_vm2, %v16277_v26  ;;  %v7263_v2 = vrot.slane %v7261_v34, 2  ;;  %v7302_v34 = vrot.slane %v7300_v14, 3 }
 0x3c5   : >> { %14766 = vmatmul.mubr.bf16.vlgmr.msra.gmra.mxu0 %v6685_v44  ;;  %v7259_v44 = vor.u32 %v7258_v1, %v7255_v39  ;;  %v16055_v39 = vld [vmem:[%s20660_s1 + $0x8c0] sm:$0xff]  }
 0x3c6   : >> { %14802 = vmatmul.mubr.bf16.vlgmr.msra.gmra.mxu1 %v6882_v56  ;;  %14822 = vmatpush3.bf16.msra.mxu0 %v16017_v50  ;;  %v7267_v50 = vor.u32 %v7266_v37, %v7263_v2  ;;  %v7273_v56 = vshll.u32 %v19094_v36, 16 }
 0x3c7   : >> { %14823 = vmatprep.subr.bf16.mxu0 %v16277_v26  ;;  %14769 = vmatprep.mubr.msk.bf16.mxu0 %vm16278_vm2, %v16277_v26 }
 0x3c8   : >> { %14805 = vmatprep.mubr.msk.bf16.mxu1 %vm16278_vm2, %v16277_v26  ;;  %14858 = vmatpush3.bf16.msra.mxu1 %v16019_v57  ;;  %v7085_v57 = vsel %vm1433_vm11, %v7083_v42, %v7084_v43  ;;  %v7268_v63 = vsel %vm20766_vm5, %v7259_v44, %v7267_v50  ;;  %v7275_v62 = vrot.slane %v7273_v56, 3  ;;  %v16059_v44 = vld [vmem:[%s20660_s1 + $0x978] sm:$0xff]   ;;  %v7466_v56 = vrot.slane %v19094_v36, 3  ;;  %vm20780_vm5 = vmmov %vm20776_vm12 }
 0x3c9   : >> { %14859 = vmatprep.subr.bf16.mxu1 %v16277_v26 }
 0x3ca   : >> { %14824 = vmatpush3.bf16.msra.mxu0 %v16018_v60  ;;  %v16036_v60 = vld [vmem:[%s20660_s1 + $0x8f8] sm:$0xff]  }
 0x3cb   : >> { %14825 = vmatprep.subr.bf16.mxu0 %v16277_v26 }
 0x3cc   : >> { %14860 = vmatpush3.bf16.msra.mxu1 %v16021_v21  ;;  %v16039_v21 = vld [vmem:[%s20660_s1 + $0x938] sm:$0xff]  }
 0x3cd   : >> { %14770 = vmatmul.mubr.bf16.gmra.mxu0 %v6694_v16  ;;  %14861 = vmatprep.subr.bf16.mxu1 %v16277_v26  ;;  %v7086_v16 = vrot.slane %v19094_v36, 2  ;;  %v16063_v36 = vld [vmem:[%s20660_s1 + $0x968] sm:$0xff]  }
 0x3ce   : >> { %14806 = vmatmul.mubr.bf16.gmra.mxu1 %v6884_v58  ;;  %14826 = vmatpush3.bf16.msra.mxu0 %v16020_v25  ;;  %v16037_v25 = vld [vmem:[%s20660_s1 + $0x8f0] sm:$0xff]   ;;  %v7276_v58 = vor.u32 %v7275_v62, %v7272_v17  ;;  %v16067_v17 = vld [vmem:[%s20660_s1 + $0x9a8] sm:$0xff]   ;;  %v7468_v62 = vrot.slane %v19112_v52, 3  ;;  %v16069_v52 = vld [vmem:[%s20660_s1 + $0x9a0] sm:$0xff]  }
 0x3cf   : >> { %14773 = vmatprep.mubr.msk.bf16.mxu0 %vm16278_vm2, %v16277_v26  ;;  %14809 = vmatprep.mubr.msk.bf16.mxu1 %vm16278_vm2, %v16277_v26  ;;  %v7087_v28 = vsel %vm1433_vm11, %v7084_v43, %v7086_v16  ;;  %v7089_v33 = vsel %vm1433_vm11, %v7086_v16, %v7088_v27  ;;  %v7464_v43 = vrot.slane %v19071_v4, 3  ;;  %v16068_v16 = vld [vmem:[%s20660_s1 + $0x958] sm:$0xff]  }
 0x3d0   : >> { %14827 = vmatprep.subr.bf16.mxu0 %v16277_v26  ;;  %14862 = vmatpush3.bf16.msra.mxu1 %v16023_v45  ;;  %v16041_v45 = vld [vmem:[%s20660_s1 + $0x930] sm:$0xff]   ;;  %v7277_v11 = vsel %vm20767_vm1, %v7267_v50, %v7276_v58  ;;  %v16062_v50 = vld [vmem:[%s20660_s1 + $0x9b8] sm:$0xff]   ;;  %v7469_v49 = vsel %vm20773_vm15, %v7466_v56, %v7468_v62  ;;  %vm20781_vm1 = vmmov %vm20777_vm6  ;;  %vm20787_vm15 = vsmask.f32 6400 }
 0x3d1   : >> { %14863 = vmatprep.subr.bf16.mxu1 %v16277_v26 }
 0x3d2   : >> { %14828 = vmatpush3.bf16.msra.mxu0 %v16022_v3  ;;  %v19138_v3 = vld [vmem:[%s18704_s15 + $0x28] sm:$0xff]  }
 0x3d3   : >> { %14829 = vmatprep.subr.bf16.mxu0 %v16277_v26  ;;  %v7288_v40 = vshrl.u32 %v19138_v3, 16  ;;  %v7291_v35 = vshll.u32 %v19138_v3, 16  ;;  %v7090_v31 = vrot.slane %v19138_v3, 2 }
 0x3d4   : >> { %14864 = vmatpush3.bf16.msra.mxu1 %v16025_v32  ;;  %v7284_v32 = vrot.slane %v7282_v48, 3  ;;  %v7470_v48 = vrot.slane %v19138_v3, 3  ;;  %v16073_v3 = vld [vmem:[%s20660_s1 + $0x990] sm:$0xff]  }
 0x3d5   : >> { %14774 = vmatmul.mubr.bf16.gmra.mxu0 %v6703_v8  ;;  %14865 = vmatprep.subr.bf16.mxu1 %v16277_v26  ;;  %v16043_v8 = vld [vmem:[%s20660_s1 + $0x8e0] sm:$0xff]   ;;  %v7290_v20 = vrot.slane %v7288_v40, 2  ;;  %v7293_v12 = vrot.slane %v7291_v35, 3  ;;  %v7091_v30 = vsel %vm1433_vm11, %v7088_v27, %v7090_v31  ;;  %v16076_v27 = vld [vmem:[%s20660_s1 + $0x988] sm:$0xff]   ;;  %v7472_v40 = vrot.slane %v19162_v46, 3 }
 0x3d6   : >> { %14810 = vmatmul.mubr.bf16.gmra.mxu1 %v6886_v59  ;;  %14830 = vmatpush3.bf16.msra.mxu0 %v16024_v38  ;;  %v16044_v38 = vld [vmem:[%s20660_s1 + $0x928] sm:$0xff]   ;;  %v7285_v59 = vor.u32 %v7284_v32, %v7281_v15  ;;  %v16078_v46 = vld [vmem:[%s20660_s1 + $0x980] sm:$0xff]  }
 0x3d7   : >> { %14777 = vmatprep.mubr.msk.bf16.mxu0 %vm16278_vm2, %v16277_v26  ;;  %14813 = vmatprep.mubr.msk.bf16.mxu1 %vm16278_vm2, %v16277_v26  ;;  %v16074_v15 = vld [vmem:[%s20660_s1 + $0x948] sm:$0xff]  }
 0x3d8   : >> { %14831 = vmatprep.subr.bf16.mxu0 %v16277_v26  ;;  %14866 = vmatpush3.bf16.msra.mxu1 %v16026_v29  ;;  %v16046_v29 = vld [vmem:[%s20660_s1 + $0x920] sm:$0xff]   ;;  %v7286_v61 = vsel %vm20768_vm14, %v7276_v58, %v7285_v59  ;;  %v16071_v58 = vld [vmem:[%s20660_s1 + $0x998] sm:$0xff]   ;;  %vm20782_vm14 = vmmov %vm20780_vm5 }
 0x3d9   : >> { %14867 = vmatprep.subr.bf16.mxu1 %v16277_v26 }
 0x3da   : >> { %14832 = vmatpush3.bf16.msra.mxu0 %v16027_v47  ;;  %v16045_v47 = vld [vmem:[%s20660_s1 + $0x8d8] sm:$0xff]  }
 0x3db   : >> { %14833 = vmatprep.subr.bf16.mxu0 %v16277_v26 }
 0x3dc   : >> { %14868 = vmatpush3.bf16.msra.mxu1 %v16028_v19  ;;  %v16048_v19 = vld [vmem:[%s20660_s1 + $0x918] sm:$0xff]  }
 0x3dd   : >> { %14778 = vmatmul.mubr.bf16.gmra.mxu0 %v6712_v55  ;;  %14869 = vmatprep.subr.bf16.mxu1 %v16277_v26  ;;  %v16049_v55 = vld [vmem:[%s20660_s1 + $0x8d0] sm:$0xff]  }
 0x3de   : >> { %14814 = vmatmul.mubr.bf16.gmra.mxu1 %v6888_v53  ;;  %14781 = vmatprep.mubr.msk.bf16.mxu0 %vm16278_vm2, %v16277_v26  ;;  %v16050_v53 = vld [vmem:[%s20660_s1 + $0x910] sm:$0xff]  }
 0x3df   : >> { %14817 = vmatprep.mubr.msk.bf16.mxu1 %vm16278_vm2, %v16277_v26  ;;  %14834 = vmatpush3.bf16.msra.mxu0 %v16029_v0  ;;  %v7294_v0 = vor.u32 %v7293_v12, %v7290_v20  ;;  %v7473_v12 = vsel %vm20775_vm4, %v7470_v48, %v7472_v40  ;;  %vm20789_vm4 = vmmov %vm20787_vm15 }
 0x3e0   : >> { %14870 = vmatpush3.bf16.msra.mxu1 %v16031_v5  ;;  %14835 = vmatprep.subr.bf16.mxu0 %v16277_v26  ;;  %v16051_v5 = vld [vmem:[%s20660_s1 + $0x8c8] sm:$0xff]  }
 0x3e1   : >> { %14871 = vmatprep.subr.bf16.mxu1 %v16277_v26  ;;  %v7295_v54 = vsel %vm20769_vm8, %v7285_v59, %v7294_v0  ;;  %v16077_v59 = vld [vmem:[%s20660_s1 + $0x940] sm:$0xff]   ;;  %vm20783_vm8 = vmmov %vm20781_vm1 }
 0x3e3   : >> { %14836 = vmatpush3.bf16.msra.mxu0 %v16032_v23  ;;  %v7299_v23 = vrot.slane %v7297_v13, 2 }
 0x3e4   : >> { %14872 = vmatpush3.bf16.msra.mxu1 %v16033_v41  ;;  %14893 = vmatprep.subr.bf16.mxu0 %v16277_v26  ;;  %v7092_v41 = vrot.slane %v16052_v7, 2 }
 0x3e5   : >> { %14782 = vmatmul.mubr.bf16.gmra.mxu0 %v6721_v22  ;;  %14929 = vmatprep.subr.bf16.mxu1 %v16277_v26  ;;  %v7303_v1 = vor.u32 %v7302_v34, %v7299_v23  ;;  %v12322_v22 = vcombine.low %v7441_v24, %v19050_v10  ;;  %v16058_v10 = vld [vmem:[%s18704_s15 + $0x34] sm:$0xff]  }
 0x3e6   : >> { %14818 = vmatmul.mubr.bf16.gmra.mxu1 %v6890_v18  ;;  %14837 = vmatprep.mubr.msk.bf16.mxu0 %vm16278_vm2, %v16277_v26  ;;  %v16056_v18 = vld [vmem:[%s20660_s1 + $0x900] sm:$0xff]   ;;  %v7093_v2 = vsel %vm1433_vm11, %v7090_v31, %v7092_v41 }
 0x3e7   : >> { %14873 = vmatprep.mubr.msk.bf16.mxu1 %vm16278_vm2, %v16277_v26  ;;  %v7304_v37 = vsel %vm20770_vm0, %v7294_v0, %v7303_v1  ;;  %v7463_v42 = vrot.slane %v12322_v22, 3  ;;  %vm20784_vm0 = vmmov %vm20780_vm5 }
 0x3e9   : >> { %v7465_v4 = vsel %vm20771_vm7, %v7463_v42, %v7464_v43  ;;  %v16085_v42 = vld [vmem:[%s20660_s1 + $0xa38] sm:$0xff]   ;;  %vm20785_vm7 = vmmov %vm20781_vm1 }
 0x3ed   : >> { %14838 = vmatmul.mubr.bf16.vlgmr.msra.gmra.mxu0 %v7085_v57  ;;  %v16064_v57 = vld [vmem:[%s20660_s1 + $0x9b0] sm:$0xff]  }
 0x3ee   : >> { %14874 = vmatmul.mubr.bf16.vlgmr.msra.gmra.mxu1 %v7268_v63  ;;  %14894 = vmatpush3.bf16.msra.mxu0 %v16036_v60  ;;  %v16061_v60 = vld [vmem:[%s18704_s15 + $0x3c] sm:$0xff]   ;;  %v7467_v63 = vsel %vm20772_vm3, %v7464_v43, %v7466_v56  ;;  %vm20786_vm3 = vmmov %vm20781_vm1 }
 0x3ef   : >> { %14895 = vmatprep.subr.bf16.mxu0 %v16277_v26  ;;  %14841 = vmatprep.mubr.msk.bf16.mxu0 %vm16278_vm2, %v16277_v26 }
 0x3f0   : >> { %14877 = vmatprep.mubr.msk.bf16.mxu1 %vm16278_vm2, %v16277_v26  ;;  %14930 = vmatpush3.bf16.msra.mxu1 %v16039_v21  ;;  %v16066_v21 = vld [vmem:[%s20660_s1 + $0x960] sm:$0xff]  }
 0x3f1   : >> { %14931 = vmatprep.subr.bf16.mxu1 %v16277_v26 }
 0x3f2   : >> { %14896 = vmatpush3.bf16.msra.mxu0 %v16037_v25  ;;  %v16065_v25 = vld [vmem:[%s18704_s15 + $0x44] sm:$0xff]  }
 0x3f3   : >> { %14897 = vmatprep.subr.bf16.mxu0 %v16277_v26 }
 0x3f4   : >> { %14932 = vmatpush3.bf16.msra.mxu1 %v16041_v45  ;;  %v16072_v45 = vld [vmem:[%s20660_s1 + $0x950] sm:$0xff]  }
 0x3f5   : >> { %14842 = vmatmul.mubr.bf16.gmra.mxu0 %v7087_v28  ;;  %14933 = vmatprep.subr.bf16.mxu1 %v16277_v26  ;;  %v12371_v28 = vld [vmem:[%s18704_s15 + $0x38] sm:$0xf] }
 0x3f6   : >> { %14878 = vmatmul.mubr.bf16.gmra.mxu1 %v7277_v11  ;;  %14898 = vmatpush3.bf16.msra.mxu0 %v16040_v6  ;;  %v12370_v6 = vld [vmem:[%s18704_s15 + $0x34] sm:$0xf]  ;;  %v16070_v11 = vld [vmem:[%s18704_s15 + $0x4c] sm:$0xff]  }
 0x3f7   : >> { %14845 = vmatprep.mubr.msk.bf16.mxu0 %vm16278_vm2, %v16277_v26  ;;  %14881 = vmatprep.mubr.msk.bf16.mxu1 %vm16278_vm2, %v16277_v26  ;;  %v12397_v32 = vcombine.low %v12370_v6, %v12371_v28 }
 0x3f8   : >> { %14899 = vmatprep.subr.bf16.mxu0 %v16277_v26  ;;  %14934 = vmatpush3.bf16.msra.mxu1 %v16044_v38  ;;  %v7471_v38 = vsel %vm20774_vm9, %v7468_v62, %v7470_v48  ;;  %vm20788_vm9 = vmmov %vm20781_vm1 }
 0x3f9   : >> { %14935 = vmatprep.subr.bf16.mxu1 %v16277_v26  ;;  %v7861_v35 = vshll.u32 %v12397_v32, 16 }
 0x3fa   : >> { %14900 = vmatpush3.bf16.msra.mxu0 %v16043_v8  ;;  %v19302_v8 = vld [vmem:[%s18704_s15 + $0x3c] sm:$0xff]  }
 0x3fb   : >> { %14901 = vmatprep.subr.bf16.mxu0 %v16277_v26  ;;  %v7863_v20 = vrot.slane %v7861_v35, 1  ;;  %v7870_v34 = vshrl.u32 %v19302_v8, 16  ;;  %v16092_v35 = vld [vmem:[%s20660_s1 + $0xa20] sm:$0xff]  }
 0x3fc   : >> { %14936 = vmatpush3.bf16.msra.mxu1 %v16046_v29  ;;  %v12411_v29 = vld [vmem:[%s18704_s15 + $0x34] sm:$0xe] }
 0x3fd   : >> { %14846 = vmatmul.mubr.bf16.gmra.mxu0 %v7089_v33  ;;  %14937 = vmatprep.subr.bf16.mxu1 %v16277_v26  ;;  %v7866_v33 = vshll.u32 %v19302_v8, 16 }
 0x3fe   : >> { %14882 = vmatmul.mubr.bf16.gmra.mxu1 %v7286_v61  ;;  %14902 = vmatpush3.bf16.msra.mxu0 %v16045_v47  ;;  %v16075_v47 = vld [vmem:[%s18704_s15 + $0x54] sm:$0xff]   ;;  %v7859_v61 = vshrl.u32 %v12397_v32, 16 }
 0x3ff   : >> { %14849 = vmatprep.mubr.msk.bf16.mxu0 %vm16278_vm2, %v16277_v26  ;;  %14885 = vmatprep.mubr.msk.bf16.mxu1 %vm16278_vm2, %v16277_v26  ;;  %v7868_v31 = vrot.slane %v7866_v33, 1 }
 0x400   : >> { %14903 = vmatprep.subr.bf16.mxu0 %v16277_v26  ;;  %14938 = vmatpush3.bf16.msra.mxu1 %v16048_v19  ;;  %v12428_v19 = vcombine.low %v12411_v29, %v12371_v28  ;;  %v7864_v14 = vor.u32 %v7863_v20, %v7859_v61  ;;  %v19403_v20 = vld [vmem:[%s18704_s15 + $0x5c] ss:$0 sps:$4 sm:$0x11]  }
 0x401   : >> { %14939 = vmatprep.subr.bf16.mxu1 %v16277_v26 }
 0x402   : >> { %14904 = vmatpush3.bf16.msra.mxu0 %v16049_v55  ;;  %v19324_v55 = vld [vmem:[%s18704_s15 + $0x44] sm:$0xff]   ;;  %v8059_v7 = vrot.slane %v12428_v19, 1 }
 0x403   : >> { %14905 = vmatprep.subr.bf16.mxu0 %v16277_v26  ;;  %v7874_v24 = vshll.u32 %v19324_v55, 16  ;;  %v7878_v62 = vshrl.u32 %v19324_v55, 16 }
 0x404   : >> { %14940 = vmatpush3.bf16.msra.mxu1 %v16050_v53 }
 0x405   : >> { %14850 = vmatmul.mubr.bf16.gmra.mxu0 %v7091_v30  ;;  %14941 = vmatprep.subr.bf16.mxu1 %v16277_v26  ;;  %v8060_v30 = vrot.slane %v19302_v8, 1 }
 0x406   : >> { %14886 = vmatmul.mubr.bf16.gmra.mxu1 %v7295_v54  ;;  %14853 = vmatprep.mubr.msk.bf16.mxu0 %vm16278_vm2, %v16277_v26  ;;  %v16082_v54 = vld [vmem:[%s20660_s1 + $0x9f8] sm:$0xff]  }
 0x407   : >> { %14889 = vmatprep.mubr.msk.bf16.mxu1 %vm16278_vm2, %v16277_v26  ;;  %14906 = vmatpush3.bf16.msra.mxu0 %v16051_v5 }
 0x408   : >> { %14942 = vmatpush3.bf16.msra.mxu1 %v16054_v9  ;;  %14907 = vmatprep.subr.bf16.mxu0 %v16277_v26 }
 0x409   : >> { %14943 = vmatprep.subr.bf16.mxu1 %v16277_v26 }
 0x40b   : >> { %14908 = vmatpush3.bf16.msra.mxu0 %v16055_v39  ;;  %v7869_v39 = vsel %vm20776_vm12, %v7864_v14, %v7868_v31  ;;  %v16095_v14 = vld [vmem:[%s20660_s1 + $0x9d0] sm:$0xff]   ;;  %vm20790_vm12 = vmmov %vm20781_vm1 }
 0x40c   : >> { %14944 = vmatpush3.bf16.msra.mxu1 %v16056_v18  ;;  %14965 = vmatprep.subr.bf16.mxu0 %v16277_v26  ;;  %v8061_v18 = vsel %vm20777_vm6, %v8059_v7, %v8060_v30  ;;  %v12437_v7 = vld [vmem:[%s18704_s15 + $0x38] sm:$0xe]  ;;  %vm20791_vm6 = vmmov %vm20789_vm4 }
 0x40d   : >> { %14854 = vmatmul.mubr.bf16.gmra.mxu0 %v7093_v2  ;;  %15001 = vmatprep.subr.bf16.mxu1 %v16277_v26 }
 0x40e   : >> { %14890 = vmatmul.mubr.bf16.gmra.mxu1 %v7304_v37  ;;  %14909 = vmatprep.mubr.msk.bf16.mxu0 %vm16278_vm2, %v16277_v26  ;;  %v16083_v37 = vld [vmem:[%s20660_s1 + $0x9f0] sm:$0xff]  }
 0x40f   : >> { %14945 = vmatprep.mubr.msk.bf16.mxu1 %vm16278_vm2, %v16277_v26 }
 0x415   : >> { %14910 = vmatmul.mubr.bf16.vlgmr.msra.gmra.mxu0 %v7465_v4 }
 0x416   : >> { %14946 = vmatmul.mubr.bf16.vlgmr.msra.gmra.mxu1 %v16058_v10  ;;  %14966 = vmatpush3.bf16.msra.mxu0 %v16059_v44  ;;  %v7876_v10 = vrot.slane %v7874_v24, 1  ;;  %v19350_v44 = vld [vmem:[%s18704_s15 + $0x4c] sm:$0xff]  }
 0x417   : >> { %14967 = vmatprep.subr.bf16.mxu0 %v16277_v26  ;;  %14913 = vmatprep.mubr.msk.bf16.mxu0 %vm16278_vm2, %v16277_v26  ;;  %v8064_v8 = vrot.slane %v19350_v44, 1  ;;  %v7886_v33 = vshrl.u32 %v19350_v44, 16 }
 0x418   : >> { %14949 = vmatprep.mubr.msk.bf16.mxu1 %vm16278_vm2, %v16277_v26  ;;  %15002 = vmatpush3.bf16.msra.mxu1 %v16062_v50  ;;  %v7872_v50 = vor.u32 %v7870_v34, %v7868_v31  ;;  %v7880_v32 = vor.u32 %v7878_v62, %v7876_v10 }
 0x419   : >> { %15003 = vmatprep.subr.bf16.mxu1 %v16277_v26 }
 0x41a   : >> { %14968 = vmatpush3.bf16.msra.mxu0 %v16060_v51 }
 0x41b   : >> { %14969 = vmatprep.subr.bf16.mxu0 %v16277_v26 }
 0x41c   : >> { %15004 = vmatpush3.bf16.msra.mxu1 %v16064_v57  ;;  %v8062_v57 = vrot.slane %v19324_v55, 1  ;;  %v16094_v55 = vld [vmem:[%s20660_s1 + $0xa18] sm:$0xff]  }
 0x41d   : >> { %14914 = vmatmul.mubr.bf16.gmra.mxu0 %v7467_v63  ;;  %15005 = vmatprep.subr.bf16.mxu1 %v16277_v26 }
 0x41e   : >> { %14950 = vmatmul.mubr.bf16.gmra.mxu1 %v16061_v60  ;;  %14970 = vmatpush3.bf16.msra.mxu0 %v16063_v36  ;;  %v16087_v36 = vld [vmem:[%s20660_s1 + $0xa30] sm:$0xff]   ;;  %v8065_v31 = vsel %vm20781_vm1, %v8062_v57, %v8064_v8 }
 0x41f   : >> { %14917 = vmatprep.mubr.msk.bf16.mxu0 %vm16278_vm2, %v16277_v26  ;;  %14953 = vmatprep.mubr.msk.bf16.mxu1 %vm16278_vm2, %v16277_v26 }
 0x420   : >> { %14971 = vmatprep.subr.bf16.mxu0 %v16277_v26  ;;  %15006 = vmatpush3.bf16.msra.mxu1 %v16067_v17  ;;  %v16086_v17 = vld [vmem:[%s20660_s1 + $0x9e8] sm:$0xff]  }
 0x421   : >> { %15007 = vmatprep.subr.bf16.mxu1 %v16277_v26 }
 0x422   : >> { %14972 = vmatpush3.bf16.msra.mxu0 %v16066_v21  ;;  %v7882_v21 = vshll.u32 %v19350_v44, 16 }
 0x423   : >> { %14973 = vmatprep.subr.bf16.mxu0 %v16277_v26 }
 0x424   : >> { %15008 = vmatpush3.bf16.msra.mxu1 %v16069_v52 }
 0x425   : >> { %14918 = vmatmul.mubr.bf16.gmra.mxu0 %v7469_v49  ;;  %15009 = vmatprep.subr.bf16.mxu1 %v16277_v26 }
 0x426   : >> { %14954 = vmatmul.mubr.bf16.gmra.mxu1 %v16065_v25  ;;  %14974 = vmatpush3.bf16.msra.mxu0 %v16068_v16  ;;  %v7877_v25 = vsel %vm20778_vm13, %v7872_v50, %v7876_v10  ;;  %v16090_v16 = vld [vmem:[%s20660_s1 + $0xa28] sm:$0xff]   ;;  %vm20792_vm13 = vmmov %vm20781_vm1 }
 0x427   : >> { %14921 = vmatprep.mubr.msk.bf16.mxu0 %vm16278_vm2, %v16277_v26  ;;  %14957 = vmatprep.mubr.msk.bf16.mxu1 %vm16278_vm2, %v16277_v26 }
 0x428   : >> { %14975 = vmatprep.subr.bf16.mxu0 %v16277_v26  ;;  %15010 = vmatpush3.bf16.msra.mxu1 %v16071_v58  ;;  %v8063_v58 = vsel %vm20779_vm10, %v8060_v30, %v8062_v57  ;;  %v19418_v30 = vld [vmem:[%s18704_s15 + $0x3c] sm:$0xf]  ;;  %vm20793_vm10 = vmmov %vm20789_vm4 }
 0x429   : >> { %15011 = vmatprep.subr.bf16.mxu1 %v16277_v26 }
 0x42a   : >> { %14976 = vmatpush3.bf16.msra.mxu0 %v16072_v45  ;;  %v19378_v45 = vld [vmem:[%s18704_s15 + $0x54] sm:$0xff]  }
 0x42b   : >> { %14977 = vmatprep.subr.bf16.mxu0 %v16277_v26  ;;  %v8066_v24 = vrot.slane %v19378_v45, 1 }
 0x42c   : >> { %15012 = vmatpush3.bf16.msra.mxu1 %v16073_v3  ;;  %v7884_v3 = vrot.slane %v7882_v21, 1  ;;  %v16100_v21 = vld [vmem:[%s20660_s1 + $0x9c0] sm:$0xff]  }
 0x42d   : >> { %14922 = vmatmul.mubr.bf16.gmra.mxu0 %v7471_v38  ;;  %15013 = vmatprep.subr.bf16.mxu1 %v16277_v26  ;;  %v8067_v50 = vsel %vm20783_vm8, %v8064_v8, %v8066_v24  ;;  %vm20797_vm8 = vcmask 1044480  }
 0x42e   : >> { %14958 = vmatmul.mubr.bf16.gmra.mxu1 %v16070_v11  ;;  %14925 = vmatprep.mubr.msk.bf16.mxu0 %vm16278_vm2, %v16277_v26  ;;  %v16089_v11 = vld [vmem:[%s20660_s1 + $0x9e0] sm:$0xff]   ;;  %v7885_v61 = vsel %vm20780_vm5, %v7880_v32, %v7884_v3  ;;  %vm20794_vm5 = vmmov %vm20781_vm1 }
 0x42f   : >> { %14961 = vmatprep.mubr.msk.bf16.mxu1 %vm16278_vm2, %v16277_v26  ;;  %14978 = vmatpush3.bf16.msra.mxu0 %v16074_v15  ;;  %vm20795_vm1 = vmmov %vm20789_vm4 }
 0x430   : >> { %15014 = vmatpush3.bf16.msra.mxu1 %v16076_v27  ;;  %14979 = vmatprep.subr.bf16.mxu0 %v16277_v26 }
 0x431   : >> { %15015 = vmatprep.subr.bf16.mxu1 %v16277_v26 }
 0x433   : >> { %14980 = vmatpush3.bf16.msra.mxu0 %v16077_v59  ;;  %v7890_v59 = vshll.u32 %v19378_v45, 16 }
 0x434   : >> { %15016 = vmatpush3.bf16.msra.mxu1 %v16078_v46  ;;  %15037 = vmatprep.subr.bf16.mxu0 %v16277_v26  ;;  %v16091_v46 = vld [vmem:[%s20660_s1 + $0x9d8] sm:$0xff]  }
 0x435   : >> { %v6110_v0 = vpop.f32.mrf.mxu0  ;;  %14926 = vmatmul.mubr.bf16.gmra.mxu0 %v7473_v12  ;;  %15073 = vmatprep.subr.bf16.mxu1 %v16277_v26 }
 0x436   : >> { %v6236_v13 = vpop.f32.mrf.mxu1  ;;  %14962 = vmatmul.mubr.bf16.gmra.mxu1 %v16075_v47  ;;  %14981 = vmatprep.mubr.msk.bf16.mxu0 %vm16278_vm2, %v16277_v26 }
 0x437   : >> { %v19329_v53 = vadd.f32 %v6236_v13, %v6110_v0  ;;  %v14623_v5 = vpop.f32.mrf.mxu0  ;;  %15017 = vmatprep.mubr.msk.bf16.mxu1 %vm16278_vm2, %v16277_v26  ;;  %v7892_v13 = vrot.slane %v7890_v59, 1 }
 0x438   : >> { %v14659_v9 = vpop.f32.mrf.mxu1 }
 0x439   : >> { %v6113_v23 = vpop.f32.mrf.mxu0 }
 0x43a   : >> { %v6239_v41 = vpop.f32.mrf.mxu1 }
 0x43b   : >> { %v19340_v1 = vadd.f32 %v6239_v41, %v6113_v23  ;;  %v14624_v22 = vpop.f32.mrf.mxu0  ;;  %v16096_v41 = vld [vmem:[%s20660_s1 + $0xa10] sm:$0xff]  }
 0x43c   : >> { %v14660_v2 = vpop.f32.mrf.mxu1  ;;  %v7898_v22 = vshll.u32 %v19403_v20, 16 }
 0x43d   : >> { %v6118_v43 = vpop.f32.mrf.mxu0  ;;  %14982 = vmatmul.mubr.bf16.vlgmr.msra.gmra.mxu0 %v7869_v39 }
 0x43e   : >> { %v6244_v4 = vpop.f32.mrf.mxu1  ;;  %15018 = vmatmul.mubr.bf16.vlgmr.msra.gmra.mxu1 %v8061_v18  ;;  %15038 = vmatpush3.bf16.msra.mxu0 %v16082_v54  ;;  %v7888_v54 = vor.u32 %v7886_v33, %v7884_v3  ;;  %v19433_v18 = vld [vmem:[%s18704_s15 + $0x40] sm:$0xff]   ;;  %v19470_v3 = vld [vmem:[%s18704_s15 + $0x48] sm:$0xff]  }
 0x43f   : >> { %v19352_v51 = vadd.f32 %v6244_v4, %v6118_v43  ;;  %v14627_v56 = vpop.f32.mrf.mxu0  ;;  %15039 = vmatprep.subr.bf16.mxu0 %v16277_v26  ;;  %14985 = vmatprep.mubr.msk.bf16.mxu0 %vm16278_vm2, %v16277_v26  ;;  %v8263_v32 = vrot.slane %v19433_v18, 1 }
 0x440   : >> { %v14663_v60 = vpop.f32.mrf.mxu1  ;;  %15021 = vmatprep.mubr.msk.bf16.mxu1 %vm16278_vm2, %v16277_v26  ;;  %15074 = vmatpush3.bf16.msra.mxu1 %v16085_v42  ;;  %v19438_v42 = vcombine.low %v12437_v7, %v19418_v30  ;;  %v7893_v10 = vsel %vm20782_vm14, %v7888_v54, %v7892_v13  ;;  %v16097_v56 = vld [vmem:[%s20660_s1 + $0x9c8] sm:$0xff]   ;;  %v8451_v7 = vshll.u32 %v19470_v3, 16  ;;  %vm20796_vm14 = vsmask.f32 5376 }
 0x441   : >> { %v6121_v63 = vpop.f32.mrf.mxu0  ;;  %15075 = vmatprep.subr.bf16.mxu1 %v16277_v26  ;;  %v7900_v60 = vrot.slane %v7898_v22, 1 }
 0x442   : >> { %v6247_v52 = vpop.f32.mrf.mxu1  ;;  %15040 = vmatpush3.bf16.msra.mxu0 %v16083_v37  ;;  %v7894_v37 = vshrl.u32 %v19378_v45, 16 }
 0x443   : >> { %v19373_v49 = vadd.f32 %v6247_v52, %v6121_v63  ;;  %v14628_v48 = vpop.f32.mrf.mxu0  ;;  %15041 = vmatprep.subr.bf16.mxu0 %v16277_v26  ;;  %v16099_v63 = vld [vmem:[%s20660_s1 + $0xa08] sm:$0xff]   ;;  %v8431_v52 = vshrl.u32 %v19438_v42, 16 }
 0x444   : >> { %v14664_v6 = vpop.f32.mrf.mxu1  ;;  %15076 = vmatpush3.bf16.msra.mxu1 %v16087_v36  ;;  %v8068_v36 = vrot.slane %v19403_v20, 1  ;;  %v7896_v48 = vor.u32 %v7894_v37, %v7892_v13  ;;  %v8262_v20 = vrot.slane %v19438_v42, 1 }
 0x445   : >> { %v6126_v28 = vpop.f32.mrf.mxu0  ;;  %14986 = vmatmul.mubr.bf16.gmra.mxu0 %v7877_v25  ;;  %15077 = vmatprep.subr.bf16.mxu1 %v16277_v26  ;;  %v8442_v25 = vshll.u32 %v19433_v18, 16  ;;  %v8433_v33 = vrot.slane %v8431_v52, 1 }
 0x446   : >> { %v6252_v15 = vpop.f32.mrf.mxu1  ;;  %15022 = vmatmul.mubr.bf16.gmra.mxu1 %v8063_v58  ;;  %15042 = vmatpush3.bf16.msra.mxu0 %v16086_v17  ;;  %v8439_v17 = vshrl.u32 %v19433_v18, 16  ;;  %v16101_v58 = vld [vmem:[%s20660_s1 + $0xa00] sm:$0xff]   ;;  %v8264_v22 = vsel %vm20786_vm3, %v8262_v20, %v8263_v32 }
 0x447   : >> { %v19384_v38 = vadd.f32 %v6252_v15, %v6126_v28  ;;  %v14631_v27 = vpop.f32.mrf.mxu0  ;;  %14989 = vmatprep.mubr.msk.bf16.mxu0 %vm16278_vm2, %v16277_v26  ;;  %15025 = vmatprep.mubr.msk.bf16.mxu1 %vm16278_vm2, %v16277_v26  ;;  %v8434_v28 = vshll.u32 %v19438_v42, 16  ;;  %v8444_v8 = vrot.slane %v8442_v25, 2  ;;  %v8453_v42 = vrot.slane %v8451_v7, 2 }
 0x448   : >> { %v14667_v40 = vpop.f32.mrf.mxu1  ;;  %15043 = vmatprep.subr.bf16.mxu0 %v16277_v26  ;;  %15078 = vmatpush3.bf16.msra.mxu1 %v16090_v16  ;;  %v8441_v27 = vrot.slane %v8439_v17, 1 }
 0x449   : >> { %v6129_v29 = vpop.f32.mrf.mxu0  ;;  %15079 = vmatprep.subr.bf16.mxu1 %v16277_v26 }
 0x44a   : >> { %v6255_v47 = vpop.f32.mrf.mxu1  ;;  %15044 = vmatpush3.bf16.msra.mxu0 %v16089_v11 }
 0x44b   : >> { %v19405_v12 = vadd.f32 %v6255_v47, %v6129_v29  ;;  %v14632_v19 = vpop.f32.mrf.mxu0  ;;  %15045 = vmatprep.subr.bf16.mxu0 %v16277_v26  ;;  %v8436_v47 = vrot.slane %v8434_v28, 2  ;;  %v16108_v28 = vld [vmem:[%s20660_s1 + $0xa68] sm:$0xff]  }
 0x44c   : >> { %v14668_v0 = vpop.f32.mrf.mxu1  ;;  %15080 = vmatpush3.bf16.msra.mxu1 %v16092_v35  ;;  %v7901_v35 = vsel %vm20784_vm0, %v7896_v48, %v7900_v60  ;;  %v8448_v19 = vshrl.u32 %v19470_v3, 16  ;;  %vm20798_vm0 = vmmov %vm20796_vm14 }
 0x44d   : >> { %v6134_v5 = vpop.f32.mrf.mxu0  ;;  %14990 = vmatmul.mubr.bf16.gmra.mxu0 %v7885_v61  ;;  %15081 = vmatprep.subr.bf16.mxu1 %v16277_v26  ;;  %vm20800_vm3 = vmmov %vm20798_vm0 }
 0x44e   : >> { %v6260_v9 = vpop.f32.mrf.mxu1  ;;  %15026 = vmatmul.mubr.bf16.gmra.mxu1 %v8065_v31  ;;  %15046 = vmatpush3.bf16.msra.mxu0 %v16091_v46  ;;  %v8069_v46 = vsel %vm20785_vm7, %v8066_v24, %v8068_v36  ;;  %v8450_v24 = vrot.slane %v8448_v19, 1  ;;  %vm20799_vm7 = vmmov %vm20797_vm8 }
 0x44f   : >> { %v19420_v23 = vadd.f32 %v6260_v9, %v6134_v5  ;;  %v14635_v34 = vpop.f32.mrf.mxu0  ;;  %14993 = vmatprep.mubr.msk.bf16.mxu0 %vm16278_vm2, %v16277_v26  ;;  %15029 = vmatprep.mubr.msk.bf16.mxu1 %vm16278_vm2, %v16277_v26  ;;  %v8445_v5 = vor.u32 %v8444_v8, %v8441_v27 }
 0x450   : >> { %v14671_v39 = vpop.f32.mrf.mxu1  ;;  %15047 = vmatprep.subr.bf16.mxu0 %v16277_v26  ;;  %15082 = vmatpush3.bf16.msra.mxu1 %v16094_v55  ;;  %v8454_v17 = vor.u32 %v8453_v42, %v8450_v24 }
 0x451   : >> { %v6137_v2 = vpop.f32.mrf.mxu0  ;;  %15083 = vmatprep.subr.bf16.mxu1 %v16277_v26 }
 0x452   : >> { %v6263_v43 = vpop.f32.mrf.mxu1  ;;  %15048 = vmatpush3.bf16.msra.mxu0 %v16095_v14  ;;  %v8437_v14 = vor.u32 %v8436_v47, %v8433_v33 }
 0x453   : >> { %v19441_v44 = vadd.f32 %v6263_v43, %v6137_v2  ;;  %v14636_v4 = vpop.f32.mrf.mxu0  ;;  %15049 = vmatprep.subr.bf16.mxu0 %v16277_v26  ;;  %v19500_v43 = vld [vmem:[%s18704_s15 + $0x50] sm:$0xff]  }
 0x454   : >> { %v14672_v57 = vpop.f32.mrf.mxu1  ;;  %15084 = vmatpush3.bf16.msra.mxu1 %v16096_v41  ;;  %v8446_v37 = vsel %vm20787_vm15, %v8437_v14, %v8445_v5  ;;  %v8267_v47 = vrot.slane %v19500_v43, 1  ;;  %vm20801_vm15 = vmmov %vm20799_vm7 }
 0x455   : >> { %v6142_v62 = vpop.f32.mrf.mxu0  ;;  %14994 = vmatmul.mubr.bf16.gmra.mxu0 %v7893_v10  ;;  %15085 = vmatprep.subr.bf16.mxu1 %v16277_v26  ;;  %v8265_v57 = vrot.slane %v19470_v3, 1 }
 0x456   : >> { %v6268_v16 = vpop.f32.mrf.mxu1  ;;  %15030 = vmatmul.mubr.bf16.gmra.mxu1 %v8067_v50  ;;  %14997 = vmatprep.mubr.msk.bf16.mxu0 %vm16278_vm2, %v16277_v26  ;;  %v16107_v50 = vld [vmem:[%s20660_s1 + $0xab8] sm:$0xff]  }
 0x457   : >> { %v19464_v45 = vadd.f32 %v6268_v16, %v6142_v62  ;;  %v14639_v6 = vpop.f32.mrf.mxu0  ;;  %15033 = vmatprep.mubr.msk.bf16.mxu1 %vm16278_vm2, %v16277_v26  ;;  %15050 = vmatpush3.bf16.msra.mxu0 %v16097_v56  ;;  %v8457_v62 = vshrl.u32 %v19500_v43, 16 }
 0x458   : >> { %v14675_v11 = vpop.f32.mrf.mxu1  ;;  %15086 = vmatpush3.bf16.msra.mxu1 %v16099_v63  ;;  %15051 = vmatprep.subr.bf16.mxu0 %v16277_v26  ;;  %v8266_v6 = vsel %vm20788_vm9, %v8263_v32, %v8265_v57  ;;  %v16112_v32 = vld [vmem:[%s20660_s1 + $0xaa8] sm:$0xff]   ;;  %vm20802_vm9 = vmmov %vm20798_vm0 }
 0x459   : >> { %v6145_v15 = vpop.f32.mrf.mxu0  ;;  %15087 = vmatprep.subr.bf16.mxu1 %v16277_v26  ;;  %v8459_v27 = vrot.slane %v8457_v62, 1  ;;  %v16118_v62 = vld [vmem:[%s20660_s1 + $0xa90] sm:$0xff]  }
 0x45a   : >> { %v6271_v40 = vpop.f32.mrf.mxu1 }
 0x45b   : >> { %v19476_v59 = vadd.f32 %v6271_v40, %v6145_v15  ;;  %v14640_v29 = vpop.f32.mrf.mxu0  ;;  %15052 = vmatpush3.bf16.msra.mxu0 %v16100_v21  ;;  %v8460_v21 = vshll.u32 %v19500_v43, 16  ;;  %v8455_v15 = vsel %vm20789_vm4, %v8445_v5, %v8454_v17  ;;  %v19535_v40 = vld [vmem:[%s18704_s15 + $0x58] sm:$0xff]   ;;  %vm20803_vm4 = vmmov %vm20799_vm7 }
 0x45c   : >> { %v14676_v61 = vpop.f32.mrf.mxu1  ;;  %15088 = vmatpush3.bf16.msra.mxu1 %v16101_v58  ;;  %15109 = vmatprep.subr.bf16.mxu0 %v16277_v26 }
 0x45d   : >> { %v6395_v31 = vpop.f32.mrf.mxu0  ;;  %14998 = vmatmul.mubr.bf16.gmra.mxu0 %v7901_v35  ;;  %15145 = vmatprep.subr.bf16.mxu1 %v16277_v26  ;;  %v8462_v8 = vrot.slane %v8460_v21, 2  ;;  %v16111_v61 = vld [vmem:[%s20660_s1 + $0xa60] sm:$0xff]  }
 0x45e   : >> { %v6434_v55 = vadd.f32 %v6395_v31, %v19329_v53  ;;  %v6598_v0 = vpop.f32.mrf.mxu1  ;;  %15034 = vmatmul.mubr.bf16.gmra.mxu1 %v8069_v46  ;;  %15053 = vmatprep.mubr.msk.bf16.mxu0 %vm16278_vm2, %v16277_v26  ;;  %v16104_v53 = vld [vmem:[%s20660_s1 + $0xa78] sm:$0xff]   ;;  %v8466_v31 = vshrl.u32 %v19535_v40, 16 }
 0x45f   : >> { %v14695_v13 = vpop.f32.mrf.mxu0  ;;  %15089 = vmatprep.mubr.msk.bf16.mxu1 %vm16278_vm2, %v16277_v26  ;;  %v8463_v19 = vor.u32 %v8462_v8, %v8459_v27 }
 0x460   : >> { %v19489_v9 = vadd.f32 %v6598_v0, %v6434_v55  ;;  %v14731_v54 = vpop.f32.mrf.mxu1  ;;  %v16114_v13 = vld [vmem:[%s20660_s1 + $0xaa0] sm:$0xff]  }
 0x461   : >> { %v6398_v34 = vpop.f32.mrf.mxu0  ;;  %v8268_v54 = vsel %vm20790_vm12, %v8265_v57, %v8267_v47  ;;  %v8464_v24 = vsel %vm20791_vm6, %v8454_v17, %v8463_v19  ;;  %vm20804_vm12 = vmmov %vm20798_vm0 }
 0x462   : >> { %v6435_v41 = vadd.f32 %v6398_v34, %v19340_v1  ;;  %v6601_v39 = vpop.f32.mrf.mxu1  ;;  %v16105_v1 = vld [vmem:[%s20660_s1 + $0xa70] sm:$0xff]   ;;  %v16113_v34 = vld [vmem:[%s20660_s1 + $0xa58] sm:$0xff]   ;;  %vm20805_vm6 = vmmov %vm20803_vm4 }
 0x463   : >> { %v14696_v2 = vpop.f32.mrf.mxu0 }
 0x464   : >> { %v19502_v10 = vadd.f32 %v6601_v39, %v6435_v41  ;;  %v14732_v4 = vpop.f32.mrf.mxu1  ;;  %v8468_v41 = vrot.slane %v8466_v31, 1  ;;  %v16124_v31 = vld [vmem:[%s20660_s1 + $0xa80] sm:$0xff]  }
 0x465   : >> { %v6403_v56 = vpop.f32.mrf.mxu0  ;;  %15054 = vmatmul.mubr.bf16.vlgmr.msra.gmra.mxu0 %v8264_v22  ;;  %v19569_v22 = vld [vmem:[%s18704_s15 + $0x60] ss:$0 sps:$4 sm:$0x33]  }
 0x466   : >> { %v6436_v60 = vadd.f32 %v6403_v56, %v19352_v51  ;;  %v6606_v36 = vpop.f32.mrf.mxu1  ;;  %15090 = vmatmul.mubr.bf16.vlgmr.msra.gmra.mxu1 %v8446_v37  ;;  %15110 = vmatpush3.bf16.msra.mxu0 %v16104_v53  ;;  %v16109_v51 = vld [vmem:[%s20660_s1 + $0xab0] sm:$0xff]   ;;  %v16116_v37 = vld [vmem:[%s20660_s1 + $0xa98] sm:$0xff]   ;;  %v8269_v56 = vrot.slane %v19535_v40, 1 }
 0x467   : >> { %v14699_v63 = vpop.f32.mrf.mxu0  ;;  %15111 = vmatprep.subr.bf16.mxu0 %v16277_v26  ;;  %15057 = vmatprep.mubr.msk.bf16.mxu0 %vm16278_vm2, %v16277_v26 }
 0x468   : >> { %v19517_v52 = vadd.f32 %v6606_v36, %v6436_v60  ;;  %v14735_v25 = vpop.f32.mrf.mxu1  ;;  %15093 = vmatprep.mubr.msk.bf16.mxu1 %vm16278_vm2, %v16277_v26  ;;  %15146 = vmatpush3.bf16.msra.mxu1 %v16107_v50  ;;  %v8478_v36 = vshll.u32 %v19569_v22, 16 }
 0x469   : >> { %v6406_v16 = vpop.f32.mrf.mxu0  ;;  %15147 = vmatprep.subr.bf16.mxu1 %v16277_v26 }
 0x46a   : >> { %v6437_v48 = vadd.f32 %v6406_v16, %v19373_v49  ;;  %v6609_v58 = vpop.f32.mrf.mxu1  ;;  %15112 = vmatpush3.bf16.msra.mxu0 %v16105_v1  ;;  %v16117_v1 = vld [vmem:[%s20660_s1 + $0xa50] sm:$0xff]   ;;  %v8270_v16 = vsel %vm20792_vm13, %v8267_v47, %v8269_v56  ;;  %vm20806_vm13 = vsmask.f32 7424 }
 0x46b   : >> { %v14700_v11 = vpop.f32.mrf.mxu0  ;;  %15113 = vmatprep.subr.bf16.mxu0 %v16277_v26 }
 0x46c   : >> { %v19537_v49 = vadd.f32 %v6609_v58, %v6437_v48  ;;  %v14736_v35 = vpop.f32.mrf.mxu1  ;;  %15148 = vmatpush3.bf16.msra.mxu1 %v16109_v51  ;;  %v16120_v48 = vld [vmem:[%s18704_s15 + $0x60] ss:$0 sps:$4 sm:$0x11]  }
 0x46d   : >> { %v6411_v29 = vpop.f32.mrf.mxu0  ;;  %15058 = vmatmul.mubr.bf16.gmra.mxu0 %v8266_v6  ;;  %15149 = vmatprep.subr.bf16.mxu1 %v16277_v26 }
 0x46e   : >> { %v6438_v46 = vadd.f32 %v6411_v29, %v19384_v38  ;;  %v6614_v33 = vpop.f32.mrf.mxu1  ;;  %15094 = vmatmul.mubr.bf16.gmra.mxu1 %v8455_v15  ;;  %15114 = vmatpush3.bf16.msra.mxu0 %v16108_v28  ;;  %v8469_v38 = vshll.u32 %v19535_v40, 16  ;;  %v16119_v28 = vld [vmem:[%s20660_s1 + $0xa48] sm:$0xff]   ;;  %v8480_v15 = vrot.slane %v8478_v36, 2 }
 0x46f   : >> { %v14703_v20 = vpop.f32.mrf.mxu0  ;;  %15061 = vmatprep.mubr.msk.bf16.mxu0 %vm16278_vm2, %v16277_v26  ;;  %15097 = vmatprep.mubr.msk.bf16.mxu1 %vm16278_vm2, %v16277_v26 }
 0x470   : >> { %v19554_v55 = vadd.f32 %v6614_v33, %v6438_v46  ;;  %v14739_v0 = vpop.f32.mrf.mxu1  ;;  %15115 = vmatprep.subr.bf16.mxu0 %v16277_v26  ;;  %15150 = vmatpush3.bf16.msra.mxu1 %v16112_v32  ;;  %v8471_v39 = vrot.slane %v8469_v38, 2  ;;  %v8271_v46 = vrot.slane %v16120_v48, 1  ;;  %v12504_v20 = vld [vmem:[%s18704_s15 + $0x38] sm:$0xc]  ;;  %v12530_v38 = vld [vmem:[%s18704_s15 + $0x3c] sm:$0xc] }
 0x471   : >> { %v6414_v14 = vpop.f32.mrf.mxu0  ;;  %15151 = vmatprep.subr.bf16.mxu1 %v16277_v26  ;;  %v19626_v0 = vld [vmem:[%s18704_s15 + $0x40] sm:$0xf]  ;;  %v16131_v48 = vld [vmem:[%s20660_s1 + $0xb38] sm:$0xff]  }
 0x472   : >> { %v6439_v5 = vadd.f32 %v6414_v14, %v19405_v12  ;;  %v6617_v7 = vpop.f32.mrf.mxu1  ;;  %15116 = vmatpush3.bf16.msra.mxu0 %v16111_v61  ;;  %v8472_v60 = vor.u32 %v8471_v39, %v8468_v41  ;;  %v16123_v61 = vld [vmem:[%s20660_s1 + $0xa40] sm:$0xff]  }
 0x473   : >> { %v14704_v53 = vpop.f32.mrf.mxu0  ;;  %15117 = vmatprep.subr.bf16.mxu0 %v16277_v26  ;;  %v19637_v41 = vld [vmem:[%s18704_s15 + $0x44] sm:$0xff]  }
 0x474   : >> { %v19571_v2 = vadd.f32 %v6617_v7, %v6439_v5  ;;  %v14740_v12 = vpop.f32.mrf.mxu1  ;;  %15152 = vmatpush3.bf16.msra.mxu1 %v16114_v13  ;;  %v8473_v6 = vsel %vm20793_vm10, %v8463_v19, %v8472_v60  ;;  %v8272_v7 = vsel %vm20794_vm5, %v8269_v56, %v8271_v46  ;;  %vm20807_vm10 = vmmov %vm20806_vm13 }
 0x475   : >> { %v6419_v42 = vpop.f32.mrf.mxu0  ;;  %15062 = vmatmul.mubr.bf16.gmra.mxu0 %v8268_v54  ;;  %15153 = vmatprep.subr.bf16.mxu1 %v16277_v26  ;;  %v12521_v54 = vcombine.low %v12504_v20, %v19418_v30  ;;  %v19692_v20 = vld [vmem:[%s18704_s15 + $0x54] sm:$0xff]   ;;  %vm20808_vm5 = vmmov %vm20807_vm10 }
 0x476   : >> { %v6440_v4 = vadd.f32 %v6419_v42, %v19420_v23  ;;  %v6622_v50 = vpop.f32.mrf.mxu1  ;;  %15098 = vmatmul.mubr.bf16.gmra.mxu1 %v8464_v24  ;;  %15118 = vmatpush3.bf16.msra.mxu0 %v16113_v34  ;;  %v8475_v23 = vshrl.u32 %v19569_v22, 16  ;;  %v19634_v24 = vcombine.low %v12530_v38, %v19626_v0 }
 0x477   : >> { %v14707_v57 = vpop.f32.mrf.mxu0  ;;  %15065 = vmatprep.mubr.msk.bf16.mxu0 %vm16278_vm2, %v16277_v26  ;;  %15101 = vmatprep.mubr.msk.bf16.mxu1 %vm16278_vm2, %v16277_v26  ;;  %v8640_v42 = vrot.slane %v12521_v54, 2 }
 0x478   : >> { %v19588_v63 = vadd.f32 %v6622_v50, %v6440_v4  ;;  %v14743_v17 = vpop.f32.mrf.mxu1  ;;  %15119 = vmatprep.subr.bf16.mxu0 %v16277_v26  ;;  %15154 = vmatpush3.bf16.msra.mxu1 %v16116_v37  ;;  %v8477_v11 = vrot.slane %v8475_v23, 1  ;;  %v8641_v4 = vrot.slane %v19433_v18, 2  ;;  %v8843_v56 = vrot.slane %v19634_v24, 2  ;;  %v16128_v18 = vld [vmem:[%s20660_s1 + $0xaf8] sm:$0xff]  }
 0x479   : >> { %v6422_v21 = vpop.f32.mrf.mxu0  ;;  %15155 = vmatprep.subr.bf16.mxu1 %v16277_v26 }
 0x47a   : >> { %v6441_v25 = vadd.f32 %v6422_v21, %v19441_v44  ;;  %v6625_v51 = vpop.f32.mrf.mxu1  ;;  %15120 = vmatpush3.bf16.msra.mxu0 %v16117_v1  ;;  %v16122_v44 = vld [vmem:[%s20660_s1 + $0xa88] sm:$0xff]   ;;  %v8481_v47 = vor.u32 %v8480_v15, %v8477_v11  ;;  %v8844_v1 = vrot.slane %v19637_v41, 2  ;;  %v8642_v17 = vsel %vm1433_vm11, %v8640_v42, %v8641_v4  ;;  %v16137_v42 = vld [vmem:[%s20660_s1 + $0xad8] sm:$0xff]  }
 0x47b   : >> { %v14708_v58 = vpop.f32.mrf.mxu0  ;;  %15121 = vmatprep.subr.bf16.mxu0 %v16277_v26  ;;  %v8643_v11 = vrot.slane %v19470_v3, 2  ;;  %v16133_v3 = vld [vmem:[%s20660_s1 + $0xb30] sm:$0xff]  }
 0x47c   : >> { %v19603_v27 = vadd.f32 %v6625_v51, %v6441_v25  ;;  %v14744_v8 = vpop.f32.mrf.mxu1  ;;  %15156 = vmatpush3.bf16.msra.mxu1 %v16118_v62  ;;  %v8482_v53 = vsel %vm20795_vm1, %v8472_v60, %v8481_v47  ;;  %v8845_v21 = vsel %vm1433_vm11, %v8843_v56, %v8844_v1  ;;  %v19660_v25 = vld [vmem:[%s18704_s15 + $0x4c] sm:$0xff]   ;;  %v19725_v56 = vld [vmem:[%s18704_s15 + $0x5c] sm:$0xff]   ;;  %vm20809_vm1 = vmmov %vm20808_vm5 }
 0x47d   : >> { %v6427_v35 = vpop.f32.mrf.mxu0  ;;  %15066 = vmatmul.mubr.bf16.gmra.mxu0 %v8270_v16  ;;  %15157 = vmatprep.subr.bf16.mxu1 %v16277_v26  ;;  %v8846_v8 = vrot.slane %v19660_v25, 2  ;;  %v8644_v46 = vsel %vm1433_vm11, %v8641_v4, %v8643_v11 }
 0x47e   : >> { %v6442_v32 = vadd.f32 %v6427_v35, %v19464_v45  ;;  %v6630_v29 = vpop.f32.mrf.mxu1  ;;  %15102 = vmatmul.mubr.bf16.gmra.mxu1 %v8473_v6  ;;  %15069 = vmatprep.mubr.msk.bf16.mxu0 %vm16278_vm2, %v16277_v26 }
 0x47f   : >> { %v14711_v33 = vpop.f32.mrf.mxu0  ;;  %15105 = vmatprep.mubr.msk.bf16.mxu1 %vm16278_vm2, %v16277_v26  ;;  %15122 = vmatpush3.bf16.msra.mxu0 %v16119_v28  ;;  %v16129_v28 = vld [vmem:[%s20660_s1 + $0xaf0] sm:$0xff]  }
 0x480   : >> { %v19618_v45 = vadd.f32 %v6630_v29, %v6442_v32  ;;  %v14747_v19 = vpop.f32.mrf.mxu1  ;;  %15158 = vmatpush3.bf16.msra.mxu1 %v16122_v44  ;;  %15123 = vmatprep.subr.bf16.mxu0 %v16277_v26  ;;  %v16132_v33 = vld [vmem:[%s20660_s1 + $0xae8] sm:$0xff]  }
 0x481   : >> { %v6430_v13 = vpop.f32.mrf.mxu0  ;;  %15159 = vmatprep.subr.bf16.mxu1 %v16277_v26 }
 0x482   : >> { %v6443_v14 = vadd.f32 %v6430_v13, %v19476_v59  ;;  %v6633_v5 = vpop.f32.mrf.mxu1 }
 0x483   : >> { %v14712_v34 = vpop.f32.mrf.mxu0  ;;  %15124 = vmatpush3.bf16.msra.mxu0 %v16123_v61  ;;  %v8847_v61 = vsel %vm1433_vm11, %v8844_v1, %v8846_v8 }
 0x484   : >> { %v19639_v39 = vadd.f32 %v6633_v5, %v6443_v14  ;;  %v14748_v12 = vpop.f32.mrf.mxu1  ;;  %15160 = vmatpush3.bf16.msra.mxu1 %v16124_v31  ;;  %15181 = vmatprep.subr.bf16.mxu0 %v16277_v26  ;;  %v8645_v5 = vrot.slane %v19500_v43, 2  ;;  %v8848_v34 = vrot.slane %v19692_v20, 2  ;;  %v16138_v43 = vld [vmem:[%s20660_s1 + $0xb20] sm:$0xff]  }
 0x485   : >> { %v6809_v59 = vpop.f32.mrf.mxu0  ;;  %15070 = vmatmul.mubr.bf16.gmra.mxu0 %v8272_v7  ;;  %15217 = vmatprep.subr.bf16.mxu1 %v16277_v26  ;;  %v16135_v7 = vld [vmem:[%s20660_s1 + $0xae0] sm:$0xff]  }
 0x486   : >> { %v6848_v30 = vadd.f32 %v6809_v59, %v19489_v9  ;;  %v6978_v37 = vpop.f32.mrf.mxu1  ;;  %15106 = vmatmul.mubr.bf16.gmra.mxu1 %v8482_v53  ;;  %15125 = vmatprep.mubr.msk.bf16.mxu0 %vm16278_vm2, %v16277_v26 }
 0x487   : >> { %v14767_v50 = vpop.f32.mrf.mxu0  ;;  %15161 = vmatprep.mubr.msk.bf16.mxu1 %vm16278_vm2, %v16277_v26 }
 0x488   : >> { %v19651_v57 = vadd.f32 %v6978_v37, %v6848_v30  ;;  %v14803_v9 = vpop.f32.mrf.mxu1  ;;  %v8646_v37 = vsel %vm1433_vm11, %v8643_v11, %v8645_v5  ;;  %v8849_v50 = vsel %vm1433_vm11, %v8846_v8, %v8848_v34  ;;  %v16144_v8 = vld [vmem:[%s18704_s15 + $0x64] ss:$0 sps:$4 sm:$0x33]  }
 0x489   : >> { %v6812_v60 = vpop.f32.mrf.mxu0 }
 0x48a   : >> { %v6849_v23 = vadd.f32 %v6812_v60, %v19502_v10  ;;  %v6981_v36 = vpop.f32.mrf.mxu1 }
 0x48b   : >> { %v14768_v62 = vpop.f32.mrf.mxu0 }
 0x48c   : >> { %v19662_v51 = vadd.f32 %v6981_v36, %v6849_v23  ;;  %v14804_v16 = vpop.f32.mrf.mxu1 }
 0x48d   : >> { %v6817_v10 = vpop.f32.mrf.mxu0  ;;  %15126 = vmatmul.mubr.bf16.vlgmr.msra.gmra.mxu0 %v8642_v17  ;;  %v8647_v17 = vrot.slane %v19535_v40, 2  ;;  %v16142_v40 = vld [vmem:[%s20660_s1 + $0xb10] sm:$0xff]  }
 0x48e   : >> { %v6850_v58 = vadd.f32 %v6817_v10, %v19517_v52  ;;  %v6986_v6 = vpop.f32.mrf.mxu1  ;;  %15162 = vmatmul.mubr.bf16.vlgmr.msra.gmra.mxu1 %v8845_v21  ;;  %15182 = vmatpush3.bf16.msra.mxu0 %v16128_v18  ;;  %v16141_v18 = vld [vmem:[%s20660_s1 + $0xad0] sm:$0xff]   ;;  %v8850_v21 = vrot.slane %v19725_v56, 2 }
 0x48f   : >> { %v14771_v15 = vpop.f32.mrf.mxu0  ;;  %15183 = vmatprep.subr.bf16.mxu0 %v16277_v26  ;;  %15129 = vmatprep.mubr.msk.bf16.mxu0 %vm16278_vm2, %v16277_v26 }
 0x490   : >> { %v19676_v44 = vadd.f32 %v6986_v6, %v6850_v58  ;;  %v14807_v52 = vpop.f32.mrf.mxu1  ;;  %15165 = vmatprep.mubr.msk.bf16.mxu1 %vm16278_vm2, %v16277_v26  ;;  %15218 = vmatpush3.bf16.msra.mxu1 %v16131_v48  ;;  %v8648_v6 = vsel %vm1433_vm11, %v8645_v5, %v8647_v17  ;;  %v8851_v11 = vsel %vm1433_vm11, %v8848_v34, %v8850_v21  ;;  %v16143_v15 = vld [vmem:[%s20660_s1 + $0xac8] sm:$0xff]  }
 0x491   : >> { %v6820_v35 = vpop.f32.mrf.mxu0  ;;  %15219 = vmatprep.subr.bf16.mxu1 %v16277_v26 }
 0x492   : >> { %v6851_v32 = vadd.f32 %v6820_v35, %v19537_v49  ;;  %v6989_v29 = vpop.f32.mrf.mxu1  ;;  %15184 = vmatpush3.bf16.msra.mxu0 %v16129_v28  ;;  %v16136_v49 = vld [vmem:[%s20660_s1 + $0xb28] sm:$0xff]  }
 0x493   : >> { %v14772_v47 = vpop.f32.mrf.mxu0  ;;  %15185 = vmatprep.subr.bf16.mxu0 %v16277_v26 }
 0x494   : >> { %v19694_v19 = vadd.f32 %v6989_v29, %v6851_v32  ;;  %v14808_v31 = vpop.f32.mrf.mxu1  ;;  %15220 = vmatpush3.bf16.msra.mxu1 %v16133_v3  ;;  %v9012_v32 = vshrl.u32 %v19634_v24, 16  ;;  %v9015_v29 = vshll.u32 %v19634_v24, 16  ;;  %v8649_v47 = vrot.slane %v19569_v22, 2  ;;  %v16147_v22 = vld [vmem:[%s20660_s1 + $0xb00] sm:$0xff]  }
 0x495   : >> { %v6825_v38 = vpop.f32.mrf.mxu0  ;;  %15130 = vmatmul.mubr.bf16.gmra.mxu0 %v8644_v46  ;;  %15221 = vmatprep.subr.bf16.mxu1 %v16277_v26  ;;  %v9023_v31 = vshll.u32 %v19637_v41, 16  ;;  %v8852_v24 = vrot.slane %v16144_v8, 2 }
 0x496   : >> { %v6852_v13 = vadd.f32 %v6825_v38, %v19554_v55  ;;  %v6994_v14 = vpop.f32.mrf.mxu1  ;;  %15166 = vmatmul.mubr.bf16.gmra.mxu1 %v8847_v61  ;;  %15186 = vmatpush3.bf16.msra.mxu0 %v16132_v33  ;;  %v9020_v61 = vshrl.u32 %v19637_v41, 16 }
 0x497   : >> { %v14775_v54 = vpop.f32.mrf.mxu0  ;;  %15133 = vmatprep.mubr.msk.bf16.mxu0 %vm16278_vm2, %v16277_v26  ;;  %15169 = vmatprep.mubr.msk.bf16.mxu1 %vm16278_vm2, %v16277_v26 }
 0x498   : >> { %v19710_v55 = vadd.f32 %v6994_v14, %v6852_v13  ;;  %v14811_v53 = vpop.f32.mrf.mxu1  ;;  %15187 = vmatprep.subr.bf16.mxu0 %v16277_v26  ;;  %15222 = vmatpush3.bf16.msra.mxu1 %v16136_v49  ;;  %v12597_v14 = vld [vmem:[%s18704_s15 + $0x3c] sm:$0x8]  ;;  %v9017_v54 = vrot.slane %v9015_v29, 3 }
 0x499   : >> { %v6828_v12 = vpop.f32.mrf.mxu0  ;;  %15223 = vmatprep.subr.bf16.mxu1 %v16277_v26 }
 0x49a   : >> { %v6853_v59 = vadd.f32 %v6828_v12, %v19571_v2  ;;  %v6997_v30 = vpop.f32.mrf.mxu1  ;;  %15188 = vmatpush3.bf16.msra.mxu0 %v16135_v7  ;;  %v16140_v2 = vld [vmem:[%s20660_s1 + $0xb18] sm:$0xff]   ;;  %v9014_v7 = vrot.slane %v9012_v32, 2  ;;  %v9022_v12 = vrot.slane %v9020_v61, 2  ;;  %v16150_v32 = vld [vmem:[%s20660_s1 + $0xb70] sm:$0xff]  }
 0x49b   : >> { %v14776_v4 = vpop.f32.mrf.mxu0  ;;  %15189 = vmatprep.subr.bf16.mxu0 %v16277_v26 }
 0x49c   : >> { %v19727_v1 = vadd.f32 %v6997_v30, %v6853_v59  ;;  %v14812_v9 = vpop.f32.mrf.mxu1  ;;  %15224 = vmatpush3.bf16.msra.mxu1 %v16138_v43  ;;  %v8650_v43 = vsel %vm1433_vm11, %v8647_v17, %v8649_v47  ;;  %v9025_v59 = vrot.slane %v9023_v31, 3 }
 0x49d   : >> { %v6833_v60 = vpop.f32.mrf.mxu0  ;;  %15134 = vmatmul.mubr.bf16.gmra.mxu0 %v8646_v37  ;;  %15225 = vmatprep.subr.bf16.mxu1 %v16277_v26  ;;  %v8853_v37 = vsel %vm1433_vm11, %v8850_v21, %v8852_v24 }
 0x49e   : >> { %v6854_v23 = vadd.f32 %v6833_v60, %v19588_v63  ;;  %v7002_v36 = vpop.f32.mrf.mxu1  ;;  %15170 = vmatmul.mubr.bf16.gmra.mxu1 %v8849_v50  ;;  %15190 = vmatpush3.bf16.msra.mxu0 %v16137_v42  ;;  %v12614_v42 = vcombine.low %v12597_v14, %v19626_v0  ;;  %v9029_v0 = vshrl.u32 %v19660_v25, 16 }
 0x49f   : >> { %v14779_v62 = vpop.f32.mrf.mxu0  ;;  %15137 = vmatprep.mubr.msk.bf16.mxu0 %vm16278_vm2, %v16277_v26  ;;  %15173 = vmatprep.mubr.msk.bf16.mxu1 %vm16278_vm2, %v16277_v26 }
 0x4a0   : >> { %v19743_v63 = vadd.f32 %v7002_v36, %v6854_v23  ;;  %v14815_v16 = vpop.f32.mrf.mxu1  ;;  %15191 = vmatprep.subr.bf16.mxu0 %v16277_v26  ;;  %15226 = vmatpush3.bf16.msra.mxu1 %v16140_v2  ;;  %v9026_v23 = vor.u32 %v9025_v59, %v9022_v12  ;;  %v9032_v36 = vshll.u32 %v19660_v25, 16  ;;  %v9222_v62 = vrot.slane %v19637_v41, 3 }
 0x4a1   : >> { %v6836_v48 = vpop.f32.mrf.mxu0  ;;  %15227 = vmatprep.subr.bf16.mxu1 %v16277_v26 }
 0x4a2   : >> { %v6855_v10 = vadd.f32 %v6836_v48, %v19603_v27  ;;  %v7005_v58 = vpop.f32.mrf.mxu1  ;;  %15192 = vmatpush3.bf16.msra.mxu0 %v16141_v18  ;;  %v16145_v27 = vld [vmem:[%s20660_s1 + $0xb08] sm:$0xff]   ;;  %v9221_v18 = vrot.slane %v12614_v42, 3  ;;  %v9047_v42 = vshrl.u32 %v19725_v56, 16 }
 0x4a3   : >> { %v14780_v28 = vpop.f32.mrf.mxu0  ;;  %15193 = vmatprep.subr.bf16.mxu0 %v16277_v26 }
 0x4a4   : >> { %v19758_v52 = vadd.f32 %v7005_v58, %v6855_v10  ;;  %v14816_v3 = vpop.f32.mrf.mxu1  ;;  %15228 = vmatpush3.bf16.msra.mxu1 %v16142_v40  ;;  %v16149_v58 = vld [vmem:[%s20660_s1 + $0xb78] sm:$0xff]   ;;  %v9034_v28 = vrot.slane %v9032_v36, 3 }
 0x4a5   : >> { %v6841_v35 = vpop.f32.mrf.mxu0  ;;  %15138 = vmatmul.mubr.bf16.gmra.mxu0 %v8648_v6  ;;  %15229 = vmatprep.subr.bf16.mxu1 %v16277_v26  ;;  %v9031_v6 = vrot.slane %v9029_v0, 2  ;;  %v16151_v3 = vld [vmem:[%s20660_s1 + $0xbb8] sm:$0xff]  }
 0x4a6   : >> { %v6856_v46 = vadd.f32 %v6841_v35, %v19618_v45  ;;  %v7010_v33 = vpop.f32.mrf.mxu1  ;;  %15174 = vmatmul.mubr.bf16.gmra.mxu1 %v8851_v11  ;;  %15141 = vmatprep.mubr.msk.bf16.mxu0 %vm16278_vm2, %v16277_v26  ;;  %v16146_v45 = vld [vmem:[%s20660_s1 + $0xac0] sm:$0xff]  }
 0x4a7   : >> { %v14783_v49 = vpop.f32.mrf.mxu0  ;;  %15177 = vmatprep.mubr.msk.bf16.mxu1 %vm16278_vm2, %v16277_v26  ;;  %15194 = vmatpush3.bf16.msra.mxu0 %v16143_v15  ;;  %v9223_v15 = vsel %vm20797_vm8, %v9221_v18, %v9222_v62  ;;  %v9035_v29 = vor.u32 %v9034_v28, %v9031_v6  ;;  %v9049_v18 = vrot.slane %v9047_v42, 2  ;;  %v16165_v42 = vld [vmem:[%s20660_s1 + $0xb80] sm:$0xff]   ;;  %vm20811_vm8 = vcmask 1046528  }
 0x4a8   : >> { %v19777_v38 = vadd.f32 %v7010_v33, %v6856_v46  ;;  %v14819_v13 = vpop.f32.mrf.mxu1  ;;  %15230 = vmatpush3.bf16.msra.mxu1 %v16145_v27  ;;  %15195 = vmatprep.subr.bf16.mxu0 %v16277_v26  ;;  %v9038_v46 = vshrl.u32 %v19692_v20, 16  ;;  %v9041_v33 = vshll.u32 %v19692_v20, 16  ;;  %v16153_v49 = vld [vmem:[%s20660_s1 + $0xbb0] sm:$0xff]  }
 0x4a9   : >> { %v6844_v5 = vpop.f32.mrf.mxu0  ;;  %15231 = vmatprep.subr.bf16.mxu1 %v16277_v26 }
 0x4aa   : >> { %v6857_v34 = vadd.f32 %v6844_v5, %v19639_v39  ;;  %v7013_v53 = vpop.f32.mrf.mxu1  ;;  %v9018_v39 = vor.u32 %v9017_v54, %v9014_v7  ;;  %v9040_v14 = vrot.slane %v9038_v46, 2  ;;  %v9043_v5 = vrot.slane %v9041_v33, 3  ;;  %v19898_v46 = vld [vmem:[%s18704_s15 + $0x6c] sm:$0xf] }
 0x4ab   : >> { %v14784_v30 = vpop.f32.mrf.mxu0  ;;  %15196 = vmatpush3.bf16.msra.mxu0 %v16146_v45 }
 0x4ac   : >> { %v19789_v4 = vadd.f32 %v7013_v53, %v6857_v34  ;;  %v14820_v50 = vpop.f32.mrf.mxu1  ;;  %15232 = vmatpush3.bf16.msra.mxu1 %v16147_v22  ;;  %15253 = vmatprep.subr.bf16.mxu0 %v16277_v26  ;;  %v9027_v10 = vsel %vm20796_vm14, %v9018_v39, %v9026_v23  ;;  %v16152_v22 = vld [vmem:[%s20660_s1 + $0xb68] sm:$0xff]   ;;  %v9044_v30 = vor.u32 %v9043_v5, %v9040_v14  ;;  %vm20810_vm14 = vmmov %vm20809_vm1 }
 0x4ad   : >> { %v7181_v9 = vpop.f32.mrf.mxu0  ;;  %15142 = vmatmul.mubr.bf16.gmra.mxu0 %v8650_v43  ;;  %15289 = vmatprep.subr.bf16.mxu1 %v16277_v26  ;;  %v9050_v50 = vshll.u32 %v19725_v56, 16  ;;  %v16163_v14 = vld [vmem:[%s20660_s1 + $0xb88] sm:$0xff]  }
 0x4ae   : >> { %v7220_v2 = vadd.f32 %v7181_v9, %v19651_v57  ;;  %v7392_v60 = vpop.f32.mrf.mxu1  ;;  %15178 = vmatmul.mubr.bf16.gmra.mxu1 %v8853_v37  ;;  %15197 = vmatprep.mubr.msk.bf16.mxu0 %vm16278_vm2, %v16277_v26  ;;  %v16154_v37 = vld [vmem:[%s20660_s1 + $0xb60] sm:$0xff]  }
 0x4af   : >> { %v14839_v17 = vpop.f32.mrf.mxu0  ;;  %15233 = vmatprep.mubr.msk.bf16.mxu1 %vm16278_vm2, %v16277_v26 }
 0x4b0   : >> { %v19801_v21 = vadd.f32 %v7392_v60, %v7220_v2  ;;  %v14875_v57 = vpop.f32.mrf.mxu1  ;;  %v16157_v60 = vld [vmem:[%s20660_s1 + $0xba0] sm:$0xff]   ;;  %v9045_v17 = vsel %vm20800_vm3, %v9035_v29, %v9044_v30 }
 0x4b1   : >> { %v7184_v16 = vpop.f32.mrf.mxu0  ;;  %v19869_v57 = vld [vmem:[%s18704_s15 + $0x64] ss:$0 sps:$4 sm:$0x77]  }
 0x4b2   : >> { %v7221_v40 = vadd.f32 %v7184_v16, %v19662_v51  ;;  %v7395_v48 = vpop.f32.mrf.mxu1 }
 0x4b3   : >> { %v14840_v11 = vpop.f32.mrf.mxu0 }
 0x4b4   : >> { %v19809_v8 = vadd.f32 %v7395_v48, %v7221_v40  ;;  %v14876_v41 = vpop.f32.mrf.mxu1 }
 0x4b5   : >> { %v7189_v51 = vpop.f32.mrf.mxu0  ;;  %15198 = vmatmul.mubr.bf16.vlgmr.msra.gmra.mxu0 %v9027_v10  ;;  %v16158_v10 = vld [vmem:[%s20660_s1 + $0xb98] sm:$0xff]   ;;  %v9056_v41 = vshrl.u32 %v19869_v57, 16 }
 0x4b6   : >> { %v7222_v27 = vadd.f32 %v7189_v51, %v19676_v44  ;;  %v7400_v35 = vpop.f32.mrf.mxu1  ;;  %15234 = vmatmul.mubr.bf16.vlgmr.msra.gmra.mxu1 %v9223_v15  ;;  %15254 = vmatpush3.bf16.msra.mxu0 %v16149_v58  ;;  %v9224_v44 = vrot.slane %v19660_v25, 3  ;;  %v9036_v25 = vsel %vm20798_vm0, %v9026_v23, %v9035_v29  ;;  %v16159_v15 = vld [vmem:[%s20660_s1 + $0xb50] sm:$0xff]   ;;  %v12662_v29 = vld [vmem:[%s18704_s15 + $0x68] sm:$0xf]  ;;  %vm20812_vm0 = vmmov %vm20811_vm8 }
 0x4b7   : >> { %v14843_v47 = vpop.f32.mrf.mxu0  ;;  %15255 = vmatprep.subr.bf16.mxu0 %v16277_v26  ;;  %15201 = vmatprep.mubr.msk.bf16.mxu0 %vm16278_vm2, %v16277_v26  ;;  %vm20814_vm3 = vmmov %vm20812_vm0 }
 0x4b8   : >> { %v19824_v61 = vadd.f32 %v7400_v35, %v7222_v27  ;;  %v14879_v31 = vpop.f32.mrf.mxu1  ;;  %15237 = vmatprep.mubr.msk.bf16.mxu1 %vm16278_vm2, %v16277_v26  ;;  %15290 = vmatpush3.bf16.msra.mxu1 %v16151_v3  ;;  %v9225_v54 = vsel %vm20799_vm7, %v9222_v62, %v9224_v44  ;;  %v9052_v62 = vrot.slane %v9050_v50, 3  ;;  %v9059_v3 = vshll.u32 %v19869_v57, 16  ;;  %vm20813_vm7 = vmmov %vm20812_vm0 }
 0x4b9   : >> { %v7192_v24 = vpop.f32.mrf.mxu0  ;;  %15291 = vmatprep.subr.bf16.mxu1 %v16277_v26  ;;  %v9058_v31 = vrot.slane %v9056_v41, 2  ;;  %v16169_v41 = vld [vmem:[%s20660_s1 + $0xbf8] sm:$0xff]  }
 0x4ba   : >> { %v7223_v45 = vadd.f32 %v7192_v24, %v19694_v19  ;;  %v7403_v13 = vpop.f32.mrf.mxu1  ;;  %15256 = vmatpush3.bf16.msra.mxu0 %v16150_v32  ;;  %v16155_v19 = vld [vmem:[%s20660_s1 + $0xba8] sm:$0xff]   ;;  %v9053_v11 = vor.u32 %v9052_v62, %v9049_v18  ;;  %v16160_v32 = vld [vmem:[%s20660_s1 + $0xb90] sm:$0xff]  }
 0x4bb   : >> { %v14844_v7 = vpop.f32.mrf.mxu0  ;;  %15257 = vmatprep.subr.bf16.mxu0 %v16277_v26 }
 0x4bc   : >> { %v19839_v34 = vadd.f32 %v7403_v13, %v7223_v45  ;;  %v14880_v53 = vpop.f32.mrf.mxu1  ;;  %15292 = vmatpush3.bf16.msra.mxu1 %v16153_v49  ;;  %v9061_v49 = vrot.slane %v9059_v3, 3  ;;  %v16161_v13 = vld [vmem:[%s20660_s1 + $0xb48] sm:$0xff]  }
 0x4bd   : >> { %v7197_v43 = vpop.f32.mrf.mxu0  ;;  %15202 = vmatmul.mubr.bf16.gmra.mxu0 %v9036_v25  ;;  %15293 = vmatprep.subr.bf16.mxu1 %v16277_v26  ;;  %v12689_v25 = vcombine.low %v12662_v29, %v19898_v46 }
 0x4be   : >> { %v7224_v12 = vadd.f32 %v7197_v43, %v19710_v55  ;;  %v7408_v59 = vpop.f32.mrf.mxu1  ;;  %15238 = vmatmul.mubr.bf16.gmra.mxu1 %v9225_v54  ;;  %15258 = vmatpush3.bf16.msra.mxu0 %v16152_v22  ;;  %v9226_v55 = vrot.slane %v19692_v20, 3  ;;  %v16156_v20 = vld [vmem:[%s20660_s1 + $0xb58] sm:$0xff]   ;;  %v9062_v53 = vor.u32 %v9061_v49, %v9058_v31  ;;  %v9230_v43 = vrot.slane %v19869_v57, 3 }
 0x4bf   : >> { %v14847_v9 = vpop.f32.mrf.mxu0  ;;  %15205 = vmatprep.mubr.msk.bf16.mxu0 %vm16278_vm2, %v16277_v26  ;;  %15241 = vmatprep.mubr.msk.bf16.mxu1 %vm16278_vm2, %v16277_v26 }
 0x4c0   : >> { %v19856_v39 = vadd.f32 %v7408_v59, %v7224_v12  ;;  %v14883_v2 = vpop.f32.mrf.mxu1  ;;  %15259 = vmatprep.subr.bf16.mxu0 %v16277_v26  ;;  %15294 = vmatpush3.bf16.msra.mxu1 %v16155_v19  ;;  %v9227_v40 = vsel %vm20801_vm15, %v9224_v44, %v9226_v55  ;;  %v16164_v12 = vld [vmem:[%s20660_s1 + $0xb40] sm:$0xff]   ;;  %v19925_v59 = vld [vmem:[%s18704_s15 + $0x70] sm:$0xff]   ;;  %vm20815_vm15 = vmmov %vm20812_vm0 }
 0x4c1   : >> { %v7200_v23 = vpop.f32.mrf.mxu0  ;;  %15295 = vmatprep.subr.bf16.mxu1 %v16277_v26  ;;  %v9063_v2 = vsel %vm20804_vm12, %v9053_v11, %v9062_v53  ;;  %vm20818_vm12 = vmmov %vm20812_vm0 }
 0x4c2   : >> { %v7225_v0 = vadd.f32 %v7200_v23, %v19727_v1  ;;  %v7411_v36 = vpop.f32.mrf.mxu1  ;;  %15260 = vmatpush3.bf16.msra.mxu0 %v16154_v37 }
 0x4c3   : >> { %v14848_v16 = vpop.f32.mrf.mxu0  ;;  %15261 = vmatprep.subr.bf16.mxu0 %v16277_v26 }
 0x4c4   : >> { %v19873_v48 = vadd.f32 %v7411_v36, %v7225_v0  ;;  %v14884_v1 = vpop.f32.mrf.mxu1  ;;  %15296 = vmatpush3.bf16.msra.mxu1 %v16157_v60  ;;  %v9617_v0 = vshrl.u32 %v12689_v25, 16 }
 0x4c5   : >> { %v7205_v58 = vpop.f32.mrf.mxu0  ;;  %15206 = vmatmul.mubr.bf16.gmra.mxu0 %v9045_v17  ;;  %15297 = vmatprep.subr.bf16.mxu1 %v16277_v26  ;;  %v9624_v17 = vshll.u32 %v19925_v59, 16 }
 0x4c6   : >> { %v7226_v6 = vadd.f32 %v7205_v58, %v19743_v63  ;;  %v7416_v28 = vpop.f32.mrf.mxu1  ;;  %15242 = vmatmul.mubr.bf16.gmra.mxu1 %v9227_v40  ;;  %15262 = vmatpush3.bf16.msra.mxu0 %v16156_v20  ;;  %v9228_v63 = vrot.slane %v19725_v56, 3  ;;  %v9054_v56 = vsel %vm20802_vm9, %v9044_v30, %v9053_v11  ;;  %v16166_v11 = vld [vmem:[%s18704_s15 + $0x68] sm:$0xff]   ;;  %vm20816_vm9 = vmmov %vm20812_vm0 }
 0x4c7   : >> { %v14851_v51 = vpop.f32.mrf.mxu0  ;;  %15209 = vmatprep.mubr.msk.bf16.mxu0 %vm16278_vm2, %v16277_v26  ;;  %15245 = vmatprep.mubr.msk.bf16.mxu1 %vm16278_vm2, %v16277_v26  ;;  %v9626_v1 = vrot.slane %v9624_v17, 1  ;;  %v16181_v17 = vld [vmem:[%s20660_s1 + $0xc20] sm:$0xff]  }
 0x4c8   : >> { %v19890_v27 = vadd.f32 %v7416_v28, %v7226_v6  ;;  %v14887_v35 = vpop.f32.mrf.mxu1  ;;  %15263 = vmatprep.subr.bf16.mxu0 %v16277_v26  ;;  %15298 = vmatpush3.bf16.msra.mxu1 %v16158_v10  ;;  %v9229_v45 = vsel %vm20803_vm4, %v9226_v55, %v9228_v63  ;;  %v9231_v23 = vsel %vm20805_vm6, %v9228_v63, %v9230_v43  ;;  %v19948_v10 = vld [vmem:[%s18704_s15 + $0x78] sm:$0xff]   ;;  %v9628_v63 = vshrl.u32 %v19925_v59, 16  ;;  %vm20817_vm4 = vmmov %vm20812_vm0 }
 0x4c9   : >> { %v7208_v33 = vpop.f32.mrf.mxu0  ;;  %15299 = vmatprep.subr.bf16.mxu1 %v16277_v26  ;;  %v9632_v35 = vshll.u32 %v19948_v10, 16  ;;  %v9636_v43 = vshrl.u32 %v19948_v10, 16  ;;  %vm20819_vm6 = vmmov %vm20812_vm0 }
 0x4ca   : >> { %v7227_v47 = vadd.f32 %v7208_v33, %v19758_v52  ;;  %v7419_v44 = vpop.f32.mrf.mxu1  ;;  %15264 = vmatpush3.bf16.msra.mxu0 %v16159_v15  ;;  %v9630_v49 = vor.u32 %v9628_v63, %v9626_v1 }
 0x4cb   : >> { %v14852_v24 = vpop.f32.mrf.mxu0  ;;  %15265 = vmatprep.subr.bf16.mxu0 %v16277_v26 }
 0x4cc   : >> { %v19909_v22 = vadd.f32 %v7419_v44, %v7227_v47  ;;  %v14888_v52 = vpop.f32.mrf.mxu1  ;;  %15300 = vmatpush3.bf16.msra.mxu1 %v16160_v32  ;;  %v9634_v24 = vrot.slane %v9632_v35, 1 }
 0x4cd   : >> { %v7213_v5 = vpop.f32.mrf.mxu0  ;;  %15210 = vmatmul.mubr.bf16.gmra.mxu0 %v9054_v56  ;;  %15301 = vmatprep.subr.bf16.mxu1 %v16277_v26  ;;  %v16170_v56 = vld [vmem:[%s20660_s1 + $0xbf0] sm:$0xff]  }
 0x4ce   : >> { %v7228_v7 = vadd.f32 %v7213_v5, %v19777_v38  ;;  %v7424_v54 = vpop.f32.mrf.mxu1  ;;  %15246 = vmatmul.mubr.bf16.gmra.mxu1 %v9229_v45  ;;  %15213 = vmatprep.mubr.msk.bf16.mxu0 %vm16278_vm2, %v16277_v26  ;;  %v9619_v38 = vshll.u32 %v12689_v25, 16  ;;  %v19973_v45 = vld [vmem:[%s18704_s15 + $0x80] sm:$0xff]   ;;  %v16175_v25 = vld [vmem:[%s20660_s1 + $0xc30] sm:$0xff]  }
 0x4cf   : >> { %v14855_v19 = vpop.f32.mrf.mxu0  ;;  %15249 = vmatprep.mubr.msk.bf16.mxu1 %vm16278_vm2, %v16277_v26  ;;  %15266 = vmatpush3.bf16.msra.mxu0 %v16161_v13 }
 0x4d0   : >> { %v19927_v30 = vadd.f32 %v7424_v54, %v7228_v7  ;;  %v14891_v37 = vpop.f32.mrf.mxu1  ;;  %15302 = vmatpush3.bf16.msra.mxu1 %v16163_v14  ;;  %15267 = vmatprep.subr.bf16.mxu0 %v16277_v26  ;;  %v9621_v36 = vrot.slane %v9619_v38, 1  ;;  %v16171_v14 = vld [vmem:[%s18704_s15 + $0x70] sm:$0xff]   ;;  %v16174_v54 = vld [vmem:[%s20660_s1 + $0xbe8] sm:$0xff]   ;;  %v9635_v19 = vsel %vm20807_vm10, %v9630_v49, %v9634_v24  ;;  %vm20821_vm10 = vsmask.f32 6400 }
 0x4d1   : >> { %v7216_v50 = vpop.f32.mrf.mxu0  ;;  %15303 = vmatprep.subr.bf16.mxu1 %v16277_v26 }
 0x4d2   : >> { %v7229_v9 = vadd.f32 %v7216_v50, %v19789_v4  ;;  %v7427_v55 = vpop.f32.mrf.mxu1  ;;  %v9622_v40 = vor.u32 %v9621_v36, %v9617_v0  ;;  %v20007_v0 = vld [vmem:[%s18704_s15 + $0x88] sm:$0xff]  }
 0x4d3   : >> { %v14856_v60 = vpop.f32.mrf.mxu0  ;;  %15268 = vmatpush3.bf16.msra.mxu0 %v16164_v12  ;;  %v9640_v12 = vshll.u32 %v19973_v45, 16 }
 0x4d4   : >> { %v19938_v20 = vadd.f32 %v7427_v55, %v7229_v9  ;;  %v14892_v18 = vpop.f32.mrf.mxu1  ;;  %15304 = vmatpush3.bf16.msra.mxu1 %v16165_v42  ;;  %15325 = vmatprep.subr.bf16.mxu0 %v16277_v26  ;;  %v9627_v51 = vsel %vm20806_vm13, %v9622_v40, %v9626_v1  ;;  %v16178_v55 = vld [vmem:[%s20660_s1 + $0xbe0] sm:$0xff]   ;;  %v9638_v60 = vor.u32 %v9636_v43, %v9634_v24  ;;  %vm20820_vm13 = vmmov %vm20812_vm0 }
 0x4d5   : >> { %v7561_v4 = vpop.f32.mrf.mxu0  ;;  %15214 = vmatmul.mubr.bf16.gmra.mxu0 %v9063_v2  ;;  %15361 = vmatprep.subr.bf16.mxu1 %v16277_v26 }
 0x4d6   : >> { %v7600_v62 = vadd.f32 %v7561_v4, %v19801_v21  ;;  %v7753_v57 = vpop.f32.mrf.mxu1  ;;  %15250 = vmatmul.mubr.bf16.gmra.mxu1 %v9231_v23  ;;  %15269 = vmatprep.mubr.msk.bf16.mxu0 %vm16278_vm2, %v16277_v26  ;;  %v9642_v23 = vrot.slane %v9640_v12, 1  ;;  %v16176_v4 = vld [vmem:[%s18704_s15 + $0x78] sm:$0xff]  }
 0x4d7   : >> { %v14911_v16 = vpop.f32.mrf.mxu0  ;;  %15305 = vmatprep.mubr.msk.bf16.mxu1 %vm16278_vm2, %v16277_v26 }
 0x4d8   : >> { %v19950_v58 = vadd.f32 %v7753_v57, %v7600_v62  ;;  %v14947_v6 = vpop.f32.mrf.mxu1  ;;  %v16180_v16 = vld [vmem:[%s20660_s1 + $0xbd8] sm:$0xff]   ;;  %v9643_v1 = vsel %vm20808_vm5, %v9638_v60, %v9642_v23  ;;  %vm20822_vm5 = vmmov %vm20821_vm10 }
 0x4d9   : >> { %v7564_v28 = vpop.f32.mrf.mxu0  ;;  %v9644_v6 = vshrl.u32 %v19973_v45, 16 }
 0x4da   : >> { %v7601_v21 = vadd.f32 %v7564_v28, %v19809_v8  ;;  %v7756_v15 = vpop.f32.mrf.mxu1  ;;  %v16173_v8 = vld [vmem:[%s20660_s1 + $0xc38] sm:$0xff]   ;;  %v9648_v28 = vshll.u32 %v20007_v0, 16 }
 0x4db   : >> { %v14912_v3 = vpop.f32.mrf.mxu0  ;;  %v9646_v35 = vor.u32 %v9644_v6, %v9642_v23  ;;  %v16188_v23 = vld [vmem:[%s18704_s15 + $0x88] sm:$0xff]  }
 0x4dc   : >> { %v19960_v32 = vadd.f32 %v7756_v15, %v7601_v21  ;;  %v14948_v29 = vpop.f32.mrf.mxu1 }
 0x4dd   : >> { %v7569_v33 = vpop.f32.mrf.mxu0  ;;  %15270 = vmatmul.mubr.bf16.vlgmr.msra.gmra.mxu0 %v16166_v11  ;;  %v9650_v29 = vrot.slane %v9648_v28, 1 }
 0x4de   : >> { %v7602_v47 = vadd.f32 %v7569_v33, %v19824_v61  ;;  %v7761_v44 = vpop.f32.mrf.mxu1  ;;  %15306 = vmatmul.mubr.bf16.vlgmr.msra.gmra.mxu1 %v9627_v51  ;;  %15326 = vmatpush3.bf16.msra.mxu0 %v16169_v41  ;;  %v16185_v51 = vld [vmem:[%s20660_s1 + $0xbd0] sm:$0xff]  }
 0x4df   : >> { %v14915_v31 = vpop.f32.mrf.mxu0  ;;  %15327 = vmatprep.subr.bf16.mxu0 %v16277_v26  ;;  %15273 = vmatprep.mubr.msk.bf16.mxu0 %vm16278_vm2, %v16277_v26 }
 0x4e0   : >> { %v19975_v13 = vadd.f32 %v7761_v44, %v7602_v47  ;;  %v14951_v61 = vpop.f32.mrf.mxu1  ;;  %15309 = vmatprep.mubr.msk.bf16.mxu1 %vm16278_vm2, %v16277_v26  ;;  %15362 = vmatpush3.bf16.msra.mxu1 %v16173_v8  ;;  %v20040_v8 = vld [vmem:[%s18704_s15 + $0x90] ss:$0 sps:$4 sm:$0x11]  }
 0x4e1   : >> { %v7572_v52 = vpop.f32.mrf.mxu0  ;;  %15363 = vmatprep.subr.bf16.mxu1 %v16277_v26  ;;  %v16186_v47 = vld [vmem:[%s20660_s1 + $0xc10] sm:$0xff]   ;;  %v9651_v61 = vsel %vm20809_vm1, %v9646_v35, %v9650_v29  ;;  %vm20823_vm1 = vmmov %vm20822_vm5 }
 0x4e2   : >> { %v7603_v5 = vadd.f32 %v7572_v52, %v19839_v34  ;;  %v7764_v7 = vpop.f32.mrf.mxu1  ;;  %15328 = vmatpush3.bf16.msra.mxu0 %v16170_v56  ;;  %v16179_v34 = vld [vmem:[%s20660_s1 + $0xc28] sm:$0xff]   ;;  %v16182_v56 = vld [vmem:[%s18704_s15 + $0x80] sm:$0xff]   ;;  %v9652_v52 = vshrl.u32 %v20007_v0, 16 }
 0x4e3   : >> { %v14916_v53 = vpop.f32.mrf.mxu0  ;;  %15329 = vmatprep.subr.bf16.mxu0 %v16277_v26 }
 0x4e4   : >> { %v19992_v38 = vadd.f32 %v7764_v7, %v7603_v5  ;;  %v14952_v37 = vpop.f32.mrf.mxu1  ;;  %15364 = vmatpush3.bf16.msra.mxu1 %v16175_v25  ;;  %v16187_v25 = vld [vmem:[%s20660_s1 + $0xbc8] sm:$0xff]   ;;  %v9654_v12 = vor.u32 %v9652_v52, %v9650_v29  ;;  %v9820_v52 = vrot.slane %v19948_v10, 1  ;;  %v16201_v10 = vld [vmem:[%s20660_s1 + $0xcb0] sm:$0xff]  }
 0x4e5   : >> { %v7577_v42 = vpop.f32.mrf.mxu0  ;;  %15274 = vmatmul.mubr.bf16.gmra.mxu0 %v16171_v14  ;;  %15365 = vmatprep.subr.bf16.mxu1 %v16277_v26  ;;  %v9656_v14 = vshll.u32 %v20040_v8, 16 }
 0x4e6   : >> { %v7604_v50 = vadd.f32 %v7577_v42, %v19856_v39  ;;  %v7769_v9 = vpop.f32.mrf.mxu1  ;;  %15310 = vmatmul.mubr.bf16.gmra.mxu1 %v9635_v19  ;;  %15330 = vmatpush3.bf16.msra.mxu0 %v16174_v54 }
 0x4e7   : >> { %v14919_v2 = vpop.f32.mrf.mxu0  ;;  %15277 = vmatprep.mubr.msk.bf16.mxu0 %vm16278_vm2, %v16277_v26  ;;  %15313 = vmatprep.mubr.msk.bf16.mxu1 %vm16278_vm2, %v16277_v26  ;;  %v9658_v37 = vrot.slane %v9656_v14, 1 }
 0x4e8   : >> { %v20009_v39 = vadd.f32 %v7769_v9, %v7604_v50  ;;  %v14955_v36 = vpop.f32.mrf.mxu1  ;;  %15331 = vmatprep.subr.bf16.mxu0 %v16277_v26  ;;  %15366 = vmatpush3.bf16.msra.mxu1 %v16179_v34  ;;  %v16191_v34 = vld [vmem:[%s20660_s1 + $0xbc0] sm:$0xff]   ;;  %v20081_v2 = vld [vmem:[%s18704_s15 + $0x70] sm:$0xf] }
 0x4e9   : >> { %v7580_v18 = vpop.f32.mrf.mxu0  ;;  %15367 = vmatprep.subr.bf16.mxu1 %v16277_v26  ;;  %v16192_v9 = vld [vmem:[%s20660_s1 + $0xc00] sm:$0xff]  }
 0x4ea   : >> { %v7605_v62 = vadd.f32 %v7580_v18, %v19873_v48  ;;  %v7772_v57 = vpop.f32.mrf.mxu1  ;;  %15332 = vmatpush3.bf16.msra.mxu0 %v16178_v55  ;;  %v16184_v48 = vld [vmem:[%s20660_s1 + $0xc18] sm:$0xff]   ;;  %v12729_v55 = vld [vmem:[%s18704_s15 + $0x6c] sm:$0xe] }
 0x4eb   : >> { %v14920_v40 = vpop.f32.mrf.mxu0  ;;  %15333 = vmatprep.subr.bf16.mxu0 %v16277_v26 }
 0x4ec   : >> { %v20025_v11 = vadd.f32 %v7772_v57, %v7605_v62  ;;  %v14956_v21 = vpop.f32.mrf.mxu1  ;;  %15368 = vmatpush3.bf16.msra.mxu1 %v16181_v17  ;;  %v9659_v62 = vsel %vm20810_vm14, %v9654_v12, %v9658_v37  ;;  %v20089_v57 = vcombine.low %v12729_v55, %v20081_v2  ;;  %v16200_v12 = vld [vmem:[%s20660_s1 + $0xc68] sm:$0xff]   ;;  %vm20824_vm14 = vmmov %vm20823_vm1 }
 0x4ed   : >> { %v7585_v15 = vpop.f32.mrf.mxu0  ;;  %15278 = vmatmul.mubr.bf16.gmra.mxu0 %v16176_v4  ;;  %15369 = vmatprep.subr.bf16.mxu1 %v16277_v26  ;;  %v9818_v21 = vrot.slane %v19925_v59, 1  ;;  %v16196_v59 = vld [vmem:[%s20660_s1 + $0xc78] sm:$0xff]  }
 0x4ee   : >> { %v7606_v41 = vadd.f32 %v7585_v15, %v19890_v27  ;;  %v7777_v3 = vpop.f32.mrf.mxu1  ;;  %15314 = vmatmul.mubr.bf16.gmra.mxu1 %v9643_v1  ;;  %15334 = vmatpush3.bf16.msra.mxu0 %v16180_v16  ;;  %v20092_v16 = vld [vmem:[%s18704_s15 + $0x74] sm:$0xff]   ;;  %v10020_v15 = vrot.slane %v20089_v57, 1 }
 0x4ef   : >> { %v14923_v63 = vpop.f32.mrf.mxu0  ;;  %15281 = vmatprep.mubr.msk.bf16.mxu0 %vm16278_vm2, %v16277_v26  ;;  %15317 = vmatprep.mubr.msk.bf16.mxu1 %vm16278_vm2, %v16277_v26 }
 0x4f0   : >> { %v20042_v27 = vadd.f32 %v7777_v3, %v7606_v41  ;;  %v14959_v33 = vpop.f32.mrf.mxu1  ;;  %15335 = vmatprep.subr.bf16.mxu0 %v16277_v26  ;;  %15370 = vmatpush3.bf16.msra.mxu1 %v16184_v48  ;;  %v10021_v41 = vrot.slane %v20092_v16, 1 }
 0x4f1   : >> { %v7588_v44 = vpop.f32.mrf.mxu0  ;;  %15371 = vmatprep.subr.bf16.mxu1 %v16277_v26 }
 0x4f2   : >> { %v7607_v31 = vadd.f32 %v7588_v44, %v19909_v22  ;;  %v7780_v49 = vpop.f32.mrf.mxu1  ;;  %15336 = vmatpush3.bf16.msra.mxu0 %v16185_v51  ;;  %v16190_v22 = vld [vmem:[%s20660_s1 + $0xc08] sm:$0xff]   ;;  %v20115_v44 = vld [vmem:[%s18704_s15 + $0x7c] sm:$0xff]  }
 0x4f3   : >> { %v14924_v24 = vpop.f32.mrf.mxu0  ;;  %15337 = vmatprep.subr.bf16.mxu0 %v16277_v26 }
 0x4f4   : >> { %v20058_v5 = vadd.f32 %v7780_v49, %v7607_v31  ;;  %v14960_v7 = vpop.f32.mrf.mxu1  ;;  %15372 = vmatpush3.bf16.msra.mxu1 %v16186_v47  ;;  %v10022_v47 = vsel %vm20812_vm0, %v10020_v15, %v10021_v41  ;;  %v16199_v49 = vld [vmem:[%s20660_s1 + $0xcb8] sm:$0xff]   ;;  %v20180_v15 = vld [vmem:[%s18704_s15 + $0x8c] sm:$0xff]   ;;  %vm20826_vm0 = vsmask.f32 5376 }
 0x4f5   : >> { %v7593_v54 = vpop.f32.mrf.mxu0  ;;  %15282 = vmatmul.mubr.bf16.gmra.mxu0 %v16182_v56  ;;  %15373 = vmatprep.subr.bf16.mxu1 %v16277_v26  ;;  %v10023_v7 = vrot.slane %v20115_v44, 1 }
 0x4f6   : >> { %v7608_v53 = vadd.f32 %v7593_v54, %v19927_v30  ;;  %v7785_v19 = vpop.f32.mrf.mxu1  ;;  %15318 = vmatmul.mubr.bf16.gmra.mxu1 %v9651_v61  ;;  %15285 = vmatprep.mubr.msk.bf16.mxu0 %vm16278_vm2, %v16277_v26  ;;  %v12703_v30 = vld [vmem:[%s18704_s15 + $0x68] sm:$0xe] }
 0x4f7   : >> { %v14927_v43 = vpop.f32.mrf.mxu0  ;;  %15321 = vmatprep.mubr.msk.bf16.mxu1 %vm16278_vm2, %v16277_v26  ;;  %15338 = vmatpush3.bf16.msra.mxu0 %v16187_v25  ;;  %v12720_v18 = vcombine.low %v12703_v30, %v19898_v46  ;;  %v16197_v25 = vld [vmem:[%s20660_s1 + $0xc70] sm:$0xff]   ;;  %v20147_v30 = vld [vmem:[%s18704_s15 + $0x84] sm:$0xff]  }
 0x4f8   : >> { %v20073_v42 = vadd.f32 %v7785_v19, %v7608_v53  ;;  %v14963_v50 = vpop.f32.mrf.mxu1  ;;  %15374 = vmatpush3.bf16.msra.mxu1 %v16190_v22  ;;  %15339 = vmatprep.subr.bf16.mxu0 %v16277_v26  ;;  %v9821_v43 = vsel %vm20813_vm7, %v9818_v21, %v9820_v52  ;;  %vm20827_vm7 = vmmov %vm20826_vm0 }
 0x4f9   : >> { %v7596_v60 = vpop.f32.mrf.mxu0  ;;  %15375 = vmatprep.subr.bf16.mxu1 %v16277_v26  ;;  %v9817_v28 = vrot.slane %v12720_v18, 1 }
 0x4fa   : >> { %v7609_v36 = vadd.f32 %v7596_v60, %v19938_v20  ;;  %v7788_v17 = vpop.f32.mrf.mxu1 }
 0x4fb   : >> { %v14928_v4 = vpop.f32.mrf.mxu0  ;;  %15340 = vmatpush3.bf16.msra.mxu0 %v16191_v34  ;;  %v9819_v29 = vsel %vm20811_vm8, %v9817_v28, %v9818_v21  ;;  %v10024_v34 = vsel %vm20814_vm3, %v10021_v41, %v10023_v7  ;;  %v16205_v28 = vld [vmem:[%s20660_s1 + $0xc58] sm:$0xff]   ;;  %vm20825_vm8 = vmmov %vm20823_vm1 }
 0x4fc   : >> { %v20094_v40 = vadd.f32 %v7788_v17, %v7609_v36  ;;  %v14964_v1 = vpop.f32.mrf.mxu1  ;;  %15376 = vmatpush3.bf16.msra.mxu1 %v16192_v9  ;;  %15397 = vmatprep.subr.bf16.mxu0 %v16277_v26  ;;  %v9822_v36 = vrot.slane %v19973_v45, 1  ;;  %v16203_v17 = vld [vmem:[%s20660_s1 + $0xc60] sm:$0xff]   ;;  %v10025_v4 = vrot.slane %v20147_v30, 1  ;;  %vm20828_vm3 = vmmov %vm20826_vm0 }
 0x4fd   : >> { %v7989_v6 = vpop.f32.mrf.mxu0  ;;  %15286 = vmatmul.mubr.bf16.gmra.mxu0 %v16188_v23  ;;  %15433 = vmatprep.subr.bf16.mxu1 %v16277_v26  ;;  %v16206_v45 = vld [vmem:[%s20660_s1 + $0xca0] sm:$0xff]  }
 0x4fe   : >> { %v8028_v46 = vadd.f32 %v7989_v6, %v19950_v58  ;;  %v8157_v20 = vpop.f32.mrf.mxu1  ;;  %15322 = vmatmul.mubr.bf16.gmra.mxu1 %v9659_v62  ;;  %15341 = vmatprep.mubr.msk.bf16.mxu0 %vm16278_vm2, %v16277_v26 }
 0x4ff   : >> { %v14983_v48 = vpop.f32.mrf.mxu0  ;;  %15377 = vmatprep.mubr.msk.bf16.mxu1 %vm16278_vm2, %v16277_v26 }
 0x500   : >> { %v20106_v3 = vadd.f32 %v8157_v20, %v8028_v46  ;;  %v15019_v58 = vpop.f32.mrf.mxu1  ;;  %v9823_v20 = vsel %vm20815_vm15, %v9820_v52, %v9822_v36  ;;  %v10026_v48 = vsel %vm20816_vm9, %v10023_v7, %v10025_v4  ;;  %v16212_v7 = vld [vmem:[%s18704_s15 + $0x94] ss:$0 sps:$4 sm:$0x11]   ;;  %vm20829_vm15 = vmmov %vm20826_vm0 }
 0x501   : >> { %v7992_v51 = vpop.f32.mrf.mxu0  ;;  %vm20830_vm9 = vmmov %vm20826_vm0 }
 0x502   : >> { %v8029_v63 = vadd.f32 %v7992_v51, %v19960_v32  ;;  %v8160_v35 = vpop.f32.mrf.mxu1 }
 0x503   : >> { %v14984_v33 = vpop.f32.mrf.mxu0 }
 0x504   : >> { %v20117_v56 = vadd.f32 %v8160_v35, %v8029_v63  ;;  %v15020_v31 = vpop.f32.mrf.mxu1 }
 0x505   : >> { %v7997_v32 = vpop.f32.mrf.mxu0  ;;  %15342 = vmatmul.mubr.bf16.vlgmr.msra.gmra.mxu0 %v9819_v29  ;;  %v9824_v29 = vrot.slane %v20007_v0, 1  ;;  %v16210_v0 = vld [vmem:[%s20660_s1 + $0xc90] sm:$0xff]  }
 0x506   : >> { %v8030_v24 = vadd.f32 %v7997_v32, %v19975_v13  ;;  %v8165_v61 = vpop.f32.mrf.mxu1  ;;  %15378 = vmatmul.mubr.bf16.vlgmr.msra.gmra.mxu1 %v10022_v47  ;;  %15398 = vmatpush3.bf16.msra.mxu0 %v16196_v59  ;;  %v16209_v59 = vld [vmem:[%s20660_s1 + $0xc50] sm:$0xff]   ;;  %v10027_v47 = vrot.slane %v20180_v15, 1 }
 0x507   : >> { %v14987_v14 = vpop.f32.mrf.mxu0  ;;  %15399 = vmatprep.subr.bf16.mxu0 %v16277_v26  ;;  %15345 = vmatprep.mubr.msk.bf16.mxu0 %vm16278_vm2, %v16277_v26 }
 0x508   : >> { %v20131_v22 = vadd.f32 %v8165_v61, %v8030_v24  ;;  %v15023_v13 = vpop.f32.mrf.mxu1  ;;  %15381 = vmatprep.mubr.msk.bf16.mxu1 %vm16278_vm2, %v16277_v26  ;;  %15434 = vmatpush3.bf16.msra.mxu1 %v16199_v49  ;;  %v9825_v61 = vsel %vm20817_vm4, %v9822_v36, %v9824_v29  ;;  %v10028_v52 = vsel %vm20818_vm12, %v10025_v4, %v10027_v47  ;;  %v16211_v14 = vld [vmem:[%s20660_s1 + $0xc48] sm:$0xff]   ;;  %vm20831_vm4 = vcmask 1044480  }
 0x509   : >> { %v8000_v54 = vpop.f32.mrf.mxu0  ;;  %15435 = vmatprep.subr.bf16.mxu1 %v16277_v26  ;;  %vm20832_vm12 = vmmov %vm20831_vm4 }
 0x50a   : >> { %v8031_v53 = vadd.f32 %v8000_v54, %v19992_v38  ;;  %v8168_v19 = vpop.f32.mrf.mxu1  ;;  %15400 = vmatpush3.bf16.msra.mxu0 %v16197_v25  ;;  %v16204_v38 = vld [vmem:[%s20660_s1 + $0xca8] sm:$0xff]  }
 0x50b   : >> { %v14988_v37 = vpop.f32.mrf.mxu0  ;;  %15401 = vmatprep.subr.bf16.mxu0 %v16277_v26 }
 0x50c   : >> { %v20149_v50 = vadd.f32 %v8168_v19, %v8031_v53  ;;  %v15024_v9 = vpop.f32.mrf.mxu1  ;;  %15436 = vmatpush3.bf16.msra.mxu1 %v16201_v10  ;;  %v10189_v53 = vshrl.u32 %v20089_v57, 16  ;;  %v10192_v19 = vshll.u32 %v20089_v57, 16  ;;  %v9826_v37 = vrot.slane %v20040_v8, 1  ;;  %v16215_v8 = vld [vmem:[%s20660_s1 + $0xc80] sm:$0xff]  }
 0x50d   : >> { %v8005_v55 = vpop.f32.mrf.mxu0  ;;  %15346 = vmatmul.mubr.bf16.gmra.mxu0 %v9821_v43  ;;  %15437 = vmatprep.subr.bf16.mxu1 %v16277_v26  ;;  %v10200_v9 = vshll.u32 %v20092_v16, 16  ;;  %v10029_v57 = vrot.slane %v16212_v7, 1 }
 0x50e   : >> { %v8032_v60 = vadd.f32 %v8005_v55, %v20009_v39  ;;  %v8173_v23 = vpop.f32.mrf.mxu1  ;;  %15382 = vmatmul.mubr.bf16.gmra.mxu1 %v10024_v34  ;;  %15402 = vmatpush3.bf16.msra.mxu0 %v16200_v12  ;;  %v10197_v34 = vshrl.u32 %v20092_v16, 16 }
 0x50f   : >> { %v14991_v18 = vpop.f32.mrf.mxu0  ;;  %15349 = vmatprep.mubr.msk.bf16.mxu0 %vm16278_vm2, %v16277_v26  ;;  %15385 = vmatprep.mubr.msk.bf16.mxu1 %vm16278_vm2, %v16277_v26 }
 0x510   : >> { %v20165_v39 = vadd.f32 %v8173_v23, %v8032_v60  ;;  %v15027_v62 = vpop.f32.mrf.mxu1  ;;  %15403 = vmatprep.subr.bf16.mxu0 %v16277_v26  ;;  %15438 = vmatpush3.bf16.msra.mxu1 %v16204_v38  ;;  %v12796_v23 = vld [vmem:[%s18704_s15 + $0x6c] sm:$0xc]  ;;  %v10194_v18 = vrot.slane %v10192_v19, 2 }
 0x511   : >> { %v8008_v1 = vpop.f32.mrf.mxu0  ;;  %15439 = vmatprep.subr.bf16.mxu1 %v16277_v26 }
 0x512   : >> { %v8033_v6 = vadd.f32 %v8008_v1, %v20025_v11  ;;  %v8176_v46 = vpop.f32.mrf.mxu1  ;;  %15404 = vmatpush3.bf16.msra.mxu0 %v16203_v17  ;;  %v16208_v11 = vld [vmem:[%s20660_s1 + $0xc98] sm:$0xff]   ;;  %v10191_v17 = vrot.slane %v10189_v53, 1  ;;  %v10199_v1 = vrot.slane %v10197_v34, 1  ;;  %v16218_v53 = vld [vmem:[%s20660_s1 + $0xcf0] sm:$0xff]  }
 0x513   : >> { %v14992_v21 = vpop.f32.mrf.mxu0  ;;  %15405 = vmatprep.subr.bf16.mxu0 %v16277_v26 }
 0x514   : >> { %v20182_v41 = vadd.f32 %v8176_v46, %v8033_v6  ;;  %v15028_v58 = vpop.f32.mrf.mxu1  ;;  %15440 = vmatpush3.bf16.msra.mxu1 %v16206_v45  ;;  %v9827_v45 = vsel %vm20819_vm6, %v9824_v29, %v9826_v37  ;;  %v10202_v6 = vrot.slane %v10200_v9, 2  ;;  %vm20833_vm6 = vmmov %vm20831_vm4 }
 0x515   : >> { %v8013_v51 = vpop.f32.mrf.mxu0  ;;  %15350 = vmatmul.mubr.bf16.gmra.mxu0 %v9823_v20  ;;  %15441 = vmatprep.subr.bf16.mxu1 %v16277_v26  ;;  %v10030_v20 = vsel %vm20820_vm13, %v10027_v47, %v10029_v57  ;;  %vm20834_vm13 = vmmov %vm20831_vm4 }
 0x516   : >> { %v8034_v63 = vadd.f32 %v8013_v51, %v20042_v27  ;;  %v8181_v35 = vpop.f32.mrf.mxu1  ;;  %15386 = vmatmul.mubr.bf16.gmra.mxu1 %v10026_v48  ;;  %15406 = vmatpush3.bf16.msra.mxu0 %v16205_v28  ;;  %v12813_v28 = vcombine.low %v12796_v23, %v20081_v2  ;;  %v10206_v2 = vshrl.u32 %v20115_v44, 16 }
 0x517   : >> { %v14995_v33 = vpop.f32.mrf.mxu0  ;;  %15353 = vmatprep.mubr.msk.bf16.mxu0 %vm16278_vm2, %v16277_v26  ;;  %15389 = vmatprep.mubr.msk.bf16.mxu1 %vm16278_vm2, %v16277_v26 }
 0x518   : >> { %v20198_v27 = vadd.f32 %v8181_v35, %v8034_v63  ;;  %v15031_v31 = vpop.f32.mrf.mxu1  ;;  %15407 = vmatprep.subr.bf16.mxu0 %v16277_v26  ;;  %15442 = vmatpush3.bf16.msra.mxu1 %v16208_v11  ;;  %v10203_v63 = vor.u32 %v10202_v6, %v10199_v1  ;;  %v10209_v35 = vshll.u32 %v20115_v44, 16  ;;  %v10399_v33 = vrot.slane %v20092_v16, 2 }
 0x519   : >> { %v8016_v49 = vpop.f32.mrf.mxu0  ;;  %15443 = vmatprep.subr.bf16.mxu1 %v16277_v26 }
 0x51a   : >> { %v8035_v32 = vadd.f32 %v8016_v49, %v20058_v5  ;;  %v8184_v24 = vpop.f32.mrf.mxu1  ;;  %15408 = vmatpush3.bf16.msra.mxu0 %v16209_v59  ;;  %v16213_v5 = vld [vmem:[%s20660_s1 + $0xc88] sm:$0xff]   ;;  %v10398_v59 = vrot.slane %v12813_v28, 2  ;;  %v10224_v28 = vshrl.u32 %v20180_v15, 16 }
 0x51b   : >> { %v14996_v25 = vpop.f32.mrf.mxu0  ;;  %15409 = vmatprep.subr.bf16.mxu0 %v16277_v26 }
 0x51c   : >> { %v20213_v13 = vadd.f32 %v8184_v24, %v8035_v32  ;;  %v15032_v10 = vpop.f32.mrf.mxu1  ;;  %15444 = vmatpush3.bf16.msra.mxu1 %v16210_v0  ;;  %v16217_v24 = vld [vmem:[%s20660_s1 + $0xcf8] sm:$0xff]   ;;  %v10211_v25 = vrot.slane %v10209_v35, 2 }
 0x51d   : >> { %v8021_v54 = vpop.f32.mrf.mxu0  ;;  %15354 = vmatmul.mubr.bf16.gmra.mxu0 %v9825_v61  ;;  %15445 = vmatprep.subr.bf16.mxu1 %v16277_v26  ;;  %v10208_v61 = vrot.slane %v10206_v2, 1  ;;  %v16219_v10 = vld [vmem:[%s20660_s1 + $0xd38] sm:$0xff]  }
 0x51e   : >> { %v8036_v43 = vadd.f32 %v8021_v54, %v20073_v42  ;;  %v8189_v12 = vpop.f32.mrf.mxu1  ;;  %15390 = vmatmul.mubr.bf16.gmra.mxu1 %v10028_v52  ;;  %15357 = vmatprep.mubr.msk.bf16.mxu0 %vm16278_vm2, %v16277_v26  ;;  %v16214_v42 = vld [vmem:[%s20660_s1 + $0xc40] sm:$0xff]  }
 0x51f   : >> { %v14999_v38 = vpop.f32.mrf.mxu0  ;;  %15393 = vmatprep.mubr.msk.bf16.mxu1 %vm16278_vm2, %v16277_v26  ;;  %15410 = vmatpush3.bf16.msra.mxu0 %v16211_v14  ;;  %v10400_v14 = vsel %vm1433_vm11, %v10398_v59, %v10399_v33  ;;  %v10212_v19 = vor.u32 %v10211_v25, %v10208_v61  ;;  %v10226_v59 = vrot.slane %v10224_v28, 1 }
 0x520   : >> { %v20232_v55 = vadd.f32 %v8189_v12, %v8036_v43  ;;  %v15035_v60 = vpop.f32.mrf.mxu1  ;;  %15446 = vmatpush3.bf16.msra.mxu1 %v16213_v5  ;;  %15411 = vmatprep.subr.bf16.mxu0 %v16277_v26  ;;  %v10215_v43 = vshrl.u32 %v20147_v30, 16  ;;  %v10218_v12 = vshll.u32 %v20147_v30, 16  ;;  %v16221_v38 = vld [vmem:[%s20660_s1 + $0xd30] sm:$0xff]  }
 0x521   : >> { %v8024_v36 = vpop.f32.mrf.mxu0  ;;  %15447 = vmatprep.subr.bf16.mxu1 %v16277_v26 }
 0x522   : >> { %v8037_v4 = vadd.f32 %v8024_v36, %v20094_v40  ;;  %v8192_v62 = vpop.f32.mrf.mxu1  ;;  %v10195_v40 = vor.u32 %v10194_v18, %v10191_v17  ;;  %v10217_v23 = vrot.slane %v10215_v43, 1  ;;  %v10220_v36 = vrot.slane %v10218_v12, 2  ;;  %v20353_v43 = vld [vmem:[%s18704_s15 + $0x74] sm:$0xf] }
 0x523   : >> { %v15000_v46 = vpop.f32.mrf.mxu0  ;;  %15412 = vmatpush3.bf16.msra.mxu0 %v16214_v42 }
 0x524   : >> { %v20244_v21 = vadd.f32 %v8192_v62, %v8037_v4  ;;  %v15036_v48 = vpop.f32.mrf.mxu1  ;;  %15448 = vmatpush3.bf16.msra.mxu1 %v16215_v8  ;;  %15469 = vmatprep.subr.bf16.mxu0 %v16277_v26  ;;  %v10204_v32 = vsel %vm20821_vm10, %v10195_v40, %v10203_v63  ;;  %v16220_v8 = vld [vmem:[%s20660_s1 + $0xce8] sm:$0xff]   ;;  %v10221_v46 = vor.u32 %v10220_v36, %v10217_v23  ;;  %vm20835_vm10 = vmmov %vm20831_vm4 }
 0x525   : >> { %v8360_v58 = vpop.f32.mrf.mxu0  ;;  %15358 = vmatmul.mubr.bf16.gmra.mxu0 %v9827_v45  ;;  %15505 = vmatprep.subr.bf16.mxu1 %v16277_v26  ;;  %v10227_v48 = vshll.u32 %v20180_v15, 16  ;;  %v16231_v36 = vld [vmem:[%s20660_s1 + $0xd08] sm:$0xff]  }
 0x526   : >> { %v8399_v11 = vadd.f32 %v8360_v58, %v20106_v3  ;;  %v8570_v51 = vpop.f32.mrf.mxu1  ;;  %15394 = vmatmul.mubr.bf16.gmra.mxu1 %v10030_v20  ;;  %15413 = vmatprep.mubr.msk.bf16.mxu0 %vm16278_vm2, %v16277_v26  ;;  %v16222_v20 = vld [vmem:[%s20660_s1 + $0xce0] sm:$0xff]  }
 0x527   : >> { %v15055_v29 = vpop.f32.mrf.mxu0  ;;  %15449 = vmatprep.mubr.msk.bf16.mxu1 %vm16278_vm2, %v16277_v26 }
 0x528   : >> { %v20256_v47 = vadd.f32 %v8570_v51, %v8399_v11  ;;  %v15091_v3 = vpop.f32.mrf.mxu1  ;;  %v16225_v51 = vld [vmem:[%s20660_s1 + $0xd20] sm:$0xff]   ;;  %v10222_v29 = vsel %vm20823_vm1, %v10212_v19, %v10221_v46 }
 0x529   : >> { %v8363_v31 = vpop.f32.mrf.mxu0  ;;  %v20324_v3 = vld [vmem:[%s18704_s15 + $0x94] ss:$0 sps:$4 sm:$0x33]  }
 0x52a   : >> { %v8400_v0 = vadd.f32 %v8363_v31, %v20117_v56  ;;  %v8573_v49 = vpop.f32.mrf.mxu1 }
 0x52b   : >> { %v15056_v52 = vpop.f32.mrf.mxu0 }
 0x52c   : >> { %v20264_v7 = vadd.f32 %v8573_v49, %v8400_v0  ;;  %v15092_v16 = vpop.f32.mrf.mxu1 }
 0x52d   : >> { %v8368_v56 = vpop.f32.mrf.mxu0  ;;  %15414 = vmatmul.mubr.bf16.vlgmr.msra.gmra.mxu0 %v10204_v32  ;;  %v16226_v32 = vld [vmem:[%s20660_s1 + $0xd18] sm:$0xff]   ;;  %v10233_v16 = vshrl.u32 %v20324_v3, 16 }
 0x52e   : >> { %v8401_v5 = vadd.f32 %v8368_v56, %v20131_v22  ;;  %v8578_v54 = vpop.f32.mrf.mxu1  ;;  %15450 = vmatmul.mubr.bf16.vlgmr.msra.gmra.mxu1 %v10400_v14  ;;  %15470 = vmatpush3.bf16.msra.mxu0 %v16217_v24  ;;  %v10401_v22 = vrot.slane %v20115_v44, 2  ;;  %v10213_v44 = vsel %vm20822_vm5, %v10203_v63, %v10212_v19  ;;  %v16227_v14 = vld [vmem:[%s20660_s1 + $0xcd0] sm:$0xff]  }
 0x52f   : >> { %v15059_v37 = vpop.f32.mrf.mxu0  ;;  %15471 = vmatprep.subr.bf16.mxu0 %v16277_v26  ;;  %15417 = vmatprep.mubr.msk.bf16.mxu0 %vm16278_vm2, %v16277_v26  ;;  %v12822_v19 = vld [vmem:[%s18704_s15 + $0x70] sm:$0xc] }
 0x530   : >> { %v20279_v34 = vadd.f32 %v8578_v54, %v8401_v5  ;;  %v15095_v9 = vpop.f32.mrf.mxu1  ;;  %15453 = vmatprep.mubr.msk.bf16.mxu1 %vm16278_vm2, %v16277_v26  ;;  %15506 = vmatpush3.bf16.msra.mxu1 %v16219_v10  ;;  %v10402_v18 = vsel %vm1433_vm11, %v10399_v33, %v10401_v22  ;;  %v10229_v33 = vrot.slane %v10227_v48, 2  ;;  %v10236_v10 = vshll.u32 %v20324_v3, 16 }
 0x531   : >> { %v8371_v57 = vpop.f32.mrf.mxu0  ;;  %15507 = vmatprep.subr.bf16.mxu1 %v16277_v26  ;;  %v10235_v9 = vrot.slane %v10233_v16, 1 }
 0x532   : >> { %v8402_v42 = vadd.f32 %v8371_v57, %v20149_v50  ;;  %v8581_v60 = vpop.f32.mrf.mxu1  ;;  %15472 = vmatpush3.bf16.msra.mxu0 %v16218_v53  ;;  %v16223_v50 = vld [vmem:[%s20660_s1 + $0xd28] sm:$0xff]   ;;  %v10230_v52 = vor.u32 %v10229_v33, %v10226_v59  ;;  %v16228_v53 = vld [vmem:[%s20660_s1 + $0xd10] sm:$0xff]  }
 0x533   : >> { %v15060_v17 = vpop.f32.mrf.mxu0  ;;  %15473 = vmatprep.subr.bf16.mxu0 %v16277_v26 }
 0x534   : >> { %v20294_v4 = vadd.f32 %v8581_v60, %v8402_v42  ;;  %v15096_v62 = vpop.f32.mrf.mxu1  ;;  %15508 = vmatpush3.bf16.msra.mxu1 %v16221_v38  ;;  %v10238_v38 = vrot.slane %v10236_v10, 2  ;;  %v16229_v60 = vld [vmem:[%s20660_s1 + $0xcc8] sm:$0xff]  }
 0x535   : >> { %v8376_v45 = vpop.f32.mrf.mxu0  ;;  %15418 = vmatmul.mubr.bf16.gmra.mxu0 %v10213_v44  ;;  %15509 = vmatprep.subr.bf16.mxu1 %v16277_v26  ;;  %v20364_v44 = vcombine.low %v12822_v19, %v20353_v43 }
 0x536   : >> { %v8403_v1 = vadd.f32 %v8376_v45, %v20165_v39  ;;  %v8586_v6 = vpop.f32.mrf.mxu1  ;;  %15454 = vmatmul.mubr.bf16.gmra.mxu1 %v10402_v18  ;;  %15474 = vmatpush3.bf16.msra.mxu0 %v16220_v8  ;;  %v10403_v39 = vrot.slane %v20147_v30, 2  ;;  %v16224_v30 = vld [vmem:[%s20660_s1 + $0xcd8] sm:$0xff]   ;;  %v10407_v45 = vrot.slane %v20324_v3, 2 }
 0x537   : >> { %v15063_v58 = vpop.f32.mrf.mxu0  ;;  %15421 = vmatprep.mubr.msk.bf16.mxu0 %vm16278_vm2, %v16277_v26  ;;  %15457 = vmatprep.mubr.msk.bf16.mxu1 %vm16278_vm2, %v16277_v26  ;;  %v20367_v8 = vld [vmem:[%s18704_s15 + $0x78] sm:$0xff]  }
 0x538   : >> { %v20311_v40 = vadd.f32 %v8586_v6, %v8403_v1  ;;  %v15099_v11 = vpop.f32.mrf.mxu1  ;;  %15475 = vmatprep.subr.bf16.mxu0 %v16277_v26  ;;  %15510 = vmatpush3.bf16.msra.mxu1 %v16223_v50  ;;  %v10404_v0 = vsel %vm1433_vm11, %v10401_v22, %v10403_v39  ;;  %v10231_v22 = vsel %vm20824_vm14, %v10221_v46, %v10230_v52  ;;  %v16232_v6 = vld [vmem:[%s20660_s1 + $0xcc0] sm:$0xff]   ;;  %v10770_v46 = vshrl.u32 %v20364_v44, 16 }
 0x539   : >> { %v8379_v63 = vpop.f32.mrf.mxu0  ;;  %15511 = vmatprep.subr.bf16.mxu1 %v16277_v26  ;;  %v10239_v50 = vor.u32 %v10238_v38, %v10235_v9  ;;  %v10781_v28 = vshll.u32 %v20367_v8, 16 }
 0x53a   : >> { %v8404_v2 = vadd.f32 %v8379_v63, %v20182_v41  ;;  %v8589_v35 = vpop.f32.mrf.mxu1  ;;  %15476 = vmatpush3.bf16.msra.mxu0 %v16222_v20  ;;  %v10778_v20 = vshrl.u32 %v20367_v8, 16 }
 0x53b   : >> { %v15064_v31 = vpop.f32.mrf.mxu0  ;;  %15477 = vmatprep.subr.bf16.mxu0 %v16277_v26  ;;  %v10783_v3 = vrot.slane %v10781_v28, 3  ;;  %v16239_v28 = vld [vmem:[%s20660_s1 + $0xd68] sm:$0xff]  }
 0x53c   : >> { %v20328_v49 = vadd.f32 %v8589_v35, %v8404_v2  ;;  %v15100_v41 = vpop.f32.mrf.mxu1  ;;  %15512 = vmatpush3.bf16.msra.mxu1 %v16225_v51  ;;  %v10240_v2 = vsel %vm20825_vm8, %v10230_v52, %v10239_v50  ;;  %v10780_v33 = vrot.slane %v10778_v20, 2  ;;  %v20399_v31 = vld [vmem:[%s18704_s15 + $0x80] sm:$0xff]  }
 0x53d   : >> { %v8384_v24 = vpop.f32.mrf.mxu0  ;;  %15422 = vmatmul.mubr.bf16.gmra.mxu0 %v10222_v29  ;;  %15513 = vmatprep.subr.bf16.mxu1 %v16277_v26  ;;  %v10787_v10 = vshrl.u32 %v20399_v31, 16 }
 0x53e   : >> { %v8405_v61 = vadd.f32 %v8384_v24, %v20198_v27  ;;  %v8594_v25 = vpop.f32.mrf.mxu1  ;;  %15458 = vmatmul.mubr.bf16.gmra.mxu1 %v10404_v0  ;;  %15478 = vmatpush3.bf16.msra.mxu0 %v16224_v30  ;;  %v10405_v27 = vrot.slane %v20180_v15, 2  ;;  %v10772_v30 = vrot.slane %v10770_v46, 2  ;;  %v10784_v16 = vor.u32 %v10783_v3, %v10780_v33  ;;  %v16241_v33 = vld [vmem:[%s20660_s1 + $0xd60] sm:$0xff]  }
 0x53f   : >> { %v15067_v56 = vpop.f32.mrf.mxu0  ;;  %15425 = vmatprep.mubr.msk.bf16.mxu0 %vm16278_vm2, %v16277_v26  ;;  %15461 = vmatprep.mubr.msk.bf16.mxu1 %vm16278_vm2, %v16277_v26  ;;  %v10789_v9 = vrot.slane %v10787_v10, 2 }
 0x540   : >> { %v20345_v5 = vadd.f32 %v8594_v25, %v8405_v61  ;;  %v15103_v54 = vpop.f32.mrf.mxu1  ;;  %15479 = vmatprep.subr.bf16.mxu0 %v16277_v26  ;;  %15514 = vmatpush3.bf16.msra.mxu1 %v16226_v32  ;;  %v10406_v42 = vsel %vm1433_vm11, %v10403_v39, %v10405_v27  ;;  %v16233_v39 = vld [vmem:[%s20660_s1 + $0xd00] sm:$0xff]   ;;  %v10408_v35 = vsel %vm1433_vm11, %v10405_v27, %v10407_v45  ;;  %v10601_v61 = vrot.slane %v20364_v44, 2 }
 0x541   : >> { %v8387_v12 = vpop.f32.mrf.mxu0  ;;  %15515 = vmatprep.subr.bf16.mxu1 %v16277_v26  ;;  %v10602_v25 = vrot.slane %v20367_v8, 2 }
 0x542   : >> { %v8406_v37 = vadd.f32 %v8387_v12, %v20213_v13  ;;  %v8597_v15 = vpop.f32.mrf.mxu1  ;;  %15480 = vmatpush3.bf16.msra.mxu0 %v16227_v14 }
 0x543   : >> { %v15068_v57 = vpop.f32.mrf.mxu0  ;;  %15481 = vmatprep.subr.bf16.mxu0 %v16277_v26  ;;  %v10603_v12 = vsel %vm1433_vm11, %v10601_v61, %v10602_v25 }
 0x544   : >> { %v20369_v13 = vadd.f32 %v8597_v15, %v8406_v37  ;;  %v15104_v23 = vpop.f32.mrf.mxu1  ;;  %15516 = vmatpush3.bf16.msra.mxu1 %v16228_v53  ;;  %v16236_v37 = vld [vmem:[%s20660_s1 + $0xd78] sm:$0xff]   ;;  %v20423_v57 = vld [vmem:[%s18704_s15 + $0x88] sm:$0xff]  }
 0x545   : >> { %v8392_v17 = vpop.f32.mrf.mxu0  ;;  %15426 = vmatmul.mubr.bf16.gmra.mxu0 %v10231_v22  ;;  %15517 = vmatprep.subr.bf16.mxu1 %v16277_v26  ;;  %v10796_v50 = vshrl.u32 %v20423_v57, 16 }
 0x546   : >> { %v8407_v18 = vadd.f32 %v8392_v17, %v20232_v55  ;;  %v8602_v62 = vpop.f32.mrf.mxu1  ;;  %15462 = vmatmul.mubr.bf16.gmra.mxu1 %v10406_v42  ;;  %15429 = vmatprep.mubr.msk.bf16.mxu0 %vm16278_vm2, %v16277_v26  ;;  %v10773_v55 = vshll.u32 %v20364_v44, 16  ;;  %v10604_v17 = vrot.slane %v20399_v31, 2 }
 0x547   : >> { %v15071_v1 = vpop.f32.mrf.mxu0  ;;  %15465 = vmatprep.mubr.msk.bf16.mxu1 %vm16278_vm2, %v16277_v26  ;;  %15482 = vmatpush3.bf16.msra.mxu0 %v16229_v60 }
 0x548   : >> { %v20388_v48 = vadd.f32 %v8602_v62, %v8407_v18  ;;  %v15107_v58 = vpop.f32.mrf.mxu1  ;;  %15518 = vmatpush3.bf16.msra.mxu1 %v16231_v36  ;;  %15483 = vmatprep.subr.bf16.mxu0 %v16277_v26  ;;  %v10775_v59 = vrot.slane %v10773_v55, 3  ;;  %v16237_v36 = vld [vmem:[%s20660_s1 + $0xd70] sm:$0xff]   ;;  %v10605_v20 = vsel %vm1433_vm11, %v10602_v25, %v10604_v17 }
 0x549   : >> { %v8395_v11 = vpop.f32.mrf.mxu0  ;;  %15519 = vmatprep.subr.bf16.mxu1 %v16277_v26 }
 0x54a   : >> { %v8408_v51 = vadd.f32 %v8395_v11, %v20244_v21  ;;  %v8605_v63 = vpop.f32.mrf.mxu1  ;;  %v10776_v14 = vor.u32 %v10775_v59, %v10772_v30  ;;  %v10798_v11 = vrot.slane %v10796_v50, 2  ;;  %v10606_v59 = vrot.slane %v20423_v57, 2  ;;  %v16246_v50 = vld [vmem:[%s18704_s15 + $0x98] ss:$0 sps:$4 sm:$0x33]  }
 0x54b   : >> { %v15072_v29 = vpop.f32.mrf.mxu0  ;;  %15484 = vmatpush3.bf16.msra.mxu0 %v16232_v6 }
 0x54c   : >> { %v20401_v0 = vadd.f32 %v8605_v63, %v8408_v51  ;;  %v15108_v41 = vpop.f32.mrf.mxu1  ;;  %15520 = vmatpush3.bf16.msra.mxu1 %v16233_v39  ;;  %15541 = vmatprep.subr.bf16.mxu0 %v16277_v26  ;;  %v10785_v22 = vsel %vm20826_vm0, %v10776_v14, %v10784_v16  ;;  %v20450_v63 = vld [vmem:[%s18704_s15 + $0x90] sm:$0xff]   ;;  %v10607_v14 = vsel %vm1433_vm11, %v10604_v17, %v10606_v59 }
 0x54d   : >> { %v8738_v21 = vpop.f32.mrf.mxu0  ;;  %15430 = vmatmul.mubr.bf16.gmra.mxu0 %v10240_v2  ;;  %15593 = vmatprep.subr.bf16.mxu1 %v16277_v26 }
 0x54e   : >> { %v8777_v32 = vadd.f32 %v8738_v21, %v20256_v47  ;;  %v8941_v24 = vpop.f32.mrf.mxu1  ;;  %15466 = vmatmul.mubr.bf16.gmra.mxu1 %v10408_v35  ;;  %15485 = vmatprep.mubr.msk.bf16.mxu0 %vm16278_vm2, %v16277_v26  ;;  %v10790_v47 = vshll.u32 %v20399_v31, 16  ;;  %v10805_v21 = vshrl.u32 %v20450_v63, 16 }
 0x54f   : >> { %v15127_v52 = vpop.f32.mrf.mxu0  ;;  %15521 = vmatprep.mubr.msk.bf16.mxu1 %vm16278_vm2, %v16277_v26 }
 0x550   : >> { %v20414_v56 = vadd.f32 %v8941_v24, %v8777_v32  ;;  %v15163_v27 = vpop.f32.mrf.mxu1  ;;  %v10792_v38 = vrot.slane %v10790_v47, 3 }
 0x551   : >> { %v8741_v54 = vpop.f32.mrf.mxu0  ;;  %v10807_v27 = vrot.slane %v10805_v21, 2 }
 0x552   : >> { %v8778_v53 = vadd.f32 %v8741_v54, %v20264_v7  ;;  %v8944_v19 = vpop.f32.mrf.mxu1  ;;  %v10793_v62 = vor.u32 %v10792_v38, %v10789_v9  ;;  %v16244_v9 = vld [vmem:[%s20660_s1 + $0xd50] sm:$0xff]  }
 0x553   : >> { %v15128_v15 = vpop.f32.mrf.mxu0 }
 0x554   : >> { %v20425_v42 = vadd.f32 %v8944_v19, %v8778_v53  ;;  %v15164_v60 = vpop.f32.mrf.mxu1  ;;  %v10794_v39 = vsel %vm20827_vm7, %v10784_v16, %v10793_v62  ;;  %v16242_v16 = vld [vmem:[%s20660_s1 + $0xd58] sm:$0xff]  }
 0x555   : >> { %v8746_v44 = vpop.f32.mrf.mxu0  ;;  %15486 = vmatmul.mubr.bf16.vlgmr.msra.gmra.mxu0 %v10603_v12  ;;  %v20478_v53 = vld [vmem:[%s18704_s15 + $0x98] ss:$0 sps:$4 sm:$0x77]  }
 0x556   : >> { %v8779_v7 = vadd.f32 %v8746_v44, %v20279_v34  ;;  %v8949_v23 = vpop.f32.mrf.mxu1  ;;  %15522 = vmatmul.mubr.bf16.vlgmr.msra.gmra.mxu1 %v10785_v22  ;;  %15542 = vmatpush3.bf16.msra.mxu0 %v16236_v37  ;;  %v10799_v34 = vshll.u32 %v20423_v57, 16  ;;  %v10608_v22 = vrot.slane %v20450_v63, 2  ;;  %v10817_v44 = vshll.u32 %v20478_v53, 16 }
 0x557   : >> { %v15131_v18 = vpop.f32.mrf.mxu0  ;;  %15543 = vmatprep.subr.bf16.mxu0 %v16277_v26  ;;  %15489 = vmatprep.mubr.msk.bf16.mxu0 %vm16278_vm2, %v16277_v26 }
 0x558   : >> { %v20437_v45 = vadd.f32 %v8949_v23, %v8779_v7  ;;  %v15167_v1 = vpop.f32.mrf.mxu1  ;;  %15525 = vmatprep.mubr.msk.bf16.mxu1 %vm16278_vm2, %v16277_v26  ;;  %15601 = vmatpush3.bf16.msra.mxu1 %v16236_v37  ;;  %v10801_v51 = vrot.slane %v10799_v34, 3 }
 0x559   : >> { %v8749_v6 = vpop.f32.mrf.mxu0  ;;  %15594 = vmatprep.subr.bf16.mxu1 %v16277_v26 }
 0x55a   : >> { %v8780_v46 = vadd.f32 %v8749_v6, %v20294_v4  ;;  %v8952_v55 = vpop.f32.mrf.mxu1  ;;  %15544 = vmatpush3.bf16.msra.mxu0 %v16237_v36  ;;  %v10802_v41 = vor.u32 %v10801_v51, %v10798_v11  ;;  %v16245_v6 = vld [vmem:[%s20660_s1 + $0xd48] sm:$0xff]   ;;  %v10610_v11 = vrot.slane %v16246_v50, 2 }
 0x55b   : >> { %v15132_v58 = vpop.f32.mrf.mxu0  ;;  %15545 = vmatprep.subr.bf16.mxu0 %v16277_v26 }
 0x55c   : >> { %v20452_v2 = vadd.f32 %v8952_v55, %v8780_v46  ;;  %v15168_v4 = vpop.f32.mrf.mxu1  ;;  %15602 = vmatpush3.bf16.msra.mxu1 %v16237_v36  ;;  %v10803_v47 = vsel %vm20828_vm3, %v10793_v62, %v10802_v41  ;;  %v10609_v62 = vsel %vm1433_vm11, %v10606_v59, %v10608_v22  ;;  %v10819_v55 = vrot.slane %v10817_v44, 3 }
 0x55d   : >> { %v8754_v35 = vpop.f32.mrf.mxu0  ;;  %15490 = vmatmul.mubr.bf16.gmra.mxu0 %v10605_v20  ;;  %15595 = vmatprep.subr.bf16.mxu1 %v16277_v26  ;;  %v10988_v44 = vrot.slane %v20478_v53, 3 }
 0x55e   : >> { %v8781_v29 = vadd.f32 %v8754_v35, %v20311_v40  ;;  %v8957_v30 = vpop.f32.mrf.mxu1  ;;  %15526 = vmatmul.mubr.bf16.gmra.mxu1 %v10794_v39  ;;  %15546 = vmatpush3.bf16.msra.mxu0 %v16239_v28  ;;  %v10808_v40 = vshll.u32 %v20450_v63, 16  ;;  %v16248_v35 = vld [vmem:[%s20660_s1 + $0xd40] sm:$0xff]  }
 0x55f   : >> { %v15135_v3 = vpop.f32.mrf.mxu0  ;;  %15493 = vmatprep.mubr.msk.bf16.mxu0 %vm16278_vm2, %v16277_v26  ;;  %15529 = vmatprep.mubr.msk.bf16.mxu1 %vm16278_vm2, %v16277_v26 }
 0x560   : >> { %v20466_v32 = vadd.f32 %v8957_v30, %v8781_v29  ;;  %v15171_v24 = vpop.f32.mrf.mxu1  ;;  %15547 = vmatprep.subr.bf16.mxu0 %v16277_v26  ;;  %15603 = vmatpush3.bf16.msra.mxu1 %v16239_v28  ;;  %v10810_v54 = vrot.slane %v10808_v40, 3  ;;  %v12889_v29 = vld [vmem:[%s18704_s15 + $0x70] sm:$0x8] }
 0x561   : >> { %v8757_v61 = vpop.f32.mrf.mxu0  ;;  %15596 = vmatprep.subr.bf16.mxu1 %v16277_v26  ;;  %v12906_v21 = vcombine.low %v12889_v29, %v20353_v43  ;;  %v10980_v43 = vrot.slane %v20367_v8, 3 }
 0x562   : >> { %v8782_v25 = vadd.f32 %v8757_v61, %v20328_v49  ;;  %v8960_v52 = vpop.f32.mrf.mxu1  ;;  %15548 = vmatpush3.bf16.msra.mxu0 %v16241_v33  ;;  %v10811_v60 = vor.u32 %v10810_v54, %v10807_v27  ;;  %v10986_v27 = vrot.slane %v20450_v63, 3 }
 0x563   : >> { %v15136_v10 = vpop.f32.mrf.mxu0  ;;  %15549 = vmatprep.subr.bf16.mxu0 %v16277_v26 }
 0x564   : >> { %v20480_v19 = vadd.f32 %v8960_v52, %v8782_v25  ;;  %v15172_v49 = vpop.f32.mrf.mxu1  ;;  %15604 = vmatpush3.bf16.msra.mxu1 %v16241_v33  ;;  %v10812_v1 = vsel %vm20829_vm15, %v10802_v41, %v10811_v60  ;;  %v10611_v41 = vsel %vm1433_vm11, %v10608_v22, %v10610_v11 }
 0x565   : >> { %v8762_v12 = vpop.f32.mrf.mxu0  ;;  %15494 = vmatmul.mubr.bf16.gmra.mxu0 %v10607_v14  ;;  %15597 = vmatprep.subr.bf16.mxu1 %v16277_v26 }
 0x566   : >> { %v8783_v37 = vadd.f32 %v8762_v12, %v20345_v5  ;;  %v8965_v15 = vpop.f32.mrf.mxu1  ;;  %15530 = vmatmul.mubr.bf16.gmra.mxu1 %v10803_v47  ;;  %15550 = vmatpush3.bf16.msra.mxu0 %v16242_v16  ;;  %v10814_v5 = vshrl.u32 %v20478_v53, 16  ;;  %v10984_v47 = vrot.slane %v20423_v57, 3 }
 0x567   : >> { %v15139_v38 = vpop.f32.mrf.mxu0  ;;  %15497 = vmatprep.mubr.msk.bf16.mxu0 %vm16278_vm2, %v16277_v26  ;;  %15533 = vmatprep.mubr.msk.bf16.mxu1 %vm16278_vm2, %v16277_v26 }
 0x568   : >> { %v20494_v7 = vadd.f32 %v8965_v15, %v8783_v37  ;;  %v15175_v23 = vpop.f32.mrf.mxu1  ;;  %15605 = vmatpush3.bf16.msra.mxu1 %v16242_v16  ;;  %15551 = vmatprep.subr.bf16.mxu0 %v16277_v26  ;;  %v10816_v46 = vrot.slane %v10814_v5, 2  ;;  %v10987_v8 = vsel %vm20832_vm12, %v10984_v47, %v10986_v27 }
 0x569   : >> { %v8765_v36 = vpop.f32.mrf.mxu0  ;;  %15598 = vmatprep.subr.bf16.mxu1 %v16277_v26 }
 0x56a   : >> { %v8784_v17 = vadd.f32 %v8765_v36, %v20369_v13  ;;  %v8968_v18 = vpop.f32.mrf.mxu1  ;;  %15552 = vmatpush3.bf16.msra.mxu0 %v16244_v9  ;;  %v10820_v4 = vor.u32 %v10819_v55, %v10816_v46 }
 0x56b   : >> { %v15140_v34 = vpop.f32.mrf.mxu0  ;;  %15553 = vmatprep.subr.bf16.mxu0 %v16277_v26 }
 0x56c   : >> { %v20506_v20 = vadd.f32 %v8968_v18, %v8784_v17  ;;  %v15176_v13 = vpop.f32.mrf.mxu1  ;;  %15606 = vmatpush3.bf16.msra.mxu1 %v16244_v9  ;;  %v10821_v24 = vsel %vm20830_vm9, %v10811_v60, %v10820_v4  ;;  %v10989_v34 = vsel %vm20834_vm13, %v10986_v27, %v10988_v44 }
 0x56d   : >> { %v8770_v28 = vpop.f32.mrf.mxu0  ;;  %15498 = vmatmul.mubr.bf16.gmra.mxu0 %v10609_v62  ;;  %15599 = vmatprep.subr.bf16.mxu1 %v16277_v26 }
 0x56e   : >> { %v8785_v58 = vadd.f32 %v8770_v28, %v20388_v48  ;;  %v8973_v39 = vpop.f32.mrf.mxu1  ;;  %15534 = vmatmul.mubr.bf16.gmra.mxu1 %v10812_v1  ;;  %15501 = vmatprep.mubr.msk.bf16.mxu0 %vm16278_vm2, %v16277_v26 }
 0x56f   : >> { %v15143_v51 = vpop.f32.mrf.mxu0  ;;  %15537 = vmatprep.mubr.msk.bf16.mxu1 %vm16278_vm2, %v16277_v26  ;;  %15554 = vmatpush3.bf16.msra.mxu0 %v16245_v6 }
 0x570   : >> { %v20518_v30 = vadd.f32 %v8973_v39, %v8785_v58  ;;  %v15179_v48 = vpop.f32.mrf.mxu1  ;;  %15607 = vmatpush3.bf16.msra.mxu1 %v16245_v6  ;;  %15555 = vmatprep.subr.bf16.mxu0 %v16277_v26 }
 0x571   : >> { %v8773_v59 = vpop.f32.mrf.mxu0  ;;  %15600 = vmatprep.subr.bf16.mxu1 %v16277_v26 }
 0x572   : >> { %v8786_v33 = vadd.f32 %v8773_v59, %v20401_v0  ;;  %v8976_v3 = vpop.f32.mrf.mxu1  ;;  %v10979_v0 = vrot.slane %v12906_v21, 3 }
 0x573   : >> { %v15144_v40 = vpop.f32.mrf.mxu0  ;;  %15556 = vmatpush3.bf16.msra.mxu0 %v16248_v35 }
 0x574   : >> { %v20526_v61 = vadd.f32 %v8976_v3, %v8786_v33  ;;  %v15180_v25 = vpop.f32.mrf.mxu1  ;;  %15608 = vmatpush3.bf16.msra.mxu1 %v16248_v35  ;;  %v10981_v15 = vsel %vm20831_vm4, %v10979_v0, %v10980_v43 }
 0x575   : >> { %v9151_v52 = vpop.f32.mrf.mxu0  ;;  %15502 = vmatmul.mubr.bf16.gmra.mxu0 %v10611_v41 }
 0x576   : >> { %v9190_v14 = vadd.f32 %v9151_v52, %v20414_v56  ;;  %v9319_v16 = vpop.f32.mrf.mxu1  ;;  %15538 = vmatmul.mubr.bf16.gmra.mxu1 %v10821_v24  ;;  %15557 = vmatprep.mubr.msk.bf16.mxu0 %vm16278_vm2, %v16277_v26 }
 0x577   : >> { %v15199_v10 = vpop.f32.mrf.mxu0  ;;  %15569 = vmatprep.mubr.msk.bf16.mxu1 %vm16278_vm2, %v16277_v26 }
 0x578   : >> { %v20536_v54 = vadd.f32 %v9319_v16, %v9190_v14  ;;  %v15235_v49 = vpop.f32.mrf.mxu1 }
 0x579   : >> { %v9154_v56 = vpop.f32.mrf.mxu0 }
 0x57a   : >> { %v9191_v12 = vadd.f32 %v9154_v56, %v20425_v42  ;;  %v9322_v37 = vpop.f32.mrf.mxu1  ;;  %v10982_v42 = vrot.slane %v20399_v31, 3 }
 0x57b   : >> { %v15200_v22 = vpop.f32.mrf.mxu0 }
 0x57c   : >> { %v20541_v9 = vadd.f32 %v9322_v37, %v9191_v12  ;;  %v15236_v38 = vpop.f32.mrf.mxu1  ;;  %v10983_v62 = vsel %vm20833_vm6, %v10980_v43, %v10982_v42  ;;  %v10985_v11 = vsel %vm20835_vm10, %v10982_v42, %v10984_v47 }
 0x57d   : >> { %v9159_v60 = vpop.f32.mrf.mxu0  ;;  %15558 = vmatmul.mubr.bf16.vlgmr.msra.gmra.mxu0 %v10981_v15 }
 0x57e   : >> { %v9192_v57 = vadd.f32 %v9159_v60, %v20437_v45  ;;  %v9327_v63 = vpop.f32.mrf.mxu1  ;;  %15570 = vmatmul.mubr.bf16.vlgmr.msra.gmra.mxu1 %v10987_v8  ;;  %15561 = vmatprep.mubr.msk.bf16.mxu0 %vm16278_vm2, %v16277_v26 }
 0x57f   : >> { %v15203_v5 = vpop.f32.mrf.mxu0  ;;  %15573 = vmatprep.mubr.msk.bf16.mxu1 %vm16278_vm2, %v16277_v26 }
 0x580   : >> { %v20550_v23 = vadd.f32 %v9327_v63, %v9192_v57  ;;  %v15239_v36 = vpop.f32.mrf.mxu1 }
 0x581   : >> { %v9162_v17 = vpop.f32.mrf.mxu0 }
 0x582   : >> { %v9193_v18 = vadd.f32 %v9162_v17, %v20452_v2  ;;  %v9330_v45 = vpop.f32.mrf.mxu1 }
 0x583   : >> { %v15204_v50 = vpop.f32.mrf.mxu0 }
 0x584   : >> { %v9361_v1 = vadd.f32 %v9330_v45, %v9193_v18  ;;  %v15240_v31 = vpop.f32.mrf.mxu1 }
 0x585   : >> { %v9167_v6 = vpop.f32.mrf.mxu0  ;;  %15562 = vmatmul.mubr.bf16.gmra.mxu0 %v10983_v62 }
 0x586   : >> { %v9194_v46 = vadd.f32 %v9167_v6, %v20466_v32  ;;  %v9335_v55 = vpop.f32.mrf.mxu1  ;;  %15574 = vmatmul.mubr.bf16.gmra.mxu1 %v10989_v34  ;;  %15565 = vmatprep.mubr.msk.bf16.mxu0 %vm16278_vm2, %v16277_v26 }
 0x587   : >> { %v15207_v53 = vpop.f32.mrf.mxu0 }
 0x588   : >> { %v9362_v13 = vadd.f32 %v9335_v55, %v9194_v46  ;;  %v15243_v2 = vpop.f32.mrf.mxu1 }
 0x589   : >> { %v9170_v28 = vpop.f32.mrf.mxu0 }
 0x58a   : >> { %v9195_v58 = vadd.f32 %v9170_v28, %v20480_v19  ;;  %v9338_v39 = vpop.f32.mrf.mxu1 }
 0x58b   : >> { %v15208_v51 = vpop.f32.mrf.mxu0 }
 0x58c   : >> { %v9363_v4 = vadd.f32 %v9338_v39, %v9195_v58  ;;  %v15244_v35 = vpop.f32.mrf.mxu1 }
 0x58d   : >> { %v9175_v29 = vpop.f32.mrf.mxu0  ;;  %15566 = vmatmul.mubr.bf16.gmra.mxu0 %v10985_v11 }
 0x58e   : >> { %v9196_v32 = vadd.f32 %v9175_v29, %v20494_v7  ;;  %v9343_v48 = vpop.f32.mrf.mxu1 }
 0x58f   : >> { %v15211_v59 = vpop.f32.mrf.mxu0 }
 0x590   : >> { %v9364_v33 = vadd.f32 %v9343_v48, %v9196_v32  ;;  %v15247_v26 = vpop.f32.mrf.mxu1 }
 0x591   : >> { %v9178_v3 = vpop.f32.mrf.mxu0 }
 0x592   : >> { %v9197_v41 = vadd.f32 %v9178_v3, %v20506_v20  ;;  %v9346_v21 = vpop.f32.mrf.mxu1 }
 0x593   : >> { %v15212_v40 = vpop.f32.mrf.mxu0 }
 0x594   : >> { %v9365_v19 = vadd.f32 %v9346_v21, %v9197_v41  ;;  %v15248_v24 = vpop.f32.mrf.mxu1 }
 0x595   : >> { %v9183_v25 = vpop.f32.mrf.mxu0 }
 0x596   : >> { %v9198_v52 = vadd.f32 %v9183_v25, %v20518_v30  ;;  %v9351_v14 = vpop.f32.mrf.mxu1 }
 0x597   : >> { %v15215_v16 = vpop.f32.mrf.mxu0 }
 0x598   : >> { %v9366_v0 = vadd.f32 %v9351_v14, %v9198_v52  ;;  %v15251_v43 = vpop.f32.mrf.mxu1 }
 0x599   : >> { %v9186_v10 = vpop.f32.mrf.mxu0 }
 0x59a   : >> { %v9199_v7 = vadd.f32 %v9186_v10, %v20526_v61  ;;  %v9354_v47 = vpop.f32.mrf.mxu1 }
 0x59b   : >> { %v15216_v27 = vpop.f32.mrf.mxu0 }
 0x59c   : >> { %v9367_v49 = vadd.f32 %v9354_v47, %v9199_v7  ;;  %v15252_v56 = vpop.f32.mrf.mxu1 }
 0x59d   : >> { %v9511_v12 = vpop.f32.mrf.mxu0 }
 0x59e   : >> { %v9550_v20 = vadd.f32 %v9511_v12, %v20536_v54  ;;  %v9747_v37 = vpop.f32.mrf.mxu1 }
 0x59f   : >> { %v15271_v15 = vpop.f32.mrf.mxu0 }
 0x5a0   : >> { %v9786_v22 = vadd.f32 %v9747_v37, %v9550_v20  ;;  %v15307_v8 = vpop.f32.mrf.mxu1 }
 0x5a1   : >> { %v9514_v38 = vpop.f32.mrf.mxu0 }
 0x5a2   : >> { %v9551_v30 = vadd.f32 %v9514_v38, %v20541_v9  ;;  %v9750_v60 = vpop.f32.mrf.mxu1 }
 0x5a3   : >> { %v15272_v57 = vpop.f32.mrf.mxu0 }
 0x5a4   : >> { %v9787_v63 = vadd.f32 %v9750_v60, %v9551_v30  ;;  %v15308_v42 = vpop.f32.mrf.mxu1 }
 0x5a5   : >> { %v9519_v5 = vpop.f32.mrf.mxu0 }
 0x5a6   : >> { %v9552_v61 = vadd.f32 %v9519_v5, %v20550_v23  ;;  %v9755_v44 = vpop.f32.mrf.mxu1 }
 0x5a7   : >> { %v15275_v36 = vpop.f32.mrf.mxu0 }
 0x5a8   : >> { %v9788_v17 = vadd.f32 %v9755_v44, %v9552_v61  ;;  %v15311_v18 = vpop.f32.mrf.mxu1 }
 0x5a9   : >> { %v9522_v45 = vpop.f32.mrf.mxu0 }
 0x5aa   : >> { %v9553_v54 = vadd.f32 %v9522_v45, %v9361_v1  ;;  %v9758_v62 = vpop.f32.mrf.mxu1 }
 0x5ab   : >> { %v15276_v50 = vpop.f32.mrf.mxu0 }
 0x5ac   : >> { %v9789_v34 = vadd.f32 %v9758_v62, %v9553_v54  ;;  %v15312_v31 = vpop.f32.mrf.mxu1 }
 0x5ad   : >> { %v9527_v6 = vpop.f32.mrf.mxu0 }
 0x5ae   : >> { %v9554_v46 = vadd.f32 %v9527_v6, %v9362_v13  ;;  %v9763_v9 = vpop.f32.mrf.mxu1 }
 0x5af   : >> { %v15279_v55 = vpop.f32.mrf.mxu0 }
 0x5b0   : >> { %v9790_v53 = vadd.f32 %v9763_v9, %v9554_v46  ;;  %v15315_v2 = vpop.f32.mrf.mxu1 }
 0x5b1   : >> { %v9530_v28 = vpop.f32.mrf.mxu0 }
 0x5b2   : >> { %v9555_v58 = vadd.f32 %v9530_v28, %v9363_v4  ;;  %v9766_v39 = vpop.f32.mrf.mxu1 }
 0x5b3   : >> { %v15280_v23 = vpop.f32.mrf.mxu0 }
 0x5b4   : >> { %v9791_v11 = vadd.f32 %v9766_v39, %v9555_v58  ;;  %v15316_v51 = vpop.f32.mrf.mxu1 }
 0x5b5   : >> { %v9535_v35 = vpop.f32.mrf.mxu0 }
 0x5b6   : >> { %v9556_v29 = vadd.f32 %v9535_v35, %v9364_v33  ;;  %v9771_v32 = vpop.f32.mrf.mxu1 }
 0x5b7   : >> { %v15283_v1 = vpop.f32.mrf.mxu0 }
 0x5b8   : >> { %v9792_v48 = vadd.f32 %v9771_v32, %v9556_v29  ;;  %v15319_v59 = vpop.f32.mrf.mxu1 }
 0x5b9   : >> { %v9538_v26 = vpop.f32.mrf.mxu0 }
 0x5ba   : >> { %v9557_v3 = vadd.f32 %v9538_v26, %v9365_v19  ;;  %v9774_v41 = vpop.f32.mrf.mxu1 }
 0x5bb   : >> { %v15284_v13 = vpop.f32.mrf.mxu0 }
 0x5bc   : >> { %v9793_v21 = vadd.f32 %v9774_v41, %v9557_v3  ;;  %v15320_v40 = vpop.f32.mrf.mxu1 }
 0x5bd   : >> { %v9543_v24 = vpop.f32.mrf.mxu0 }
 0x5be   : >> { %v9558_v25 = vadd.f32 %v9543_v24, %v9366_v0  ;;  %v9779_v52 = vpop.f32.mrf.mxu1 }
 0x5bf   : >> { %v15287_v4 = vpop.f32.mrf.mxu0 }
 0x5c0   : >> { %v9794_v14 = vadd.f32 %v9779_v52, %v9558_v25  ;;  %v15323_v16 = vpop.f32.mrf.mxu1 }
 0x5c1   : >> { %v9546_v43 = vpop.f32.mrf.mxu0 }
 0x5c2   : >> { %v9559_v10 = vadd.f32 %v9546_v43, %v9367_v49  ;;  %v9782_v7 = vpop.f32.mrf.mxu1 }
 0x5c3   : >> { %v15288_v33 = vpop.f32.mrf.mxu0 }
 0x5c4   : >> { %v9795_v47 = vadd.f32 %v9782_v7, %v9559_v10  ;;  %v15324_v27 = vpop.f32.mrf.mxu1 }
 0x5c5   : >> { %v9915_v56 = vpop.f32.mrf.mxu0 }
 0x5c6   : >> { %v9954_v12 = vadd.f32 %v9915_v56, %v9786_v22  ;;  %v10118_v20 = vpop.f32.mrf.mxu1 }
 0x5c7   : >> { %v15343_v19 = vpop.f32.mrf.mxu0 }
 0x5c8   : >> { %v10157_v37 = vadd.f32 %v10118_v20, %v9954_v12  ;;  %v15379_v15 = vpop.f32.mrf.mxu1 }
 0x5c9   : >> { %v9918_v8 = vpop.f32.mrf.mxu0 }
 0x5ca   : >> { %v9955_v38 = vadd.f32 %v9918_v8, %v9787_v63  ;;  %v10121_v30 = vpop.f32.mrf.mxu1 }
 0x5cb   : >> { %v15344_v0 = vpop.f32.mrf.mxu0 }
 0x5cc   : >> { %v10158_v60 = vadd.f32 %v10121_v30, %v9955_v38  ;;  %v15380_v57 = vpop.f32.mrf.mxu1 }
 0x5cd   : >> { %v9923_v42 = vpop.f32.mrf.mxu0 }
 0x5ce   : >> { %v9956_v5 = vadd.f32 %v9923_v42, %v9788_v17  ;;  %v10126_v61 = vpop.f32.mrf.mxu1 }
 0x5cf   : >> { %v15347_v49 = vpop.f32.mrf.mxu0 }
 0x5d0   : >> { %v10159_v44 = vadd.f32 %v10126_v61, %v9956_v5  ;;  %v15383_v36 = vpop.f32.mrf.mxu1 }
 0x5d1   : >> { %v9926_v18 = vpop.f32.mrf.mxu0 }
 0x5d2   : >> { %v9957_v45 = vadd.f32 %v9926_v18, %v9789_v34  ;;  %v10129_v54 = vpop.f32.mrf.mxu1 }
 0x5d3   : >> { %v15348_v22 = vpop.f32.mrf.mxu0 }
 0x5d4   : >> { %v10160_v62 = vadd.f32 %v10129_v54, %v9957_v45  ;;  %v15384_v50 = vpop.f32.mrf.mxu1 }
 0x5d5   : >> { %v9931_v31 = vpop.f32.mrf.mxu0 }
 0x5d6   : >> { %v9958_v6 = vadd.f32 %v9931_v31, %v9790_v53  ;;  %v10134_v46 = vpop.f32.mrf.mxu1 }
 0x5d7   : >> { %v15351_v63 = vpop.f32.mrf.mxu0 }
 0x5d8   : >> { %v10161_v9 = vadd.f32 %v10134_v46, %v9958_v6  ;;  %v15387_v55 = vpop.f32.mrf.mxu1 }
 0x5d9   : >> { %v9934_v2 = vpop.f32.mrf.mxu0 }
 0x5da   : >> { %v9959_v28 = vadd.f32 %v9934_v2, %v9791_v11  ;;  %v10137_v58 = vpop.f32.mrf.mxu1 }
 0x5db   : >> { %v15352_v17 = vpop.f32.mrf.mxu0 }
 0x5dc   : >> { %v10162_v39 = vadd.f32 %v10137_v58, %v9959_v28  ;;  %v15388_v23 = vpop.f32.mrf.mxu1 }
 0x5dd   : >> { %v9939_v51 = vpop.f32.mrf.mxu0 }
 0x5de   : >> { %v9960_v35 = vadd.f32 %v9939_v51, %v9792_v48  ;;  %v10142_v29 = vpop.f32.mrf.mxu1 }
 0x5df   : >> { %v15355_v34 = vpop.f32.mrf.mxu0 }
 0x5e0   : >> { %v20567_v32 = vadd.f32 %v10142_v29, %v9960_v35  ;;  %v15391_v1 = vpop.f32.mrf.mxu1 }
 0x5e1   : >> { %v9942_v59 = vpop.f32.mrf.mxu0 }
 0x5e2   : >> { %v9961_v26 = vadd.f32 %v9942_v59, %v9793_v21  ;;  %v10145_v53 = vpop.f32.mrf.mxu1 }
 0x5e3   : >> { %v15356_v3 = vpop.f32.mrf.mxu0 }
 0x5e4   : >> { %v20569_v41 = vadd.f32 %v10145_v53, %v9961_v26  ;;  %v15392_v13 = vpop.f32.mrf.mxu1 }
 0x5e5   : >> { %v9947_v40 = vpop.f32.mrf.mxu0 }
 0x5e6   : >> { %v9962_v11 = vadd.f32 %v9947_v40, %v9794_v14  ;;  %v10150_v24 = vpop.f32.mrf.mxu1 }
 0x5e7   : >> { %v15359_v25 = vpop.f32.mrf.mxu0 }
 0x5e8   : >> { %v20571_v52 = vadd.f32 %v10150_v24, %v9962_v11  ;;  %v15395_v4 = vpop.f32.mrf.mxu1 }
 0x5e9   : >> { %v9950_v48 = vpop.f32.mrf.mxu0 }
 0x5ea   : >> { %v9963_v16 = vadd.f32 %v9950_v48, %v9795_v47  ;;  %v10153_v43 = vpop.f32.mrf.mxu1 }
 0x5eb   : >> { %v15360_v10 = vpop.f32.mrf.mxu0 }
 0x5ec   : >> { %v20573_v7 = vadd.f32 %v10153_v43, %v9963_v16  ;;  %v15396_v33 = vpop.f32.mrf.mxu1 }
 0x5ed   : >> { %v10328_v21 = vpop.f32.mrf.mxu0 }
 0x5ee   : >> { %v10367_v27 = vadd.f32 %v10328_v21, %v10157_v37  ;;  %v10496_v56 = vpop.f32.mrf.mxu1 }
 0x5ef   : >> { %v15415_v12 = vpop.f32.mrf.mxu0 }
 0x5f0   : >> { %v20575_v20 = vadd.f32 %v10496_v56, %v10367_v27  ;;  %v15451_v19 = vpop.f32.mrf.mxu1 }
 0x5f1   : >> { %v10331_v14 = vpop.f32.mrf.mxu0 }
 0x5f2   : >> { %v10368_v15 = vadd.f32 %v10331_v14, %v10158_v60  ;;  %v10499_v8 = vpop.f32.mrf.mxu1 }
 0x5f3   : >> { %v15416_v38 = vpop.f32.mrf.mxu0 }
 0x5f4   : >> { %v20577_v30 = vadd.f32 %v10499_v8, %v10368_v15  ;;  %v15452_v0 = vpop.f32.mrf.mxu1 }
 0x5f5   : >> { %v10336_v47 = vpop.f32.mrf.mxu0 }
 0x5f6   : >> { %v10369_v57 = vadd.f32 %v10336_v47, %v10159_v44  ;;  %v10504_v42 = vpop.f32.mrf.mxu1 }
 0x5f7   : >> { %v15419_v5 = vpop.f32.mrf.mxu0 }
 0x5f8   : >> { %v20579_v61 = vadd.f32 %v10504_v42, %v10369_v57  ;;  %v15455_v49 = vpop.f32.mrf.mxu1 }
 0x5f9   : >> { %v10339_v37 = vpop.f32.mrf.mxu0 }
 0x5fa   : >> { %v10370_v36 = vadd.f32 %v10339_v37, %v10160_v62  ;;  %v10507_v18 = vpop.f32.mrf.mxu1 }
 0x5fb   : >> { %v15420_v45 = vpop.f32.mrf.mxu0 }
 0x5fc   : >> { %v20581_v54 = vadd.f32 %v10507_v18, %v10370_v36  ;;  %v15456_v22 = vpop.f32.mrf.mxu1 }
 0x5fd   : >> { %v10344_v60 = vpop.f32.mrf.mxu0 }
 0x5fe   : >> { %v10371_v50 = vadd.f32 %v10344_v60, %v10161_v9  ;;  %v10512_v31 = vpop.f32.mrf.mxu1 }
 0x5ff   : >> { %v15423_v6 = vpop.f32.mrf.mxu0 }
 0x600   : >> { %v20583_v46 = vadd.f32 %v10512_v31, %v10371_v50  ;;  %v15459_v63 = vpop.f32.mrf.mxu1 }
 0x601   : >> { %v10347_v44 = vpop.f32.mrf.mxu0 }
 0x602   : >> { %v10372_v55 = vadd.f32 %v10347_v44, %v10162_v39  ;;  %v10515_v2 = vpop.f32.mrf.mxu1 }
 0x603   : >> { %v15424_v28 = vpop.f32.mrf.mxu0 }
 0x604   : >> { %v20585_v58 = vadd.f32 %v10515_v2, %v10372_v55  ;;  %v15460_v17 = vpop.f32.mrf.mxu1 }
 0x605   : >> { %v10352_v62 = vpop.f32.mrf.mxu0 }
 0x606   : >> { %v10520_v23 = vpop.f32.mrf.mxu1  ;;  %v10373_v31 = vadd.f32 %v10352_v62, %v20567_v32 }
 0x607   : >> { %v15427_v51 = vpop.f32.mrf.mxu0 }
 0x608   : >> { %v15463_v35 = vpop.f32.mrf.mxu1  ;;  %v10541_v2 = vadd.f32 %v10520_v23, %v10373_v31 }
 0x609   : >> { %v10355_v29 = vpop.f32.mrf.mxu0 }
 0x60a   : >> { %v10523_v34 = vpop.f32.mrf.mxu1  ;;  %v10374_v28 = vadd.f32 %v10355_v29, %v20569_v41 }
 0x60b   : >> { %v15428_v1 = vpop.f32.mrf.mxu0 }
 0x60c   : >> { %v15464_v9 = vpop.f32.mrf.mxu1 }
 0x60d   : >> { %v10360_v59 = vpop.f32.mrf.mxu0 }
 0x60e   : >> { %v20587_v26 = vpop.f32.mrf.mxu1 }
 0x60f   : >> { %v15431_v53 = vpop.f32.mrf.mxu0 }
 0x610   : >> { %v15467_v3 = vpop.f32.mrf.mxu1 }
 0x611   : >> { %v10363_v13 = vpop.f32.mrf.mxu0  ;;  %v10542_v3 = vadd.f32 %v10523_v34, %v10374_v28 }
 0x612   : >> { %v20589_v39 = vpop.f32.mrf.mxu1 }
 0x613   : >> { %v15432_v40 = vpop.f32.mrf.mxu0 }
 0x614   : >> { %v15468_v11 = vpop.f32.mrf.mxu1  ;;  %v10375_v40 = vadd.f32 %v10360_v59, %v20571_v52  ;;  %v10376_v52 = vadd.f32 %v10363_v13, %v20573_v7 }
 0x615   : >> { %v10699_v24 = vpop.f32.mrf.mxu0 }
 0x616   : >> { %v10909_v25 = vpop.f32.mrf.mxu1  ;;  %v10738_v51 = vadd.f32 %v10699_v24, %v20575_v20  ;;  %v20613_v20 = vld [vmem:[%s20661_s2 + $0x1] ss:$0 sm:$0xff]  ;;  %v10543_v34 = vadd.f32 %v20587_v26, %v10375_v40  ;;  %v10544_v13 = vadd.f32 %v20589_v39, %v10376_v52 }
 0x617   : >> { %v15487_v4 = vpop.f32.mrf.mxu0 }
 0x618   : >> { %v15523_v48 = vpop.f32.mrf.mxu1  ;;  %v10948_v32 = vadd.f32 %v10909_v25, %v10738_v51 }
 0x619   : >> { %v10702_v16 = vpop.f32.mrf.mxu0 }
 0x61a   : >> { %v10912_v43 = vpop.f32.mrf.mxu1  ;;  %v10739_v62 = vadd.f32 %v10702_v16, %v20577_v30 }
 0x61b   : >> { %v15488_v10 = vpop.f32.mrf.mxu0 }
 0x61c   : >> { %v15524_v33 = vpop.f32.mrf.mxu1  ;;  %v10949_v30 = vadd.f32 %v10912_v43, %v10739_v62 }
 0x61d   : >> { %v10707_v21 = vpop.f32.mrf.mxu0 }
 0x61e   : >> { %v20591_v27 = vpop.f32.mrf.mxu1  ;;  %v10740_v16 = vadd.f32 %v10707_v21, %v20579_v61 }
 0x61f   : >> { %v15491_v56 = vpop.f32.mrf.mxu0 }
 0x620   : >> { %v15527_v12 = vpop.f32.mrf.mxu1  ;;  %v10950_v21 = vadd.f32 %v20591_v27, %v10740_v16 }
 0x621   : >> { %v20593_v19 = vpop.f32.mrf.mxu0 }
 0x622   : >> { %v20595_v14 = vpop.f32.mrf.mxu1 }
 0x623   : >> { %v15492_v15 = vpop.f32.mrf.mxu0 }
 0x624   : >> { %v15528_v8 = vpop.f32.mrf.mxu1 }
 0x625   : >> { %v20597_v38 = vpop.f32.mrf.mxu0 }
 0x626   : >> { %v20599_v0 = vpop.f32.mrf.mxu1 }
 0x627   : >> { %v15495_v47 = vpop.f32.mrf.mxu0 }
 0x628   : >> { %v15531_v57 = vpop.f32.mrf.mxu1 }
 0x629   : >> { %v20601_v42 = vpop.f32.mrf.mxu0 }
 0x62a   : >> { %v20603_v5 = vpop.f32.mrf.mxu1 }
 0x62b   : >> { %v15496_v49 = vpop.f32.mrf.mxu0 }
 0x62c   : >> { %v15532_v37 = vpop.f32.mrf.mxu1  ;;  %v10741_v49 = vadd.f32 %v20593_v19, %v20581_v54  ;;  %v10742_v19 = vadd.f32 %v20597_v38, %v20583_v46  ;;  %v10743_v38 = vadd.f32 %v20601_v42, %v20585_v58 }
 0x62d   : >> { %v10723_v36 = vpop.f32.mrf.mxu0 }
 0x62e   : >> { %v10933_v18 = vpop.f32.mrf.mxu1  ;;  %v10744_v1 = vadd.f32 %v10723_v36, %v10541_v2  ;;  %v10951_v54 = vadd.f32 %v20595_v14, %v10741_v49  ;;  %v10952_v46 = vadd.f32 %v20599_v0, %v10742_v19 }
 0x62f   : >> { %v15499_v45 = vpop.f32.mrf.mxu0 }
 0x630   : >> { %v15535_v22 = vpop.f32.mrf.mxu1  ;;  %v10954_v48 = vadd.f32 %v10933_v18, %v10744_v1 }
 0x631   : >> { %v10726_v60 = vpop.f32.mrf.mxu0 }
 0x632   : >> { %v10936_v50 = vpop.f32.mrf.mxu1  ;;  %v10745_v23 = vadd.f32 %v10726_v60, %v10542_v3 }
 0x633   : >> { %v15500_v6 = vpop.f32.mrf.mxu0 }
 0x634   : >> { %v15536_v63 = vpop.f32.mrf.mxu1  ;;  %v10955_v56 = vadd.f32 %v10936_v50, %v10745_v23 }
 0x635   : >> { %v10731_v44 = vpop.f32.mrf.mxu0 }
 0x636   : >> { %v10941_v55 = vpop.f32.mrf.mxu1  ;;  %v10746_v12 = vadd.f32 %v10731_v44, %v10543_v34 }
 0x637   : >> { %v15503_v17 = vpop.f32.mrf.mxu0 }
 0x638   : >> { %v15539_v35 = vpop.f32.mrf.mxu1  ;;  %v10956_v18 = vadd.f32 %v10941_v55, %v10746_v12 }
 0x639   : >> { %v10734_v9 = vpop.f32.mrf.mxu0 }
 0x63a   : >> { %v10944_v53 = vpop.f32.mrf.mxu1  ;;  %v10747_v45 = vadd.f32 %v10734_v9, %v10544_v13 }
 0x63b   : >> { %v15504_v11 = vpop.f32.mrf.mxu0 }
 0x63c   : >> { %v15540_v4 = vpop.f32.mrf.mxu1  ;;  %v10957_v2 = vadd.f32 %v10944_v53, %v10747_v45 }
 0x63d   : >> { %v11077_v41 = vpop.f32.mrf.mxu0 }
 0x63e   : >> { %v11116_v29 = vadd.f32 %v11077_v41, %v10948_v32  ;;  %v11101_v24 = vpop.f32.mrf.mxu1  ;;  %v10953_v41 = vadd.f32 %v20603_v5, %v10743_v38 }
 0x63f   : >> { %v11122_v59 = vadd.f32 %v11101_v24, %v10954_v48  ;;  %v15559_v25 = vpop.f32.mrf.mxu0 }
 0x640   : >> { %v11134_v10 = vadd.f32 %v20613_v20, %v11116_v29  ;;  %v15571_v33 = vpop.f32.mrf.mxu1 }
 0x641   : >> { %v11140_v15 = vadd.f32 %v20613_v20, %v11122_v59  ;;  %v11080_v8 = vpop.f32.mrf.mxu0 }
 0x642   : >> { %v11144_v26 = vmax.f32 %v11134_v10, 0.0  ;;  %v11117_v47 = vadd.f32 %v11080_v8, %v10949_v30  ;;  %v11104_v7 = vpop.f32.mrf.mxu1 }
 0x643   : >> { %v11150_v43 = vmax.f32 %v11140_v15, 0.0  ;;  %v11123_v57 = vadd.f32 %v11104_v7, %v10955_v56  ;;  %v15560_v61 = vpop.f32.mrf.mxu0 }
 0x644   : >> { %11156 = vst [vmem:[%s20621_s10] sm:$0xff] %v11144_v26  ;;  %v11135_v37 = vadd.f32 %v20613_v20, %v11117_v47  ;;  %v15572_v36 = vpop.f32.mrf.mxu1 }
 0x645   : >> { %11162 = vst [vmem:[%s20621_s10 + $0x30] sm:$0xff] %v11150_v43  ;;  %v11141_v22 = vadd.f32 %v20613_v20, %v11123_v57  ;;  %v11085_v39 = vpop.f32.mrf.mxu0 }
 0x646   : >> { %v11145_v60 = vmax.f32 %v11135_v37, 0.0  ;;  %v11118_v50 = vadd.f32 %v11085_v39, %v10950_v21  ;;  %v11109_v31 = vpop.f32.mrf.mxu1 }
 0x647   : >> { %v11151_v6 = vmax.f32 %v11141_v22, 0.0  ;;  %v11124_v27 = vadd.f32 %v11109_v31, %v10956_v18  ;;  %v15563_v63 = vpop.f32.mrf.mxu0 }
 0x648   : >> { %11157 = vst [vmem:[%s20621_s10 + $0x8] sm:$0xff] %v11145_v60  ;;  %v11136_v44 = vadd.f32 %v20613_v20, %v11118_v50  ;;  %v15575_v55 = vpop.f32.mrf.mxu1 }
 0x649   : >> { %11163 = vst [vmem:[%s20621_s10 + $0x38] sm:$0xff] %v11151_v6  ;;  %v11142_v28 = vadd.f32 %v20613_v20, %v11124_v27  ;;  %v11088_v17 = vpop.f32.mrf.mxu0 }
 0x64a   : >> { %v11146_v51 = vmax.f32 %v11136_v44, 0.0  ;;  %v11119_v35 = vadd.f32 %v11088_v17, %v10951_v54  ;;  %v11112_v1 = vpop.f32.mrf.mxu1 }
 0x64b   : >> { %v11152_v9 = vmax.f32 %v11142_v28, 0.0  ;;  %v11125_v14 = vadd.f32 %v11112_v1, %v10957_v2  ;;  %v15564_v3 = vpop.f32.mrf.mxu0 }
 0x64c   : >> { %11158 = vst [vmem:[%s20621_s10 + $0x10] sm:$0xff] %v11146_v51  ;;  %v11137_v53 = vadd.f32 %v20613_v20, %v11119_v35  ;;  %v15576_v40 = vpop.f32.mrf.mxu1 }
 0x64d   : >> { %11164 = vst [vmem:[%s20621_s10 + $0x40] sm:$0xff] %v11152_v9  ;;  %v11143_v11 = vadd.f32 %v20613_v20, %v11125_v14  ;;  %v11093_v32 = vpop.f32.mrf.mxu0 }
 0x64e   : >> { %v11147_v62 = vmax.f32 %v11137_v53, 0.0  ;;  %v11120_v4 = vadd.f32 %v11093_v32, %v10952_v46 }
 0x64f   : >> { %v11153_v48 = vmax.f32 %v11143_v11, 0.0  ;;  %v15567_v23 = vpop.f32.mrf.mxu0 }
 0x650   : >> { %11159 = vst [vmem:[%s20621_s10 + $0x18] sm:$0xff] %v11147_v62  ;;  %v11138_v0 = vadd.f32 %v20613_v20, %v11120_v4 }
 0x651   : >> { %11165 = vst [vmem:[%s20621_s10 + $0x48] sm:$0xff] %v11153_v48  ;;  %v11096_v58 = vpop.f32.mrf.mxu0 }
 0x652   : >> { %v11148_v42 = vmax.f32 %v11138_v0, 0.0  ;;  %v11121_v29 = vadd.f32 %v11096_v58, %v10953_v41 }
 0x653   : >> { %v15568_v24 = vpop.f32.mrf.mxu0 }
 0x654   : >> { %11160 = vst [vmem:[%s20621_s10 + $0x20] sm:$0xff] %v11148_v42  ;;  %v11139_v34 = vadd.f32 %v20613_v20, %v11121_v29  ;;  %5900 = sbr.rel (!%p5898_p5) target bundleno = 852 (0x354), region = 151 }
 0x656   : >> { %v11149_v52 = vmax.f32 %v11139_v34, 0.0 }
 0x658   : >> { %11161 = vst [vmem:[%s20621_s10 + $0x28] sm:$0xff] %v11149_v52 }
 0x659 PF: > { %s13_s12 = sadd.s32 1, %s16264_s12  }
 0x65a   : > { %p10_p6 = scmp.ge.s32.totalorder %s13_s12, 4  }
 0x65c   :  { %12 = sbr.rel (!%p10_p6) target bundleno = 1 (0x1), region = 162 }

</bundles_post_ra>
